<compile_context>
chip_gen: v7x
topology: tpu7x:2x2x1
jax: 0.10.0
libtpu: 0.0.40
codegen_flags: <defaults>
</compile_context>

<pallas_src>
import functools

import jax
import jax.numpy as jnp
from jax.experimental import pallas as pl
from jax.experimental.pallas import tpu as pltpu

CP = 128                        # padded channel width (lane dimension)
KDIM = 8                        # padded coordinate width for distance matmuls
SENTINEL = 1.0e9                # padded-point coordinate -> squared dist ~3e18
VMEM_LIMIT = 32 * 1024 * 1024   # explicit scoped-VMEM budget (safe on v5e/v6e/v7x)


def _round_up(x, m):
    return (x + m - 1) // m * m


def _pad_to(a, rows, cols):
    return jnp.pad(a, ((0, rows - a.shape[0]), (0, cols - a.shape[1])))


def _prep_layer(layer):
    """Pad weights to (128, 128) lane-dense blocks; cast matmul weights to bf16."""
    w1 = _pad_to(layer["w1"], CP, CP).astype(jnp.bfloat16)
    b1 = _pad_to(layer["b1"], 1, CP)
    w2 = _pad_to(layer["w2"], CP, CP).astype(jnp.bfloat16)
    b2 = _pad_to(layer["b2"], 1, CP)
    return w1, b1, w2, b2


# -----------------------------------------------------------------------------
# Kernel 1: pairwise squared distances  dist[i, j] = ||a_i - b_j||^2
#   gridded over rows of A; B^T stays resident across grid steps.
#   B columns are padded with SENTINEL coordinates in the wrapper so the output
#   is a lane-dense (multiple-of-128) slab with huge distances in the padding.
# -----------------------------------------------------------------------------
def _pairwise_sqdist_kernel(a_ref, bt_ref, o_ref):
    a = a_ref[...]                                               # (ta, 8)  f32
    bt = bt_ref[...]                                             # (8, NbP) f32
    ab = jnp.dot(a, bt, preferred_element_type=jnp.float32)      # (ta, NbP)
    a2 = jnp.sum(a * a, axis=-1, keepdims=True)                  # (ta, 1)
    b2 = jnp.sum(bt * bt, axis=0, keepdims=True)                 # (1, NbP)
    o_ref[...] = jnp.maximum(a2 + b2 - 2.0 * ab, 0.0)            # clamp cancellation


def pairwise_sqdist(a, b, *, tile_a=256):
    """a: (Na, 3), b: (Nb, 3) -> (Na, Nb_pad) squared distances (f32).

    Nb_pad = round_up(Nb, 128); padded columns hold huge sentinel distances so
    downstream top_k(-d, k) can never select them (requires k <= Nb).
    """
    na, nb = a.shape[0], b.shape[0]
    nb_pad = _round_up(nb, 128)
    ta = tile_a if na >= tile_a else _round_up(na, 8)
    na_pad = _round_up(na, ta)
    # Pad A rows with zeros (sliced off afterwards) and coords 3 -> 8 with zeros.
    a_p = jnp.pad(a, ((0, na_pad - na), (0, KDIM - 3)))
    # Pad B rows with SENTINEL coordinates (huge distances), coords 3 -> 8 zero.
    b_p = jnp.pad(b, ((0, nb_pad - nb), (0, 0)), constant_values=SENTINEL)
    b_p = jnp.pad(b_p, ((0, 0), (0, KDIM - 3)))
    bt = jnp.transpose(b_p)                                      # (8, Nb_pad)
    out = pl.pallas_call(
        _pairwise_sqdist_kernel,
        out_shape=jax.ShapeDtypeStruct((na_pad, nb_pad), jnp.float32),
        grid=(pl.cdiv(na_pad, ta),),
        in_specs=[
            pl.BlockSpec((ta, KDIM), lambda i: (i, 0)),
            pl.BlockSpec((KDIM, nb_pad), lambda i: (0, 0)),
        ],
        out_specs=pl.BlockSpec((ta, nb_pad), lambda i: (i, 0)),
        compiler_params=pltpu.CompilerParams(
            dimension_semantics=("parallel",),
            vmem_limit_bytes=VMEM_LIMIT,
        ),
    )(a_p, bt)
    return out[:na]
    # TODO(synk): fuse running k-smallest selection into this kernel so the full
    # (Na, Nb) distance matrix never round-trips HBM at large point counts.


# -----------------------------------------------------------------------------
# Kernel 2: set-abstraction ("pool") — shared 2-layer MLP + max over K neighbors
#   input slab: (M*K, 128) bf16  = padded concat([x_neighbors, pos_rel], -1)
#   output:     (M, 128) f32     = max_k relu(relu(g @ W1 + b1) @ W2 + b2)
# -----------------------------------------------------------------------------
def _sa_mlp_max_kernel(g_ref, w1_ref, b1_ref, w2_ref, b2_ref, o_ref, *, k):
    g = g_ref[...]                                               # (tp*k, 128) bf16
    h = jnp.dot(g, w1_ref[...], preferred_element_type=jnp.float32) + b1_ref[...]
    h = jnp.maximum(h, 0.0)
    h = jnp.dot(h.astype(jnp.bfloat16), w2_ref[...],
                preferred_element_type=jnp.float32) + b2_ref[...]
    h = jnp.maximum(h, 0.0)                                      # (tp*k, 128) f32
    tp = o_ref.shape[0]
    o_ref[...] = jnp.max(h.reshape(tp, k, h.shape[-1]), axis=1)  # max over neighbors


def sa_mlp_maxpool(grouped, m, k, w1, b1, w2, b2, *, tile_pts=64):
    """grouped: (M*K, 128) bf16 slab. Returns (M, 128) f32 (padded channels zero)."""
    tp = tile_pts if m >= tile_pts else _round_up(m, 8)
    m_pad = _round_up(m, tp)
    if m_pad * k != grouped.shape[0]:
        grouped = jnp.pad(grouped, ((0, m_pad * k - grouped.shape[0]), (0, 0)))
    kernel = functools.partial(_sa_mlp_max_kernel, k=k)
    out = pl.pallas_call(
        kernel,
        out_shape=jax.ShapeDtypeStruct((m_pad, CP), jnp.float32),
        grid=(pl.cdiv(m_pad, tp),),
        in_specs=[
            pl.BlockSpec((tp * k, CP), lambda i: (i, 0)),
            pl.BlockSpec((CP, CP), lambda i: (0, 0)),
            pl.BlockSpec((1, CP), lambda i: (0, 0)),
            pl.BlockSpec((CP, CP), lambda i: (0, 0)),
            pl.BlockSpec((1, CP), lambda i: (0, 0)),
        ],
        out_specs=pl.BlockSpec((tp, CP), lambda i: (i, 0)),
        compiler_params=pltpu.CompilerParams(
            dimension_semantics=("parallel",),
            vmem_limit_bytes=VMEM_LIMIT,
        ),
    )(grouped, w1, b1, w2, b2)
    return out[:m]


# -----------------------------------------------------------------------------
# Kernel 3: feature-propagation MLP — fused 2-layer MLP on a lane-dense slab
#   input slab: (N, 128) bf16 = padded concat([x_interp, x_skip], -1)
#   output:     (N, 128) f32  = relu(relu(x @ W1 + b1) @ W2 + b2)
# -----------------------------------------------------------------------------
def _mlp2_kernel(x_ref, w1_ref, b1_ref, w2_ref, b2_ref, o_ref):
    x = x_ref[...]                                               # (tn, 128) bf16
    h = jnp.dot(x, w1_ref[...], preferred_element_type=jnp.float32) + b1_ref[...]
    h = jnp.maximum(h, 0.0)
    h = jnp.dot(h.astype(jnp.bfloat16), w2_ref[...],
                preferred_element_type=jnp.float32) + b2_ref[...]
    o_ref[...] = jnp.maximum(h, 0.0)


def mlp2(x, w1, b1, w2, b2, *, tile_n=256):
    """x: (N, 128) bf16 slab. Returns (N, 128) f32."""
    n = x.shape[0]
    tn = tile_n if n >= tile_n else _round_up(n, 8)
    n_pad = _round_up(n, tn)
    if n_pad != n:
        x = jnp.pad(x, ((0, n_pad - n), (0, 0)))
    out = pl.pallas_call(
        _mlp2_kernel,
        out_shape=jax.ShapeDtypeStruct((n_pad, CP), jnp.float32),
        grid=(pl.cdiv(n_pad, tn),),
        in_specs=[
            pl.BlockSpec((tn, CP), lambda i: (i, 0)),
            pl.BlockSpec((CP, CP), lambda i: (0, 0)),
            pl.BlockSpec((1, CP), lambda i: (0, 0)),
            pl.BlockSpec((CP, CP), lambda i: (0, 0)),
            pl.BlockSpec((1, CP), lambda i: (0, 0)),
        ],
        out_specs=pl.BlockSpec((tn, CP), lambda i: (i, 0)),
        compiler_params=pltpu.CompilerParams(
            dimension_semantics=("parallel",),
            vmem_limit_bytes=VMEM_LIMIT,
        ),
    )(x, w1, b1, w2, b2)
    return out[:n]


# -----------------------------------------------------------------------------
# Glue: pool / interp, mirroring PointNetBase.forward
# -----------------------------------------------------------------------------
def pool(layer, x, pos, *, stride=2, k=8):
    pos_coarse = pos[::stride]                          # deterministic FPS stand-in
    m = pos_coarse.shape[0]
    d = pairwise_sqdist(pos_coarse, pos)                # (M, N_pad) — Pallas
    _, idx = jax.lax.top_k(-d, k)                       # (M, K); padded cols never win
    x_g = x[idx]                                        # (M, K, C)     (JAX gather)
    rel = pos[idx] - pos_coarse[:, None, :]             # (M, K, 3)
    grouped = jnp.concatenate([x_g, rel], axis=-1)      # (M, K, C+3)
    c_in = grouped.shape[-1]
    grouped = grouped.reshape(m * k, c_in)              # lane-friendly 2-D slab
    grouped = _pad_to(grouped, m * k, CP).astype(jnp.bfloat16)
    w1, b1, w2, b2 = _prep_layer(layer)
    c_out = layer["w2"].shape[1]
    x_out = sa_mlp_maxpool(grouped, m, k, w1, b1, w2, b2)[:, :c_out]
    return x_out, pos_coarse


def interp(layer, x_coarse, x_skip, pos_coarse, pos_fine, *, k=3):
    n = pos_fine.shape[0]
    d = pairwise_sqdist(pos_fine, pos_coarse)           # (N, M_pad) — Pallas
    neg_d, idx = jax.lax.top_k(-d, k)                   # (N, k); padded cols never win
    w = 1.0 / (jnp.maximum(-neg_d, 0.0) + 1e-8)
    w = w / jnp.sum(w, axis=-1, keepdims=True)
    # Sparse 3-NN gather + inverse-distance weighted sum (replaces a dense
    # one-hot (N, M) interpolation matmul).
    x_interp = jnp.sum(x_coarse[idx] * w[..., None], axis=1)     # (N, Cc)
    fp_in = jnp.concatenate([x_interp, x_skip.astype(jnp.float32)], axis=-1)
    fp_in = _pad_to(fp_in, n, CP).astype(jnp.bfloat16)
    w1, b1, w2, b2 = _prep_layer(layer)
    c_out = layer["w2"].shape[1]
    return mlp2(fp_in, w1, b1, w2, b2)[:, :c_out]       # Pallas


def pointnet_forward(params, x, pos):
    """Mirrors PointNetBase.forward: encoder caches, decoder pops."""
    x_cache, pos_cache = [], []
    for layer in params["pool_layers"]:
        x_cache.append(x)
        pos_cache.append(pos)
        x, pos = pool(layer, x, pos)
    for layer in params["mlp_layers"]:
        x_skip = x_cache.pop()
        pos_fine = pos_cache.pop()
        x = interp(layer, x, x_skip, pos, pos_fine)
        pos = pos_fine
    return x


# -----------------------------------------------------------------------------
# Deterministic parameter construction (synthetic; no checkpoint load)
# -----------------------------------------------------------------------------
def _init_linear(key, fan_in, fan_out):
    kw, kb = jax.random.split(key)
    w = jax.random.normal(kw, (fan_in, fan_out), jnp.float32) / jnp.sqrt(fan_in)
    b = 0.01 * jax.random.normal(kb, (1, fan_out), jnp.float32)
    return w, b


def init_params(key, c_in=4):
    keys = jax.random.split(key, 8)
    # encoder: two point_cloud_pooling_layers  (shared MLP: [x, rel_pos] -> feat)
    p0_w1, p0_b1 = _init_linear(keys[0], c_in + 3, 16)       # 7  -> 16
    p0_w2, p0_b2 = _init_linear(keys[1], 16, 32)             # 16 -> 32
    p1_w1, p1_b1 = _init_linear(keys[2], 32 + 3, 32)         # 35 -> 32
    p1_w2, p1_b2 = _init_linear(keys[3], 32, 64)             # 32 -> 64
    # decoder: two mlp_layers  (concat(interp_feat, skip_feat) -> feat)
    m0_w1, m0_b1 = _init_linear(keys[4], 64 + 32, 32)        # 96 -> 32
    m0_w2, m0_b2 = _init_linear(keys[5], 32, 32)             # 32 -> 32
    m1_w1, m1_b1 = _init_linear(keys[6], 32 + c_in, 32)      # 36 -> 32
    m1_w2, m1_b2 = _init_linear(keys[7], 32, 16)             # 32 -> 16
    return {
        "pool_layers": [
            {"w1": p0_w1, "b1": p0_b1, "w2": p0_w2, "b2": p0_b2},
            {"w1": p1_w1, "b1": p1_b1, "w2": p1_w2, "b2": p1_b2},
        ],
        "mlp_layers": [
            {"w1": m0_w1, "b1": m0_b1, "w2": m0_w2, "b2": m0_b2},
            {"w1": m1_w1, "b1": m1_b1, "w2": m1_w2, "b2": m1_b2},
        ],
    }


if __name__ == "__main__":
    key = jax.random.PRNGKey(0)
    kx, kp, kparams = jax.random.split(key, 3)

    N, C0 = 256, 4                                   # small point cloud
    x = jax.random.normal(kx, (N, C0), jnp.float32)      # data.x
    pos = jax.random.normal(kp, (N, 3), jnp.float32)     # data.pos
    params = init_params(kparams, c_in=C0)

    fwd = jax.jit(pointnet_forward)
    out = fwd(params, x, pos)
    out = jax.block_until_ready(out)

    assert out.shape == (N, 16), out.shape
    assert out.dtype == jnp.float32
    assert bool(jnp.all(jnp.isfinite(out)))
    print("KERNEL_OK")
</pallas_src>

<mosaic_0001>
module attributes {stable_mosaic.version = 11 : i64} {
  func.func @_pairwise_sqdist_kernel(%arg0: i32, %arg1: memref<128x8xf32, #tpu.memory_space<vmem>>, %arg2: memref<8x256xf32, #tpu.memory_space<vmem>>, %arg3: memref<128x256xf32, #tpu.memory_space<vmem>>) attributes {dimension_semantics = [#tpu.dimension_semantics<parallel>], iteration_bounds = array<i64: 1>, scalar_prefetch = 0 : i64, scratch_operands = 0 : i64, tpu.core_type = #tpu.core_type<tc>, window_params = [{transform_indices = @transform_0, window_bounds = array<i64: 128, 8>}, {pipeline_mode = #tpu.pipeline_mode<synchronous>, transform_indices = @transform_1, window_bounds = array<i64: 8, 256>}, {transform_indices = @transform_2, window_bounds = array<i64: 128, 256>}]} {
    %c0 = arith.constant 0 : index
    %c0_0 = arith.constant 0 : index
    %0 = vector.load %arg1[%c0, %c0_0] : memref<128x8xf32, #tpu.memory_space<vmem>>, vector<128x8xf32>
    %c0_1 = arith.constant 0 : index
    %c0_2 = arith.constant 0 : index
    %1 = vector.load %arg2[%c0_1, %c0_2] : memref<8x256xf32, #tpu.memory_space<vmem>>, vector<8x256xf32>
    %cst = arith.constant dense<0.000000e+00> : vector<128x256xf32>
    %2 = tpu.matmul %0, %1, %cst {dimension_numbers = #tpu.dot_dimension_numbers<[1], [0], [0], [1], [0, 0, 1, 1], [], []>} : vector<128x8xf32>, vector<8x256xf32>, vector<128x256xf32> -> vector<128x256xf32>
    %3 = arith.mulf %0, %0 : vector<128x8xf32>
    %cst_3 = arith.constant dense<0.000000e+00> : vector<128xf32>
    %4 = vector.multi_reduction <add>, %3, %cst_3 [1] : vector<128x8xf32> to vector<128xf32>
    %5 = vector.shape_cast %4 : vector<128xf32> to vector<128x1xf32>
    %6 = arith.mulf %1, %1 : vector<8x256xf32>
    %cst_4 = arith.constant dense<0.000000e+00> : vector<256xf32>
    %7 = vector.multi_reduction <add>, %6, %cst_4 [0] : vector<8x256xf32> to vector<256xf32>
    %8 = vector.shape_cast %7 : vector<256xf32> to vector<1x256xf32>
    %9 = vector.broadcast %5 : vector<128x1xf32> to vector<128x256xf32>
    %10 = vector.broadcast %8 : vector<1x256xf32> to vector<128x256xf32>
    %11 = arith.addf %9, %10 : vector<128x256xf32>
    %cst_5 = arith.constant 2.000000e+00 : f32
    %12 = vector.broadcast %cst_5 : f32 to vector<128x256xf32>
    %13 = arith.mulf %12, %2 : vector<128x256xf32>
    %14 = arith.subf %11, %13 : vector<128x256xf32>
    %cst_6 = arith.constant 0.000000e+00 : f32
    %15 = vector.broadcast %cst_6 : f32 to vector<128x256xf32>
    %16 = arith.maximumf %14, %15 : vector<128x256xf32>
    %c0_7 = arith.constant 0 : index
    %c0_8 = arith.constant 0 : index
    %17 = vector.load %arg3[%c0_7, %c0_8] : memref<128x256xf32, #tpu.memory_space<vmem>>, vector<128x256xf32>
    tpu.vector_store %arg3[%c0_7, %c0_8], %16 {strides = array<i32>} : memref<128x256xf32, #tpu.memory_space<vmem>>, vector<128x256xf32>,
    return
  }
  func.func @transform_0(%arg0: i32) -> (i32, i32) {
    %c0_i32 = arith.constant 0 : i32
    %c0_i32_0 = arith.constant 0 : i32
    return %arg0, %c0_i32 : i32, i32
  }
  func.func @transform_1(%arg0: i32) -> (i32, i32) {
    %c0_i32 = arith.constant 0 : i32
    %c0_i32_0 = arith.constant 0 : i32
    %c0_i32_1 = arith.constant 0 : i32
    return %c0_i32, %c0_i32_0 : i32, i32
  }
  func.func @transform_2(%arg0: i32) -> (i32, i32) {
    %c0_i32 = arith.constant 0 : i32
    %c0_i32_0 = arith.constant 0 : i32
    return %arg0, %c0_i32 : i32, i32
  }
}

module attributes {stable_mosaic.version = 11 : i64} {
  func.func @_sa_mlp_max_kernel(%arg0: i32, %arg1: memref<512x128xbf16, #tpu.memory_space<vmem>>, %arg2: memref<128x128xbf16, #tpu.memory_space<vmem>>, %arg3: memref<1x128xf32, #tpu.memory_space<vmem>>, %arg4: memref<128x128xbf16, #tpu.memory_space<vmem>>, %arg5: memref<1x128xf32, #tpu.memory_space<vmem>>, %arg6: memref<64x128xf32, #tpu.memory_space<vmem>>) attributes {dimension_semantics = [#tpu.dimension_semantics<parallel>], iteration_bounds = array<i64: 2>, scalar_prefetch = 0 : i64, scratch_operands = 0 : i64, tpu.core_type = #tpu.core_type<tc>, window_params = [{transform_indices = @transform_0, window_bounds = array<i64: 512, 128>}, {pipeline_mode = #tpu.pipeline_mode<synchronous>, transform_indices = @transform_1, window_bounds = array<i64: 128, 128>}, {pipeline_mode = #tpu.pipeline_mode<synchronous>, transform_indices = @transform_2, window_bounds = array<i64: 1, 128>}, {pipeline_mode = #tpu.pipeline_mode<synchronous>, transform_indices = @transform_3, window_bounds = array<i64: 128, 128>}, {pipeline_mode = #tpu.pipeline_mode<synchronous>, transform_indices = @transform_4, window_bounds = array<i64: 1, 128>}, {transform_indices = @transform_5, window_bounds = array<i64: 64, 128>}]} {
    %c0 = arith.constant 0 : index
    %c0_0 = arith.constant 0 : index
    %0 = vector.load %arg1[%c0, %c0_0] : memref<512x128xbf16, #tpu.memory_space<vmem>>, vector<512x128xbf16>
    %c0_1 = arith.constant 0 : index
    %c0_2 = arith.constant 0 : index
    %1 = vector.load %arg2[%c0_1, %c0_2] : memref<128x128xbf16, #tpu.memory_space<vmem>>, vector<128x128xbf16>
    %cst = arith.constant dense<0.000000e+00> : vector<512x128xf32>
    %2 = tpu.matmul %0, %1, %cst {dimension_numbers = #tpu.dot_dimension_numbers<[1], [0], [0], [1], [0, 0, 1, 1], [], []>} : vector<512x128xbf16>, vector<128x128xbf16>, vector<512x128xf32> -> vector<512x128xf32>
    %c0_3 = arith.constant 0 : index
    %c0_4 = arith.constant 0 : index
    %3 = vector.load %arg3[%c0_3, %c0_4] : memref<1x128xf32, #tpu.memory_space<vmem>>, vector<1x128xf32>
    %4 = vector.broadcast %3 : vector<1x128xf32> to vector<512x128xf32>
    %5 = arith.addf %2, %4 : vector<512x128xf32>
    %cst_5 = arith.constant 0.000000e+00 : f32
    %6 = vector.broadcast %cst_5 : f32 to vector<512x128xf32>
    %7 = arith.maximumf %5, %6 : vector<512x128xf32>
    %8 = arith.truncf %7 : vector<512x128xf32> to vector<512x128xbf16>
    %c0_6 = arith.constant 0 : index
    %c0_7 = arith.constant 0 : index
    %9 = vector.load %arg4[%c0_6, %c0_7] : memref<128x128xbf16, #tpu.memory_space<vmem>>, vector<128x128xbf16>
    %cst_8 = arith.constant dense<0.000000e+00> : vector<512x128xf32>
    %10 = tpu.matmul %8, %9, %cst_8 {dimension_numbers = #tpu.dot_dimension_numbers<[1], [0], [0], [1], [0, 0, 1, 1], [], []>} : vector<512x128xbf16>, vector<128x128xbf16>, vector<512x128xf32> -> vector<512x128xf32>
    %c0_9 = arith.constant 0 : index
    %c0_10 = arith.constant 0 : index
    %11 = vector.load %arg5[%c0_9, %c0_10] : memref<1x128xf32, #tpu.memory_space<vmem>>, vector<1x128xf32>
    %12 = vector.broadcast %11 : vector<1x128xf32> to vector<512x128xf32>
    %13 = arith.addf %10, %12 : vector<512x128xf32>
    %cst_11 = arith.constant 0.000000e+00 : f32
    %14 = vector.broadcast %cst_11 : f32 to vector<512x128xf32>
    %15 = arith.maximumf %13, %14 : vector<512x128xf32>
    %16 = vector.shape_cast %15 : vector<512x128xf32> to vector<64x8x128xf32>
    %cst_12 = arith.constant dense<0xFF800000> : vector<64x128xf32>
    %17 = vector.multi_reduction <maximumf>, %16, %cst_12 [1] : vector<64x8x128xf32> to vector<64x128xf32>
    %c0_13 = arith.constant 0 : index
    %c0_14 = arith.constant 0 : index
    %18 = vector.load %arg6[%c0_13, %c0_14] : memref<64x128xf32, #tpu.memory_space<vmem>>, vector<64x128xf32>
    tpu.vector_store %arg6[%c0_13, %c0_14], %17 {strides = array<i32>} : memref<64x128xf32, #tpu.memory_space<vmem>>, vector<64x128xf32>,
    return
  }
  func.func @transform_0(%arg0: i32) -> (i32, i32) {
    %c0_i32 = arith.constant 0 : i32
    %c0_i32_0 = arith.constant 0 : i32
    return %arg0, %c0_i32 : i32, i32
  }
  func.func @transform_1(%arg0: i32) -> (i32, i32) {
    %c0_i32 = arith.constant 0 : i32
    %c0_i32_0 = arith.constant 0 : i32
    %c0_i32_1 = arith.constant 0 : i32
    return %c0_i32, %c0_i32_0 : i32, i32
  }
  func.func @transform_2(%arg0: i32) -> (i32, i32) {
    %c0_i32 = arith.constant 0 : i32
    %c0_i32_0 = arith.constant 0 : i32
    %c0_i32_1 = arith.constant 0 : i32
    return %c0_i32, %c0_i32_0 : i32, i32
  }
  func.func @transform_3(%arg0: i32) -> (i32, i32) {
    %c0_i32 = arith.constant 0 : i32
    %c0_i32_0 = arith.constant 0 : i32
    %c0_i32_1 = arith.constant 0 : i32
    return %c0_i32, %c0_i32_0 : i32, i32
  }
  func.func @transform_4(%arg0: i32) -> (i32, i32) {
    %c0_i32 = arith.constant 0 : i32
    %c0_i32_0 = arith.constant 0 : i32
    %c0_i32_1 = arith.constant 0 : i32
    return %c0_i32, %c0_i32_0 : i32, i32
  }
  func.func @transform_5(%arg0: i32) -> (i32, i32) {
    %c0_i32 = arith.constant 0 : i32
    %c0_i32_0 = arith.constant 0 : i32
    return %arg0, %c0_i32 : i32, i32
  }
}

module attributes {stable_mosaic.version = 11 : i64} {
  func.func @_pairwise_sqdist_kernel(%arg0: i32, %arg1: memref<64x8xf32, #tpu.memory_space<vmem>>, %arg2: memref<8x128xf32, #tpu.memory_space<vmem>>, %arg3: memref<64x128xf32, #tpu.memory_space<vmem>>) attributes {dimension_semantics = [#tpu.dimension_semantics<parallel>], iteration_bounds = array<i64: 1>, scalar_prefetch = 0 : i64, scratch_operands = 0 : i64, tpu.core_type = #tpu.core_type<tc>, window_params = [{transform_indices = @transform_0, window_bounds = array<i64: 64, 8>}, {pipeline_mode = #tpu.pipeline_mode<synchronous>, transform_indices = @transform_1, window_bounds = array<i64: 8, 128>}, {transform_indices = @transform_2, window_bounds = array<i64: 64, 128>}]} {
    %c0 = arith.constant 0 : index
    %c0_0 = arith.constant 0 : index
    %0 = vector.load %arg1[%c0, %c0_0] : memref<64x8xf32, #tpu.memory_space<vmem>>, vector<64x8xf32>
    %c0_1 = arith.constant 0 : index
    %c0_2 = arith.constant 0 : index
    %1 = vector.load %arg2[%c0_1, %c0_2] : memref<8x128xf32, #tpu.memory_space<vmem>>, vector<8x128xf32>
    %cst = arith.constant dense<0.000000e+00> : vector<64x128xf32>
    %2 = tpu.matmul %0, %1, %cst {dimension_numbers = #tpu.dot_dimension_numbers<[1], [0], [0], [1], [0, 0, 1, 1], [], []>} : vector<64x8xf32>, vector<8x128xf32>, vector<64x128xf32> -> vector<64x128xf32>
    %3 = arith.mulf %0, %0 : vector<64x8xf32>
    %cst_3 = arith.constant dense<0.000000e+00> : vector<64xf32>
    %4 = vector.multi_reduction <add>, %3, %cst_3 [1] : vector<64x8xf32> to vector<64xf32>
    %5 = vector.shape_cast %4 : vector<64xf32> to vector<64x1xf32>
    %6 = arith.mulf %1, %1 : vector<8x128xf32>
    %cst_4 = arith.constant dense<0.000000e+00> : vector<128xf32>
    %7 = vector.multi_reduction <add>, %6, %cst_4 [0] : vector<8x128xf32> to vector<128xf32>
    %8 = vector.shape_cast %7 : vector<128xf32> to vector<1x128xf32>
    %9 = vector.broadcast %5 : vector<64x1xf32> to vector<64x128xf32>
    %10 = vector.broadcast %8 : vector<1x128xf32> to vector<64x128xf32>
    %11 = arith.addf %9, %10 : vector<64x128xf32>
    %cst_5 = arith.constant 2.000000e+00 : f32
    %12 = vector.broadcast %cst_5 : f32 to vector<64x128xf32>
    %13 = arith.mulf %12, %2 : vector<64x128xf32>
    %14 = arith.subf %11, %13 : vector<64x128xf32>
    %cst_6 = arith.constant 0.000000e+00 : f32
    %15 = vector.broadcast %cst_6 : f32 to vector<64x128xf32>
    %16 = arith.maximumf %14, %15 : vector<64x128xf32>
    %c0_7 = arith.constant 0 : index
    %c0_8 = arith.constant 0 : index
    %17 = vector.load %arg3[%c0_7, %c0_8] : memref<64x128xf32, #tpu.memory_space<vmem>>, vector<64x128xf32>
    tpu.vector_store %arg3[%c0_7, %c0_8], %16 {strides = array<i32>} : memref<64x128xf32, #tpu.memory_space<vmem>>, vector<64x128xf32>,
    return
  }
  func.func @transform_0(%arg0: i32) -> (i32, i32) {
    %c0_i32 = arith.constant 0 : i32
    %c0_i32_0 = arith.constant 0 : i32
    return %arg0, %c0_i32 : i32, i32
  }
  func.func @transform_1(%arg0: i32) -> (i32, i32) {
    %c0_i32 = arith.constant 0 : i32
    %c0_i32_0 = arith.constant 0 : i32
    %c0_i32_1 = arith.constant 0 : i32
    return %c0_i32, %c0_i32_0 : i32, i32
  }
  func.func @transform_2(%arg0: i32) -> (i32, i32) {
    %c0_i32 = arith.constant 0 : i32
    %c0_i32_0 = arith.constant 0 : i32
    return %arg0, %c0_i32 : i32, i32
  }
}

module attributes {stable_mosaic.version = 11 : i64} {
  func.func @_sa_mlp_max_kernel(%arg0: i32, %arg1: memref<512x128xbf16, #tpu.memory_space<vmem>>, %arg2: memref<128x128xbf16, #tpu.memory_space<vmem>>, %arg3: memref<1x128xf32, #tpu.memory_space<vmem>>, %arg4: memref<128x128xbf16, #tpu.memory_space<vmem>>, %arg5: memref<1x128xf32, #tpu.memory_space<vmem>>, %arg6: memref<64x128xf32, #tpu.memory_space<vmem>>) attributes {dimension_semantics = [#tpu.dimension_semantics<parallel>], iteration_bounds = array<i64: 1>, scalar_prefetch = 0 : i64, scratch_operands = 0 : i64, tpu.core_type = #tpu.core_type<tc>, window_params = [{transform_indices = @transform_0, window_bounds = array<i64: 512, 128>}, {pipeline_mode = #tpu.pipeline_mode<synchronous>, transform_indices = @transform_1, window_bounds = array<i64: 128, 128>}, {pipeline_mode = #tpu.pipeline_mode<synchronous>, transform_indices = @transform_2, window_bounds = array<i64: 1, 128>}, {pipeline_mode = #tpu.pipeline_mode<synchronous>, transform_indices = @transform_3, window_bounds = array<i64: 128, 128>}, {pipeline_mode = #tpu.pipeline_mode<synchronous>, transform_indices = @transform_4, window_bounds = array<i64: 1, 128>}, {transform_indices = @transform_5, window_bounds = array<i64: 64, 128>}]} {
    %c0 = arith.constant 0 : index
    %c0_0 = arith.constant 0 : index
    %0 = vector.load %arg1[%c0, %c0_0] : memref<512x128xbf16, #tpu.memory_space<vmem>>, vector<512x128xbf16>
    %c0_1 = arith.constant 0 : index
    %c0_2 = arith.constant 0 : index
    %1 = vector.load %arg2[%c0_1, %c0_2] : memref<128x128xbf16, #tpu.memory_space<vmem>>, vector<128x128xbf16>
    %cst = arith.constant dense<0.000000e+00> : vector<512x128xf32>
    %2 = tpu.matmul %0, %1, %cst {dimension_numbers = #tpu.dot_dimension_numbers<[1], [0], [0], [1], [0, 0, 1, 1], [], []>} : vector<512x128xbf16>, vector<128x128xbf16>, vector<512x128xf32> -> vector<512x128xf32>
    %c0_3 = arith.constant 0 : index
    %c0_4 = arith.constant 0 : index
    %3 = vector.load %arg3[%c0_3, %c0_4] : memref<1x128xf32, #tpu.memory_space<vmem>>, vector<1x128xf32>
    %4 = vector.broadcast %3 : vector<1x128xf32> to vector<512x128xf32>
    %5 = arith.addf %2, %4 : vector<512x128xf32>
    %cst_5 = arith.constant 0.000000e+00 : f32
    %6 = vector.broadcast %cst_5 : f32 to vector<512x128xf32>
    %7 = arith.maximumf %5, %6 : vector<512x128xf32>
    %8 = arith.truncf %7 : vector<512x128xf32> to vector<512x128xbf16>
    %c0_6 = arith.constant 0 : index
    %c0_7 = arith.constant 0 : index
    %9 = vector.load %arg4[%c0_6, %c0_7] : memref<128x128xbf16, #tpu.memory_space<vmem>>, vector<128x128xbf16>
    %cst_8 = arith.constant dense<0.000000e+00> : vector<512x128xf32>
    %10 = tpu.matmul %8, %9, %cst_8 {dimension_numbers = #tpu.dot_dimension_numbers<[1], [0], [0], [1], [0, 0, 1, 1], [], []>} : vector<512x128xbf16>, vector<128x128xbf16>, vector<512x128xf32> -> vector<512x128xf32>
    %c0_9 = arith.constant 0 : index
    %c0_10 = arith.constant 0 : index
    %11 = vector.load %arg5[%c0_9, %c0_10] : memref<1x128xf32, #tpu.memory_space<vmem>>, vector<1x128xf32>
    %12 = vector.broadcast %11 : vector<1x128xf32> to vector<512x128xf32>
    %13 = arith.addf %10, %12 : vector<512x128xf32>
    %cst_11 = arith.constant 0.000000e+00 : f32
    %14 = vector.broadcast %cst_11 : f32 to vector<512x128xf32>
    %15 = arith.maximumf %13, %14 : vector<512x128xf32>
    %16 = vector.shape_cast %15 : vector<512x128xf32> to vector<64x8x128xf32>
    %cst_12 = arith.constant dense<0xFF800000> : vector<64x128xf32>
    %17 = vector.multi_reduction <maximumf>, %16, %cst_12 [1] : vector<64x8x128xf32> to vector<64x128xf32>
    %c0_13 = arith.constant 0 : index
    %c0_14 = arith.constant 0 : index
    %18 = vector.load %arg6[%c0_13, %c0_14] : memref<64x128xf32, #tpu.memory_space<vmem>>, vector<64x128xf32>
    tpu.vector_store %arg6[%c0_13, %c0_14], %17 {strides = array<i32>} : memref<64x128xf32, #tpu.memory_space<vmem>>, vector<64x128xf32>,
    return
  }
  func.func @transform_0(%arg0: i32) -> (i32, i32) {
    %c0_i32 = arith.constant 0 : i32
    %c0_i32_0 = arith.constant 0 : i32
    return %arg0, %c0_i32 : i32, i32
  }
  func.func @transform_1(%arg0: i32) -> (i32, i32) {
    %c0_i32 = arith.constant 0 : i32
    %c0_i32_0 = arith.constant 0 : i32
    %c0_i32_1 = arith.constant 0 : i32
    return %c0_i32, %c0_i32_0 : i32, i32
  }
  func.func @transform_2(%arg0: i32) -> (i32, i32) {
    %c0_i32 = arith.constant 0 : i32
    %c0_i32_0 = arith.constant 0 : i32
    %c0_i32_1 = arith.constant 0 : i32
    return %c0_i32, %c0_i32_0 : i32, i32
  }
  func.func @transform_3(%arg0: i32) -> (i32, i32) {
    %c0_i32 = arith.constant 0 : i32
    %c0_i32_0 = arith.constant 0 : i32
    %c0_i32_1 = arith.constant 0 : i32
    return %c0_i32, %c0_i32_0 : i32, i32
  }
  func.func @transform_4(%arg0: i32) -> (i32, i32) {
    %c0_i32 = arith.constant 0 : i32
    %c0_i32_0 = arith.constant 0 : i32
    %c0_i32_1 = arith.constant 0 : i32
    return %c0_i32, %c0_i32_0 : i32, i32
  }
  func.func @transform_5(%arg0: i32) -> (i32, i32) {
    %c0_i32 = arith.constant 0 : i32
    %c0_i32_0 = arith.constant 0 : i32
    return %arg0, %c0_i32 : i32, i32
  }
}

module attributes {stable_mosaic.version = 11 : i64} {
  func.func @_pairwise_sqdist_kernel(%arg0: i32, %arg1: memref<128x8xf32, #tpu.memory_space<vmem>>, %arg2: memref<8x128xf32, #tpu.memory_space<vmem>>, %arg3: memref<128x128xf32, #tpu.memory_space<vmem>>) attributes {dimension_semantics = [#tpu.dimension_semantics<parallel>], iteration_bounds = array<i64: 1>, scalar_prefetch = 0 : i64, scratch_operands = 0 : i64, tpu.core_type = #tpu.core_type<tc>, window_params = [{transform_indices = @transform_0, window_bounds = array<i64: 128, 8>}, {pipeline_mode = #tpu.pipeline_mode<synchronous>, transform_indices = @transform_1, window_bounds = array<i64: 8, 128>}, {transform_indices = @transform_2, window_bounds = array<i64: 128, 128>}]} {
    %c0 = arith.constant 0 : index
    %c0_0 = arith.constant 0 : index
    %0 = vector.load %arg1[%c0, %c0_0] : memref<128x8xf32, #tpu.memory_space<vmem>>, vector<128x8xf32>
    %c0_1 = arith.constant 0 : index
    %c0_2 = arith.constant 0 : index
    %1 = vector.load %arg2[%c0_1, %c0_2] : memref<8x128xf32, #tpu.memory_space<vmem>>, vector<8x128xf32>
    %cst = arith.constant dense<0.000000e+00> : vector<128x128xf32>
    %2 = tpu.matmul %0, %1, %cst {dimension_numbers = #tpu.dot_dimension_numbers<[1], [0], [0], [1], [0, 0, 1, 1], [], []>} : vector<128x8xf32>, vector<8x128xf32>, vector<128x128xf32> -> vector<128x128xf32>
    %3 = arith.mulf %0, %0 : vector<128x8xf32>
    %cst_3 = arith.constant dense<0.000000e+00> : vector<128xf32>
    %4 = vector.multi_reduction <add>, %3, %cst_3 [1] : vector<128x8xf32> to vector<128xf32>
    %5 = vector.shape_cast %4 : vector<128xf32> to vector<128x1xf32>
    %6 = arith.mulf %1, %1 : vector<8x128xf32>
    %cst_4 = arith.constant dense<0.000000e+00> : vector<128xf32>
    %7 = vector.multi_reduction <add>, %6, %cst_4 [0] : vector<8x128xf32> to vector<128xf32>
    %8 = vector.shape_cast %7 : vector<128xf32> to vector<1x128xf32>
    %9 = vector.broadcast %5 : vector<128x1xf32> to vector<128x128xf32>
    %10 = vector.broadcast %8 : vector<1x128xf32> to vector<128x128xf32>
    %11 = arith.addf %9, %10 : vector<128x128xf32>
    %cst_5 = arith.constant 2.000000e+00 : f32
    %12 = vector.broadcast %cst_5 : f32 to vector<128x128xf32>
    %13 = arith.mulf %12, %2 : vector<128x128xf32>
    %14 = arith.subf %11, %13 : vector<128x128xf32>
    %cst_6 = arith.constant 0.000000e+00 : f32
    %15 = vector.broadcast %cst_6 : f32 to vector<128x128xf32>
    %16 = arith.maximumf %14, %15 : vector<128x128xf32>
    %c0_7 = arith.constant 0 : index
    %c0_8 = arith.constant 0 : index
    %17 = vector.load %arg3[%c0_7, %c0_8] : memref<128x128xf32, #tpu.memory_space<vmem>>, vector<128x128xf32>
    tpu.vector_store %arg3[%c0_7, %c0_8], %16 {strides = array<i32>} : memref<128x128xf32, #tpu.memory_space<vmem>>, vector<128x128xf32>,
    return
  }
  func.func @transform_0(%arg0: i32) -> (i32, i32) {
    %c0_i32 = arith.constant 0 : i32
    %c0_i32_0 = arith.constant 0 : i32
    return %arg0, %c0_i32 : i32, i32
  }
  func.func @transform_1(%arg0: i32) -> (i32, i32) {
    %c0_i32 = arith.constant 0 : i32
    %c0_i32_0 = arith.constant 0 : i32
    %c0_i32_1 = arith.constant 0 : i32
    return %c0_i32, %c0_i32_0 : i32, i32
  }
  func.func @transform_2(%arg0: i32) -> (i32, i32) {
    %c0_i32 = arith.constant 0 : i32
    %c0_i32_0 = arith.constant 0 : i32
    return %arg0, %c0_i32 : i32, i32
  }
}

module attributes {stable_mosaic.version = 11 : i64} {
  func.func @_mlp2_kernel(%arg0: i32, %arg1: memref<128x128xbf16, #tpu.memory_space<vmem>>, %arg2: memref<128x128xbf16, #tpu.memory_space<vmem>>, %arg3: memref<1x128xf32, #tpu.memory_space<vmem>>, %arg4: memref<128x128xbf16, #tpu.memory_space<vmem>>, %arg5: memref<1x128xf32, #tpu.memory_space<vmem>>, %arg6: memref<128x128xf32, #tpu.memory_space<vmem>>) attributes {dimension_semantics = [#tpu.dimension_semantics<parallel>], iteration_bounds = array<i64: 1>, scalar_prefetch = 0 : i64, scratch_operands = 0 : i64, tpu.core_type = #tpu.core_type<tc>, window_params = [{transform_indices = @transform_0, window_bounds = array<i64: 128, 128>}, {pipeline_mode = #tpu.pipeline_mode<synchronous>, transform_indices = @transform_1, window_bounds = array<i64: 128, 128>}, {pipeline_mode = #tpu.pipeline_mode<synchronous>, transform_indices = @transform_2, window_bounds = array<i64: 1, 128>}, {pipeline_mode = #tpu.pipeline_mode<synchronous>, transform_indices = @transform_3, window_bounds = array<i64: 128, 128>}, {pipeline_mode = #tpu.pipeline_mode<synchronous>, transform_indices = @transform_4, window_bounds = array<i64: 1, 128>}, {transform_indices = @transform_5, window_bounds = array<i64: 128, 128>}]} {
    %c0 = arith.constant 0 : index
    %c0_0 = arith.constant 0 : index
    %0 = vector.load %arg1[%c0, %c0_0] : memref<128x128xbf16, #tpu.memory_space<vmem>>, vector<128x128xbf16>
    %c0_1 = arith.constant 0 : index
    %c0_2 = arith.constant 0 : index
    %1 = vector.load %arg2[%c0_1, %c0_2] : memref<128x128xbf16, #tpu.memory_space<vmem>>, vector<128x128xbf16>
    %cst = arith.constant dense<0.000000e+00> : vector<128x128xf32>
    %2 = tpu.matmul %0, %1, %cst {dimension_numbers = #tpu.dot_dimension_numbers<[1], [0], [0], [1], [0, 0, 1, 1], [], []>} : vector<128x128xbf16>, vector<128x128xbf16>, vector<128x128xf32> -> vector<128x128xf32>
    %c0_3 = arith.constant 0 : index
    %c0_4 = arith.constant 0 : index
    %3 = vector.load %arg3[%c0_3, %c0_4] : memref<1x128xf32, #tpu.memory_space<vmem>>, vector<1x128xf32>
    %4 = vector.broadcast %3 : vector<1x128xf32> to vector<128x128xf32>
    %5 = arith.addf %2, %4 : vector<128x128xf32>
    %cst_5 = arith.constant 0.000000e+00 : f32
    %6 = vector.broadcast %cst_5 : f32 to vector<128x128xf32>
    %7 = arith.maximumf %5, %6 : vector<128x128xf32>
    %8 = arith.truncf %7 : vector<128x128xf32> to vector<128x128xbf16>
    %c0_6 = arith.constant 0 : index
    %c0_7 = arith.constant 0 : index
    %9 = vector.load %arg4[%c0_6, %c0_7] : memref<128x128xbf16, #tpu.memory_space<vmem>>, vector<128x128xbf16>
    %cst_8 = arith.constant dense<0.000000e+00> : vector<128x128xf32>
    %10 = tpu.matmul %8, %9, %cst_8 {dimension_numbers = #tpu.dot_dimension_numbers<[1], [0], [0], [1], [0, 0, 1, 1], [], []>} : vector<128x128xbf16>, vector<128x128xbf16>, vector<128x128xf32> -> vector<128x128xf32>
    %c0_9 = arith.constant 0 : index
    %c0_10 = arith.constant 0 : index
    %11 = vector.load %arg5[%c0_9, %c0_10] : memref<1x128xf32, #tpu.memory_space<vmem>>, vector<1x128xf32>
    %12 = vector.broadcast %11 : vector<1x128xf32> to vector<128x128xf32>
    %13 = arith.addf %10, %12 : vector<128x128xf32>
    %cst_11 = arith.constant 0.000000e+00 : f32
    %14 = vector.broadcast %cst_11 : f32 to vector<128x128xf32>
    %15 = arith.maximumf %13, %14 : vector<128x128xf32>
    %c0_12 = arith.constant 0 : index
    %c0_13 = arith.constant 0 : index
    %16 = vector.load %arg6[%c0_12, %c0_13] : memref<128x128xf32, #tpu.memory_space<vmem>>, vector<128x128xf32>
    tpu.vector_store %arg6[%c0_12, %c0_13], %15 {strides = array<i32>} : memref<128x128xf32, #tpu.memory_space<vmem>>, vector<128x128xf32>,
    return
  }
  func.func @transform_0(%arg0: i32) -> (i32, i32) {
    %c0_i32 = arith.constant 0 : i32
    %c0_i32_0 = arith.constant 0 : i32
    return %arg0, %c0_i32 : i32, i32
  }
  func.func @transform_1(%arg0: i32) -> (i32, i32) {
    %c0_i32 = arith.constant 0 : i32
    %c0_i32_0 = arith.constant 0 : i32
    %c0_i32_1 = arith.constant 0 : i32
    return %c0_i32, %c0_i32_0 : i32, i32
  }
  func.func @transform_2(%arg0: i32) -> (i32, i32) {
    %c0_i32 = arith.constant 0 : i32
    %c0_i32_0 = arith.constant 0 : i32
    %c0_i32_1 = arith.constant 0 : i32
    return %c0_i32, %c0_i32_0 : i32, i32
  }
  func.func @transform_3(%arg0: i32) -> (i32, i32) {
    %c0_i32 = arith.constant 0 : i32
    %c0_i32_0 = arith.constant 0 : i32
    %c0_i32_1 = arith.constant 0 : i32
    return %c0_i32, %c0_i32_0 : i32, i32
  }
  func.func @transform_4(%arg0: i32) -> (i32, i32) {
    %c0_i32 = arith.constant 0 : i32
    %c0_i32_0 = arith.constant 0 : i32
    %c0_i32_1 = arith.constant 0 : i32
    return %c0_i32, %c0_i32_0 : i32, i32
  }
  func.func @transform_5(%arg0: i32) -> (i32, i32) {
    %c0_i32 = arith.constant 0 : i32
    %c0_i32_0 = arith.constant 0 : i32
    return %arg0, %c0_i32 : i32, i32
  }
}

module attributes {stable_mosaic.version = 11 : i64} {
  func.func @_pairwise_sqdist_kernel(%arg0: i32, %arg1: memref<256x8xf32, #tpu.memory_space<vmem>>, %arg2: memref<8x128xf32, #tpu.memory_space<vmem>>, %arg3: memref<256x128xf32, #tpu.memory_space<vmem>>) attributes {dimension_semantics = [#tpu.dimension_semantics<parallel>], iteration_bounds = array<i64: 1>, scalar_prefetch = 0 : i64, scratch_operands = 0 : i64, tpu.core_type = #tpu.core_type<tc>, window_params = [{transform_indices = @transform_0, window_bounds = array<i64: 256, 8>}, {pipeline_mode = #tpu.pipeline_mode<synchronous>, transform_indices = @transform_1, window_bounds = array<i64: 8, 128>}, {transform_indices = @transform_2, window_bounds = array<i64: 256, 128>}]} {
    %c0 = arith.constant 0 : index
    %c0_0 = arith.constant 0 : index
    %0 = vector.load %arg1[%c0, %c0_0] : memref<256x8xf32, #tpu.memory_space<vmem>>, vector<256x8xf32>
    %c0_1 = arith.constant 0 : index
    %c0_2 = arith.constant 0 : index
    %1 = vector.load %arg2[%c0_1, %c0_2] : memref<8x128xf32, #tpu.memory_space<vmem>>, vector<8x128xf32>
    %cst = arith.constant dense<0.000000e+00> : vector<256x128xf32>
    %2 = tpu.matmul %0, %1, %cst {dimension_numbers = #tpu.dot_dimension_numbers<[1], [0], [0], [1], [0, 0, 1, 1], [], []>} : vector<256x8xf32>, vector<8x128xf32>, vector<256x128xf32> -> vector<256x128xf32>
    %3 = arith.mulf %0, %0 : vector<256x8xf32>
    %cst_3 = arith.constant dense<0.000000e+00> : vector<256xf32>
    %4 = vector.multi_reduction <add>, %3, %cst_3 [1] : vector<256x8xf32> to vector<256xf32>
    %5 = vector.shape_cast %4 : vector<256xf32> to vector<256x1xf32>
    %6 = arith.mulf %1, %1 : vector<8x128xf32>
    %cst_4 = arith.constant dense<0.000000e+00> : vector<128xf32>
    %7 = vector.multi_reduction <add>, %6, %cst_4 [0] : vector<8x128xf32> to vector<128xf32>
    %8 = vector.shape_cast %7 : vector<128xf32> to vector<1x128xf32>
    %9 = vector.broadcast %5 : vector<256x1xf32> to vector<256x128xf32>
    %10 = vector.broadcast %8 : vector<1x128xf32> to vector<256x128xf32>
    %11 = arith.addf %9, %10 : vector<256x128xf32>
    %cst_5 = arith.constant 2.000000e+00 : f32
    %12 = vector.broadcast %cst_5 : f32 to vector<256x128xf32>
    %13 = arith.mulf %12, %2 : vector<256x128xf32>
    %14 = arith.subf %11, %13 : vector<256x128xf32>
    %cst_6 = arith.constant 0.000000e+00 : f32
    %15 = vector.broadcast %cst_6 : f32 to vector<256x128xf32>
    %16 = arith.maximumf %14, %15 : vector<256x128xf32>
    %c0_7 = arith.constant 0 : index
    %c0_8 = arith.constant 0 : index
    %17 = vector.load %arg3[%c0_7, %c0_8] : memref<256x128xf32, #tpu.memory_space<vmem>>, vector<256x128xf32>
    tpu.vector_store %arg3[%c0_7, %c0_8], %16 {strides = array<i32>} : memref<256x128xf32, #tpu.memory_space<vmem>>, vector<256x128xf32>,
    return
  }
  func.func @transform_0(%arg0: i32) -> (i32, i32) {
    %c0_i32 = arith.constant 0 : i32
    %c0_i32_0 = arith.constant 0 : i32
    return %arg0, %c0_i32 : i32, i32
  }
  func.func @transform_1(%arg0: i32) -> (i32, i32) {
    %c0_i32 = arith.constant 0 : i32
    %c0_i32_0 = arith.constant 0 : i32
    %c0_i32_1 = arith.constant 0 : i32
    return %c0_i32, %c0_i32_0 : i32, i32
  }
  func.func @transform_2(%arg0: i32) -> (i32, i32) {
    %c0_i32 = arith.constant 0 : i32
    %c0_i32_0 = arith.constant 0 : i32
    return %arg0, %c0_i32 : i32, i32
  }
}

module attributes {stable_mosaic.version = 11 : i64} {
  func.func @_mlp2_kernel(%arg0: i32, %arg1: memref<256x128xbf16, #tpu.memory_space<vmem>>, %arg2: memref<128x128xbf16, #tpu.memory_space<vmem>>, %arg3: memref<1x128xf32, #tpu.memory_space<vmem>>, %arg4: memref<128x128xbf16, #tpu.memory_space<vmem>>, %arg5: memref<1x128xf32, #tpu.memory_space<vmem>>, %arg6: memref<256x128xf32, #tpu.memory_space<vmem>>) attributes {dimension_semantics = [#tpu.dimension_semantics<parallel>], iteration_bounds = array<i64: 1>, scalar_prefetch = 0 : i64, scratch_operands = 0 : i64, tpu.core_type = #tpu.core_type<tc>, window_params = [{transform_indices = @transform_0, window_bounds = array<i64: 256, 128>}, {pipeline_mode = #tpu.pipeline_mode<synchronous>, transform_indices = @transform_1, window_bounds = array<i64: 128, 128>}, {pipeline_mode = #tpu.pipeline_mode<synchronous>, transform_indices = @transform_2, window_bounds = array<i64: 1, 128>}, {pipeline_mode = #tpu.pipeline_mode<synchronous>, transform_indices = @transform_3, window_bounds = array<i64: 128, 128>}, {pipeline_mode = #tpu.pipeline_mode<synchronous>, transform_indices = @transform_4, window_bounds = array<i64: 1, 128>}, {transform_indices = @transform_5, window_bounds = array<i64: 256, 128>}]} {
    %c0 = arith.constant 0 : index
    %c0_0 = arith.constant 0 : index
    %0 = vector.load %arg1[%c0, %c0_0] : memref<256x128xbf16, #tpu.memory_space<vmem>>, vector<256x128xbf16>
    %c0_1 = arith.constant 0 : index
    %c0_2 = arith.constant 0 : index
    %1 = vector.load %arg2[%c0_1, %c0_2] : memref<128x128xbf16, #tpu.memory_space<vmem>>, vector<128x128xbf16>
    %cst = arith.constant dense<0.000000e+00> : vector<256x128xf32>
    %2 = tpu.matmul %0, %1, %cst {dimension_numbers = #tpu.dot_dimension_numbers<[1], [0], [0], [1], [0, 0, 1, 1], [], []>} : vector<256x128xbf16>, vector<128x128xbf16>, vector<256x128xf32> -> vector<256x128xf32>
    %c0_3 = arith.constant 0 : index
    %c0_4 = arith.constant 0 : index
    %3 = vector.load %arg3[%c0_3, %c0_4] : memref<1x128xf32, #tpu.memory_space<vmem>>, vector<1x128xf32>
    %4 = vector.broadcast %3 : vector<1x128xf32> to vector<256x128xf32>
    %5 = arith.addf %2, %4 : vector<256x128xf32>
    %cst_5 = arith.constant 0.000000e+00 : f32
    %6 = vector.broadcast %cst_5 : f32 to vector<256x128xf32>
    %7 = arith.maximumf %5, %6 : vector<256x128xf32>
    %8 = arith.truncf %7 : vector<256x128xf32> to vector<256x128xbf16>
    %c0_6 = arith.constant 0 : index
    %c0_7 = arith.constant 0 : index
    %9 = vector.load %arg4[%c0_6, %c0_7] : memref<128x128xbf16, #tpu.memory_space<vmem>>, vector<128x128xbf16>
    %cst_8 = arith.constant dense<0.000000e+00> : vector<256x128xf32>
    %10 = tpu.matmul %8, %9, %cst_8 {dimension_numbers = #tpu.dot_dimension_numbers<[1], [0], [0], [1], [0, 0, 1, 1], [], []>} : vector<256x128xbf16>, vector<128x128xbf16>, vector<256x128xf32> -> vector<256x128xf32>
    %c0_9 = arith.constant 0 : index
    %c0_10 = arith.constant 0 : index
    %11 = vector.load %arg5[%c0_9, %c0_10] : memref<1x128xf32, #tpu.memory_space<vmem>>, vector<1x128xf32>
    %12 = vector.broadcast %11 : vector<1x128xf32> to vector<256x128xf32>
    %13 = arith.addf %10, %12 : vector<256x128xf32>
    %cst_11 = arith.constant 0.000000e+00 : f32
    %14 = vector.broadcast %cst_11 : f32 to vector<256x128xf32>
    %15 = arith.maximumf %13, %14 : vector<256x128xf32>
    %c0_12 = arith.constant 0 : index
    %c0_13 = arith.constant 0 : index
    %16 = vector.load %arg6[%c0_12, %c0_13] : memref<256x128xf32, #tpu.memory_space<vmem>>, vector<256x128xf32>
    tpu.vector_store %arg6[%c0_12, %c0_13], %15 {strides = array<i32>} : memref<256x128xf32, #tpu.memory_space<vmem>>, vector<256x128xf32>,
    return
  }
  func.func @transform_0(%arg0: i32) -> (i32, i32) {
    %c0_i32 = arith.constant 0 : i32
    %c0_i32_0 = arith.constant 0 : i32
    return %arg0, %c0_i32 : i32, i32
  }
  func.func @transform_1(%arg0: i32) -> (i32, i32) {
    %c0_i32 = arith.constant 0 : i32
    %c0_i32_0 = arith.constant 0 : i32
    %c0_i32_1 = arith.constant 0 : i32
    return %c0_i32, %c0_i32_0 : i32, i32
  }
  func.func @transform_2(%arg0: i32) -> (i32, i32) {
    %c0_i32 = arith.constant 0 : i32
    %c0_i32_0 = arith.constant 0 : i32
    %c0_i32_1 = arith.constant 0 : i32
    return %c0_i32, %c0_i32_0 : i32, i32
  }
  func.func @transform_3(%arg0: i32) -> (i32, i32) {
    %c0_i32 = arith.constant 0 : i32
    %c0_i32_0 = arith.constant 0 : i32
    %c0_i32_1 = arith.constant 0 : i32
    return %c0_i32, %c0_i32_0 : i32, i32
  }
  func.func @transform_4(%arg0: i32) -> (i32, i32) {
    %c0_i32 = arith.constant 0 : i32
    %c0_i32_0 = arith.constant 0 : i32
    %c0_i32_1 = arith.constant 0 : i32
    return %c0_i32, %c0_i32_0 : i32, i32
  }
  func.func @transform_5(%arg0: i32) -> (i32, i32) {
    %c0_i32 = arith.constant 0 : i32
    %c0_i32_0 = arith.constant 0 : i32
    return %arg0, %c0_i32 : i32, i32
  }
}

</mosaic_0001>

<bundles_post_ra>
// kernel: neg.6
= control target key start
LH: loop header
LB: loop body
LE: loop exit
PB: predicated region body
PF: predicated region fallthrough
CT: control target
= control target key end

     0   :  { %s520_s0 = inlined_call_operand.vmem [shape: f32[128,256], index: 0, kind: input, shape index: {}]   ;;  %s521_s1 = inlined_call_operand.vmem [shape: f32[128,256], index: 1, kind: output, shape index: {}]  }
   0x1   :  { %v2_v0 = vld [vmem:[%s520_s0] sm:$0xff]  ;;  %v256_v1 = vld [vmem:[%s520_s0 + $0x10] sm:$0xff]  ;;  %v286_v31 = vld [vmem:[%s520_s0 + $0x8] sm:$0xff] }
   0x2   :  { %v258_v2 = vld [vmem:[%s520_s0 + $0x20] sm:$0xff]  ;;  %v5_v3 = vxor.u32 2147483648, %v2_v0  ;;  %v12_v4 = vxor.u32 2147483648, %v256_v1  ;;  %v260_v6 = vld [vmem:[%s520_s0 + $0x30] sm:$0xff]  ;;  %v288_v32 = vld [vmem:[%s520_s0 + $0x18] sm:$0xff]  ;;  %v132_v34 = vxor.u32 2147483648, %v286_v31 }
   0x3   :  { %v20_v5 = vxor.u32 2147483648, %v258_v2  ;;  %v262_v7 = vld [vmem:[%s520_s0 + $0x40] sm:$0xff]  ;;  %v264_v8 = vld [vmem:[%s520_s0 + $0x50] sm:$0xff]  ;;  %v28_v9 = vxor.u32 2147483648, %v260_v6  ;;  %v140_v35 = vxor.u32 2147483648, %v288_v32  ;;  %v290_v36 = vld [vmem:[%s520_s0 + $0x28] sm:$0xff] }
   0x4   :  { %v36_v10 = vxor.u32 2147483648, %v262_v7  ;;  %v44_v11 = vxor.u32 2147483648, %v264_v8  ;;  %v266_v12 = vld [vmem:[%s520_s0 + $0x60] sm:$0xff]  ;;  %v268_v13 = vld [vmem:[%s520_s0 + $0x70] sm:$0xff]  ;;  %7 = vst [vmem:[%s521_s1] sm:$0xff] %v5_v3  ;;  %257 = vst [vmem:[%s521_s1 + $0x10] sm:$0xff] %v12_v4  ;;  %v148_v39 = vxor.u32 2147483648, %v290_v36 }
   0x5   :  { %v270_v14 = vld [vmem:[%s520_s0 + $0x80] sm:$0xff]  ;;  %259 = vst [vmem:[%s521_s1 + $0x20] sm:$0xff] %v20_v5  ;;  %v52_v15 = vxor.u32 2147483648, %v266_v12  ;;  %v60_v16 = vxor.u32 2147483648, %v268_v13  ;;  %v272_v18 = vld [vmem:[%s520_s0 + $0x90] sm:$0xff]  ;;  %261 = vst [vmem:[%s521_s1 + $0x30] sm:$0xff] %v28_v9 }
   0x6   :  { %v68_v17 = vxor.u32 2147483648, %v270_v14  ;;  %v274_v19 = vld [vmem:[%s520_s0 + $0xa0] sm:$0xff]  ;;  %v276_v20 = vld [vmem:[%s520_s0 + $0xb0] sm:$0xff]  ;;  %263 = vst [vmem:[%s521_s1 + $0x40] sm:$0xff] %v36_v10  ;;  %265 = vst [vmem:[%s521_s1 + $0x50] sm:$0xff] %v44_v11  ;;  %v76_v21 = vxor.u32 2147483648, %v272_v18 }
   0x7   :  { %v84_v22 = vxor.u32 2147483648, %v274_v19  ;;  %v92_v23 = vxor.u32 2147483648, %v276_v20  ;;  %v278_v24 = vld [vmem:[%s520_s0 + $0xc0] sm:$0xff]  ;;  %v280_v25 = vld [vmem:[%s520_s0 + $0xd0] sm:$0xff]  ;;  %267 = vst [vmem:[%s521_s1 + $0x60] sm:$0xff] %v52_v15  ;;  %269 = vst [vmem:[%s521_s1 + $0x70] sm:$0xff] %v60_v16 }
   0x8   :  { %v282_v26 = vld [vmem:[%s520_s0 + $0xe0] sm:$0xff]  ;;  %271 = vst [vmem:[%s521_s1 + $0x80] sm:$0xff] %v68_v17  ;;  %v100_v27 = vxor.u32 2147483648, %v278_v24  ;;  %v108_v28 = vxor.u32 2147483648, %v280_v25  ;;  %v284_v30 = vld [vmem:[%s520_s0 + $0xf0] sm:$0xff]  ;;  %273 = vst [vmem:[%s521_s1 + $0x90] sm:$0xff] %v76_v21 }
   0x9   :  { %v116_v29 = vxor.u32 2147483648, %v282_v26  ;;  %275 = vst [vmem:[%s521_s1 + $0xa0] sm:$0xff] %v84_v22  ;;  %277 = vst [vmem:[%s521_s1 + $0xb0] sm:$0xff] %v92_v23  ;;  %v124_v33 = vxor.u32 2147483648, %v284_v30  ;;  %v292_v37 = vld [vmem:[%s520_s0 + $0x38] sm:$0xff]  ;;  %v294_v38 = vld [vmem:[%s520_s0 + $0x48] sm:$0xff] }
   0xa   :  { %279 = vst [vmem:[%s521_s1 + $0xc0] sm:$0xff] %v100_v27  ;;  %281 = vst [vmem:[%s521_s1 + $0xd0] sm:$0xff] %v108_v28  ;;  %v156_v40 = vxor.u32 2147483648, %v292_v37  ;;  %v164_v41 = vxor.u32 2147483648, %v294_v38  ;;  %v296_v42 = vld [vmem:[%s520_s0 + $0x58] sm:$0xff]  ;;  %v298_v43 = vld [vmem:[%s520_s0 + $0x68] sm:$0xff] }
   0xb   :  { %283 = vst [vmem:[%s521_s1 + $0xe0] sm:$0xff] %v116_v29  ;;  %v300_v44 = vld [vmem:[%s520_s0 + $0x78] sm:$0xff]  ;;  %285 = vst [vmem:[%s521_s1 + $0xf0] sm:$0xff] %v124_v33  ;;  %v172_v45 = vxor.u32 2147483648, %v296_v42  ;;  %v180_v46 = vxor.u32 2147483648, %v298_v43  ;;  %v302_v48 = vld [vmem:[%s520_s0 + $0x88] sm:$0xff] }
   0xc   :  { %287 = vst [vmem:[%s521_s1 + $0x8] sm:$0xff] %v132_v34  ;;  %289 = vst [vmem:[%s521_s1 + $0x18] sm:$0xff] %v140_v35  ;;  %v188_v47 = vxor.u32 2147483648, %v300_v44  ;;  %v304_v49 = vld [vmem:[%s520_s0 + $0x98] sm:$0xff]  ;;  %v306_v50 = vld [vmem:[%s520_s0 + $0xa8] sm:$0xff]  ;;  %v196_v51 = vxor.u32 2147483648, %v302_v48 }
   0xd   :  { %291 = vst [vmem:[%s521_s1 + $0x28] sm:$0xff] %v148_v39  ;;  %293 = vst [vmem:[%s521_s1 + $0x38] sm:$0xff] %v156_v40  ;;  %v204_v52 = vxor.u32 2147483648, %v304_v49  ;;  %v212_v53 = vxor.u32 2147483648, %v306_v50  ;;  %v308_v54 = vld [vmem:[%s520_s0 + $0xb8] sm:$0xff]  ;;  %v310_v55 = vld [vmem:[%s520_s0 + $0xc8] sm:$0xff] }
   0xe   :  { %295 = vst [vmem:[%s521_s1 + $0x48] sm:$0xff] %v164_v41  ;;  %v312_v56 = vld [vmem:[%s520_s0 + $0xd8] sm:$0xff]  ;;  %297 = vst [vmem:[%s521_s1 + $0x58] sm:$0xff] %v172_v45  ;;  %v220_v57 = vxor.u32 2147483648, %v308_v54  ;;  %v228_v58 = vxor.u32 2147483648, %v310_v55  ;;  %v314_v60 = vld [vmem:[%s520_s0 + $0xe8] sm:$0xff] }
   0xf   :  { %299 = vst [vmem:[%s521_s1 + $0x68] sm:$0xff] %v180_v46  ;;  %301 = vst [vmem:[%s521_s1 + $0x78] sm:$0xff] %v188_v47  ;;  %v236_v59 = vxor.u32 2147483648, %v312_v56  ;;  %v316_v61 = vld [vmem:[%s520_s0 + $0xf8] sm:$0xff]  ;;  %v244_v62 = vxor.u32 2147483648, %v314_v60 }
  0x10   :  { %303 = vst [vmem:[%s521_s1 + $0x88] sm:$0xff] %v196_v51  ;;  %305 = vst [vmem:[%s521_s1 + $0x98] sm:$0xff] %v204_v52  ;;  %v252_v63 = vxor.u32 2147483648, %v316_v61 }
  0x11   :  { %307 = vst [vmem:[%s521_s1 + $0xa8] sm:$0xff] %v212_v53  ;;  %309 = vst [vmem:[%s521_s1 + $0xb8] sm:$0xff] %v220_v57 }
  0x12   :  { %311 = vst [vmem:[%s521_s1 + $0xc8] sm:$0xff] %v228_v58  ;;  %313 = vst [vmem:[%s521_s1 + $0xd8] sm:$0xff] %v236_v59 }
  0x13   :  { %315 = vst [vmem:[%s521_s1 + $0xe8] sm:$0xff] %v244_v62  ;;  %317 = vst [vmem:[%s521_s1 + $0xf8] sm:$0xff] %v252_v63 }

// kernel: pointnet_forward.8
= control target key start
LH: loop header
LB: loop body
LE: loop exit
PB: predicated region body
PF: predicated region fallthrough
CT: control target
= control target key end

     0   :  { %v500_v2 = vmov 0.0   ;;  %vm29_vm0 = vcmask 64512   ;;  %s782_s1 = inlined_call_operand.vmem [shape: f32[8,256], index: 1, kind: input, shape index: {}]   ;;  %s783_s0 = inlined_call_operand.vmem [shape: f32[128,8], index: 0, kind: input, shape index: {}]   ;;  %s784_s2 = inlined_call_operand.vmem [shape: f32[128,256], index: 2, kind: output, shape index: {}]  }
   0x1   :  { %v519_v0 = vld [vmem:[%s782_s1 + $0x8] sm:$0xff]  ;;  %v524_v1 = vld [vmem:[%s782_s1] sm:$0xff]  ;;  %142 = vmatprep.mubr.f32.mxu0 %v500_v2  ;;  %190 = vmatprep.mubr.f32.mxu1 %v500_v2  ;;  %v13_v7 = vld [vmem:[%s783_s0 + $0x10] sm:$0xff] }
   0x2   :  { %v11_v3 = vld [vmem:[%s783_s0] sm:$0xff]  ;;  %78 = vmatprep.subr.mxu0 %v519_v0  ;;  %497 = vmatprep.subr.mxu1 %v519_v0  ;;  %v12_v5 = vld [vmem:[%s783_s0 + $0x8] sm:$0xff]  ;;  %v14_v9 = vld [vmem:[%s783_s0 + $0x18] sm:$0xff]  ;;  %v241_v11 = vmul.f32 %v13_v7, %v13_v7  ;;  %v303_v51 = vmul.f32 %v524_v1, %v524_v1  ;;  %v304_v52 = vmul.f32 %v519_v0, %v519_v0 }
   0x3   :  { %v19_v4 = vld [vmem:[%s783_s0 + $0x40] sm:$0xff]  ;;  %v239_v6 = vmul.f32 %v11_v3, %v11_v3  ;;  %79 = vmatpush1.msra.mxu0 %v524_v1  ;;  %498 = vmatpush1.msra.mxu1 %v524_v1  ;;  %v240_v8 = vmul.f32 %v12_v5, %v12_v5  ;;  %v20_v12 = vld [vmem:[%s783_s0 + $0x48] sm:$0xff]  ;;  %v242_v13 = vmul.f32 %v14_v9, %v14_v9  ;;  %v21_v21 = vld [vmem:[%s783_s0 + $0x50] sm:$0xff] }
   0x4   :  { %481 = vmatmul.mubr.msk.f32.vlgmr.msra.gmra.mrb[0].mxu0 %vm29_vm0, %v11_v3  ;;  %489 = vmatmul.mubr.msk.f32.vlgmr.msra.gmra.mrb[0].mxu1 %vm29_vm0, %v19_v4  ;;  %v15_v14 = vld [vmem:[%s783_s0 + $0x20] sm:$0xff]  ;;  %v261_v15 = vsel %vm29_vm0, %v241_v11, 0.0  ;;  %v16_v16 = vld [vmem:[%s783_s0 + $0x28] sm:$0xff]  ;;  %v17_v22 = vld [vmem:[%s783_s0 + $0x30] sm:$0xff]  ;;  %v247_v30 = vmul.f32 %v19_v4, %v19_v4  ;;  %v248_v32 = vmul.f32 %v20_v12, %v20_v12  ;;  %v249_v35 = vmul.f32 %v21_v21, %v21_v21 }
   0x5   :  { %v255_v10 = vsel %vm29_vm0, %v239_v6, 0.0  ;;  %148 = vmatprep.mubr.f32.mxu0 %v500_v2  ;;  %196 = vmatprep.mubr.f32.mxu1 %v500_v2  ;;  %v258_v17 = vsel %vm29_vm0, %v240_v8, 0.0  ;;  %v243_v18 = vmul.f32 %v15_v14, %v15_v14  ;;  %v264_v19 = vsel %vm29_vm0, %v242_v13, 0.0  ;;  %v18_v23 = vld [vmem:[%s783_s0 + $0x38] sm:$0xff]  ;;  %v23_v33 = vld [vmem:[%s783_s0 + $0x60] sm:$0xff]  ;;  %v24_v38 = vld [vmem:[%s783_s0 + $0x68] sm:$0xff] }
   0x6   :  { %256 = vadd.xlane.f32.xlu0 %v255_v10  ;;  %262 = vadd.xlane.f32.xlu1 %v261_v15  ;;  %v244_v20 = vmul.f32 %v16_v16, %v16_v16  ;;  %v245_v25 = vmul.f32 %v17_v22, %v17_v22  ;;  %v246_v27 = vmul.f32 %v18_v23, %v18_v23  ;;  %v22_v28 = vld [vmem:[%s783_s0 + $0x58] sm:$0xff]  ;;  %v279_v34 = vsel %vm29_vm0, %v247_v30, 0.0  ;;  %v25_v43 = vld [vmem:[%s783_s0 + $0x70] sm:$0xff] }
   0x7   :  { %v267_v24 = vsel %vm29_vm0, %v243_v18, 0.0  ;;  %v282_v36 = vsel %vm29_vm0, %v248_v32, 0.0  ;;  %v250_v37 = vmul.f32 %v22_v28, %v22_v28  ;;  %v285_v39 = vsel %vm29_vm0, %v249_v35, 0.0  ;;  %v26_v44 = vld [vmem:[%s783_s0 + $0x78] sm:$0xff] }
   0x8   :  { %482 = vmatmul.mubr.msk.f32.gmra.mrb[2].mxu0 %vm29_vm0, %v12_v5  ;;  %490 = vmatmul.mubr.msk.f32.gmra.mrb[2].mxu1 %vm29_vm0, %v20_v12  ;;  %v270_v26 = vsel %vm29_vm0, %v244_v20, 0.0  ;;  %v273_v29 = vsel %vm29_vm0, %v245_v25, 0.0  ;;  %v276_v31 = vsel %vm29_vm0, %v246_v27, 0.0  ;;  %v251_v40 = vmul.f32 %v23_v33, %v23_v33 }
   0x9   :  { %154 = vmatprep.mubr.f32.mxu0 %v500_v2  ;;  %202 = vmatprep.mubr.f32.mxu1 %v500_v2  ;;  %v288_v41 = vsel %vm29_vm0, %v250_v37, 0.0  ;;  %v252_v42 = vmul.f32 %v24_v38, %v24_v38  ;;  %v253_v46 = vmul.f32 %v25_v43, %v25_v43  ;;  %v254_v48 = vmul.f32 %v26_v44, %v26_v44 }
   0xa   :  { %259 = vadd.xlane.f32.xlu0 %v258_v17  ;;  %265 = vadd.xlane.f32.xlu1 %v264_v19  ;;  %v291_v45 = vsel %vm29_vm0, %v251_v40, 0.0  ;;  %v305_v54 = vrot.slane %v303_v51, 4  ;;  %v311_v56 = vrot.slane %v304_v52, 4 }
   0xb   :  { %v294_v47 = vsel %vm29_vm0, %v252_v42, 0.0  ;;  %v297_v49 = vsel %vm29_vm0, %v253_v46, 0.0  ;;  %v300_v50 = vsel %vm29_vm0, %v254_v48, 0.0 }
   0xc   :  { %483 = vmatmul.mubr.msk.f32.gmra.mrb[4].mxu0 %vm29_vm0, %v13_v7  ;;  %491 = vmatmul.mubr.msk.f32.gmra.mrb[4].mxu1 %vm29_vm0, %v21_v21  ;;  %v306_v58 = vadd.f32 %v305_v54, %v303_v51  ;;  %v312_v59 = vadd.f32 %v311_v56, %v304_v52 }
   0xd   :  { %160 = vmatprep.mubr.f32.mxu0 %v500_v2  ;;  %208 = vmatprep.mubr.f32.mxu1 %v500_v2 }
   0xe   :  { %268 = vadd.xlane.f32.xlu0 %v267_v24  ;;  %271 = vadd.xlane.f32.xlu1 %v270_v26  ;;  %v307_v61 = vrot.slane %v306_v58, 2  ;;  %v313_v62 = vrot.slane %v312_v59, 2 }
  0x10   :  { %484 = vmatmul.mubr.msk.f32.gmra.mrb[6].mxu0 %vm29_vm0, %v14_v9  ;;  %492 = vmatmul.mubr.msk.f32.gmra.mrb[6].mxu1 %vm29_vm0, %v22_v28  ;;  %v314_v1 = vadd.f32 %v313_v62, %v312_v59 }
  0x11   :  { %166 = vmatprep.mubr.f32.mxu0 %v500_v2  ;;  %214 = vmatprep.mubr.f32.mxu1 %v500_v2 }
  0x12   :  { %274 = vadd.xlane.f32.xlu0 %v273_v29  ;;  %277 = vadd.xlane.f32.xlu1 %v276_v31  ;;  %v315_v5 = vrot.slane %v314_v1, 1 }
  0x14   :  { %485 = vmatmul.mubr.msk.f32.gmra.mrb[8].mxu0 %vm29_vm0, %v15_v14  ;;  %493 = vmatmul.mubr.msk.f32.gmra.mrb[8].mxu1 %vm29_vm0, %v23_v33  ;;  %v642_v8 = vadd.f32 %v315_v5, %v314_v1 }
  0x15   :  { %172 = vmatprep.mubr.f32.mxu0 %v500_v2  ;;  %220 = vmatprep.mubr.f32.mxu1 %v500_v2 }
  0x16   :  { %280 = vadd.xlane.f32.xlu0 %v279_v34  ;;  %283 = vadd.xlane.f32.xlu1 %v282_v36 }
  0x18   :  { %486 = vmatmul.mubr.msk.f32.gmra.mrb[10].mxu0 %vm29_vm0, %v16_v16  ;;  %494 = vmatmul.mubr.msk.f32.gmra.mrb[10].mxu1 %vm29_vm0, %v24_v38 }
  0x19   :  { %178 = vmatprep.mubr.f32.mxu0 %v500_v2  ;;  %226 = vmatprep.mubr.f32.mxu1 %v500_v2 }
  0x1a   :  { %286 = vadd.xlane.f32.xlu0 %v285_v39  ;;  %289 = vadd.xlane.f32.xlu1 %v288_v41 }
  0x1c   :  { %487 = vmatmul.mubr.msk.f32.gmra.mrb[12].mxu0 %vm29_vm0, %v17_v22  ;;  %495 = vmatmul.mubr.msk.f32.gmra.mrb[12].mxu1 %vm29_vm0, %v25_v43 }
  0x1d   :  { %184 = vmatprep.mubr.f32.mxu0 %v500_v2  ;;  %232 = vmatprep.mubr.f32.mxu1 %v500_v2  ;;  %v308_v2 = vadd.f32 %v307_v61, %v306_v58 }
  0x1e   :  { %292 = vadd.xlane.f32.xlu0 %v291_v45  ;;  %295 = vadd.xlane.f32.xlu1 %v294_v47 }
  0x1f   :  { %v309_v0 = vrot.slane %v308_v2, 1 }
  0x20   :  { %488 = vmatmul.mubr.msk.f32.gmra.mrb[14].mxu0 %vm29_vm0, %v18_v23  ;;  %496 = vmatmul.mubr.msk.f32.gmra.mrb[14].mxu1 %vm29_vm0, %v26_v44 }
  0x21   :  { %v640_v7 = vadd.f32 %v309_v0, %v308_v2 }
  0x22   :  { %298 = vadd.xlane.f32.xlu0 %v297_v49  ;;  %301 = vadd.xlane.f32.xlu1 %v300_v50 }
  0x93   :  { %v257_v53 = vpop.xlane.xlu0 %256  ;;  %v263_v55 = vpop.xlane.xlu1 %262 }
  0x94   :  { %v317_v10 = vadd.f32 %v640_v7, %v257_v53  ;;  %v318_v13 = vadd.f32 %v642_v8, %v257_v53  ;;  %v321_v44 = vadd.f32 %v640_v7, %v263_v55  ;;  %v322_v49 = vadd.f32 %v642_v8, %v263_v55 }
  0x97   :  { %v260_v57 = vpop.xlane.xlu0 %259  ;;  %v630_v60 = vpop.xlane.xlu1 %265 }
  0x98   :  { %v319_v23 = vadd.f32 %v640_v7, %v260_v57  ;;  %v320_v28 = vadd.f32 %v642_v8, %v260_v57  ;;  %v323_v5 = vadd.f32 %v640_v7, %v630_v60 }
  0x9b   :  { %v632_v63 = vpop.xlane.xlu0 %268  ;;  %v634_v3 = vpop.xlane.xlu1 %271 }
  0x9f   :  { %v636_v4 = vpop.xlane.xlu0 %274  ;;  %v638_v6 = vpop.xlane.xlu1 %277 }
  0xa3   :  { %v281_v9 = vpop.xlane.xlu0 %280  ;;  %v284_v12 = vpop.xlane.xlu1 %283 }
  0xa4   :  { %v333_v11 = vadd.f32 %v640_v7, %v281_v9  ;;  %v334_v15 = vadd.f32 %v642_v8, %v281_v9  ;;  %v335_v26 = vadd.f32 %v640_v7, %v284_v12  ;;  %v336_v32 = vadd.f32 %v642_v8, %v284_v12 }
  0xa7   :  { %v287_v27 = vpop.xlane.xlu0 %286  ;;  %v290_v48 = vpop.xlane.xlu1 %289 }
  0xa8   :  { %v337_v47 = vadd.f32 %v640_v7, %v287_v27  ;;  %v338_v53 = vadd.f32 %v642_v8, %v287_v27 }
  0xab   :  { %v293_v12 = vpop.xlane.xlu0 %292 }
  0xd7   :  { %v192_v14 = vpop.f32.mrb[0].mxu1  ;;  %v144_v16 = vpop.f32.mrb[0].mxu0 }
  0xd8   :  { %v365_v17 = vmul.f32 2.0, %v192_v14  ;;  %v349_v18 = vmul.f32 2.0, %v144_v16  ;;  %v146_v19 = vpop.f32.mrb[1].mxu0  ;;  %v194_v20 = vpop.f32.mrb[1].mxu1 }
  0xd9   :  { %v350_v21 = vmul.f32 2.0, %v146_v19  ;;  %v366_v22 = vmul.f32 2.0, %v194_v20 }
  0xda   :  { %v397_v24 = vsub.f32 %v333_v11, %v365_v17  ;;  %v381_v25 = vsub.f32 %v317_v10, %v349_v18  ;;  %v339_v11 = vadd.f32 %v640_v7, %v290_v48  ;;  %v340_v17 = vadd.f32 %v642_v8, %v290_v48 }
  0xdb   :  { %v382_v29 = vsub.f32 %v318_v13, %v350_v21  ;;  %v398_v30 = vsub.f32 %v334_v15, %v366_v22  ;;  %v198_v31 = vpop.f32.mrb[2].mxu1  ;;  %v150_v33 = vpop.f32.mrb[2].mxu0  ;;  %v324_v13 = vadd.f32 %v642_v8, %v630_v60  ;;  %v327_v48 = vadd.f32 %v640_v7, %v634_v3 }
  0xdc   :  { %v429_v34 = vmax.f32 %v397_v24, 0.0  ;;  %v413_v35 = vmax.f32 %v381_v25, 0.0  ;;  %v367_v36 = vmul.f32 2.0, %v198_v31  ;;  %v351_v37 = vmul.f32 2.0, %v150_v33  ;;  %v152_v38 = vpop.f32.mrb[3].mxu0  ;;  %v200_v39 = vpop.f32.mrb[3].mxu1 }
  0xdd   :  { %v414_v40 = vmax.f32 %v382_v29, 0.0  ;;  %v430_v41 = vmax.f32 %v398_v30, 0.0  ;;  %v352_v42 = vmul.f32 2.0, %v152_v38  ;;  %v368_v43 = vmul.f32 2.0, %v200_v39 }
  0xde   :  { %461 = vst [vmem:[%s784_s2 + $0x80] sm:$0xff] %v429_v34  ;;  %445 = vst [vmem:[%s784_s2] sm:$0xff] %v413_v35  ;;  %v399_v45 = vsub.f32 %v335_v26, %v367_v36  ;;  %v383_v46 = vsub.f32 %v319_v23, %v351_v37  ;;  %v341_v31 = vadd.f32 %v640_v7, %v293_v12 }
  0xdf   :  { %446 = vst [vmem:[%s784_s2 + $0x8] sm:$0xff] %v414_v40  ;;  %462 = vst [vmem:[%s784_s2 + $0x88] sm:$0xff] %v430_v41  ;;  %v384_v50 = vsub.f32 %v320_v28, %v352_v42  ;;  %v400_v51 = vsub.f32 %v336_v32, %v368_v43  ;;  %v204_v52 = vpop.f32.mrb[4].mxu1  ;;  %v156_v54 = vpop.f32.mrb[4].mxu0  ;;  %v325_v28 = vadd.f32 %v640_v7, %v632_v63 }
  0xe0   :  { %v431_v56 = vmax.f32 %v399_v45, 0.0  ;;  %v415_v57 = vmax.f32 %v383_v46, 0.0  ;;  %v369_v58 = vmul.f32 2.0, %v204_v52  ;;  %v353_v59 = vmul.f32 2.0, %v156_v54  ;;  %v158_v61 = vpop.f32.mrb[5].mxu0  ;;  %v206_v55 = vpop.f32.mrb[5].mxu1 }
  0xe1   :  { %v416_v62 = vmax.f32 %v384_v50, 0.0  ;;  %v432_v2 = vmax.f32 %v400_v51, 0.0  ;;  %v354_v1 = vmul.f32 2.0, %v158_v61  ;;  %v370_v0 = vmul.f32 2.0, %v206_v55  ;;  %v296_v32 = vpop.xlane.xlu1 %295  ;;  %v299_v52 = vpop.xlane.xlu0 %298 }
  0xe2   :  { %463 = vst [vmem:[%s784_s2 + $0x90] sm:$0xff] %v431_v56  ;;  %447 = vst [vmem:[%s784_s2 + $0x10] sm:$0xff] %v415_v57  ;;  %v401_v9 = vsub.f32 %v337_v47, %v369_v58  ;;  %v385_v10 = vsub.f32 %v321_v44, %v353_v59  ;;  %v326_v33 = vadd.f32 %v642_v8, %v632_v63 }
  0xe3   :  { %448 = vst [vmem:[%s784_s2 + $0x18] sm:$0xff] %v416_v62  ;;  %464 = vst [vmem:[%s784_s2 + $0x98] sm:$0xff] %v432_v2  ;;  %v386_v14 = vsub.f32 %v322_v49, %v354_v1  ;;  %v402_v15 = vsub.f32 %v338_v53, %v370_v0  ;;  %v210_v16 = vpop.f32.mrb[6].mxu1  ;;  %v162_v18 = vpop.f32.mrb[6].mxu0  ;;  %v342_v37 = vadd.f32 %v642_v8, %v293_v12 }
  0xe4   :  { %v433_v19 = vmax.f32 %v401_v9, 0.0  ;;  %v417_v20 = vmax.f32 %v385_v10, 0.0  ;;  %v371_v21 = vmul.f32 2.0, %v210_v16  ;;  %v355_v22 = vmul.f32 2.0, %v162_v18  ;;  %v164_v23 = vpop.f32.mrb[7].mxu0  ;;  %v212_v60 = vpop.f32.mrb[7].mxu1 }
  0xe5   :  { %v418_v24 = vmax.f32 %v386_v14, 0.0  ;;  %v434_v25 = vmax.f32 %v402_v15, 0.0  ;;  %v356_v26 = vmul.f32 2.0, %v164_v23  ;;  %v372_v27 = vmul.f32 2.0, %v212_v60  ;;  %v302_v15 = vpop.xlane.xlu1 %301 }
  0xe6   :  { %465 = vst [vmem:[%s784_s2 + $0xa0] sm:$0xff] %v433_v19  ;;  %449 = vst [vmem:[%s784_s2 + $0x20] sm:$0xff] %v417_v20  ;;  %v403_v29 = vsub.f32 %v339_v11, %v371_v21  ;;  %v387_v30 = vsub.f32 %v323_v5, %v355_v22  ;;  %v343_v51 = vadd.f32 %v640_v7, %v296_v32 }
  0xe7   :  { %450 = vst [vmem:[%s784_s2 + $0x28] sm:$0xff] %v418_v24  ;;  %466 = vst [vmem:[%s784_s2 + $0xa8] sm:$0xff] %v434_v25  ;;  %v388_v34 = vsub.f32 %v324_v13, %v356_v26  ;;  %v404_v35 = vsub.f32 %v340_v17, %v372_v27  ;;  %v216_v36 = vpop.f32.mrb[8].mxu1  ;;  %v168_v38 = vpop.f32.mrb[8].mxu0  ;;  %v328_v53 = vadd.f32 %v642_v8, %v634_v3 }
  0xe8   :  { %v435_v39 = vmax.f32 %v403_v29, 0.0  ;;  %v419_v40 = vmax.f32 %v387_v30, 0.0  ;;  %v373_v41 = vmul.f32 2.0, %v216_v36  ;;  %v357_v42 = vmul.f32 2.0, %v168_v38  ;;  %v170_v43 = vpop.f32.mrb[9].mxu0  ;;  %v218_v63 = vpop.f32.mrb[9].mxu1 }
  0xe9   :  { %v420_v44 = vmax.f32 %v388_v34, 0.0  ;;  %v436_v45 = vmax.f32 %v404_v35, 0.0  ;;  %v358_v46 = vmul.f32 2.0, %v170_v43  ;;  %v374_v47 = vmul.f32 2.0, %v218_v63 }
  0xea   :  { %467 = vst [vmem:[%s784_s2 + $0xb0] sm:$0xff] %v435_v39  ;;  %451 = vst [vmem:[%s784_s2 + $0x30] sm:$0xff] %v419_v40  ;;  %v405_v49 = vsub.f32 %v341_v31, %v373_v41  ;;  %v389_v50 = vsub.f32 %v325_v28, %v357_v42  ;;  %v344_v58 = vadd.f32 %v642_v8, %v296_v32 }
  0xeb   :  { %452 = vst [vmem:[%s784_s2 + $0x38] sm:$0xff] %v420_v44  ;;  %468 = vst [vmem:[%s784_s2 + $0xb8] sm:$0xff] %v436_v45  ;;  %v390_v54 = vsub.f32 %v326_v33, %v358_v46  ;;  %v406_v56 = vsub.f32 %v342_v37, %v374_v47  ;;  %v222_v57 = vpop.f32.mrb[10].mxu1  ;;  %v174_v59 = vpop.f32.mrb[10].mxu0  ;;  %v329_v11 = vadd.f32 %v640_v7, %v636_v4 }
  0xec   :  { %v437_v61 = vmax.f32 %v405_v49, 0.0  ;;  %v421_v55 = vmax.f32 %v389_v50, 0.0  ;;  %v375_v62 = vmul.f32 2.0, %v222_v57  ;;  %v359_v2 = vmul.f32 2.0, %v174_v59  ;;  %v176_v1 = vpop.f32.mrb[11].mxu0  ;;  %v224_v3 = vpop.f32.mrb[11].mxu1 }
  0xed   :  { %v422_v0 = vmax.f32 %v390_v54, 0.0  ;;  %v438_v5 = vmax.f32 %v406_v56, 0.0  ;;  %v360_v9 = vmul.f32 2.0, %v176_v1  ;;  %v376_v10 = vmul.f32 2.0, %v224_v3 }
  0xee   :  { %469 = vst [vmem:[%s784_s2 + $0xc0] sm:$0xff] %v437_v61  ;;  %453 = vst [vmem:[%s784_s2 + $0x40] sm:$0xff] %v421_v55  ;;  %v407_v12 = vsub.f32 %v343_v51, %v375_v62  ;;  %v391_v13 = vsub.f32 %v327_v48, %v359_v2  ;;  %v345_v14 = vadd.f32 %v640_v7, %v299_v52 }
  0xef   :  { %v330_v16 = vadd.f32 %v642_v8, %v636_v4  ;;  %454 = vst [vmem:[%s784_s2 + $0x48] sm:$0xff] %v422_v0  ;;  %470 = vst [vmem:[%s784_s2 + $0xc8] sm:$0xff] %v438_v5  ;;  %v392_v17 = vsub.f32 %v328_v53, %v360_v9  ;;  %v408_v18 = vsub.f32 %v344_v58, %v376_v10  ;;  %v228_v19 = vpop.f32.mrb[12].mxu1  ;;  %v180_v21 = vpop.f32.mrb[12].mxu0 }
  0xf0   :  { %v346_v20 = vadd.f32 %v642_v8, %v299_v52  ;;  %v439_v22 = vmax.f32 %v407_v12, 0.0  ;;  %v423_v23 = vmax.f32 %v391_v13, 0.0  ;;  %v377_v60 = vmul.f32 2.0, %v228_v19  ;;  %v182_v25 = vpop.f32.mrb[13].mxu0  ;;  %v230_v4 = vpop.f32.mrb[13].mxu1 }
  0xf1   :  { %v361_v24 = vmul.f32 2.0, %v180_v21  ;;  %v424_v26 = vmax.f32 %v392_v17, 0.0  ;;  %v440_v27 = vmax.f32 %v408_v18, 0.0  ;;  %v362_v28 = vmul.f32 2.0, %v182_v25 }
  0xf2   :  { %v378_v29 = vmul.f32 2.0, %v230_v4  ;;  %v331_v30 = vadd.f32 %v640_v7, %v638_v6  ;;  %471 = vst [vmem:[%s784_s2 + $0xd0] sm:$0xff] %v439_v22  ;;  %455 = vst [vmem:[%s784_s2 + $0x50] sm:$0xff] %v423_v23  ;;  %v409_v31 = vsub.f32 %v345_v14, %v377_v60  ;;  %v347_v33 = vadd.f32 %v640_v7, %v302_v15 }
  0xf3   :  { %v393_v32 = vsub.f32 %v329_v11, %v361_v24  ;;  %v332_v34 = vadd.f32 %v642_v8, %v638_v6  ;;  %456 = vst [vmem:[%s784_s2 + $0x58] sm:$0xff] %v424_v26  ;;  %472 = vst [vmem:[%s784_s2 + $0xd8] sm:$0xff] %v440_v27  ;;  %v394_v35 = vsub.f32 %v330_v16, %v362_v28  ;;  %v234_v37 = vpop.f32.mrb[14].mxu1  ;;  %v186_v39 = vpop.f32.mrb[14].mxu0 }
  0xf4   :  { %v410_v36 = vsub.f32 %v346_v20, %v378_v29  ;;  %v348_v38 = vadd.f32 %v642_v8, %v302_v15  ;;  %v441_v40 = vmax.f32 %v409_v31, 0.0  ;;  %v379_v7 = vmul.f32 2.0, %v234_v37  ;;  %v188_v43 = vpop.f32.mrb[15].mxu0  ;;  %v236_v6 = vpop.f32.mrb[15].mxu1 }
  0xf5   :  { %v425_v41 = vmax.f32 %v393_v32, 0.0  ;;  %v363_v42 = vmul.f32 2.0, %v186_v39  ;;  %v426_v63 = vmax.f32 %v394_v35, 0.0  ;;  %v364_v45 = vmul.f32 2.0, %v188_v43 }
  0xf6   :  { %v442_v44 = vmax.f32 %v410_v36, 0.0  ;;  %v380_v46 = vmul.f32 2.0, %v236_v6  ;;  %473 = vst [vmem:[%s784_s2 + $0xe0] sm:$0xff] %v441_v40  ;;  %v411_v8 = vsub.f32 %v347_v33, %v379_v7 }
  0xf7   :  { %457 = vst [vmem:[%s784_s2 + $0x60] sm:$0xff] %v425_v41  ;;  %v395_v47 = vsub.f32 %v331_v30, %v363_v42  ;;  %458 = vst [vmem:[%s784_s2 + $0x68] sm:$0xff] %v426_v63  ;;  %v396_v48 = vsub.f32 %v332_v34, %v364_v45 }
  0xf8   :  { %474 = vst [vmem:[%s784_s2 + $0xe8] sm:$0xff] %v442_v44  ;;  %v412_v49 = vsub.f32 %v348_v38, %v380_v46  ;;  %v443_v50 = vmax.f32 %v411_v8, 0.0 }
  0xf9   :  { %v427_v51 = vmax.f32 %v395_v47, 0.0  ;;  %v428_v52 = vmax.f32 %v396_v48, 0.0 }
  0xfa   :  { %v444_v53 = vmax.f32 %v412_v49, 0.0  ;;  %475 = vst [vmem:[%s784_s2 + $0xf0] sm:$0xff] %v443_v50 }
  0xfb   :  { %459 = vst [vmem:[%s784_s2 + $0x70] sm:$0xff] %v427_v51  ;;  %460 = vst [vmem:[%s784_s2 + $0x78] sm:$0xff] %v428_v52 }
  0xfc   :  { %476 = vst [vmem:[%s784_s2 + $0xf8] sm:$0xff] %v444_v53 }

// kernel: pointnet_forward.9
= control target key start
LH: loop header
LB: loop body
LE: loop exit
PB: predicated region body
PF: predicated region fallthrough
CT: control target
= control target key end

     0   :  { %s2344_s18 = smov 0   ;;  %s2679_s0 = inlined_call_operand.vmem [shape: bf16[1024,128], index: 0, kind: input, shape index: {}]   ;;  %s2680_s1 = inlined_call_operand.vmem [shape: bf16[128,128], index: 1, kind: input, shape index: {}]   ;;  %s2681_s2 = inlined_call_operand.vmem [shape: f32[1,128], index: 2, kind: input, shape index: {}]   ;;  %s2682_s3 = inlined_call_operand.vmem [shape: bf16[128,128], index: 3, kind: input, shape index: {}]   ;;  %s2683_s4 = inlined_call_operand.vmem [shape: f32[1,128], index: 4, kind: input, shape index: {}]   ;;  %s2684_s5 = inlined_call_operand.vmem [shape: f32[128,128], index: 5, kind: output, shape index: {}]  }
   0x1 LB: > { %s1948_s19 = sadd.s32 4294967295, %s2312_s18   ;;  %p1952_p0 = scmp.ge.s32.totalorder %s2312_s18, 1  ;;  %s2312_s18 = sphi %s2344_s18, %s15_s18  }
   0x2   : > { %p188_p1 = scmp.lt.s32.totalorder %s2312_s18, 3 }
   0x4   : > { %p189_p2 = pnand %p1952_p0, %p188_p1 }
   0x5   : > { %v2257_v0 = vld [vmem:[%s2680_s1] sm:$0xff] (!%p189_p2)   ;;  %s1953_s22 = sshll.u32 (!%p189_p2), %s1948_s19, 6  ;;  %v2258_v1 = vld [vmem:[%s2680_s1 + $0x8] sm:$0xff] (!%p189_p2)   ;;  %v2259_v2 = vld [vmem:[%s2680_s1 + $0x10] sm:$0xff] (!%p189_p2)   ;;  %vm1813_vm0 = vcmask (!%p189_p2), 1041409   ;;  %vm1815_vm1 = vcmask (!%p189_p2), 1042434  }
   0x6   : > { %192 = sbr.rel (%p189_p2) target bundleno = 626 (0x272), region = 40  ;;  %p217_p3 = scmp.lt.s32.totalorder (!%p189_p2), %s1953_s22, 127  ;;  %2089 = vmatprep.subr.bf16.mxu0 (!%p189_p2), %v2257_v0  ;;  %v2260_v3 = vld [vmem:[%s2680_s1 + $0x18] sm:$0xff] (!%p189_p2)   ;;  %v2261_v5 = vld [vmem:[%s2680_s1 + $0x20] sm:$0xff] (!%p189_p2)   ;;  %v2262_v6 = vld [vmem:[%s2680_s1 + $0x28] sm:$0xff] (!%p189_p2)   ;;  %vm1817_vm2 = vcmask (!%p189_p2), 1043459  }
   0x7   : > { %2090 = vmatpush3.bf16.msra.mxu0 (!%p189_p2), %v2257_v0  ;;  %v2263_v7 = vld [vmem:[%s2680_s1 + $0x30] sm:$0xff] (!%p189_p2)   ;;  %v2264_v8 = vld [vmem:[%s2680_s1 + $0x38] sm:$0xff] (!%p189_p2)   ;;  %v2297_v13 = vld [vmem:[%s2682_s3] sm:$0xff] (!%p189_p2)   ;;  %s2523_s13 = sshll.u32 (!%p189_p2), %s1948_s19, 3  ;;  %vm1819_vm3 = vcmask (!%p189_p2), 1044484   ;;  %vm1821_vm4 = vcmask (!%p189_p2), 1045509  }
   0x8   : > { %2091 = vmatprep.subr.bf16.mxu0 (!%p189_p2), %v2258_v1  ;;  %v2298_v14 = vld [vmem:[%s2682_s3 + $0x8] sm:$0xff] (!%p189_p2)   ;;  %2169 = vmatprep.subr.bf16.mxu1 (!%p189_p2), %v2297_v13  ;;  %v2299_v15 = vld [vmem:[%s2682_s3 + $0x10] sm:$0xff] (!%p189_p2)   ;;  %v2300_v18 = vld [vmem:[%s2682_s3 + $0x18] sm:$0xff] (!%p189_p2)   ;;  %p223_p4 = scmp.lt.s32.totalorder (!%p189_p2), %s2523_s13, 15  ;;  %vm1823_vm5 = vcmask (!%p189_p2), 1046534   ;;  %vm1825_vm6 = vcmask (!%p189_p2), 1047559  }
   0x9   : > { %2170 = vmatpush3.bf16.msra.mxu1 (!%p189_p2), %v2297_v13  ;;  %v2301_v19 = vld [vmem:[%s2682_s3 + $0x20] sm:$0xff] (!%p189_p2)   ;;  %v2302_v22 = vld [vmem:[%s2682_s3 + $0x28] sm:$0xff] (!%p189_p2)   ;;  %v2303_v38 = vld [vmem:[%s2682_s3 + $0x30] sm:$0xff] (!%p189_p2)  }
   0xa   : > { %2171 = vmatprep.subr.bf16.mxu1 (!%p189_p2), %v2298_v14  ;;  %v2304_v40 = vld [vmem:[%s2682_s3 + $0x38] sm:$0xff] (!%p189_p2)   ;;  %v2442_v48 = vld [vmem:[%s2681_s2] ss:$0 sm:$0xff] (!%p189_p2) }
   0xb   : > { %2092 = vmatpush3.bf16.msra.mxu0 (!%p189_p2), %v2258_v1 }
   0xc   : > { %2093 = vmatprep.subr.bf16.mxu0 (!%p189_p2), %v2259_v2 }
   0xd   : > { %s2686_s22 = smov (!%p217_p3, %s1953_s22), 127  ;;  %2172 = vmatpush3.bf16.msra.mxu1 %v2298_v14  ;;  %s2688_s13 = smov (!%p223_p4, %s2523_s13), 15 }
   0xe   : > { %s1954_s27 = sshll.u32 %s2686_s22, 2  ;;  %2173 = vmatprep.subr.bf16.mxu1 %v2299_v15  ;;  %s1956_s19 = sshll.u32 %s2688_s13, 3 }
   0xf   : > { %s2366_s30 = scalar_lea.vmem %s2679_s0, %s1954_s27  ;;  %2094 = vmatpush3.bf16.msra.mxu0 %v2259_v2  ;;  %s2545_s16 = scalar_lea.vmem %s2684_s5, %s1956_s19 }
  0x10   : > { %v2265_v4 = vld [vmem:[%s2366_s30] sm:$0xff]   ;;  %2095 = vmatprep.subr.bf16.mxu0 %v2260_v3  ;;  %v2266_v9 = vld [vmem:[%s2366_s30 + $0x8] sm:$0xff]   ;;  %v2267_v10 = vld [vmem:[%s2366_s30 + $0x10] sm:$0xff]  }
  0x11   : > { %2105 = vmatprep.mubr.bf16.mxu0 %v2265_v4  ;;  %v2268_v11 = vld [vmem:[%s2366_s30 + $0x18] sm:$0xff]   ;;  %v2269_v12 = vld [vmem:[%s2366_s30 + $0x20] sm:$0xff]   ;;  %v2270_v16 = vld [vmem:[%s2366_s30 + $0x28] sm:$0xff]   ;;  %2174 = vmatpush3.bf16.msra.mxu1 %v2299_v15 }
  0x12   : > { %v2271_v17 = vld [vmem:[%s2366_s30 + $0x30] sm:$0xff]   ;;  %2175 = vmatprep.subr.bf16.mxu1 %v2300_v18  ;;  %v2272_v20 = vld [vmem:[%s2366_s30 + $0x38] sm:$0xff]   ;;  %v2273_v21 = vld [vmem:[%s2366_s30 + $0x40] sm:$0xff]  }
  0x13   : > { %2096 = vmatpush3.bf16.msra.mxu0 %v2260_v3  ;;  %v2274_v23 = vld [vmem:[%s2366_s30 + $0x48] sm:$0xff]   ;;  %v2275_v24 = vld [vmem:[%s2366_s30 + $0x50] sm:$0xff]   ;;  %v2276_v25 = vld [vmem:[%s2366_s30 + $0x58] sm:$0xff]  }
  0x14   : > { %2097 = vmatprep.subr.bf16.mxu0 %v2261_v5  ;;  %v2277_v26 = vld [vmem:[%s2366_s30 + $0x60] sm:$0xff]   ;;  %v2278_v27 = vld [vmem:[%s2366_s30 + $0x68] sm:$0xff]   ;;  %v2279_v28 = vld [vmem:[%s2366_s30 + $0x70] sm:$0xff]  }
  0x15   : > { %2176 = vmatpush3.bf16.msra.mxu1 %v2300_v18  ;;  %v2280_v29 = vld [vmem:[%s2366_s30 + $0x78] sm:$0xff]   ;;  %v2281_v30 = vld [vmem:[%s2366_s30 + $0x80] sm:$0xff]   ;;  %v2282_v31 = vld [vmem:[%s2366_s30 + $0x88] sm:$0xff]  }
  0x16   : > { %2177 = vmatprep.subr.bf16.mxu1 %v2301_v19  ;;  %v2283_v32 = vld [vmem:[%s2366_s30 + $0x90] sm:$0xff]   ;;  %v2284_v33 = vld [vmem:[%s2366_s30 + $0x98] sm:$0xff]   ;;  %v2285_v34 = vld [vmem:[%s2366_s30 + $0xa0] sm:$0xff]  }
  0x17   : > { %2098 = vmatpush3.bf16.msra.mxu0 %v2261_v5  ;;  %v2286_v35 = vld [vmem:[%s2366_s30 + $0xa8] sm:$0xff]   ;;  %v2287_v36 = vld [vmem:[%s2366_s30 + $0xb0] sm:$0xff]   ;;  %v2288_v37 = vld [vmem:[%s2366_s30 + $0xb8] sm:$0xff]  }
  0x18   : > { %2099 = vmatprep.subr.bf16.mxu0 %v2262_v6  ;;  %v2289_v39 = vld [vmem:[%s2366_s30 + $0xc0] sm:$0xff]   ;;  %v2290_v41 = vld [vmem:[%s2366_s30 + $0xc8] sm:$0xff]   ;;  %v2291_v42 = vld [vmem:[%s2366_s30 + $0xd0] sm:$0xff]  }
  0x19   : > { %2178 = vmatpush3.bf16.msra.mxu1 %v2301_v19  ;;  %v2292_v43 = vld [vmem:[%s2366_s30 + $0xd8] sm:$0xff]   ;;  %v2293_v44 = vld [vmem:[%s2366_s30 + $0xe0] sm:$0xff]   ;;  %v2294_v45 = vld [vmem:[%s2366_s30 + $0xe8] sm:$0xff]  }
  0x1a   : > { %2179 = vmatprep.subr.bf16.mxu1 %v2302_v22  ;;  %v2295_v46 = vld [vmem:[%s2366_s30 + $0xf0] sm:$0xff]   ;;  %v2296_v47 = vld [vmem:[%s2366_s30 + $0xf8] sm:$0xff]  }
  0x1b   : > { %2100 = vmatpush3.bf16.msra.mxu0 %v2262_v6 }
  0x1c   : > { %2101 = vmatprep.subr.bf16.mxu0 %v2263_v7 }
  0x1d   : > { %2180 = vmatpush3.bf16.msra.mxu1 %v2302_v22 }
  0x1e   : > { %2181 = vmatprep.subr.bf16.mxu1 %v2303_v38 }
  0x1f   : > { %2102 = vmatpush3.bf16.msra.mxu0 %v2263_v7 }
  0x20   : > { %2103 = vmatprep.subr.bf16.mxu0 %v2264_v8 }
  0x21   : > { %2182 = vmatpush3.bf16.msra.mxu1 %v2303_v38 }
  0x22   : > { %2183 = vmatprep.subr.bf16.mxu1 %v2304_v40 }
  0x23   : > { %2104 = vmatpush3.bf16.msra.mxu0 %v2264_v8 }
  0x25   : > { %2184 = vmatpush3.bf16.msra.mxu1 %v2304_v40 }
  0x26   : > { %2106 = vmatmul.mubr.bf16.vlgmr.msra.gmra.mrb[0].mxu0 %v2266_v9 }
  0x27   : > { %2109 = vmatprep.mubr.bf16.mxu0 %v2267_v10 }
  0x2e   : > { %2110 = vmatmul.mubr.bf16.gmra.mrb[4].mxu0 %v2268_v11 }
  0x2f   : > { %2113 = vmatprep.mubr.bf16.mxu0 %v2269_v12 }
  0x36   : > { %2114 = vmatmul.mubr.bf16.gmra.mrb[8].mxu0 %v2270_v16 }
  0x37   : > { %2117 = vmatprep.mubr.bf16.mxu0 %v2271_v17 }
  0x3e   : > { %2118 = vmatmul.mubr.bf16.gmra.mrb[12].mxu0 %v2272_v20 }
  0x3f   : > { %2121 = vmatprep.mubr.bf16.mxu0 %v2273_v21 }
  0x46   : > { %2122 = vmatmul.mubr.bf16.gmra.mrb[16].mxu0 %v2274_v23 }
  0x47   : > { %2125 = vmatprep.mubr.bf16.mxu0 %v2275_v24 }
  0x4e   : > { %2126 = vmatmul.mubr.bf16.gmra.mrb[20].mxu0 %v2276_v25 }
  0x4f   : > { %2129 = vmatprep.mubr.bf16.mxu0 %v2277_v26 }
  0x56   : > { %2130 = vmatmul.mubr.bf16.gmra.mrb[24].mxu0 %v2278_v27 }
  0x57   : > { %2133 = vmatprep.mubr.bf16.mxu0 %v2279_v28 }
  0x5e   : > { %2134 = vmatmul.mubr.bf16.gmra.mrb[28].mxu0 %v2280_v29 }
  0x5f   : > { %2137 = vmatprep.mubr.bf16.mxu0 %v2281_v30 }
  0x66   : > { %2138 = vmatmul.mubr.bf16.gmra.mrb[32].mxu0 %v2282_v31 }
  0x67   : > { %2141 = vmatprep.mubr.bf16.mxu0 %v2283_v32 }
  0x6e   : > { %2142 = vmatmul.mubr.bf16.gmra.mrb[36].mxu0 %v2284_v33 }
  0x6f   : > { %2145 = vmatprep.mubr.bf16.mxu0 %v2285_v34 }
  0x76   : > { %2146 = vmatmul.mubr.bf16.gmra.mrb[40].mxu0 %v2286_v35 }
  0x77   : > { %2149 = vmatprep.mubr.bf16.mxu0 %v2287_v36 }
  0x7e   : > { %2150 = vmatmul.mubr.bf16.gmra.mrb[44].mxu0 %v2288_v37 }
  0x7f   : > { %2153 = vmatprep.mubr.bf16.mxu0 %v2289_v39 }
  0x86   : > { %2154 = vmatmul.mubr.bf16.gmra.mrb[48].mxu0 %v2290_v41 }
  0x87   : > { %2157 = vmatprep.mubr.bf16.mxu0 %v2291_v42 }
  0x8e   : > { %2158 = vmatmul.mubr.bf16.gmra.mrb[52].mxu0 %v2292_v43 }
  0x8f   : > { %2161 = vmatprep.mubr.bf16.mxu0 %v2293_v44 }
  0x96   : > { %2162 = vmatmul.mubr.bf16.gmra.mrb[56].mxu0 %v2294_v45 }
  0x97   : > { %2165 = vmatprep.mubr.bf16.mxu0 %v2295_v46 }
  0x9e   : > { %2166 = vmatmul.mubr.bf16.gmra.mrb[60].mxu0 %v2296_v47 }
  0xf9   : > { %v2107_v49 = vpop.f32.mrb[0].mxu0 }
  0xfa   : > { %v599_v50 = vadd.f32 %v2107_v49, %v2442_v48  ;;  %v590_v51 = vpop.f32.mrb[1].mxu0 }
  0xfb   : > { %v591_v52 = vadd.f32 %v2442_v48, %v590_v51  ;;  %v2108_v53 = vpop.f32.mrb[2].mxu0 }
  0xfc   : > { %v602_v54 = vadd.f32 %v2108_v53, %v2442_v48  ;;  %v593_v55 = vpop.f32.mrb[3].mxu0  ;;  %v847_v57 = vmax.f32 %v599_v50, 0.0 }
  0xfd   : > { %v594_v56 = vadd.f32 %v2442_v48, %v593_v55  ;;  %v845_v59 = vmax.f32 %v591_v52, 0.0 }
  0xfe   : > { %v848_v58 = vmax.f32 %v602_v54, 0.0 }
  0xff   : > { %v846_v60 = vmax.f32 %v594_v56, 0.0 }
 0x100   : > { %v910_v61 = vpack.c.bf16 %v848_v58, %v847_v57 }
 0x101   : > { %v2111_v62 = vpop.f32.mrb[4].mxu0  ;;  %v909_v63 = vpack.c.bf16 %v846_v60, %v845_v59 }
 0x102   : > { %v615_v0 = vadd.f32 %v2111_v62, %v2442_v48  ;;  %v606_v1 = vpop.f32.mrb[5].mxu0 }
 0x103   : > { %v607_v2 = vadd.f32 %v2442_v48, %v606_v1  ;;  %v2112_v3 = vpop.f32.mrb[6].mxu0  ;;  %2185 = vmatprep.mubr.bf16.mxu1 %v909_v63 }
 0x104   : > { %v618_v4 = vadd.f32 %v2112_v3, %v2442_v48  ;;  %v609_v5 = vpop.f32.mrb[7].mxu0  ;;  %2186 = vmatmul.mubr.bf16.vlgmr.msra.gmra.mrb[0].mxu1 %v910_v61  ;;  %v851_v7 = vmax.f32 %v615_v0, 0.0 }
 0x105   : > { %v610_v6 = vadd.f32 %v2442_v48, %v609_v5  ;;  %v849_v9 = vmax.f32 %v607_v2, 0.0 }
 0x106   : > { %v852_v8 = vmax.f32 %v618_v4, 0.0 }
 0x107   : > { %v850_v10 = vmax.f32 %v610_v6, 0.0 }
 0x108   : > { %v912_v11 = vpack.c.bf16 %v852_v8, %v851_v7 }
 0x109   : > { %v911_v12 = vpack.c.bf16 %v850_v10, %v849_v9  ;;  %v2115_v13 = vpop.f32.mrb[8].mxu0 }
 0x10a   : > { %v631_v14 = vadd.f32 %v2115_v13, %v2442_v48  ;;  %v622_v15 = vpop.f32.mrb[9].mxu0 }
 0x10b   : > { %v623_v16 = vadd.f32 %v2442_v48, %v622_v15  ;;  %v2116_v17 = vpop.f32.mrb[10].mxu0  ;;  %2189 = vmatprep.mubr.bf16.mxu1 %v911_v12 }
 0x10c   : > { %v634_v18 = vadd.f32 %v2116_v17, %v2442_v48  ;;  %v625_v19 = vpop.f32.mrb[11].mxu0  ;;  %2190 = vmatmul.mubr.bf16.gmra.mrb[4].mxu1 %v912_v11  ;;  %v855_v21 = vmax.f32 %v631_v14, 0.0 }
 0x10d   : > { %v626_v20 = vadd.f32 %v2442_v48, %v625_v19  ;;  %v853_v23 = vmax.f32 %v623_v16, 0.0 }
 0x10e   : > { %v856_v22 = vmax.f32 %v634_v18, 0.0 }
 0x10f   : > { %v854_v24 = vmax.f32 %v626_v20, 0.0 }
 0x110   : > { %v914_v25 = vpack.c.bf16 %v856_v22, %v855_v21 }
 0x111   : > { %v913_v26 = vpack.c.bf16 %v854_v24, %v853_v23  ;;  %v2119_v27 = vpop.f32.mrb[12].mxu0 }
 0x112   : > { %v647_v28 = vadd.f32 %v2119_v27, %v2442_v48  ;;  %v638_v29 = vpop.f32.mrb[13].mxu0 }
 0x113   : > { %v639_v30 = vadd.f32 %v2442_v48, %v638_v29  ;;  %v2120_v31 = vpop.f32.mrb[14].mxu0  ;;  %2193 = vmatprep.mubr.bf16.mxu1 %v913_v26 }
 0x114   : > { %v650_v32 = vadd.f32 %v2120_v31, %v2442_v48  ;;  %v641_v33 = vpop.f32.mrb[15].mxu0  ;;  %2194 = vmatmul.mubr.bf16.gmra.mrb[8].mxu1 %v914_v25  ;;  %v859_v35 = vmax.f32 %v647_v28, 0.0 }
 0x115   : > { %v642_v34 = vadd.f32 %v2442_v48, %v641_v33  ;;  %v857_v37 = vmax.f32 %v639_v30, 0.0 }
 0x116   : > { %v860_v36 = vmax.f32 %v650_v32, 0.0 }
 0x117   : > { %v858_v38 = vmax.f32 %v642_v34, 0.0 }
 0x118   : > { %v916_v39 = vpack.c.bf16 %v860_v36, %v859_v35 }
 0x119   : > { %v915_v40 = vpack.c.bf16 %v858_v38, %v857_v37  ;;  %v2123_v41 = vpop.f32.mrb[16].mxu0 }
 0x11a   : > { %v663_v42 = vadd.f32 %v2123_v41, %v2442_v48  ;;  %v654_v43 = vpop.f32.mrb[17].mxu0 }
 0x11b   : > { %v655_v44 = vadd.f32 %v2442_v48, %v654_v43  ;;  %v2124_v45 = vpop.f32.mrb[18].mxu0  ;;  %2197 = vmatprep.mubr.bf16.mxu1 %v915_v40 }
 0x11c   : > { %v666_v46 = vadd.f32 %v2124_v45, %v2442_v48  ;;  %v657_v47 = vpop.f32.mrb[19].mxu0  ;;  %2198 = vmatmul.mubr.bf16.gmra.mrb[12].mxu1 %v916_v39  ;;  %v863_v50 = vmax.f32 %v663_v42, 0.0 }
 0x11d   : > { %v658_v49 = vadd.f32 %v2442_v48, %v657_v47  ;;  %v861_v52 = vmax.f32 %v655_v44, 0.0 }
 0x11e   : > { %v864_v51 = vmax.f32 %v666_v46, 0.0 }
 0x11f   : > { %v862_v53 = vmax.f32 %v658_v49, 0.0 }
 0x120   : > { %v918_v54 = vpack.c.bf16 %v864_v51, %v863_v50 }
 0x121   : > { %v917_v55 = vpack.c.bf16 %v862_v53, %v861_v52  ;;  %v2127_v56 = vpop.f32.mrb[20].mxu0 }
 0x122   : > { %v679_v57 = vadd.f32 %v2127_v56, %v2442_v48  ;;  %v670_v58 = vpop.f32.mrb[21].mxu0 }
 0x123   : > { %v671_v59 = vadd.f32 %v2442_v48, %v670_v58  ;;  %v2128_v60 = vpop.f32.mrb[22].mxu0  ;;  %2201 = vmatprep.mubr.bf16.mxu1 %v917_v55 }
 0x124   : > { %v682_v61 = vadd.f32 %v2128_v60, %v2442_v48  ;;  %v673_v62 = vpop.f32.mrb[23].mxu0  ;;  %2202 = vmatmul.mubr.bf16.gmra.mrb[16].mxu1 %v918_v54  ;;  %v867_v0 = vmax.f32 %v679_v57, 0.0 }
 0x125   : > { %v674_v63 = vadd.f32 %v2442_v48, %v673_v62  ;;  %v865_v2 = vmax.f32 %v671_v59, 0.0 }
 0x126   : > { %v868_v1 = vmax.f32 %v682_v61, 0.0 }
 0x127   : > { %v866_v3 = vmax.f32 %v674_v63, 0.0 }
 0x128   : > { %v920_v4 = vpack.c.bf16 %v868_v1, %v867_v0 }
 0x129   : > { %v919_v5 = vpack.c.bf16 %v866_v3, %v865_v2  ;;  %v2131_v6 = vpop.f32.mrb[24].mxu0 }
 0x12a   : > { %v695_v7 = vadd.f32 %v2131_v6, %v2442_v48  ;;  %v686_v8 = vpop.f32.mrb[25].mxu0 }
 0x12b   : > { %v687_v9 = vadd.f32 %v2442_v48, %v686_v8  ;;  %v2132_v10 = vpop.f32.mrb[26].mxu0  ;;  %2205 = vmatprep.mubr.bf16.mxu1 %v919_v5 }
 0x12c   : > { %v698_v11 = vadd.f32 %v2132_v10, %v2442_v48  ;;  %v689_v12 = vpop.f32.mrb[27].mxu0  ;;  %2206 = vmatmul.mubr.bf16.gmra.mrb[20].mxu1 %v920_v4  ;;  %v871_v14 = vmax.f32 %v695_v7, 0.0 }
 0x12d   : > { %v690_v13 = vadd.f32 %v2442_v48, %v689_v12  ;;  %v869_v16 = vmax.f32 %v687_v9, 0.0 }
 0x12e   : > { %v872_v15 = vmax.f32 %v698_v11, 0.0 }
 0x12f   : > { %v870_v17 = vmax.f32 %v690_v13, 0.0 }
 0x130   : > { %v922_v18 = vpack.c.bf16 %v872_v15, %v871_v14 }
 0x131   : > { %v921_v19 = vpack.c.bf16 %v870_v17, %v869_v16  ;;  %v2135_v20 = vpop.f32.mrb[28].mxu0 }
 0x132   : > { %v711_v21 = vadd.f32 %v2135_v20, %v2442_v48  ;;  %v702_v22 = vpop.f32.mrb[29].mxu0 }
 0x133   : > { %v703_v23 = vadd.f32 %v2442_v48, %v702_v22  ;;  %v2136_v24 = vpop.f32.mrb[30].mxu0  ;;  %2209 = vmatprep.mubr.bf16.mxu1 %v921_v19 }
 0x134   : > { %v714_v25 = vadd.f32 %v2136_v24, %v2442_v48  ;;  %v705_v26 = vpop.f32.mrb[31].mxu0  ;;  %2210 = vmatmul.mubr.bf16.gmra.mrb[24].mxu1 %v922_v18  ;;  %v875_v28 = vmax.f32 %v711_v21, 0.0 }
 0x135   : > { %v706_v27 = vadd.f32 %v2442_v48, %v705_v26  ;;  %v873_v30 = vmax.f32 %v703_v23, 0.0 }
 0x136   : > { %v876_v29 = vmax.f32 %v714_v25, 0.0 }
 0x137   : > { %v874_v31 = vmax.f32 %v706_v27, 0.0 }
 0x138   : > { %v924_v32 = vpack.c.bf16 %v876_v29, %v875_v28 }
 0x139   : > { %v923_v33 = vpack.c.bf16 %v874_v31, %v873_v30  ;;  %v2139_v34 = vpop.f32.mrb[32].mxu0 }
 0x13a   : > { %v727_v35 = vadd.f32 %v2139_v34, %v2442_v48  ;;  %v718_v36 = vpop.f32.mrb[33].mxu0 }
 0x13b   : > { %v719_v37 = vadd.f32 %v2442_v48, %v718_v36  ;;  %v2140_v38 = vpop.f32.mrb[34].mxu0  ;;  %2213 = vmatprep.mubr.bf16.mxu1 %v923_v33 }
 0x13c   : > { %v730_v39 = vadd.f32 %v2140_v38, %v2442_v48  ;;  %v721_v40 = vpop.f32.mrb[35].mxu0  ;;  %2214 = vmatmul.mubr.bf16.gmra.mrb[28].mxu1 %v924_v32  ;;  %v879_v42 = vmax.f32 %v727_v35, 0.0 }
 0x13d   : > { %v722_v41 = vadd.f32 %v2442_v48, %v721_v40  ;;  %v877_v44 = vmax.f32 %v719_v37, 0.0 }
 0x13e   : > { %v880_v43 = vmax.f32 %v730_v39, 0.0 }
 0x13f   : > { %v878_v45 = vmax.f32 %v722_v41, 0.0 }
 0x140   : > { %v926_v46 = vpack.c.bf16 %v880_v43, %v879_v42 }
 0x141   : > { %v925_v47 = vpack.c.bf16 %v878_v45, %v877_v44  ;;  %v2143_v49 = vpop.f32.mrb[36].mxu0 }
 0x142   : > { %v743_v50 = vadd.f32 %v2143_v49, %v2442_v48  ;;  %v734_v51 = vpop.f32.mrb[37].mxu0 }
 0x143   : > { %v735_v52 = vadd.f32 %v2442_v48, %v734_v51  ;;  %v2144_v53 = vpop.f32.mrb[38].mxu0  ;;  %2217 = vmatprep.mubr.bf16.mxu1 %v925_v47 }
 0x144   : > { %v746_v54 = vadd.f32 %v2144_v53, %v2442_v48  ;;  %v737_v55 = vpop.f32.mrb[39].mxu0  ;;  %2218 = vmatmul.mubr.bf16.gmra.mrb[32].mxu1 %v926_v46  ;;  %v883_v57 = vmax.f32 %v743_v50, 0.0 }
 0x145   : > { %v738_v56 = vadd.f32 %v2442_v48, %v737_v55  ;;  %v881_v59 = vmax.f32 %v735_v52, 0.0 }
 0x146   : > { %v884_v58 = vmax.f32 %v746_v54, 0.0 }
 0x147   : > { %v882_v60 = vmax.f32 %v738_v56, 0.0 }
 0x148   : > { %v928_v61 = vpack.c.bf16 %v884_v58, %v883_v57 }
 0x149   : > { %v927_v62 = vpack.c.bf16 %v882_v60, %v881_v59  ;;  %v2147_v63 = vpop.f32.mrb[40].mxu0 }
 0x14a   : > { %v759_v0 = vadd.f32 %v2147_v63, %v2442_v48  ;;  %v750_v1 = vpop.f32.mrb[41].mxu0 }
 0x14b   : > { %v751_v2 = vadd.f32 %v2442_v48, %v750_v1  ;;  %v2148_v3 = vpop.f32.mrb[42].mxu0  ;;  %2221 = vmatprep.mubr.bf16.mxu1 %v927_v62 }
 0x14c   : > { %v762_v4 = vadd.f32 %v2148_v3, %v2442_v48  ;;  %v753_v5 = vpop.f32.mrb[43].mxu0  ;;  %2222 = vmatmul.mubr.bf16.gmra.mrb[36].mxu1 %v928_v61  ;;  %v887_v7 = vmax.f32 %v759_v0, 0.0 }
 0x14d   : > { %v754_v6 = vadd.f32 %v2442_v48, %v753_v5  ;;  %v885_v9 = vmax.f32 %v751_v2, 0.0 }
 0x14e   : > { %v888_v8 = vmax.f32 %v762_v4, 0.0 }
 0x14f   : > { %v886_v10 = vmax.f32 %v754_v6, 0.0 }
 0x150   : > { %v930_v11 = vpack.c.bf16 %v888_v8, %v887_v7 }
 0x151   : > { %v929_v12 = vpack.c.bf16 %v886_v10, %v885_v9  ;;  %v2151_v13 = vpop.f32.mrb[44].mxu0 }
 0x152   : > { %v775_v14 = vadd.f32 %v2151_v13, %v2442_v48  ;;  %v766_v15 = vpop.f32.mrb[45].mxu0 }
 0x153   : > { %v767_v16 = vadd.f32 %v2442_v48, %v766_v15  ;;  %v2152_v17 = vpop.f32.mrb[46].mxu0  ;;  %2225 = vmatprep.mubr.bf16.mxu1 %v929_v12 }
 0x154   : > { %v778_v18 = vadd.f32 %v2152_v17, %v2442_v48  ;;  %v769_v19 = vpop.f32.mrb[47].mxu0  ;;  %2226 = vmatmul.mubr.bf16.gmra.mrb[40].mxu1 %v930_v11  ;;  %v891_v21 = vmax.f32 %v775_v14, 0.0 }
 0x155   : > { %v770_v20 = vadd.f32 %v2442_v48, %v769_v19  ;;  %v889_v23 = vmax.f32 %v767_v16, 0.0 }
 0x156   : > { %v892_v22 = vmax.f32 %v778_v18, 0.0 }
 0x157   : > { %v890_v24 = vmax.f32 %v770_v20, 0.0  ;;  %v2511_v20 = vld [vmem:[%s2683_s4] ss:$0 sm:$0xff] }
 0x158   : > { %v932_v25 = vpack.c.bf16 %v892_v22, %v891_v21 }
 0x159   : > { %v931_v26 = vpack.c.bf16 %v890_v24, %v889_v23  ;;  %v2155_v27 = vpop.f32.mrb[48].mxu0 }
 0x15a   : > { %v791_v28 = vadd.f32 %v2155_v27, %v2442_v48  ;;  %v782_v29 = vpop.f32.mrb[49].mxu0 }
 0x15b   : > { %v783_v30 = vadd.f32 %v2442_v48, %v782_v29  ;;  %v2156_v31 = vpop.f32.mrb[50].mxu0  ;;  %2229 = vmatprep.mubr.bf16.mxu1 %v931_v26 }
 0x15c   : > { %v794_v32 = vadd.f32 %v2156_v31, %v2442_v48  ;;  %v785_v33 = vpop.f32.mrb[51].mxu0  ;;  %2230 = vmatmul.mubr.bf16.gmra.mrb[44].mxu1 %v932_v25  ;;  %v895_v35 = vmax.f32 %v791_v28, 0.0 }
 0x15d   : > { %v786_v34 = vadd.f32 %v2442_v48, %v785_v33  ;;  %v893_v37 = vmax.f32 %v783_v30, 0.0 }
 0x15e   : > { %v896_v36 = vmax.f32 %v794_v32, 0.0 }
 0x15f   : > { %v894_v38 = vmax.f32 %v786_v34, 0.0 }
 0x160   : > { %v934_v39 = vpack.c.bf16 %v896_v36, %v895_v35 }
 0x161   : > { %v933_v40 = vpack.c.bf16 %v894_v38, %v893_v37  ;;  %v2159_v41 = vpop.f32.mrb[52].mxu0 }
 0x162   : > { %v807_v42 = vadd.f32 %v2159_v41, %v2442_v48  ;;  %v798_v43 = vpop.f32.mrb[53].mxu0 }
 0x163   : > { %v799_v44 = vadd.f32 %v2442_v48, %v798_v43  ;;  %v2160_v45 = vpop.f32.mrb[54].mxu0  ;;  %2233 = vmatprep.mubr.bf16.mxu1 %v933_v40 }
 0x164   : > { %v810_v46 = vadd.f32 %v2160_v45, %v2442_v48  ;;  %v801_v47 = vpop.f32.mrb[55].mxu0  ;;  %2234 = vmatmul.mubr.bf16.gmra.mrb[48].mxu1 %v934_v39  ;;  %v899_v50 = vmax.f32 %v807_v42, 0.0 }
 0x165   : > { %v802_v49 = vadd.f32 %v2442_v48, %v801_v47  ;;  %v897_v52 = vmax.f32 %v799_v44, 0.0 }
 0x166   : > { %v900_v51 = vmax.f32 %v810_v46, 0.0 }
 0x167   : > { %v898_v53 = vmax.f32 %v802_v49, 0.0 }
 0x168   : > { %v936_v54 = vpack.c.bf16 %v900_v51, %v899_v50 }
 0x169   : > { %v935_v55 = vpack.c.bf16 %v898_v53, %v897_v52  ;;  %v2163_v56 = vpop.f32.mrb[56].mxu0 }
 0x16a   : > { %v823_v57 = vadd.f32 %v2163_v56, %v2442_v48  ;;  %v814_v58 = vpop.f32.mrb[57].mxu0 }
 0x16b   : > { %v815_v59 = vadd.f32 %v2442_v48, %v814_v58  ;;  %v2164_v60 = vpop.f32.mrb[58].mxu0  ;;  %2237 = vmatprep.mubr.bf16.mxu1 %v935_v55 }
 0x16c   : > { %v826_v61 = vadd.f32 %v2164_v60, %v2442_v48  ;;  %v817_v62 = vpop.f32.mrb[59].mxu0  ;;  %2238 = vmatmul.mubr.bf16.gmra.mrb[52].mxu1 %v936_v54  ;;  %v903_v0 = vmax.f32 %v823_v57, 0.0 }
 0x16d   : > { %v818_v63 = vadd.f32 %v2442_v48, %v817_v62  ;;  %v901_v2 = vmax.f32 %v815_v59, 0.0 }
 0x16e   : > { %v904_v1 = vmax.f32 %v826_v61, 0.0 }
 0x16f   : > { %v902_v3 = vmax.f32 %v818_v63, 0.0 }
 0x170   : > { %v938_v4 = vpack.c.bf16 %v904_v1, %v903_v0 }
 0x171   : > { %v937_v5 = vpack.c.bf16 %v902_v3, %v901_v2  ;;  %v2167_v6 = vpop.f32.mrb[60].mxu0 }
 0x172   : > { %v839_v7 = vadd.f32 %v2167_v6, %v2442_v48  ;;  %v830_v8 = vpop.f32.mrb[61].mxu0 }
 0x173   : > { %v831_v9 = vadd.f32 %v2442_v48, %v830_v8  ;;  %v2168_v10 = vpop.f32.mrb[62].mxu0  ;;  %2241 = vmatprep.mubr.bf16.mxu1 %v937_v5 }
 0x174   : > { %v842_v11 = vadd.f32 %v2168_v10, %v2442_v48  ;;  %v833_v12 = vpop.f32.mrb[63].mxu0  ;;  %2242 = vmatmul.mubr.bf16.gmra.mrb[56].mxu1 %v938_v4  ;;  %v907_v14 = vmax.f32 %v839_v7, 0.0 }
 0x175   : > { %v834_v13 = vadd.f32 %v2442_v48, %v833_v12  ;;  %v905_v16 = vmax.f32 %v831_v9, 0.0 }
 0x176   : > { %v908_v15 = vmax.f32 %v842_v11, 0.0 }
 0x177   : > { %v906_v17 = vmax.f32 %v834_v13, 0.0 }
 0x178   : > { %v940_v18 = vpack.c.bf16 %v908_v15, %v907_v14 }
 0x179   : > { %v939_v19 = vpack.c.bf16 %v906_v17, %v905_v16 }
 0x17b   : > { %2245 = vmatprep.mubr.bf16.mxu1 %v939_v19 }
 0x17c   : > { %2246 = vmatmul.mubr.bf16.gmra.mrb[60].mxu1 %v940_v18 }
 0x1d7   : > { %v2187_v21 = vpop.f32.mrb[0].mxu1 }
 0x1d8   : > { %v1055_v22 = vadd.f32 %v2187_v21, %v2511_v20  ;;  %v1046_v23 = vpop.f32.mrb[1].mxu1 }
 0x1d9   : > { %v1047_v24 = vadd.f32 %v2511_v20, %v1046_v23  ;;  %v2188_v48 = vpop.f32.mrb[2].mxu1 }
 0x1da   : > { %v1303_v25 = vmax.f32 %v1055_v22, 0.0  ;;  %v1058_v26 = vadd.f32 %v2188_v48, %v2511_v20  ;;  %v1049_v27 = vpop.f32.mrb[3].mxu1 }
 0x1db   : > { %v1301_v28 = vmax.f32 %v1047_v24, 0.0  ;;  %v1050_v29 = vadd.f32 %v2511_v20, %v1049_v27 }
 0x1dc   : > { %v1377_v30 = vrot.slane %v1303_v25, 4  ;;  %v1304_v31 = vmax.f32 %v1058_v26, 0.0 }
 0x1dd   : > { %v1365_v32 = vrot.slane %v1301_v28, 4  ;;  %v1302_v33 = vmax.f32 %v1050_v29, 0.0 }
 0x1de   : > { %v1378_v34 = vmax.f32 %v1303_v25, %v1377_v30  ;;  %v1383_v35 = vrot.slane %v1304_v31, 4 }
 0x1df   : > { %v1366_v36 = vmax.f32 %v1301_v28, %v1365_v32  ;;  %v1371_v37 = vrot.slane %v1302_v33, 4  ;;  %v2191_v38 = vpop.f32.mrb[4].mxu1 }
 0x1e0   : > { %v1379_v39 = vrot.slane %v1378_v34, 2  ;;  %v1384_v40 = vmax.f32 %v1304_v31, %v1383_v35  ;;  %v1071_v41 = vadd.f32 %v2191_v38, %v2511_v20  ;;  %v1062_v42 = vpop.f32.mrb[5].mxu1 }
 0x1e1   : > { %v1367_v43 = vrot.slane %v1366_v36, 2  ;;  %v1372_v44 = vmax.f32 %v1302_v33, %v1371_v37  ;;  %v1063_v45 = vadd.f32 %v2511_v20, %v1062_v42  ;;  %v2192_v46 = vpop.f32.mrb[6].mxu1 }
 0x1e2   : > { %v1380_v47 = vmax.f32 %v1378_v34, %v1379_v39  ;;  %v1385_v49 = vrot.slane %v1384_v40, 2  ;;  %v1307_v50 = vmax.f32 %v1071_v41, 0.0  ;;  %v1074_v51 = vadd.f32 %v2192_v46, %v2511_v20  ;;  %v1065_v52 = vpop.f32.mrb[7].mxu1 }
 0x1e3   : > { %v1368_v53 = vmax.f32 %v1366_v36, %v1367_v43  ;;  %v1373_v54 = vrot.slane %v1372_v44, 2  ;;  %v1305_v55 = vmax.f32 %v1063_v45, 0.0  ;;  %v1066_v56 = vadd.f32 %v2511_v20, %v1065_v52 }
 0x1e4   : > { %v1381_v57 = vrot.slane %v1380_v47, 1  ;;  %v1386_v58 = vmax.f32 %v1384_v40, %v1385_v49  ;;  %v1401_v59 = vrot.slane %v1307_v50, 4  ;;  %v1308_v60 = vmax.f32 %v1074_v51, 0.0 }
 0x1e5   : > { %v1369_v61 = vrot.slane %v1368_v53, 1  ;;  %v1374_v62 = vmax.f32 %v1372_v44, %v1373_v54  ;;  %v1389_v63 = vrot.slane %v1305_v55, 4  ;;  %v1306_v0 = vmax.f32 %v1066_v56, 0.0 }
 0x1e6   : > { %v1382_v1 = vmax.f32 %v1380_v47, %v1381_v57  ;;  %v1387_v2 = vrot.slane %v1386_v58, 1  ;;  %v1402_v3 = vmax.f32 %v1307_v50, %v1401_v59  ;;  %v1407_v4 = vrot.slane %v1308_v60, 4 }
 0x1e7   : > { %v1370_v5 = vmax.f32 %v1368_v53, %v1369_v61  ;;  %v1375_v6 = vrot.slane %v1374_v62, 1  ;;  %v1390_v7 = vmax.f32 %v1305_v55, %v1389_v63  ;;  %v1395_v8 = vrot.slane %v1306_v0, 4  ;;  %v2195_v9 = vpop.f32.mrb[8].mxu1 }
 0x1e8   : > { %v1388_v10 = vmax.f32 %v1386_v58, %v1387_v2  ;;  %v1403_v11 = vrot.slane %v1402_v3, 2  ;;  %v1408_v12 = vmax.f32 %v1308_v60, %v1407_v4  ;;  %v1087_v13 = vadd.f32 %v2195_v9, %v2511_v20  ;;  %v1078_v14 = vpop.f32.mrb[9].mxu1 }
 0x1e9   : > { %v1376_v15 = vmax.f32 %v1374_v62, %v1375_v6  ;;  %v1391_v16 = vrot.slane %v1390_v7, 2  ;;  %v1396_v17 = vmax.f32 %v1306_v0, %v1395_v8  ;;  %v1079_v18 = vadd.f32 %v2511_v20, %v1078_v14  ;;  %v2196_v19 = vpop.f32.mrb[10].mxu1 }
 0x1ea   : > { %v1404_v21 = vmax.f32 %v1402_v3, %v1403_v11  ;;  %v1409_v22 = vrot.slane %v1408_v12, 2  ;;  %v1311_v23 = vmax.f32 %v1087_v13, 0.0  ;;  %v1090_v24 = vadd.f32 %v2196_v19, %v2511_v20  ;;  %v1081_v48 = vpop.f32.mrb[11].mxu1 }
 0x1eb   : > { %v1814_v25 = vsel %vm1813_vm0, %v1376_v15, %v1370_v5  ;;  %v1392_v26 = vmax.f32 %v1390_v7, %v1391_v16  ;;  %v1397_v27 = vrot.slane %v1396_v17, 2  ;;  %v1309_v28 = vmax.f32 %v1079_v18, 0.0 }
 0x1ec   : > { %v1816_v29 = vsel %vm1815_vm1, %v1382_v1, %v1814_v25  ;;  %v1405_v30 = vrot.slane %v1404_v21, 1  ;;  %v1410_v31 = vmax.f32 %v1408_v12, %v1409_v22  ;;  %v1425_v32 = vrot.slane %v1311_v23, 4 }
 0x1ed   : > { %v1393_v33 = vrot.slane %v1392_v26, 1  ;;  %v1818_v34 = vsel %vm1817_vm2, %v1388_v10, %v1816_v29  ;;  %v1398_v35 = vmax.f32 %v1396_v17, %v1397_v27  ;;  %v1413_v36 = vrot.slane %v1309_v28, 4 }
 0x1ee   : > { %v1406_v37 = vmax.f32 %v1404_v21, %v1405_v30  ;;  %v1411_v38 = vrot.slane %v1410_v31, 1  ;;  %v1426_v39 = vmax.f32 %v1311_v23, %v1425_v32  ;;  %v1312_v40 = vmax.f32 %v1090_v24, 0.0 }
 0x1ef   : > { %v1394_v41 = vmax.f32 %v1392_v26, %v1393_v33  ;;  %v1399_v42 = vrot.slane %v1398_v35, 1  ;;  %v1414_v43 = vmax.f32 %v1309_v28, %v1413_v36  ;;  %v1082_v44 = vadd.f32 %v2511_v20, %v1081_v48  ;;  %v2199_v45 = vpop.f32.mrb[12].mxu1 }
 0x1f0   : > { %v1412_v46 = vmax.f32 %v1410_v31, %v1411_v38  ;;  %v1427_v47 = vrot.slane %v1426_v39, 2  ;;  %v1431_v49 = vrot.slane %v1312_v40, 4  ;;  %v1103_v50 = vadd.f32 %v2199_v45, %v2511_v20  ;;  %v1094_v51 = vpop.f32.mrb[13].mxu1 }
 0x1f1   : > { %v1820_v52 = vsel %vm1819_vm3, %v1394_v41, %v1818_v34  ;;  %v1400_v53 = vmax.f32 %v1398_v35, %v1399_v42  ;;  %v1415_v54 = vrot.slane %v1414_v43, 2  ;;  %v1310_v55 = vmax.f32 %v1082_v44, 0.0  ;;  %v2200_v56 = vpop.f32.mrb[14].mxu1 }
 0x1f2   : > { %v1428_v57 = vmax.f32 %v1426_v39, %v1427_v47  ;;  %v1432_v58 = vmax.f32 %v1312_v40, %v1431_v49  ;;  %v1315_v59 = vmax.f32 %v1103_v50, 0.0  ;;  %v1095_v60 = vadd.f32 %v2511_v20, %v1094_v51  ;;  %v1097_v61 = vpop.f32.mrb[15].mxu1 }
 0x1f3   : > { %v1822_v62 = vsel %vm1821_vm4, %v1400_v53, %v1820_v52  ;;  %v1416_v63 = vmax.f32 %v1414_v43, %v1415_v54  ;;  %v1419_v0 = vrot.slane %v1310_v55, 4  ;;  %v1106_v1 = vadd.f32 %v2200_v56, %v2511_v20 }
 0x1f4   : > { %v1824_v2 = vsel %vm1823_vm5, %v1406_v37, %v1822_v62  ;;  %v1429_v3 = vrot.slane %v1428_v57, 1  ;;  %v1433_v4 = vrot.slane %v1432_v58, 2  ;;  %v1449_v5 = vrot.slane %v1315_v59, 4 }
 0x1f5   : > { %v1826_v6 = vsel %vm1825_vm6, %v1412_v46, %v1824_v2  ;;  %v1420_v7 = vmax.f32 %v1310_v55, %v1419_v0  ;;  %v1313_v8 = vmax.f32 %v1095_v60, 0.0  ;;  %v1417_v9 = vrot.slane %v1416_v63, 1 }
 0x1f6   : > { %1884 = vst [vmem:[%s2545_s16] sm:$0xff] %v1826_v6  ;;  %v1434_v10 = vmax.f32 %v1432_v58, %v1433_v4  ;;  %v1450_v11 = vmax.f32 %v1315_v59, %v1449_v5  ;;  %v1316_v12 = vmax.f32 %v1106_v1, 0.0  ;;  %v1098_v15 = vadd.f32 %v2511_v20, %v1097_v61 }
 0x1f7   : > { %v1421_v13 = vrot.slane %v1420_v7, 2  ;;  %v1437_v14 = vrot.slane %v1313_v8, 4  ;;  %v2203_v16 = vpop.f32.mrb[16].mxu1  ;;  %v1430_v17 = vmax.f32 %v1428_v57, %v1429_v3  ;;  %v1418_v27 = vmax.f32 %v1416_v63, %v1417_v9 }
 0x1f8   : > { %v1451_v18 = vrot.slane %v1450_v11, 2  ;;  %v1455_v19 = vrot.slane %v1316_v12, 4  ;;  %v1119_v21 = vadd.f32 %v2203_v16, %v2511_v20  ;;  %v1110_v22 = vpop.f32.mrb[17].mxu1  ;;  %v1314_v48 = vmax.f32 %v1098_v15, 0.0 }
 0x1f9   : > { %v1422_v23 = vmax.f32 %v1420_v7, %v1421_v13  ;;  %v1438_v24 = vmax.f32 %v1313_v8, %v1437_v14  ;;  %v1111_v25 = vadd.f32 %v2511_v20, %v1110_v22  ;;  %v2204_v26 = vpop.f32.mrb[18].mxu1  ;;  %v1435_v28 = vrot.slane %v1434_v10, 1 }
 0x1fa   : > { %v1456_v29 = vmax.f32 %v1316_v12, %v1455_v19  ;;  %v1319_v30 = vmax.f32 %v1119_v21, 0.0  ;;  %v1113_v31 = vpop.f32.mrb[19].mxu1  ;;  %v1443_v34 = vrot.slane %v1314_v48, 4  ;;  %v1452_v36 = vmax.f32 %v1450_v11, %v1451_v18 }
 0x1fb   : > { %v1423_v32 = vrot.slane %v1422_v23, 1  ;;  %v1439_v33 = vrot.slane %v1438_v24, 2  ;;  %v1317_v35 = vmax.f32 %v1111_v25, 0.0  ;;  %v1122_v39 = vadd.f32 %v2204_v26, %v2511_v20 }
 0x1fc   : > { %v1457_v37 = vrot.slane %v1456_v29, 2  ;;  %v1473_v38 = vrot.slane %v1319_v30, 4  ;;  %v1444_v42 = vmax.f32 %v1314_v48, %v1443_v34  ;;  %v1436_v44 = vmax.f32 %v1434_v10, %v1435_v28 }
 0x1fd   : > { %v1424_v40 = vmax.f32 %v1422_v23, %v1423_v32  ;;  %v1440_v41 = vmax.f32 %v1438_v24, %v1439_v33  ;;  %v1461_v43 = vrot.slane %v1317_v35, 4  ;;  %v1320_v47 = vmax.f32 %v1122_v39, 0.0 }
 0x1fe   : > { %v1458_v45 = vmax.f32 %v1456_v29, %v1457_v37  ;;  %v1474_v46 = vmax.f32 %v1319_v30, %v1473_v38  ;;  %v1445_v51 = vrot.slane %v1444_v42, 2  ;;  %v1453_v55 = vrot.slane %v1452_v36, 1 }
 0x1ff   : > { %v1827_v49 = vsel %vm1813_vm0, %v1424_v40, %v1418_v27  ;;  %v1441_v50 = vrot.slane %v1440_v41, 1  ;;  %v1462_v52 = vmax.f32 %v1317_v35, %v1461_v43  ;;  %v2207_v53 = vpop.f32.mrb[20].mxu1  ;;  %v1479_v57 = vrot.slane %v1320_v47, 4 }
 0x200   : > { %v1828_v54 = vsel %vm1815_vm1, %v1430_v17, %v1827_v49  ;;  %v1475_v56 = vrot.slane %v1474_v46, 2  ;;  %v1126_v58 = vpop.f32.mrb[21].mxu1  ;;  %v1446_v61 = vmax.f32 %v1444_v42, %v1445_v51  ;;  %v1459_v0 = vrot.slane %v1458_v45, 1 }
 0x201   : > { %v1442_v59 = vmax.f32 %v1440_v41, %v1441_v50  ;;  %v1829_v60 = vsel %vm1817_vm2, %v1436_v44, %v1828_v54  ;;  %v1463_v62 = vrot.slane %v1462_v52, 2  ;;  %v2208_v63 = vpop.f32.mrb[22].mxu1  ;;  %v1480_v2 = vmax.f32 %v1320_v47, %v1479_v57 }
 0x202   : > { %v1476_v1 = vmax.f32 %v1474_v46, %v1475_v56  ;;  %v1114_v3 = vadd.f32 %v2511_v20, %v1113_v31  ;;  %v1129_v4 = vpop.f32.mrb[23].mxu1  ;;  %v1447_v6 = vrot.slane %v1446_v61, 1  ;;  %v1135_v8 = vadd.f32 %v2207_v53, %v2511_v20 }
 0x203   : > { %v1830_v5 = vsel %vm1819_vm3, %v1442_v59, %v1829_v60  ;;  %v1464_v7 = vmax.f32 %v1462_v52, %v1463_v62  ;;  %v1481_v10 = vrot.slane %v1480_v2, 2  ;;  %v1127_v12 = vadd.f32 %v2511_v20, %v1126_v58 }
 0x204   : > { %v1477_v9 = vrot.slane %v1476_v1, 1  ;;  %v1318_v11 = vmax.f32 %v1114_v3, 0.0  ;;  %v1454_v13 = vmax.f32 %v1452_v36, %v1453_v55  ;;  %v1448_v14 = vmax.f32 %v1446_v61, %v1447_v6 }
 0x205   : > { %v1323_v15 = vmax.f32 %v1135_v8, 0.0  ;;  %v1138_v16 = vadd.f32 %v2208_v63, %v2511_v20  ;;  %v1460_v17 = vmax.f32 %v1458_v45, %v1459_v0  ;;  %v1482_v18 = vmax.f32 %v1480_v2, %v1481_v10 }
 0x206   : > { %v1467_v19 = vrot.slane %v1318_v11, 4  ;;  %v1321_v21 = vmax.f32 %v1127_v12, 0.0  ;;  %v1831_v22 = vsel %vm1821_vm4, %v1448_v14, %v1830_v5  ;;  %v1465_v23 = vrot.slane %v1464_v7, 1 }
 0x207   : > { %v1497_v24 = vrot.slane %v1323_v15, 4  ;;  %v1324_v48 = vmax.f32 %v1138_v16, 0.0  ;;  %v2211_v25 = vpop.f32.mrb[24].mxu1  ;;  %v1832_v26 = vsel %vm1823_vm5, %v1454_v13, %v1831_v22  ;;  %v1478_v27 = vmax.f32 %v1476_v1, %v1477_v9 }
 0x208   : > { %v1468_v28 = vmax.f32 %v1318_v11, %v1467_v19  ;;  %v1485_v29 = vrot.slane %v1321_v21, 4  ;;  %v1142_v30 = vpop.f32.mrb[25].mxu1  ;;  %v1833_v31 = vsel %vm1825_vm6, %v1460_v17, %v1832_v26  ;;  %v1130_v34 = vadd.f32 %v2511_v20, %v1129_v4 }
 0x209   : > { %v1498_v32 = vmax.f32 %v1323_v15, %v1497_v24  ;;  %v1503_v33 = vrot.slane %v1324_v48, 4  ;;  %v2212_v35 = vpop.f32.mrb[26].mxu1  ;;  %1885 = vst [vmem:[%s2545_s16 + $0x8] sm:$0xff] %v1833_v31  ;;  %v1483_v36 = vrot.slane %v1482_v18, 1  ;;  %v1151_v39 = vadd.f32 %v2211_v25, %v2511_v20 }
 0x20a   : > { %v1469_v37 = vrot.slane %v1468_v28, 2  ;;  %v1486_v38 = vmax.f32 %v1321_v21, %v1485_v29  ;;  %v1145_v40 = vpop.f32.mrb[27].mxu1  ;;  %v1322_v43 = vmax.f32 %v1130_v34, 0.0  ;;  %v1143_v44 = vadd.f32 %v2511_v20, %v1142_v30 }
 0x20b   : > { %v1499_v41 = vrot.slane %v1498_v32, 2  ;;  %v1504_v42 = vmax.f32 %v1324_v48, %v1503_v33  ;;  %v1327_v47 = vmax.f32 %v1151_v39, 0.0  ;;  %v1154_v49 = vadd.f32 %v2212_v35, %v2511_v20 }
 0x20c   : > { %v1470_v45 = vmax.f32 %v1468_v28, %v1469_v37  ;;  %v1487_v46 = vrot.slane %v1486_v38, 2  ;;  %v1491_v52 = vrot.slane %v1322_v43, 4  ;;  %v1325_v53 = vmax.f32 %v1143_v44, 0.0 }
 0x20d   : > { %v1500_v50 = vmax.f32 %v1498_v32, %v1499_v41  ;;  %v1505_v51 = vrot.slane %v1504_v42, 2  ;;  %v1521_v56 = vrot.slane %v1327_v47, 4  ;;  %v1328_v57 = vmax.f32 %v1154_v49, 0.0 }
 0x20e   : > { %v1471_v54 = vrot.slane %v1470_v45, 1  ;;  %v1488_v55 = vmax.f32 %v1486_v38, %v1487_v46  ;;  %v1466_v58 = vmax.f32 %v1464_v7, %v1465_v23  ;;  %v1492_v60 = vmax.f32 %v1322_v43, %v1491_v52 }
 0x20f   : > { %v1506_v59 = vmax.f32 %v1504_v42, %v1505_v51  ;;  %v1509_v61 = vrot.slane %v1325_v53, 4  ;;  %v2215_v62 = vpop.f32.mrb[28].mxu1  ;;  %v1522_v1 = vmax.f32 %v1327_v47, %v1521_v56  ;;  %v1527_v2 = vrot.slane %v1328_v57, 4 }
 0x210   : > { %v1472_v63 = vmax.f32 %v1470_v45, %v1471_v54  ;;  %v1489_v0 = vrot.slane %v1488_v55, 1  ;;  %v1158_v3 = vpop.f32.mrb[29].mxu1  ;;  %v1484_v4 = vmax.f32 %v1482_v18, %v1483_v36  ;;  %v1501_v5 = vrot.slane %v1500_v50, 1 }
 0x211   : > { %v1493_v6 = vrot.slane %v1492_v60, 2  ;;  %v1510_v8 = vmax.f32 %v1325_v53, %v1509_v61  ;;  %v2216_v9 = vpop.f32.mrb[30].mxu1  ;;  %v1523_v12 = vrot.slane %v1522_v1, 2  ;;  %v1528_v13 = vmax.f32 %v1328_v57, %v1527_v2 }
 0x212   : > { %v1834_v10 = vsel %vm1813_vm0, %v1472_v63, %v1466_v58  ;;  %v1490_v11 = vmax.f32 %v1488_v55, %v1489_v0  ;;  %v1161_v7 = vpop.f32.mrb[31].mxu1  ;;  %v1507_v15 = vrot.slane %v1506_v59, 1  ;;  %v1146_v18 = vadd.f32 %v2511_v20, %v1145_v40 }
 0x213   : > { %v1835_v14 = vsel %vm1815_vm1, %v1478_v27, %v1834_v10  ;;  %v1494_v16 = vmax.f32 %v1492_v60, %v1493_v6  ;;  %v1511_v17 = vrot.slane %v1510_v8, 2  ;;  %v1524_v21 = vmax.f32 %v1522_v1, %v1523_v12 }
 0x214   : > { %v1836_v19 = vsel %vm1817_vm2, %v1484_v4, %v1835_v14  ;;  %v1529_v22 = vrot.slane %v1528_v13, 2  ;;  %v1167_v25 = vadd.f32 %v2215_v62, %v2511_v20  ;;  %v1326_v29 = vmax.f32 %v1146_v18, 0.0 }
 0x215   : > { %v1837_v23 = vsel %vm1819_vm3, %v1490_v11, %v1836_v19  ;;  %v1495_v24 = vrot.slane %v1494_v16, 1  ;;  %v1512_v48 = vmax.f32 %v1510_v8, %v1511_v17  ;;  %v1525_v26 = vrot.slane %v1524_v21, 1 }
 0x216   : > { %v1530_v28 = vmax.f32 %v1528_v13, %v1529_v22  ;;  %v1159_v27 = vadd.f32 %v2511_v20, %v1158_v3  ;;  %v1502_v30 = vmax.f32 %v1500_v50, %v1501_v5  ;;  %v1331_v32 = vmax.f32 %v1167_v25, 0.0 }
 0x217   : > { %v1496_v31 = vmax.f32 %v1494_v16, %v1495_v24  ;;  %v1170_v33 = vadd.f32 %v2216_v9, %v2511_v20  ;;  %v2219_v34 = vpop.f32.mrb[32].mxu1  ;;  %v1508_v35 = vmax.f32 %v1506_v59, %v1507_v15  ;;  %v1513_v36 = vrot.slane %v1512_v48, 1 }
 0x218   : > { %v1515_v37 = vrot.slane %v1326_v29, 4  ;;  %v1329_v38 = vmax.f32 %v1159_v27, 0.0  ;;  %v1174_v39 = vpop.f32.mrb[33].mxu1  ;;  %v1526_v41 = vmax.f32 %v1524_v21, %v1525_v26  ;;  %v1545_v42 = vrot.slane %v1331_v32, 4 }
 0x219   : > { %v1838_v40 = vsel %vm1821_vm4, %v1496_v31, %v1837_v23  ;;  %v1332_v43 = vmax.f32 %v1170_v33, 0.0  ;;  %v2220_v44 = vpop.f32.mrb[34].mxu1  ;;  %v1531_v46 = vrot.slane %v1530_v28, 1  ;;  %v1162_v54 = vadd.f32 %v2511_v20, %v1161_v7 }
 0x21a   : > { %v1839_v45 = vsel %vm1823_vm5, %v1502_v30, %v1838_v40  ;;  %v1516_v47 = vmax.f32 %v1326_v29, %v1515_v37  ;;  %v1533_v49 = vrot.slane %v1329_v38, 4  ;;  %v1177_v50 = vpop.f32.mrb[35].mxu1  ;;  %v1546_v52 = vmax.f32 %v1331_v32, %v1545_v42 }
 0x21b   : > { %v1840_v51 = vsel %vm1825_vm6, %v1508_v35, %v1839_v45  ;;  %v1551_v53 = vrot.slane %v1332_v43, 4  ;;  %v1183_v57 = vadd.f32 %v2219_v34, %v2511_v20  ;;  %v1175_v58 = vadd.f32 %v2511_v20, %v1174_v39 }
 0x21c   : > { %1886 = vst [vmem:[%s2545_s16 + $0x10] sm:$0xff] %v1840_v51  ;;  %v1517_v55 = vrot.slane %v1516_v47, 2  ;;  %v1534_v56 = vmax.f32 %v1329_v38, %v1533_v49  ;;  %v1547_v59 = vrot.slane %v1546_v52, 2  ;;  %v1330_v61 = vmax.f32 %v1162_v54, 0.0 }
 0x21d   : > { %v1552_v60 = vmax.f32 %v1332_v43, %v1551_v53  ;;  %v1186_v62 = vadd.f32 %v2220_v44, %v2511_v20  ;;  %v1335_v1 = vmax.f32 %v1183_v57, 0.0  ;;  %v1333_v2 = vmax.f32 %v1175_v58, 0.0 }
 0x21e   : > { %v1518_v63 = vmax.f32 %v1516_v47, %v1517_v55  ;;  %v1535_v0 = vrot.slane %v1534_v56, 2  ;;  %v1548_v3 = vmax.f32 %v1546_v52, %v1547_v59  ;;  %v1539_v5 = vrot.slane %v1330_v61, 4 }
 0x21f   : > { %v1553_v4 = vrot.slane %v1552_v60, 2  ;;  %v1336_v6 = vmax.f32 %v1186_v62, 0.0  ;;  %v2223_v8 = vpop.f32.mrb[36].mxu1  ;;  %v1569_v11 = vrot.slane %v1335_v1, 4  ;;  %v1557_v12 = vrot.slane %v1333_v2, 4 }
 0x220   : > { %v1519_v9 = vrot.slane %v1518_v63, 1  ;;  %v1536_v10 = vmax.f32 %v1534_v56, %v1535_v0  ;;  %v1190_v13 = vpop.f32.mrb[37].mxu1  ;;  %v1514_v7 = vmax.f32 %v1512_v48, %v1513_v36  ;;  %v1540_v15 = vmax.f32 %v1330_v61, %v1539_v5 }
 0x221   : > { %v1554_v14 = vmax.f32 %v1552_v60, %v1553_v4  ;;  %v1575_v16 = vrot.slane %v1336_v6, 4  ;;  %v2224_v17 = vpop.f32.mrb[38].mxu1  ;;  %v1570_v22 = vmax.f32 %v1335_v1, %v1569_v11  ;;  %v1558_v18 = vmax.f32 %v1333_v2, %v1557_v12 }
 0x222   : > { %v1520_v19 = vmax.f32 %v1518_v63, %v1519_v9  ;;  %v1537_v21 = vrot.slane %v1536_v10, 1  ;;  %v1193_v23 = vpop.f32.mrb[39].mxu1  ;;  %v1532_v24 = vmax.f32 %v1530_v28, %v1531_v46  ;;  %v1549_v25 = vrot.slane %v1548_v3, 1 }
 0x223   : > { %v1541_v26 = vrot.slane %v1540_v15, 2  ;;  %v1576_v29 = vmax.f32 %v1336_v6, %v1575_v16  ;;  %v1571_v31 = vrot.slane %v1570_v22, 2  ;;  %v1559_v32 = vrot.slane %v1558_v18, 2 }
 0x224   : > { %v1841_v27 = vsel %vm1813_vm0, %v1520_v19, %v1514_v7  ;;  %v1538_v30 = vmax.f32 %v1536_v10, %v1537_v21  ;;  %v1555_v33 = vrot.slane %v1554_v14, 1  ;;  %v1178_v39 = vadd.f32 %v2511_v20, %v1177_v50 }
 0x225   : > { %v1842_v48 = vsel %vm1815_vm1, %v1526_v41, %v1841_v27  ;;  %v1542_v34 = vmax.f32 %v1540_v15, %v1541_v26  ;;  %v1577_v35 = vrot.slane %v1576_v29, 2  ;;  %v1572_v37 = vmax.f32 %v1570_v22, %v1571_v31 }
 0x226   : > { %v1843_v36 = vsel %vm1817_vm2, %v1532_v24, %v1842_v48  ;;  %v1560_v38 = vmax.f32 %v1558_v18, %v1559_v32  ;;  %v1199_v43 = vadd.f32 %v2223_v8, %v2511_v20  ;;  %v1550_v45 = vmax.f32 %v1548_v3, %v1549_v25 }
 0x227   : > { %v1844_v28 = vsel %vm1819_vm3, %v1538_v30, %v1843_v36  ;;  %v1543_v40 = vrot.slane %v1542_v34, 1  ;;  %v2593_v42 = vmax.f32 %v1576_v29, %v1577_v35  ;;  %v2227_v44 = vpop.f32.mrb[40].mxu1  ;;  %v1573_v46 = vrot.slane %v1572_v37, 1 }
 0x228   : > { %v1334_v41 = vmax.f32 %v1178_v39, 0.0  ;;  %v1191_v47 = vadd.f32 %v2511_v20, %v1190_v13  ;;  %v1206_v49 = vpop.f32.mrb[41].mxu1  ;;  %v1556_v51 = vmax.f32 %v1554_v14, %v1555_v33  ;;  %v1339_v53 = vmax.f32 %v1199_v43, 0.0 }
 0x229   : > { %v1544_v52 = vmax.f32 %v1542_v34, %v1543_v40  ;;  %v1202_v54 = vadd.f32 %v2224_v17, %v2511_v20  ;;  %v2228_v50 = vpop.f32.mrb[42].mxu1  ;;  %v1561_v55 = vrot.slane %v1560_v38, 1  ;;  %v1579_v56 = vrot.slane %v2593_v42, 1 }
 0x22a   : > { %v1563_v57 = vrot.slane %v1334_v41, 4  ;;  %v1337_v58 = vmax.f32 %v1191_v47, 0.0  ;;  %v1209_v59 = vpop.f32.mrb[43].mxu1  ;;  %v1574_v61 = vmax.f32 %v1572_v37, %v1573_v46  ;;  %v1593_v62 = vrot.slane %v1339_v53, 4 }
 0x22b   : > { %v1845_v60 = vsel %vm1821_vm4, %v1544_v52, %v1844_v28  ;;  %v1340_v63 = vmax.f32 %v1202_v54, 0.0  ;;  %v1194_v3 = vadd.f32 %v2511_v20, %v1193_v23  ;;  %v1215_v8 = vadd.f32 %v2227_v44, %v2511_v20 }
 0x22c   : > { %v1846_v0 = vsel %vm1823_vm5, %v1550_v45, %v1845_v60  ;;  %v1564_v1 = vmax.f32 %v1334_v41, %v1563_v57  ;;  %v1581_v2 = vrot.slane %v1337_v58, 4  ;;  %v1594_v5 = vmax.f32 %v1339_v53, %v1593_v62 }
 0x22d   : > { %v1847_v4 = vsel %vm1825_vm6, %v1556_v51, %v1846_v0  ;;  %v1599_v6 = vrot.slane %v1340_v63, 4  ;;  %v1338_v11 = vmax.f32 %v1194_v3, 0.0  ;;  %v1207_v12 = vadd.f32 %v2511_v20, %v1206_v49 }
 0x22e   : > { %1887 = vst [vmem:[%s2545_s16 + $0x18] sm:$0xff] %v1847_v4  ;;  %v1565_v9 = vrot.slane %v1564_v1, 2  ;;  %v1582_v10 = vmax.f32 %v1337_v58, %v1581_v2  ;;  %v1595_v13 = vrot.slane %v1594_v5, 2  ;;  %v1343_v14 = vmax.f32 %v1215_v8, 0.0 }
 0x22f   : > { %v1600_v7 = vmax.f32 %v1340_v63, %v1599_v6  ;;  %v1218_v15 = vadd.f32 %v2228_v50, %v2511_v20  ;;  %v2231_v16 = vpop.f32.mrb[44].mxu1  ;;  %v1587_v21 = vrot.slane %v1338_v11, 4  ;;  %v1341_v22 = vmax.f32 %v1207_v12, 0.0 }
 0x230   : > { %v1566_v17 = vmax.f32 %v1564_v1, %v1565_v9  ;;  %v1583_v19 = vrot.slane %v1582_v10, 2  ;;  %v1222_v18 = vpop.f32.mrb[45].mxu1  ;;  %v1596_v23 = vmax.f32 %v1594_v5, %v1595_v13  ;;  %v1617_v25 = vrot.slane %v1343_v14, 4 }
 0x231   : > { %v1601_v24 = vrot.slane %v1600_v7, 2  ;;  %v1344_v26 = vmax.f32 %v1218_v15, 0.0  ;;  %v2232_v29 = vpop.f32.mrb[46].mxu1  ;;  %v1588_v31 = vmax.f32 %v1338_v11, %v1587_v21  ;;  %v1605_v32 = vrot.slane %v1341_v22, 4 }
 0x232   : > { %v1567_v27 = vrot.slane %v1566_v17, 1  ;;  %v1584_v30 = vmax.f32 %v1582_v10, %v1583_v19  ;;  %v1225_v48 = vpop.f32.mrb[47].mxu1  ;;  %v1562_v33 = vmax.f32 %v1560_v38, %v1561_v55  ;;  %v1618_v35 = vmax.f32 %v1343_v14, %v1617_v25 }
 0x233   : > { %v1602_v34 = vmax.f32 %v1600_v7, %v1601_v24  ;;  %v1623_v36 = vrot.slane %v1344_v26, 4  ;;  %v1589_v28 = vrot.slane %v1588_v31, 2  ;;  %v1606_v40 = vmax.f32 %v1341_v22, %v1605_v32 }
 0x234   : > { %v1568_v37 = vmax.f32 %v1566_v17, %v1567_v27  ;;  %v1585_v39 = vrot.slane %v1584_v30, 1  ;;  %v1580_v43 = vmax.f32 %v2593_v42, %v1579_v56  ;;  %v1597_v44 = vrot.slane %v1596_v23, 1 }
 0x235   : > { %v1619_v45 = vrot.slane %v1618_v35, 2  ;;  %v1624_v46 = vmax.f32 %v1344_v26, %v1623_v36  ;;  %v1590_v49 = vmax.f32 %v1588_v31, %v1589_v28  ;;  %v1607_v51 = vrot.slane %v1606_v40, 2 }
 0x236   : > { %v1848_v41 = vsel %vm1813_vm0, %v1568_v37, %v1562_v33  ;;  %v1586_v47 = vmax.f32 %v1584_v30, %v1585_v39  ;;  %v1603_v38 = vrot.slane %v1602_v34, 1  ;;  %v1210_v42 = vadd.f32 %v2511_v20, %v1209_v59 }
 0x237   : > { %v1849_v52 = vsel %vm1815_vm1, %v1574_v61, %v1848_v41  ;;  %v2610_v53 = vmax.f32 %v1618_v35, %v1619_v45  ;;  %v1625_v54 = vrot.slane %v1624_v46, 2  ;;  %v2235_v50 = vpop.f32.mrb[48].mxu1  ;;  %v1591_v57 = vrot.slane %v1590_v49, 1 }
 0x238   : > { %v1850_v55 = vsel %vm1817_vm2, %v1580_v43, %v1849_v52  ;;  %v1608_v58 = vmax.f32 %v1606_v40, %v1607_v51  ;;  %v1238_v56 = vpop.f32.mrb[49].mxu1  ;;  %v1231_v63 = vadd.f32 %v2231_v16, %v2511_v20  ;;  %v1598_v1 = vmax.f32 %v1596_v23, %v1597_v44 }
 0x239   : > { %v1851_v60 = vsel %vm1819_vm3, %v1586_v47, %v1850_v55  ;;  %v1626_v62 = vmax.f32 %v1624_v46, %v1625_v54  ;;  %v2236_v0 = vpop.f32.mrb[50].mxu1  ;;  %v1592_v61 = vmax.f32 %v1590_v49, %v1591_v57  ;;  %v1342_v2 = vmax.f32 %v1210_v42, 0.0 }
 0x23a   : > { %v1223_v3 = vadd.f32 %v2511_v20, %v1222_v18  ;;  %v2617_v4 = vpop.f32.mrb[51].mxu1  ;;  %v1604_v5 = vmax.f32 %v1602_v34, %v1603_v38  ;;  %v1621_v6 = vrot.slane %v2610_v53, 1  ;;  %v1347_v8 = vmax.f32 %v1231_v63, 0.0 }
 0x23b   : > { %v1234_v59 = vadd.f32 %v2232_v29, %v2511_v20  ;;  %v1852_v9 = vsel %vm1821_vm4, %v1592_v61, %v1851_v60  ;;  %v1609_v10 = vrot.slane %v1608_v58, 1  ;;  %v1611_v11 = vrot.slane %v1342_v2, 4 }
 0x23c   : > { %v1345_v12 = vmax.f32 %v1223_v3, 0.0  ;;  %v1853_v13 = vsel %vm1823_vm5, %v1598_v1, %v1852_v9  ;;  %v1627_v7 = vrot.slane %v1626_v62, 1  ;;  %v1641_v14 = vrot.slane %v1347_v8, 4 }
 0x23d   : > { %v1348_v15 = vmax.f32 %v1234_v59, 0.0  ;;  %v1854_v16 = vsel %vm1825_vm6, %v1604_v5, %v1853_v13  ;;  %v1612_v17 = vmax.f32 %v1342_v2, %v1611_v11  ;;  %v1226_v21 = vadd.f32 %v2511_v20, %v1225_v48 }
 0x23e   : > { %v1629_v19 = vrot.slane %v1345_v12, 4  ;;  %1888 = vst [vmem:[%s2545_s16 + $0x20] sm:$0xff] %v1854_v16  ;;  %v1642_v22 = vmax.f32 %v1347_v8, %v1641_v14  ;;  %v1247_v23 = vadd.f32 %v2235_v50, %v2511_v20  ;;  %v1239_v24 = vadd.f32 %v2511_v20, %v1238_v56 }
 0x23f   : > { %v1647_v18 = vrot.slane %v1348_v15, 4  ;;  %v2239_v25 = vpop.f32.mrb[52].mxu1  ;;  %v1613_v26 = vrot.slane %v1612_v17, 2  ;;  %v1346_v27 = vmax.f32 %v1226_v21, 0.0  ;;  %v1250_v30 = vadd.f32 %v2236_v0, %v2511_v20 }
 0x240   : > { %v1630_v29 = vmax.f32 %v1345_v12, %v1629_v19  ;;  %v1254_v31 = vpop.f32.mrb[53].mxu1  ;;  %v1643_v32 = vrot.slane %v1642_v22, 2  ;;  %v1351_v34 = vmax.f32 %v1247_v23, 0.0  ;;  %v1349_v35 = vmax.f32 %v1239_v24, 0.0 }
 0x241   : > { %v1648_v33 = vmax.f32 %v1348_v15, %v1647_v18  ;;  %v2240_v36 = vpop.f32.mrb[54].mxu1  ;;  %v1614_v48 = vmax.f32 %v1612_v17, %v1613_v26  ;;  %v1635_v39 = vrot.slane %v1346_v27, 4  ;;  %v1352_v28 = vmax.f32 %v1250_v30, 0.0 }
 0x242   : > { %v1631_v37 = vrot.slane %v1630_v29, 2  ;;  %v1257_v40 = vpop.f32.mrb[55].mxu1  ;;  %v1644_v43 = vmax.f32 %v1642_v22, %v1643_v32  ;;  %v1665_v45 = vrot.slane %v1351_v34, 4  ;;  %v1653_v46 = vrot.slane %v1349_v35, 4 }
 0x243   : > { %v1649_v44 = vrot.slane %v1648_v33, 2  ;;  %v1615_v41 = vrot.slane %v1614_v48, 1  ;;  %v1636_v49 = vmax.f32 %v1346_v27, %v1635_v39  ;;  %v1671_v51 = vrot.slane %v1352_v28, 4 }
 0x244   : > { %v1632_v47 = vmax.f32 %v1630_v29, %v1631_v37  ;;  %v1610_v20 = vmax.f32 %v1608_v58, %v1609_v10  ;;  %v1666_v38 = vmax.f32 %v1351_v34, %v1665_v45  ;;  %v1654_v54 = vmax.f32 %v1349_v35, %v1653_v46 }
 0x245   : > { %v1650_v52 = vmax.f32 %v1648_v33, %v1649_v44  ;;  %v1616_v50 = vmax.f32 %v1614_v48, %v1615_v41  ;;  %v1637_v57 = vrot.slane %v1636_v49, 2  ;;  %v1672_v42 = vmax.f32 %v1352_v28, %v1671_v51 }
 0x246   : > { %v1633_v55 = vrot.slane %v1632_v47, 1  ;;  %v1622_v56 = vmax.f32 %v2610_v53, %v1621_v6  ;;  %v1628_v60 = vmax.f32 %v1626_v62, %v1627_v7  ;;  %v1645_v63 = vrot.slane %v1644_v43, 1  ;;  %v2636_v53 = vld [vmem:[%s2683_s4] ss:$0 sm:$0xff] }
 0x247   : > { %v1667_v0 = vrot.slane %v1666_v38, 2  ;;  %v2243_v1 = vpop.f32.mrb[56].mxu1  ;;  %v1855_v61 = vsel %vm1813_vm0, %v1616_v50, %v1610_v20  ;;  %v1651_v3 = vrot.slane %v1650_v52, 1  ;;  %v1638_v5 = vmax.f32 %v1636_v49, %v1637_v57 }
 0x248   : > { %v1634_v2 = vmax.f32 %v1632_v47, %v1633_v55  ;;  %v1270_v8 = vpop.f32.mrb[57].mxu1  ;;  %v1856_v58 = vsel %vm1815_vm1, %v1622_v56, %v1855_v61  ;;  %v1655_v59 = vrot.slane %v1654_v54, 2  ;;  %v1673_v9 = vrot.slane %v1672_v42, 2 }
 0x249   : > { %v2244_v10 = vpop.f32.mrb[58].mxu1  ;;  %v1857_v11 = vsel %vm1817_vm2, %v1628_v60, %v1856_v58  ;;  %v1639_v12 = vrot.slane %v1638_v5, 1  ;;  %v1668_v13 = vmax.f32 %v1666_v38, %v1667_v0  ;;  %v1242_v62 = vadd.f32 %v2636_v53, %v2617_v4 }
 0x24a   : > { %v2640_v6 = vpop.f32.mrb[59].mxu1  ;;  %v1646_v7 = vmax.f32 %v1644_v43, %v1645_v63  ;;  %v1858_v14 = vsel %vm1819_vm3, %v1634_v2, %v1857_v11  ;;  %v1263_v15 = vadd.f32 %v2636_v53, %v2239_v25  ;;  %v1652_v16 = vmax.f32 %v1650_v52, %v1651_v3 }
 0x24b   : > { %v1640_v17 = vmax.f32 %v1638_v5, %v1639_v12  ;;  %v1350_v19 = vmax.f32 %v1242_v62, 0.0  ;;  %v1255_v21 = vadd.f32 %v2636_v53, %v1254_v31  ;;  %v1656_v22 = vmax.f32 %v1654_v54, %v1655_v59 }
 0x24c   : > { %v1674_v18 = vmax.f32 %v1672_v42, %v1673_v9  ;;  %v1355_v23 = vmax.f32 %v1263_v15, 0.0  ;;  %v1266_v24 = vadd.f32 %v2636_v53, %v2240_v36  ;;  %v1669_v26 = vrot.slane %v1668_v13, 1 }
 0x24d   : > { %v1859_v4 = vsel %vm1821_vm4, %v1640_v17, %v1858_v14  ;;  %v1659_v29 = vrot.slane %v1350_v19, 4  ;;  %v1353_v27 = vmax.f32 %v1255_v21, 0.0  ;;  %v1258_v33 = vadd.f32 %v2636_v53, %v1257_v40 }
 0x24e   : > { %v1860_v30 = vsel %vm1823_vm5, %v1646_v7, %v1859_v4  ;;  %v1689_v32 = vrot.slane %v1355_v23, 4  ;;  %v1356_v25 = vmax.f32 %v1266_v24, 0.0  ;;  %v1279_v37 = vadd.f32 %v2636_v53, %v2243_v1 }
 0x24f   : > { %v2247_v34 = vpop.f32.mrb[60].mxu1  ;;  %v1861_v31 = vsel %vm1825_vm6, %v1652_v16, %v1860_v30  ;;  %v1660_v35 = vmax.f32 %v1350_v19, %v1659_v29  ;;  %v1677_v48 = vrot.slane %v1353_v27, 4  ;;  %v1354_v43 = vmax.f32 %v1258_v33, 0.0 }
 0x250   : > { %v1286_v39 = vpop.f32.mrb[61].mxu1  ;;  %1889 = vst [vmem:[%s2545_s16 + $0x28] sm:$0xff] %v1861_v31  ;;  %v1690_v36 = vmax.f32 %v1355_v23, %v1689_v32  ;;  %v1695_v28 = vrot.slane %v1356_v25, 4  ;;  %v1271_v44 = vadd.f32 %v2636_v53, %v1270_v8  ;;  %v1359_v47 = vmax.f32 %v1279_v37, 0.0 }
 0x251   : > { %v2248_v45 = vpop.f32.mrb[62].mxu1  ;;  %v1661_v46 = vrot.slane %v1660_v35, 2  ;;  %v1678_v41 = vmax.f32 %v1353_v27, %v1677_v48  ;;  %v1282_v40 = vadd.f32 %v2636_v53, %v2244_v10  ;;  %v1683_v52 = vrot.slane %v1354_v43, 4 }
 0x252   : > { %v1289_v49 = vpop.f32.mrb[63].mxu1  ;;  %v1691_v51 = vrot.slane %v1690_v36, 2  ;;  %v1696_v20 = vmax.f32 %v1356_v25, %v1695_v28  ;;  %v1357_v38 = vmax.f32 %v1271_v44, 0.0  ;;  %v1657_v54 = vrot.slane %v1656_v22, 1 }
 0x253   : > { %v1662_v50 = vmax.f32 %v1660_v35, %v1661_v46  ;;  %v1679_v55 = vrot.slane %v1678_v41, 2  ;;  %v1360_v57 = vmax.f32 %v1282_v40, 0.0  ;;  %v1675_v42 = vrot.slane %v1674_v18, 1 }
 0x254   : > { %v1697_v56 = vrot.slane %v1696_v20, 2  ;;  %v1684_v60 = vmax.f32 %v1354_v43, %v1683_v52  ;;  %v1713_v63 = vrot.slane %v1359_v47, 4  ;;  %v1692_v1 = vmax.f32 %v1690_v36, %v1691_v51 }
 0x255   : > { %v1663_v0 = vrot.slane %v1662_v50, 1  ;;  %v1680_v61 = vmax.f32 %v1678_v41, %v1679_v55  ;;  %v1701_v2 = vrot.slane %v1357_v38, 4  ;;  %v1658_v8 = vmax.f32 %v1656_v22, %v1657_v54 }
 0x256   : > { %v1698_v3 = vmax.f32 %v1696_v20, %v1697_v56  ;;  %v1685_v5 = vrot.slane %v1684_v60, 2  ;;  %v1719_v9 = vrot.slane %v1360_v57, 4  ;;  %v1670_v10 = vmax.f32 %v1668_v13, %v1669_v26 }
 0x257   : > { %v1664_v58 = vmax.f32 %v1662_v50, %v1663_v0  ;;  %v1681_v59 = vrot.slane %v1680_v61, 1  ;;  %v1676_v11 = vmax.f32 %v1674_v18, %v1675_v42  ;;  %v1714_v62 = vmax.f32 %v1359_v47, %v1713_v63 }
 0x258   : > { %v1686_v12 = vmax.f32 %v1684_v60, %v1685_v5  ;;  %v1693_v14 = vrot.slane %v1692_v1, 1  ;;  %v1702_v16 = vmax.f32 %v1357_v38, %v1701_v2  ;;  %v1699_v19 = vrot.slane %v1698_v3, 1 }
 0x259   : > { %v1862_v7 = vsel %vm1813_vm0, %v1664_v58, %v1658_v8  ;;  %v1682_v15 = vmax.f32 %v1680_v61, %v1681_v59  ;;  %v1720_v24 = vmax.f32 %v1360_v57, %v1719_v9  ;;  %v1274_v22 = vadd.f32 %v2636_v53, %v2640_v6 }
 0x25a   : > { %v1863_v17 = vsel %vm1815_vm1, %v1670_v10, %v1862_v7  ;;  %v1687_v21 = vrot.slane %v1686_v12, 1  ;;  %v1715_v4 = vrot.slane %v1714_v62, 2  ;;  %v1295_v26 = vadd.f32 %v2636_v53, %v2247_v34 }
 0x25b   : > { %v1864_v23 = vsel %vm1817_vm2, %v1676_v11, %v1863_v17  ;;  %v1694_v29 = vmax.f32 %v1692_v1, %v1693_v14  ;;  %v1703_v27 = vrot.slane %v1702_v16, 2  ;;  %v1358_v30 = vmax.f32 %v1274_v22, 0.0 }
 0x25c   : > { %v1865_v13 = vsel %vm1819_vm3, %v1682_v15, %v1864_v23  ;;  %v1688_v18 = vmax.f32 %v1686_v12, %v1687_v21  ;;  %v1287_v32 = vadd.f32 %v2636_v53, %v1286_v39  ;;  %v1700_v25 = vmax.f32 %v1698_v3, %v1699_v19 }
 0x25d   : > { %v1363_v31 = vmax.f32 %v1295_v26, 0.0  ;;  %v1298_v35 = vadd.f32 %v2636_v53, %v2248_v45  ;;  %v1721_v48 = vrot.slane %v1720_v24, 2  ;;  %v1707_v37 = vrot.slane %v1358_v30, 4 }
 0x25e   : > { %v1866_v33 = vsel %vm1821_vm4, %v1688_v18, %v1865_v13  ;;  %v1361_v36 = vmax.f32 %v1287_v32, 0.0  ;;  %v1290_v44 = vadd.f32 %v2636_v53, %v1289_v49  ;;  %v1704_v46 = vmax.f32 %v1702_v16, %v1703_v27 }
 0x25f   : > { %v1867_v6 = vsel %vm1823_vm5, %v1694_v29, %v1866_v33  ;;  %v1737_v34 = vrot.slane %v1363_v31, 4  ;;  %v1364_v43 = vmax.f32 %v1298_v35, 0.0  ;;  %v1708_v39 = vmax.f32 %v1358_v30, %v1707_v37 }
 0x260   : > { %v1868_v28 = vsel %vm1825_vm6, %v1700_v25, %v1867_v6  ;;  %v1725_v41 = vrot.slane %v1361_v36, 4  ;;  %v1716_v47 = vmax.f32 %v1714_v62, %v1715_v4  ;;  %v1362_v20 = vmax.f32 %v1290_v44, 0.0 }
 0x261   : > { %1890 = vst [vmem:[%s2545_s16 + $0x30] sm:$0xff] %v1868_v28  ;;  %v1738_v40 = vmax.f32 %v1363_v31, %v1737_v34  ;;  %v1743_v51 = vrot.slane %v1364_v43, 4  ;;  %v1722_v45 = vmax.f32 %v1720_v24, %v1721_v48  ;;  %v1709_v52 = vrot.slane %v1708_v39, 2 }
 0x262   : > { %v1726_v38 = vmax.f32 %v1361_v36, %v1725_v41  ;;  %v1731_v55 = vrot.slane %v1362_v20, 4  ;;  %v1705_v57 = vrot.slane %v1704_v46, 1  ;;  %v1717_v60 = vrot.slane %v1716_v47, 1 }
 0x263   : > { %v1739_v54 = vrot.slane %v1738_v40, 2  ;;  %v1744_v50 = vmax.f32 %v1364_v43, %v1743_v51  ;;  %v1710_v42 = vmax.f32 %v1708_v39, %v1709_v52  ;;  %v1723_v49 = vrot.slane %v1722_v45, 1 }
 0x264   : > { %v1727_v56 = vrot.slane %v1726_v38, 2  ;;  %v1732_v53 = vmax.f32 %v1362_v20, %v1731_v55  ;;  %v1706_v5 = vmax.f32 %v1704_v46, %v1705_v57  ;;  %v1718_v59 = vmax.f32 %v1716_v47, %v1717_v60 }
 0x265   : > { %v1745_v63 = vrot.slane %v1744_v50, 2  ;;  %v1711_v0 = vrot.slane %v1710_v42, 1  ;;  %v1740_v1 = vmax.f32 %v1738_v40, %v1739_v54  ;;  %v1724_v10 = vmax.f32 %v1722_v45, %v1723_v49 }
 0x266   : > { %v1728_v61 = vmax.f32 %v1726_v38, %v1727_v56  ;;  %v1733_v3 = vrot.slane %v1732_v53, 2 }
 0x267   : > { %v1746_v2 = vmax.f32 %v1744_v50, %v1745_v63  ;;  %v1712_v8 = vmax.f32 %v1710_v42, %v1711_v0  ;;  %v1741_v12 = vrot.slane %v1740_v1, 1 }
 0x268   : > { %v1729_v58 = vrot.slane %v1728_v61, 1  ;;  %v1734_v9 = vmax.f32 %v1732_v53, %v1733_v3 }
 0x269   : > { %v1869_v11 = vsel %vm1813_vm0, %v1712_v8, %v1706_v5  ;;  %v1747_v14 = vrot.slane %v1746_v2, 1  ;;  %v1742_v21 = vmax.f32 %v1740_v1, %v1741_v12 }
 0x26a   : > { %v1730_v62 = vmax.f32 %v1728_v61, %v1729_v58  ;;  %v1870_v7 = vsel %vm1815_vm1, %v1718_v59, %v1869_v11  ;;  %v1735_v15 = vrot.slane %v1734_v9, 1 }
 0x26b   : > { %v1871_v16 = vsel %vm1817_vm2, %v1724_v10, %v1870_v7  ;;  %v1748_v23 = vmax.f32 %v1746_v2, %v1747_v14 }
 0x26c   : > { %v1872_v17 = vsel %vm1819_vm3, %v1730_v62, %v1871_v16  ;;  %v1736_v19 = vmax.f32 %v1734_v9, %v1735_v15 }
 0x26e   : > { %v1873_v24 = vsel %vm1821_vm4, %v1736_v19, %v1872_v17 }
 0x26f   : > { %v1874_v22 = vsel %vm1823_vm5, %v1742_v21, %v1873_v24 }
 0x270   : > { %v1875_v13 = vsel %vm1825_vm6, %v1748_v23, %v1874_v22 }
 0x271   : > { %1891 = vst [vmem:[%s2545_s16 + $0x38] sm:$0xff] %v1875_v13 }
 0x272 PF: > { %s15_s18 = sadd.s32 1, %s2312_s18  }
 0x273   : > { %p12_p5 = scmp.ge.s32.totalorder %s15_s18, 4  }
 0x275   :  { %14 = sbr.rel (!%p12_p5) target bundleno = 1 (0x1), region = 70 }

// kernel: neg.7
= control target key start
LH: loop header
LB: loop body
LE: loop exit
PB: predicated region body
PF: predicated region fallthrough
CT: control target
= control target key end

     0   :  { %s136_s0 = inlined_call_operand.vmem [shape: f32[64,128], index: 0, kind: input, shape index: {}]   ;;  %s137_s1 = inlined_call_operand.vmem [shape: f32[64,128], index: 1, kind: output, shape index: {}]  }
   0x1   :  { %v2_v0 = vld [vmem:[%s136_s0] sm:$0xff]  ;;  %v64_v1 = vld [vmem:[%s136_s0 + $0x8] sm:$0xff]  ;;  %v66_v2 = vld [vmem:[%s136_s0 + $0x10] sm:$0xff] }
   0x2   :  { %v5_v3 = vxor.u32 2147483648, %v2_v0  ;;  %v12_v4 = vxor.u32 2147483648, %v64_v1  ;;  %v20_v5 = vxor.u32 2147483648, %v66_v2  ;;  %v68_v6 = vld [vmem:[%s136_s0 + $0x18] sm:$0xff]  ;;  %v70_v7 = vld [vmem:[%s136_s0 + $0x20] sm:$0xff]  ;;  %v72_v8 = vld [vmem:[%s136_s0 + $0x28] sm:$0xff] }
   0x3   :  { %v28_v9 = vxor.u32 2147483648, %v68_v6  ;;  %v36_v10 = vxor.u32 2147483648, %v70_v7  ;;  %v44_v11 = vxor.u32 2147483648, %v72_v8  ;;  %v74_v12 = vld [vmem:[%s136_s0 + $0x30] sm:$0xff]  ;;  %v76_v13 = vld [vmem:[%s136_s0 + $0x38] sm:$0xff] }
   0x4   :  { %7 = vst [vmem:[%s137_s1] sm:$0xff] %v5_v3  ;;  %65 = vst [vmem:[%s137_s1 + $0x8] sm:$0xff] %v12_v4  ;;  %v52_v14 = vxor.u32 2147483648, %v74_v12  ;;  %v60_v15 = vxor.u32 2147483648, %v76_v13 }
   0x5   :  { %67 = vst [vmem:[%s137_s1 + $0x10] sm:$0xff] %v20_v5  ;;  %69 = vst [vmem:[%s137_s1 + $0x18] sm:$0xff] %v28_v9 }
   0x6   :  { %71 = vst [vmem:[%s137_s1 + $0x20] sm:$0xff] %v36_v10  ;;  %73 = vst [vmem:[%s137_s1 + $0x28] sm:$0xff] %v44_v11 }
   0x7   :  { %75 = vst [vmem:[%s137_s1 + $0x30] sm:$0xff] %v52_v14  ;;  %77 = vst [vmem:[%s137_s1 + $0x38] sm:$0xff] %v60_v15 }

// kernel: pointnet_forward.10
= control target key start
LH: loop header
LB: loop body
LE: loop exit
PB: predicated region body
PF: predicated region fallthrough
CT: control target
= control target key end

     0   :  { %vm20_vm0 = vcmask 64512   ;;  %s348_s1 = inlined_call_operand.vmem [shape: f32[8,128], index: 1, kind: input, shape index: {}]   ;;  %s349_s0 = inlined_call_operand.vmem [shape: f32[64,8], index: 0, kind: input, shape index: {}]   ;;  %s350_s2 = inlined_call_operand.vmem [shape: f32[64,128], index: 2, kind: output, shape index: {}]  }
   0x1   :  { %v19_v0 = vld [vmem:[%s348_s1] sm:$0xff]  ;;  %v12_v4 = vld [vmem:[%s349_s0 + $0x8] sm:$0xff]  ;;  %v13_v6 = vld [vmem:[%s349_s0 + $0x10] sm:$0xff] }
   0x2   :  { %v11_v1 = vld [vmem:[%s349_s0] sm:$0xff]  ;;  %250 = vmatprep.subr.mxu0 %v19_v0  ;;  %264 = vmatprep.subr.mxu1 %v19_v0  ;;  %v16_v5 = vld [vmem:[%s349_s0 + $0x28] sm:$0xff]  ;;  %v17_v7 = vld [vmem:[%s349_s0 + $0x30] sm:$0xff]  ;;  %v152_v9 = vmul.f32 %v13_v6, %v13_v6  ;;  %v151_v12 = vmul.f32 %v12_v4, %v12_v4  ;;  %v182_v25 = vmul.f32 %v19_v0, %v19_v0 }
   0x3   :  { %v15_v2 = vld [vmem:[%s349_s0 + $0x20] sm:$0xff]  ;;  %v150_v3 = vmul.f32 %v11_v1, %v11_v1  ;;  %251 = vmatpush3.msra.mxu0 %v19_v0  ;;  %265 = vmatpush3.msra.mxu1 %v19_v0  ;;  %v14_v8 = vld [vmem:[%s349_s0 + $0x18] sm:$0xff]  ;;  %v155_v18 = vmul.f32 %v16_v5, %v16_v5  ;;  %v156_v22 = vmul.f32 %v17_v7, %v17_v7 }
   0x4   :  { %252 = vmatprep.mubr.msk.f32.mxu0 %vm20_vm0, %v11_v1  ;;  %258 = vmatprep.mubr.msk.f32.mxu1 %vm20_vm0, %v15_v2  ;;  %v153_v11 = vmul.f32 %v14_v8, %v14_v8  ;;  %v164_v13 = vsel %vm20_vm0, %v152_v9, 0.0  ;;  %v18_v14 = vld [vmem:[%s349_s0 + $0x38] sm:$0xff]  ;;  %v154_v15 = vmul.f32 %v15_v2, %v15_v2  ;;  %v161_v17 = vsel %vm20_vm0, %v151_v12, 0.0 }
   0x5   :  { %v158_v10 = vsel %vm20_vm0, %v150_v3, 0.0  ;;  %253 = vmatmul.mubr.msk.f32.vlgmr.msra.gmra.mrb[0].mxu0 %vm20_vm0, %v12_v4  ;;  %259 = vmatmul.mubr.msk.f32.vlgmr.msra.gmra.mrb[0].mxu1 %vm20_vm0, %v16_v5  ;;  %v173_v19 = vsel %vm20_vm0, %v155_v18, 0.0  ;;  %v157_v21 = vmul.f32 %v18_v14, %v18_v14  ;;  %v176_v24 = vsel %vm20_vm0, %v156_v22, 0.0 }
   0x6   :  { %255 = vmatprep.mubr.msk.f32.mxu0 %vm20_vm0, %v13_v6  ;;  %261 = vmatprep.mubr.msk.f32.mxu1 %vm20_vm0, %v17_v7  ;;  %v167_v16 = vsel %vm20_vm0, %v153_v11, 0.0  ;;  %v170_v20 = vsel %vm20_vm0, %v154_v15, 0.0  ;;  %v183_v26 = vrot.slane %v182_v25, 4 }
   0x7   :  { %165 = vadd.xlane.f32.xlu1 %v164_v13  ;;  %159 = vadd.xlane.f32.xlu0 %v158_v10  ;;  %v179_v23 = vsel %vm20_vm0, %v157_v21, 0.0 }
   0x8   :  { %v184_v27 = vadd.f32 %v183_v26, %v182_v25 }
   0x9   :  { %256 = vmatmul.mubr.msk.f32.gmra.mrb[2].mxu0 %vm20_vm0, %v14_v8  ;;  %262 = vmatmul.mubr.msk.f32.gmra.mrb[2].mxu1 %vm20_vm0, %v18_v14 }
   0xa   :  { %v185_v30 = vrot.slane %v184_v27, 2 }
   0xb   :  { %168 = vadd.xlane.f32.xlu1 %v167_v16  ;;  %162 = vadd.xlane.f32.xlu0 %v161_v17 }
   0xc   :  { %v186_v33 = vadd.f32 %v185_v30, %v184_v27 }
   0xe   :  { %v187_v34 = vrot.slane %v186_v33, 1 }
   0xf   :  { %174 = vadd.xlane.f32.xlu1 %v173_v19  ;;  %171 = vadd.xlane.f32.xlu0 %v170_v20 }
  0x10   :  { %v188_v37 = vadd.f32 %v187_v34, %v186_v33 }
  0x13   :  { %180 = vadd.xlane.f32.xlu1 %v179_v23  ;;  %177 = vadd.xlane.f32.xlu0 %v176_v24 }
  0x94   :  { %v166_v28 = vpop.xlane.xlu1 %165  ;;  %v160_v29 = vpop.xlane.xlu0 %159 }
  0x95   :  { %v189_v49 = vadd.f32 %v188_v37, %v160_v29  ;;  %v191_v52 = vadd.f32 %v188_v37, %v166_v28 }
  0x98   :  { %v169_v31 = vpop.xlane.xlu1 %168  ;;  %v163_v32 = vpop.xlane.xlu0 %162 }
  0x99   :  { %v190_v44 = vadd.f32 %v188_v37, %v163_v32  ;;  %v192_v56 = vadd.f32 %v188_v37, %v169_v31 }
  0x9c   :  { %v175_v35 = vpop.xlane.xlu1 %174  ;;  %v172_v36 = vpop.xlane.xlu0 %171 }
  0x9d   :  { %v194_v38 = vadd.f32 %v188_v37, %v175_v35  ;;  %v193_v43 = vadd.f32 %v188_v37, %v172_v36 }
  0xa0   :  { %v181_v39 = vpop.xlane.xlu1 %180  ;;  %v178_v40 = vpop.xlane.xlu0 %177 }
  0xa1   :  { %v196_v55 = vadd.f32 %v188_v37, %v181_v39  ;;  %v195_v61 = vadd.f32 %v188_v37, %v178_v40 }
  0xd8   :  { %v260_v41 = vpop.f32.mrb[0].mxu1  ;;  %v254_v42 = vpop.f32.mrb[0].mxu0 }
  0xd9   :  { %v202_v45 = vmul.f32 2.0, %v260_v41  ;;  %v198_v46 = vmul.f32 2.0, %v254_v42  ;;  %v131_v47 = vpop.f32.mrb[1].mxu1  ;;  %v111_v48 = vpop.f32.mrb[1].mxu0 }
  0xda   :  { %v201_v50 = vmul.f32 2.0, %v131_v47  ;;  %v197_v51 = vmul.f32 2.0, %v111_v48 }
  0xdb   :  { %v210_v53 = vsub.f32 %v194_v38, %v202_v45  ;;  %v206_v54 = vsub.f32 %v190_v44, %v198_v46 }
  0xdc   :  { %v209_v57 = vsub.f32 %v193_v43, %v201_v50  ;;  %v205_v58 = vsub.f32 %v189_v49, %v197_v51  ;;  %v263_v59 = vpop.f32.mrb[2].mxu1  ;;  %v257_v60 = vpop.f32.mrb[2].mxu0 }
  0xdd   :  { %v218_v62 = vmax.f32 %v210_v53, 0.0  ;;  %v214_v63 = vmax.f32 %v206_v54, 0.0  ;;  %v204_v0 = vmul.f32 2.0, %v263_v59  ;;  %v200_v1 = vmul.f32 2.0, %v257_v60  ;;  %v141_v2 = vpop.f32.mrb[3].mxu1  ;;  %v121_v3 = vpop.f32.mrb[3].mxu0 }
  0xde   :  { %v217_v4 = vmax.f32 %v209_v57, 0.0  ;;  %v213_v5 = vmax.f32 %v205_v58, 0.0  ;;  %v203_v6 = vmul.f32 2.0, %v141_v2  ;;  %v199_v7 = vmul.f32 2.0, %v121_v3 }
  0xdf   :  { %226 = vst [vmem:[%s350_s2 + $0x28] sm:$0xff] %v218_v62  ;;  %222 = vst [vmem:[%s350_s2 + $0x8] sm:$0xff] %v214_v63  ;;  %v212_v8 = vsub.f32 %v196_v55, %v204_v0  ;;  %v208_v9 = vsub.f32 %v192_v56, %v200_v1 }
  0xe0   :  { %225 = vst [vmem:[%s350_s2 + $0x20] sm:$0xff] %v217_v4  ;;  %221 = vst [vmem:[%s350_s2] sm:$0xff] %v213_v5  ;;  %v211_v10 = vsub.f32 %v195_v61, %v203_v6  ;;  %v207_v11 = vsub.f32 %v191_v52, %v199_v7 }
  0xe1   :  { %v220_v12 = vmax.f32 %v212_v8, 0.0  ;;  %v216_v13 = vmax.f32 %v208_v9, 0.0 }
  0xe2   :  { %v219_v14 = vmax.f32 %v211_v10, 0.0  ;;  %v215_v15 = vmax.f32 %v207_v11, 0.0 }
  0xe3   :  { %228 = vst [vmem:[%s350_s2 + $0x38] sm:$0xff] %v220_v12  ;;  %224 = vst [vmem:[%s350_s2 + $0x18] sm:$0xff] %v216_v13 }
  0xe4   :  { %227 = vst [vmem:[%s350_s2 + $0x30] sm:$0xff] %v219_v14  ;;  %223 = vst [vmem:[%s350_s2 + $0x10] sm:$0xff] %v215_v15 }

// kernel: pointnet_forward.12
= control target key start
LH: loop header
LB: loop body
LE: loop exit
PB: predicated region body
PF: predicated region fallthrough
CT: control target
= control target key end

     0   :  { %vm28_vm0 = vcmask 64512   ;;  %s616_s1 = inlined_call_operand.vmem [shape: f32[8,128], index: 1, kind: input, shape index: {}]   ;;  %s617_s0 = inlined_call_operand.vmem [shape: f32[128,8], index: 0, kind: input, shape index: {}]   ;;  %s618_s2 = inlined_call_operand.vmem [shape: f32[128,128], index: 2, kind: output, shape index: {}]  }
   0x1   :  { %v456_v0 = vld [vmem:[%s616_s1] sm:$0xff]  ;;  %v12_v4 = vld [vmem:[%s617_s0 + $0x8] sm:$0xff]  ;;  %v13_v6 = vld [vmem:[%s617_s0 + $0x10] sm:$0xff] }
   0x2   :  { %v11_v1 = vld [vmem:[%s617_s0] sm:$0xff]  ;;  %410 = vmatprep.subr.mxu0 %v456_v0  ;;  %436 = vmatprep.subr.mxu1 %v456_v0  ;;  %v20_v5 = vld [vmem:[%s617_s0 + $0x48] sm:$0xff]  ;;  %v21_v7 = vld [vmem:[%s617_s0 + $0x50] sm:$0xff]  ;;  %v224_v9 = vmul.f32 %v13_v6, %v13_v6  ;;  %v223_v12 = vmul.f32 %v12_v4, %v12_v4  ;;  %v286_v53 = vmul.f32 %v456_v0, %v456_v0 }
   0x3   :  { %v19_v2 = vld [vmem:[%s617_s0 + $0x40] sm:$0xff]  ;;  %v222_v3 = vmul.f32 %v11_v1, %v11_v1  ;;  %411 = vmatpush3.msra.mxu0 %v456_v0  ;;  %437 = vmatpush3.msra.mxu1 %v456_v0  ;;  %v14_v8 = vld [vmem:[%s617_s0 + $0x18] sm:$0xff]  ;;  %v16_v17 = vld [vmem:[%s617_s0 + $0x28] sm:$0xff]  ;;  %v231_v34 = vmul.f32 %v20_v5, %v20_v5  ;;  %v232_v38 = vmul.f32 %v21_v7, %v21_v7 }
   0x4   :  { %412 = vmatprep.mubr.msk.f32.mxu0 %vm28_vm0, %v11_v1  ;;  %424 = vmatprep.mubr.msk.f32.mxu1 %vm28_vm0, %v19_v2  ;;  %v225_v11 = vmul.f32 %v14_v8, %v14_v8  ;;  %v244_v13 = vsel %vm28_vm0, %v224_v9, 0.0  ;;  %v22_v14 = vld [vmem:[%s617_s0 + $0x58] sm:$0xff]  ;;  %v15_v15 = vld [vmem:[%s617_s0 + $0x20] sm:$0xff]  ;;  %v241_v19 = vsel %vm28_vm0, %v223_v12, 0.0  ;;  %v227_v20 = vmul.f32 %v16_v17, %v16_v17  ;;  %v24_v22 = vld [vmem:[%s617_s0 + $0x68] sm:$0xff] }
   0x5   :  { %v238_v10 = vsel %vm28_vm0, %v222_v3, 0.0  ;;  %413 = vmatmul.mubr.msk.f32.vlgmr.msra.gmra.mrb[0].mxu0 %vm28_vm0, %v12_v4  ;;  %425 = vmatmul.mubr.msk.f32.vlgmr.msra.gmra.mrb[0].mxu1 %vm28_vm0, %v20_v5  ;;  %v23_v16 = vld [vmem:[%s617_s0 + $0x60] sm:$0xff]  ;;  %v226_v21 = vmul.f32 %v15_v15, %v15_v15  ;;  %v17_v23 = vld [vmem:[%s617_s0 + $0x30] sm:$0xff]  ;;  %v18_v25 = vld [vmem:[%s617_s0 + $0x38] sm:$0xff]  ;;  %v230_v31 = vmul.f32 %v19_v2, %v19_v2  ;;  %v265_v35 = vsel %vm28_vm0, %v231_v34, 0.0 }
   0x6   :  { %415 = vmatprep.mubr.msk.f32.mxu0 %vm28_vm0, %v13_v6  ;;  %427 = vmatprep.mubr.msk.f32.mxu1 %vm28_vm0, %v21_v7  ;;  %v247_v18 = vsel %vm28_vm0, %v225_v11, 0.0  ;;  %v25_v24 = vld [vmem:[%s617_s0 + $0x70] sm:$0xff]  ;;  %v253_v26 = vsel %vm28_vm0, %v227_v20, 0.0  ;;  %v229_v28 = vmul.f32 %v18_v25, %v18_v25  ;;  %v228_v29 = vmul.f32 %v17_v23, %v17_v23  ;;  %v26_v30 = vld [vmem:[%s617_s0 + $0x78] sm:$0xff] }
   0x7   :  { %245 = vadd.xlane.f32.xlu1 %v244_v13  ;;  %239 = vadd.xlane.f32.xlu0 %v238_v10  ;;  %v250_v27 = vsel %vm28_vm0, %v226_v21, 0.0  ;;  %v262_v36 = vsel %vm28_vm0, %v230_v31, 0.0  ;;  %v233_v37 = vmul.f32 %v22_v14, %v22_v14  ;;  %v268_v40 = vsel %vm28_vm0, %v232_v38, 0.0 }
   0x8   :  { %v259_v32 = vsel %vm28_vm0, %v229_v28, 0.0  ;;  %v256_v33 = vsel %vm28_vm0, %v228_v29, 0.0  ;;  %v235_v41 = vmul.f32 %v24_v22, %v24_v22  ;;  %v234_v42 = vmul.f32 %v23_v16, %v23_v16 }
   0x9   :  { %416 = vmatmul.mubr.msk.f32.gmra.mrb[2].mxu0 %vm28_vm0, %v14_v8  ;;  %428 = vmatmul.mubr.msk.f32.gmra.mrb[2].mxu1 %vm28_vm0, %v22_v14  ;;  %v271_v39 = vsel %vm28_vm0, %v233_v37, 0.0  ;;  %v237_v45 = vmul.f32 %v26_v30, %v26_v30  ;;  %v236_v46 = vmul.f32 %v25_v24, %v25_v24  ;;  %v287_v56 = vrot.slane %v286_v53, 4 }
   0xa   :  { %418 = vmatprep.mubr.msk.f32.mxu0 %vm28_vm0, %v15_v15  ;;  %430 = vmatprep.mubr.msk.f32.mxu1 %vm28_vm0, %v23_v16  ;;  %v277_v43 = vsel %vm28_vm0, %v235_v41, 0.0  ;;  %v274_v44 = vsel %vm28_vm0, %v234_v42, 0.0 }
   0xb   :  { %248 = vadd.xlane.f32.xlu1 %v247_v18  ;;  %242 = vadd.xlane.f32.xlu0 %v241_v19  ;;  %v283_v47 = vsel %vm28_vm0, %v237_v45, 0.0  ;;  %v280_v48 = vsel %vm28_vm0, %v236_v46, 0.0  ;;  %v288_v57 = vadd.f32 %v287_v56, %v286_v53 }
   0xd   :  { %419 = vmatmul.mubr.msk.f32.gmra.mrb[4].mxu0 %vm28_vm0, %v16_v17  ;;  %431 = vmatmul.mubr.msk.f32.gmra.mrb[4].mxu1 %vm28_vm0, %v24_v22  ;;  %v289_v60 = vrot.slane %v288_v57, 2 }
   0xe   :  { %421 = vmatprep.mubr.msk.f32.mxu0 %vm28_vm0, %v17_v23  ;;  %433 = vmatprep.mubr.msk.f32.mxu1 %vm28_vm0, %v25_v24 }
   0xf   :  { %254 = vadd.xlane.f32.xlu1 %v253_v26  ;;  %251 = vadd.xlane.f32.xlu0 %v250_v27  ;;  %v290_v63 = vadd.f32 %v289_v60, %v288_v57 }
  0x11   :  { %422 = vmatmul.mubr.msk.f32.gmra.mrb[6].mxu0 %vm28_vm0, %v18_v25  ;;  %434 = vmatmul.mubr.msk.f32.gmra.mrb[6].mxu1 %vm28_vm0, %v26_v30  ;;  %v291_v1 = vrot.slane %v290_v63, 1 }
  0x13   :  { %260 = vadd.xlane.f32.xlu1 %v259_v32  ;;  %257 = vadd.xlane.f32.xlu0 %v256_v33  ;;  %v548_v4 = vadd.f32 %v291_v1, %v290_v63 }
  0x17   :  { %266 = vadd.xlane.f32.xlu1 %v265_v35  ;;  %263 = vadd.xlane.f32.xlu0 %v262_v36 }
  0x1b   :  { %272 = vadd.xlane.f32.xlu1 %v271_v39  ;;  %269 = vadd.xlane.f32.xlu0 %v268_v40 }
  0x1f   :  { %278 = vadd.xlane.f32.xlu1 %v277_v43  ;;  %275 = vadd.xlane.f32.xlu0 %v274_v44 }
  0x23   :  { %284 = vadd.xlane.f32.xlu1 %v283_v47  ;;  %281 = vadd.xlane.f32.xlu0 %v280_v48 }
  0x94   :  { %v246_v49 = vpop.xlane.xlu1 %245  ;;  %v240_v50 = vpop.xlane.xlu0 %239 }
  0x95   :  { %v293_v15 = vadd.f32 %v548_v4, %v240_v50  ;;  %v295_v18 = vadd.f32 %v548_v4, %v246_v49 }
  0x98   :  { %v249_v51 = vpop.xlane.xlu1 %248  ;;  %v243_v52 = vpop.xlane.xlu0 %242 }
  0x99   :  { %v294_v10 = vadd.f32 %v548_v4, %v243_v52  ;;  %v296_v22 = vadd.f32 %v548_v4, %v249_v51 }
  0x9c   :  { %v255_v54 = vpop.xlane.xlu1 %254  ;;  %v252_v55 = vpop.xlane.xlu0 %251 }
  0x9d   :  { %v298_v38 = vadd.f32 %v548_v4, %v255_v54  ;;  %v297_v44 = vadd.f32 %v548_v4, %v252_v55 }
  0xa0   :  { %v544_v58 = vpop.xlane.xlu1 %260  ;;  %v546_v59 = vpop.xlane.xlu0 %257 }
  0xa4   :  { %v267_v61 = vpop.xlane.xlu1 %266  ;;  %v264_v62 = vpop.xlane.xlu0 %263 }
  0xa5   :  { %v302_v5 = vadd.f32 %v548_v4, %v267_v61  ;;  %v301_v9 = vadd.f32 %v548_v4, %v264_v62  ;;  %v300_v62 = vadd.f32 %v548_v4, %v544_v58 }
  0xa8   :  { %v273_v2 = vpop.xlane.xlu1 %272  ;;  %v270_v3 = vpop.xlane.xlu0 %269 }
  0xa9   :  { %v304_v21 = vadd.f32 %v548_v4, %v273_v2  ;;  %v303_v27 = vadd.f32 %v548_v4, %v270_v3  ;;  %v299_v3 = vadd.f32 %v548_v4, %v546_v59 }
  0xac   :  { %v279_v0 = vpop.xlane.xlu1 %278  ;;  %v276_v6 = vpop.xlane.xlu0 %275 }
  0xad   :  { %v306_v41 = vadd.f32 %v548_v4, %v279_v0  ;;  %v305_v49 = vadd.f32 %v548_v4, %v276_v6 }
  0xb0   :  { %v285_v42 = vpop.xlane.xlu1 %284  ;;  %v282_v43 = vpop.xlane.xlu0 %281 }
  0xb1   :  { %v308_v2 = vadd.f32 %v548_v4, %v285_v42 }
  0xd8   :  { %v426_v7 = vpop.f32.mrb[0].mxu1  ;;  %v414_v8 = vpop.f32.mrb[0].mxu0 }
  0xd9   :  { %v318_v11 = vmul.f32 2.0, %v426_v7  ;;  %v310_v12 = vmul.f32 2.0, %v414_v8  ;;  %v183_v13 = vpop.f32.mrb[1].mxu1  ;;  %v143_v14 = vpop.f32.mrb[1].mxu0  ;;  %v307_v7 = vadd.f32 %v548_v4, %v282_v43 }
  0xda   :  { %v317_v16 = vmul.f32 2.0, %v183_v13  ;;  %v309_v17 = vmul.f32 2.0, %v143_v14 }
  0xdb   :  { %v334_v19 = vsub.f32 %v302_v5, %v318_v11  ;;  %v326_v20 = vsub.f32 %v294_v10, %v310_v12 }
  0xdc   :  { %v333_v23 = vsub.f32 %v301_v9, %v317_v16  ;;  %v325_v24 = vsub.f32 %v293_v15, %v309_v17  ;;  %v429_v25 = vpop.f32.mrb[2].mxu1  ;;  %v417_v26 = vpop.f32.mrb[2].mxu0 }
  0xdd   :  { %v350_v28 = vmax.f32 %v334_v19, 0.0  ;;  %v342_v29 = vmax.f32 %v326_v20, 0.0  ;;  %v320_v30 = vmul.f32 2.0, %v429_v25  ;;  %v312_v31 = vmul.f32 2.0, %v417_v26  ;;  %v193_v32 = vpop.f32.mrb[3].mxu1  ;;  %v153_v33 = vpop.f32.mrb[3].mxu0 }
  0xde   :  { %v349_v34 = vmax.f32 %v333_v23, 0.0  ;;  %v341_v35 = vmax.f32 %v325_v24, 0.0  ;;  %v319_v36 = vmul.f32 2.0, %v193_v32  ;;  %v311_v37 = vmul.f32 2.0, %v153_v33 }
  0xdf   :  { %366 = vst [vmem:[%s618_s2 + $0x48] sm:$0xff] %v350_v28  ;;  %358 = vst [vmem:[%s618_s2 + $0x8] sm:$0xff] %v342_v29  ;;  %v336_v39 = vsub.f32 %v304_v21, %v320_v30  ;;  %v328_v40 = vsub.f32 %v296_v22, %v312_v31 }
  0xe0   :  { %365 = vst [vmem:[%s618_s2 + $0x40] sm:$0xff] %v349_v34  ;;  %357 = vst [vmem:[%s618_s2] sm:$0xff] %v341_v35  ;;  %v335_v45 = vsub.f32 %v303_v27, %v319_v36  ;;  %v327_v46 = vsub.f32 %v295_v18, %v311_v37  ;;  %v432_v47 = vpop.f32.mrb[4].mxu1  ;;  %v420_v48 = vpop.f32.mrb[4].mxu0 }
  0xe1   :  { %v352_v50 = vmax.f32 %v336_v39, 0.0  ;;  %v344_v51 = vmax.f32 %v328_v40, 0.0  ;;  %v322_v52 = vmul.f32 2.0, %v432_v47  ;;  %v314_v53 = vmul.f32 2.0, %v420_v48  ;;  %v203_v54 = vpop.f32.mrb[5].mxu1  ;;  %v163_v55 = vpop.f32.mrb[5].mxu0 }
  0xe2   :  { %v351_v56 = vmax.f32 %v335_v45, 0.0  ;;  %v343_v57 = vmax.f32 %v327_v46, 0.0  ;;  %v321_v60 = vmul.f32 2.0, %v203_v54  ;;  %v313_v61 = vmul.f32 2.0, %v163_v55 }
  0xe3   :  { %368 = vst [vmem:[%s618_s2 + $0x58] sm:$0xff] %v352_v50  ;;  %360 = vst [vmem:[%s618_s2 + $0x18] sm:$0xff] %v344_v51  ;;  %v338_v63 = vsub.f32 %v306_v41, %v322_v52  ;;  %v330_v1 = vsub.f32 %v298_v38, %v314_v53 }
  0xe4   :  { %367 = vst [vmem:[%s618_s2 + $0x50] sm:$0xff] %v351_v56  ;;  %359 = vst [vmem:[%s618_s2 + $0x10] sm:$0xff] %v343_v57  ;;  %v337_v58 = vsub.f32 %v305_v49, %v321_v60  ;;  %v329_v5 = vsub.f32 %v297_v44, %v313_v61  ;;  %v435_v0 = vpop.f32.mrb[6].mxu1  ;;  %v423_v6 = vpop.f32.mrb[6].mxu0 }
  0xe5   :  { %v354_v8 = vmax.f32 %v338_v63, 0.0  ;;  %v346_v9 = vmax.f32 %v330_v1, 0.0  ;;  %v324_v10 = vmul.f32 2.0, %v435_v0  ;;  %v316_v11 = vmul.f32 2.0, %v423_v6  ;;  %v213_v12 = vpop.f32.mrb[7].mxu1  ;;  %v173_v59 = vpop.f32.mrb[7].mxu0 }
  0xe6   :  { %v353_v13 = vmax.f32 %v337_v58, 0.0  ;;  %v345_v14 = vmax.f32 %v329_v5, 0.0  ;;  %v323_v15 = vmul.f32 2.0, %v213_v12  ;;  %v315_v16 = vmul.f32 2.0, %v173_v59 }
  0xe7   :  { %370 = vst [vmem:[%s618_s2 + $0x68] sm:$0xff] %v354_v8  ;;  %362 = vst [vmem:[%s618_s2 + $0x28] sm:$0xff] %v346_v9  ;;  %v340_v17 = vsub.f32 %v308_v2, %v324_v10  ;;  %v332_v4 = vsub.f32 %v300_v62, %v316_v11 }
  0xe8   :  { %369 = vst [vmem:[%s618_s2 + $0x60] sm:$0xff] %v353_v13  ;;  %361 = vst [vmem:[%s618_s2 + $0x20] sm:$0xff] %v345_v14  ;;  %v339_v18 = vsub.f32 %v307_v7, %v323_v15  ;;  %v331_v19 = vsub.f32 %v299_v3, %v315_v16 }
  0xe9   :  { %v356_v20 = vmax.f32 %v340_v17, 0.0  ;;  %v348_v21 = vmax.f32 %v332_v4, 0.0 }
  0xea   :  { %v355_v22 = vmax.f32 %v339_v18, 0.0  ;;  %v347_v23 = vmax.f32 %v331_v19, 0.0 }
  0xeb   :  { %372 = vst [vmem:[%s618_s2 + $0x78] sm:$0xff] %v356_v20  ;;  %364 = vst [vmem:[%s618_s2 + $0x38] sm:$0xff] %v348_v21 }
  0xec   :  { %371 = vst [vmem:[%s618_s2 + $0x70] sm:$0xff] %v355_v22  ;;  %363 = vst [vmem:[%s618_s2 + $0x30] sm:$0xff] %v347_v23 }

// kernel: neg.8
= control target key start
LH: loop header
LB: loop body
LE: loop exit
PB: predicated region body
PF: predicated region fallthrough
CT: control target
= control target key end

     0   :  { %s264_s0 = inlined_call_operand.vmem [shape: f32[128,128], index: 0, kind: input, shape index: {}]   ;;  %s265_s1 = inlined_call_operand.vmem [shape: f32[128,128], index: 1, kind: output, shape index: {}]  }
   0x1   :  { %v2_v0 = vld [vmem:[%s264_s0] sm:$0xff]  ;;  %v128_v1 = vld [vmem:[%s264_s0 + $0x8] sm:$0xff]  ;;  %v130_v2 = vld [vmem:[%s264_s0 + $0x10] sm:$0xff] }
   0x2   :  { %v5_v3 = vxor.u32 2147483648, %v2_v0  ;;  %v12_v4 = vxor.u32 2147483648, %v128_v1  ;;  %v20_v5 = vxor.u32 2147483648, %v130_v2  ;;  %v132_v6 = vld [vmem:[%s264_s0 + $0x18] sm:$0xff]  ;;  %v134_v7 = vld [vmem:[%s264_s0 + $0x20] sm:$0xff]  ;;  %v136_v8 = vld [vmem:[%s264_s0 + $0x28] sm:$0xff] }
   0x3   :  { %v28_v9 = vxor.u32 2147483648, %v132_v6  ;;  %v36_v10 = vxor.u32 2147483648, %v134_v7  ;;  %v44_v11 = vxor.u32 2147483648, %v136_v8  ;;  %v138_v12 = vld [vmem:[%s264_s0 + $0x30] sm:$0xff]  ;;  %v140_v13 = vld [vmem:[%s264_s0 + $0x38] sm:$0xff]  ;;  %v142_v14 = vld [vmem:[%s264_s0 + $0x40] sm:$0xff] }
   0x4   :  { %7 = vst [vmem:[%s265_s1] sm:$0xff] %v5_v3  ;;  %129 = vst [vmem:[%s265_s1 + $0x8] sm:$0xff] %v12_v4  ;;  %v52_v15 = vxor.u32 2147483648, %v138_v12  ;;  %v60_v16 = vxor.u32 2147483648, %v140_v13  ;;  %v68_v17 = vxor.u32 2147483648, %v142_v14  ;;  %v144_v18 = vld [vmem:[%s264_s0 + $0x48] sm:$0xff]  ;;  %v146_v19 = vld [vmem:[%s264_s0 + $0x50] sm:$0xff] }
   0x5   :  { %131 = vst [vmem:[%s265_s1 + $0x10] sm:$0xff] %v20_v5  ;;  %v148_v20 = vld [vmem:[%s264_s0 + $0x58] sm:$0xff]  ;;  %133 = vst [vmem:[%s265_s1 + $0x18] sm:$0xff] %v28_v9  ;;  %v76_v21 = vxor.u32 2147483648, %v144_v18  ;;  %v84_v22 = vxor.u32 2147483648, %v146_v19  ;;  %v150_v24 = vld [vmem:[%s264_s0 + $0x60] sm:$0xff] }
   0x6   :  { %135 = vst [vmem:[%s265_s1 + $0x20] sm:$0xff] %v36_v10  ;;  %137 = vst [vmem:[%s265_s1 + $0x28] sm:$0xff] %v44_v11  ;;  %v92_v23 = vxor.u32 2147483648, %v148_v20  ;;  %v152_v25 = vld [vmem:[%s264_s0 + $0x68] sm:$0xff]  ;;  %v154_v26 = vld [vmem:[%s264_s0 + $0x70] sm:$0xff]  ;;  %v100_v27 = vxor.u32 2147483648, %v150_v24 }
   0x7   :  { %139 = vst [vmem:[%s265_s1 + $0x30] sm:$0xff] %v52_v15  ;;  %141 = vst [vmem:[%s265_s1 + $0x38] sm:$0xff] %v60_v16  ;;  %v108_v28 = vxor.u32 2147483648, %v152_v25  ;;  %v116_v29 = vxor.u32 2147483648, %v154_v26  ;;  %v156_v30 = vld [vmem:[%s264_s0 + $0x78] sm:$0xff] }
   0x8   :  { %143 = vst [vmem:[%s265_s1 + $0x40] sm:$0xff] %v68_v17  ;;  %145 = vst [vmem:[%s265_s1 + $0x48] sm:$0xff] %v76_v21  ;;  %v124_v31 = vxor.u32 2147483648, %v156_v30 }
   0x9   :  { %147 = vst [vmem:[%s265_s1 + $0x50] sm:$0xff] %v84_v22  ;;  %149 = vst [vmem:[%s265_s1 + $0x58] sm:$0xff] %v92_v23 }
   0xa   :  { %151 = vst [vmem:[%s265_s1 + $0x60] sm:$0xff] %v100_v27  ;;  %153 = vst [vmem:[%s265_s1 + $0x68] sm:$0xff] %v108_v28 }
   0xb   :  { %155 = vst [vmem:[%s265_s1 + $0x70] sm:$0xff] %v116_v29  ;;  %157 = vst [vmem:[%s265_s1 + $0x78] sm:$0xff] %v124_v31 }

// kernel: pointnet_forward.11
= control target key start
LH: loop header
LB: loop body
LE: loop exit
PB: predicated region body
PF: predicated region fallthrough
CT: control target
= control target key end

     0   :  { %vm1605_vm0 = vcmask 1041409   ;;  %vm1607_vm1 = vcmask 1042434   ;;  %vm1609_vm2 = vcmask 1043459   ;;  %vm1611_vm3 = vcmask 1044484   ;;  %s2438_s1 = inlined_call_operand.vmem [shape: bf16[128,128], index: 1, kind: input, shape index: {}]   ;;  %s2439_s0 = inlined_call_operand.vmem [shape: bf16[512,128], index: 0, kind: input, shape index: {}]   ;;  %s2440_s3 = inlined_call_operand.vmem [shape: bf16[128,128], index: 3, kind: input, shape index: {}]   ;;  %s2441_s2 = inlined_call_operand.vmem [shape: f32[1,128], index: 2, kind: input, shape index: {}]   ;;  %s2442_s4 = inlined_call_operand.vmem [shape: f32[1,128], index: 4, kind: input, shape index: {}]   ;;  %s2443_s5 = inlined_call_operand.vmem [shape: f32[64,128], index: 5, kind: output, shape index: {}]  }
   0x1   :  { %v1978_v0 = vld [vmem:[%s2438_s1] sm:$0xff]   ;;  %v1979_v1 = vld [vmem:[%s2438_s1 + $0x8] sm:$0xff]   ;;  %v1980_v2 = vld [vmem:[%s2438_s1 + $0x10] sm:$0xff]   ;;  %vm1613_vm4 = vcmask 1045509   ;;  %vm1615_vm5 = vcmask 1046534   ;;  %vm1617_vm6 = vcmask 1047559  }
   0x2   :  { %1818 = vmatprep.subr.bf16.mxu0 %v1978_v0  ;;  %v1981_v3 = vld [vmem:[%s2438_s1 + $0x18] sm:$0xff]   ;;  %v1986_v4 = vld [vmem:[%s2439_s0] sm:$0xff]   ;;  %v1983_v6 = vld [vmem:[%s2438_s1 + $0x28] sm:$0xff]  }
   0x3   :  { %1819 = vmatpush3.bf16.msra.mxu0 %v1978_v0  ;;  %1834 = vmatprep.mubr.bf16.mxu0 %v1986_v4  ;;  %v1982_v5 = vld [vmem:[%s2438_s1 + $0x20] sm:$0xff]   ;;  %v1984_v7 = vld [vmem:[%s2438_s1 + $0x30] sm:$0xff]   ;;  %v1985_v8 = vld [vmem:[%s2438_s1 + $0x38] sm:$0xff]  }
   0x4   :  { %1820 = vmatprep.subr.bf16.mxu0 %v1979_v1  ;;  %v1987_v9 = vld [vmem:[%s2439_s0 + $0x8] sm:$0xff]   ;;  %v1988_v10 = vld [vmem:[%s2439_s0 + $0x10] sm:$0xff]   ;;  %v1989_v11 = vld [vmem:[%s2439_s0 + $0x18] sm:$0xff]  }
   0x5   :  { %v1990_v12 = vld [vmem:[%s2439_s0 + $0x20] sm:$0xff]   ;;  %v2019_v14 = vld [vmem:[%s2440_s3 + $0x8] sm:$0xff]   ;;  %v2020_v15 = vld [vmem:[%s2440_s3 + $0x10] sm:$0xff]  }
   0x6   :  { %v2018_v13 = vld [vmem:[%s2440_s3] sm:$0xff]   ;;  %v1991_v16 = vld [vmem:[%s2439_s0 + $0x28] sm:$0xff]   ;;  %v1992_v17 = vld [vmem:[%s2439_s0 + $0x30] sm:$0xff]  }
   0x7   :  { %1821 = vmatpush3.bf16.msra.mxu0 %v1979_v1  ;;  %1898 = vmatprep.subr.bf16.mxu1 %v2018_v13  ;;  %v2021_v18 = vld [vmem:[%s2440_s3 + $0x18] sm:$0xff]   ;;  %v2022_v19 = vld [vmem:[%s2440_s3 + $0x20] sm:$0xff]   ;;  %v2023_v22 = vld [vmem:[%s2440_s3 + $0x28] sm:$0xff]  }
   0x8   :  { %1822 = vmatprep.subr.bf16.mxu0 %v1980_v2  ;;  %1899 = vmatpush3.bf16.msra.mxu1 %v2018_v13  ;;  %v1993_v20 = vld [vmem:[%s2439_s0 + $0x38] sm:$0xff]   ;;  %v1994_v21 = vld [vmem:[%s2439_s0 + $0x40] sm:$0xff]   ;;  %v1995_v23 = vld [vmem:[%s2439_s0 + $0x48] sm:$0xff]  }
   0x9   :  { %1900 = vmatprep.subr.bf16.mxu1 %v2019_v14  ;;  %v1996_v24 = vld [vmem:[%s2439_s0 + $0x50] sm:$0xff]   ;;  %v1997_v25 = vld [vmem:[%s2439_s0 + $0x58] sm:$0xff]   ;;  %v1998_v26 = vld [vmem:[%s2439_s0 + $0x60] sm:$0xff]  }
   0xa   :  { %v1999_v27 = vld [vmem:[%s2439_s0 + $0x68] sm:$0xff]   ;;  %v2000_v28 = vld [vmem:[%s2439_s0 + $0x70] sm:$0xff]   ;;  %v2001_v29 = vld [vmem:[%s2439_s0 + $0x78] sm:$0xff]  }
   0xb   :  { %1823 = vmatpush3.bf16.msra.mxu0 %v1980_v2  ;;  %v2002_v30 = vld [vmem:[%s2439_s0 + $0x80] sm:$0xff]   ;;  %v2003_v31 = vld [vmem:[%s2439_s0 + $0x88] sm:$0xff]   ;;  %v2004_v32 = vld [vmem:[%s2439_s0 + $0x90] sm:$0xff]  }
   0xc   :  { %1824 = vmatprep.subr.bf16.mxu0 %v1981_v3  ;;  %1901 = vmatpush3.bf16.msra.mxu1 %v2019_v14  ;;  %v2005_v33 = vld [vmem:[%s2439_s0 + $0x98] sm:$0xff]   ;;  %v2006_v34 = vld [vmem:[%s2439_s0 + $0xa0] sm:$0xff]   ;;  %v2007_v35 = vld [vmem:[%s2439_s0 + $0xa8] sm:$0xff]  }
   0xd   :  { %1902 = vmatprep.subr.bf16.mxu1 %v2020_v15  ;;  %v2008_v36 = vld [vmem:[%s2439_s0 + $0xb0] sm:$0xff]   ;;  %v2009_v37 = vld [vmem:[%s2439_s0 + $0xb8] sm:$0xff]   ;;  %v2010_v39 = vld [vmem:[%s2439_s0 + $0xc0] sm:$0xff]  }
   0xe   :  { %v2024_v38 = vld [vmem:[%s2440_s3 + $0x30] sm:$0xff]   ;;  %v2025_v40 = vld [vmem:[%s2440_s3 + $0x38] sm:$0xff]   ;;  %v2011_v41 = vld [vmem:[%s2439_s0 + $0xc8] sm:$0xff]  }
   0xf   :  { %1825 = vmatpush3.bf16.msra.mxu0 %v1981_v3  ;;  %v2012_v42 = vld [vmem:[%s2439_s0 + $0xd0] sm:$0xff]   ;;  %v2013_v43 = vld [vmem:[%s2439_s0 + $0xd8] sm:$0xff]   ;;  %v2014_v44 = vld [vmem:[%s2439_s0 + $0xe0] sm:$0xff]  }
  0x10   :  { %1826 = vmatprep.subr.bf16.mxu0 %v1982_v5  ;;  %1903 = vmatpush3.bf16.msra.mxu1 %v2020_v15  ;;  %v2015_v45 = vld [vmem:[%s2439_s0 + $0xe8] sm:$0xff]   ;;  %v2016_v46 = vld [vmem:[%s2439_s0 + $0xf0] sm:$0xff]   ;;  %v2017_v47 = vld [vmem:[%s2439_s0 + $0xf8] sm:$0xff]  }
  0x11   :  { %1904 = vmatprep.subr.bf16.mxu1 %v2021_v18  ;;  %v2204_v48 = vld [vmem:[%s2441_s2] ss:$0 sm:$0xff] }
  0x13   :  { %1827 = vmatpush3.bf16.msra.mxu0 %v1982_v5 }
  0x14   :  { %1828 = vmatprep.subr.bf16.mxu0 %v1983_v6  ;;  %1905 = vmatpush3.bf16.msra.mxu1 %v2021_v18 }
  0x15   :  { %1906 = vmatprep.subr.bf16.mxu1 %v2022_v19 }
  0x17   :  { %1829 = vmatpush3.bf16.msra.mxu0 %v1983_v6 }
  0x18   :  { %1830 = vmatprep.subr.bf16.mxu0 %v1984_v7  ;;  %1907 = vmatpush3.bf16.msra.mxu1 %v2022_v19 }
  0x19   :  { %1908 = vmatprep.subr.bf16.mxu1 %v2023_v22 }
  0x1b   :  { %1831 = vmatpush3.bf16.msra.mxu0 %v1984_v7 }
  0x1c   :  { %1832 = vmatprep.subr.bf16.mxu0 %v1985_v8  ;;  %1909 = vmatpush3.bf16.msra.mxu1 %v2023_v22 }
  0x1d   :  { %1910 = vmatprep.subr.bf16.mxu1 %v2024_v38 }
  0x1f   :  { %1833 = vmatpush3.bf16.msra.mxu0 %v1985_v8 }
  0x20   :  { %1911 = vmatpush3.bf16.msra.mxu1 %v2024_v38 }
  0x21   :  { %1912 = vmatprep.subr.bf16.mxu1 %v2025_v40 }
  0x22   :  { %1835 = vmatmul.mubr.bf16.vlgmr.msra.gmra.mrb[0].mxu0 %v1987_v9 }
  0x23   :  { %1838 = vmatprep.mubr.bf16.mxu0 %v1988_v10 }
  0x24   :  { %1913 = vmatpush3.bf16.msra.mxu1 %v2025_v40 }
  0x2a   :  { %1839 = vmatmul.mubr.bf16.gmra.mrb[4].mxu0 %v1989_v11 }
  0x2b   :  { %1842 = vmatprep.mubr.bf16.mxu0 %v1990_v12 }
  0x32   :  { %1843 = vmatmul.mubr.bf16.gmra.mrb[8].mxu0 %v1991_v16 }
  0x33   :  { %1846 = vmatprep.mubr.bf16.mxu0 %v1992_v17 }
  0x3a   :  { %1847 = vmatmul.mubr.bf16.gmra.mrb[12].mxu0 %v1993_v20 }
  0x3b   :  { %1850 = vmatprep.mubr.bf16.mxu0 %v1994_v21 }
  0x42   :  { %1851 = vmatmul.mubr.bf16.gmra.mrb[16].mxu0 %v1995_v23 }
  0x43   :  { %1854 = vmatprep.mubr.bf16.mxu0 %v1996_v24 }
  0x4a   :  { %1855 = vmatmul.mubr.bf16.gmra.mrb[20].mxu0 %v1997_v25 }
  0x4b   :  { %1858 = vmatprep.mubr.bf16.mxu0 %v1998_v26 }
  0x52   :  { %1859 = vmatmul.mubr.bf16.gmra.mrb[24].mxu0 %v1999_v27 }
  0x53   :  { %1862 = vmatprep.mubr.bf16.mxu0 %v2000_v28 }
  0x5a   :  { %1863 = vmatmul.mubr.bf16.gmra.mrb[28].mxu0 %v2001_v29 }
  0x5b   :  { %1866 = vmatprep.mubr.bf16.mxu0 %v2002_v30 }
  0x62   :  { %1867 = vmatmul.mubr.bf16.gmra.mrb[32].mxu0 %v2003_v31 }
  0x63   :  { %1870 = vmatprep.mubr.bf16.mxu0 %v2004_v32 }
  0x6a   :  { %1871 = vmatmul.mubr.bf16.gmra.mrb[36].mxu0 %v2005_v33 }
  0x6b   :  { %1874 = vmatprep.mubr.bf16.mxu0 %v2006_v34 }
  0x72   :  { %1875 = vmatmul.mubr.bf16.gmra.mrb[40].mxu0 %v2007_v35 }
  0x73   :  { %1878 = vmatprep.mubr.bf16.mxu0 %v2008_v36 }
  0x7a   :  { %1879 = vmatmul.mubr.bf16.gmra.mrb[44].mxu0 %v2009_v37 }
  0x7b   :  { %1882 = vmatprep.mubr.bf16.mxu0 %v2010_v39 }
  0x82   :  { %1883 = vmatmul.mubr.bf16.gmra.mrb[48].mxu0 %v2011_v41 }
  0x83   :  { %1886 = vmatprep.mubr.bf16.mxu0 %v2012_v42 }
  0x8a   :  { %1887 = vmatmul.mubr.bf16.gmra.mrb[52].mxu0 %v2013_v43 }
  0x8b   :  { %1890 = vmatprep.mubr.bf16.mxu0 %v2014_v44 }
  0x92   :  { %1891 = vmatmul.mubr.bf16.gmra.mrb[56].mxu0 %v2015_v45 }
  0x93   :  { %1894 = vmatprep.mubr.bf16.mxu0 %v2016_v46 }
  0x9a   :  { %1895 = vmatmul.mubr.bf16.gmra.mrb[60].mxu0 %v2017_v47 }
  0xf5   :  { %v1836_v49 = vpop.f32.mrb[0].mxu0 }
  0xf6   :  { %v391_v50 = vadd.f32 %v1836_v49, %v2204_v48  ;;  %v382_v51 = vpop.f32.mrb[1].mxu0 }
  0xf7   :  { %v383_v52 = vadd.f32 %v2204_v48, %v382_v51  ;;  %v1837_v53 = vpop.f32.mrb[2].mxu0 }
  0xf8   :  { %v394_v54 = vadd.f32 %v1837_v53, %v2204_v48  ;;  %v385_v55 = vpop.f32.mrb[3].mxu0  ;;  %v639_v57 = vmax.f32 %v391_v50, 0.0 }
  0xf9   :  { %v386_v56 = vadd.f32 %v2204_v48, %v385_v55  ;;  %v637_v59 = vmax.f32 %v383_v52, 0.0 }
  0xfa   :  { %v640_v58 = vmax.f32 %v394_v54, 0.0 }
  0xfb   :  { %v638_v60 = vmax.f32 %v386_v56, 0.0 }
  0xfc   :  { %v702_v61 = vpack.c.bf16 %v640_v58, %v639_v57 }
  0xfd   :  { %v1840_v62 = vpop.f32.mrb[4].mxu0  ;;  %v701_v63 = vpack.c.bf16 %v638_v60, %v637_v59 }
  0xfe   :  { %v407_v0 = vadd.f32 %v1840_v62, %v2204_v48  ;;  %v398_v1 = vpop.f32.mrb[5].mxu0 }
  0xff   :  { %v399_v2 = vadd.f32 %v2204_v48, %v398_v1  ;;  %v1841_v3 = vpop.f32.mrb[6].mxu0  ;;  %1914 = vmatprep.mubr.bf16.mxu1 %v701_v63 }
 0x100   :  { %v410_v4 = vadd.f32 %v1841_v3, %v2204_v48  ;;  %v401_v5 = vpop.f32.mrb[7].mxu0  ;;  %1915 = vmatmul.mubr.bf16.vlgmr.msra.gmra.mrb[0].mxu1 %v702_v61  ;;  %v643_v7 = vmax.f32 %v407_v0, 0.0 }
 0x101   :  { %v402_v6 = vadd.f32 %v2204_v48, %v401_v5  ;;  %v641_v9 = vmax.f32 %v399_v2, 0.0 }
 0x102   :  { %v644_v8 = vmax.f32 %v410_v4, 0.0 }
 0x103   :  { %v642_v10 = vmax.f32 %v402_v6, 0.0 }
 0x104   :  { %v704_v11 = vpack.c.bf16 %v644_v8, %v643_v7 }
 0x105   :  { %v703_v12 = vpack.c.bf16 %v642_v10, %v641_v9  ;;  %v1844_v13 = vpop.f32.mrb[8].mxu0 }
 0x106   :  { %v423_v14 = vadd.f32 %v1844_v13, %v2204_v48  ;;  %v414_v15 = vpop.f32.mrb[9].mxu0 }
 0x107   :  { %v415_v16 = vadd.f32 %v2204_v48, %v414_v15  ;;  %v1845_v17 = vpop.f32.mrb[10].mxu0  ;;  %1918 = vmatprep.mubr.bf16.mxu1 %v703_v12 }
 0x108   :  { %v426_v18 = vadd.f32 %v1845_v17, %v2204_v48  ;;  %v417_v19 = vpop.f32.mrb[11].mxu0  ;;  %1919 = vmatmul.mubr.bf16.gmra.mrb[4].mxu1 %v704_v11  ;;  %v647_v21 = vmax.f32 %v423_v14, 0.0 }
 0x109   :  { %v418_v20 = vadd.f32 %v2204_v48, %v417_v19  ;;  %v645_v23 = vmax.f32 %v415_v16, 0.0 }
 0x10a   :  { %v648_v22 = vmax.f32 %v426_v18, 0.0 }
 0x10b   :  { %v646_v24 = vmax.f32 %v418_v20, 0.0 }
 0x10c   :  { %v706_v25 = vpack.c.bf16 %v648_v22, %v647_v21 }
 0x10d   :  { %v705_v26 = vpack.c.bf16 %v646_v24, %v645_v23  ;;  %v1848_v27 = vpop.f32.mrb[12].mxu0 }
 0x10e   :  { %v439_v28 = vadd.f32 %v1848_v27, %v2204_v48  ;;  %v430_v29 = vpop.f32.mrb[13].mxu0 }
 0x10f   :  { %v431_v30 = vadd.f32 %v2204_v48, %v430_v29  ;;  %v1849_v31 = vpop.f32.mrb[14].mxu0  ;;  %1922 = vmatprep.mubr.bf16.mxu1 %v705_v26 }
 0x110   :  { %v442_v32 = vadd.f32 %v1849_v31, %v2204_v48  ;;  %v433_v33 = vpop.f32.mrb[15].mxu0  ;;  %1923 = vmatmul.mubr.bf16.gmra.mrb[8].mxu1 %v706_v25  ;;  %v651_v35 = vmax.f32 %v439_v28, 0.0 }
 0x111   :  { %v434_v34 = vadd.f32 %v2204_v48, %v433_v33  ;;  %v649_v37 = vmax.f32 %v431_v30, 0.0 }
 0x112   :  { %v652_v36 = vmax.f32 %v442_v32, 0.0 }
 0x113   :  { %v650_v38 = vmax.f32 %v434_v34, 0.0 }
 0x114   :  { %v708_v39 = vpack.c.bf16 %v652_v36, %v651_v35 }
 0x115   :  { %v707_v40 = vpack.c.bf16 %v650_v38, %v649_v37  ;;  %v1852_v41 = vpop.f32.mrb[16].mxu0 }
 0x116   :  { %v455_v42 = vadd.f32 %v1852_v41, %v2204_v48  ;;  %v446_v43 = vpop.f32.mrb[17].mxu0 }
 0x117   :  { %v447_v44 = vadd.f32 %v2204_v48, %v446_v43  ;;  %v1853_v45 = vpop.f32.mrb[18].mxu0  ;;  %1926 = vmatprep.mubr.bf16.mxu1 %v707_v40 }
 0x118   :  { %v458_v46 = vadd.f32 %v1853_v45, %v2204_v48  ;;  %v449_v47 = vpop.f32.mrb[19].mxu0  ;;  %1927 = vmatmul.mubr.bf16.gmra.mrb[12].mxu1 %v708_v39  ;;  %v655_v50 = vmax.f32 %v455_v42, 0.0 }
 0x119   :  { %v450_v49 = vadd.f32 %v2204_v48, %v449_v47  ;;  %v653_v52 = vmax.f32 %v447_v44, 0.0 }
 0x11a   :  { %v656_v51 = vmax.f32 %v458_v46, 0.0 }
 0x11b   :  { %v654_v53 = vmax.f32 %v450_v49, 0.0 }
 0x11c   :  { %v710_v54 = vpack.c.bf16 %v656_v51, %v655_v50 }
 0x11d   :  { %v709_v55 = vpack.c.bf16 %v654_v53, %v653_v52  ;;  %v1856_v56 = vpop.f32.mrb[20].mxu0 }
 0x11e   :  { %v471_v57 = vadd.f32 %v1856_v56, %v2204_v48  ;;  %v462_v58 = vpop.f32.mrb[21].mxu0 }
 0x11f   :  { %v463_v59 = vadd.f32 %v2204_v48, %v462_v58  ;;  %v1857_v60 = vpop.f32.mrb[22].mxu0  ;;  %1930 = vmatprep.mubr.bf16.mxu1 %v709_v55 }
 0x120   :  { %v474_v61 = vadd.f32 %v1857_v60, %v2204_v48  ;;  %v465_v62 = vpop.f32.mrb[23].mxu0  ;;  %1931 = vmatmul.mubr.bf16.gmra.mrb[16].mxu1 %v710_v54  ;;  %v659_v0 = vmax.f32 %v471_v57, 0.0 }
 0x121   :  { %v466_v63 = vadd.f32 %v2204_v48, %v465_v62  ;;  %v657_v2 = vmax.f32 %v463_v59, 0.0 }
 0x122   :  { %v660_v1 = vmax.f32 %v474_v61, 0.0 }
 0x123   :  { %v658_v3 = vmax.f32 %v466_v63, 0.0 }
 0x124   :  { %v712_v4 = vpack.c.bf16 %v660_v1, %v659_v0 }
 0x125   :  { %v711_v5 = vpack.c.bf16 %v658_v3, %v657_v2  ;;  %v1860_v6 = vpop.f32.mrb[24].mxu0 }
 0x126   :  { %v487_v7 = vadd.f32 %v1860_v6, %v2204_v48  ;;  %v478_v8 = vpop.f32.mrb[25].mxu0 }
 0x127   :  { %v479_v9 = vadd.f32 %v2204_v48, %v478_v8  ;;  %v1861_v10 = vpop.f32.mrb[26].mxu0  ;;  %1934 = vmatprep.mubr.bf16.mxu1 %v711_v5 }
 0x128   :  { %v490_v11 = vadd.f32 %v1861_v10, %v2204_v48  ;;  %v481_v12 = vpop.f32.mrb[27].mxu0  ;;  %1935 = vmatmul.mubr.bf16.gmra.mrb[20].mxu1 %v712_v4  ;;  %v663_v14 = vmax.f32 %v487_v7, 0.0 }
 0x129   :  { %v482_v13 = vadd.f32 %v2204_v48, %v481_v12  ;;  %v661_v16 = vmax.f32 %v479_v9, 0.0 }
 0x12a   :  { %v664_v15 = vmax.f32 %v490_v11, 0.0 }
 0x12b   :  { %v662_v17 = vmax.f32 %v482_v13, 0.0 }
 0x12c   :  { %v714_v18 = vpack.c.bf16 %v664_v15, %v663_v14 }
 0x12d   :  { %v713_v19 = vpack.c.bf16 %v662_v17, %v661_v16  ;;  %v1864_v20 = vpop.f32.mrb[28].mxu0 }
 0x12e   :  { %v503_v21 = vadd.f32 %v1864_v20, %v2204_v48  ;;  %v494_v22 = vpop.f32.mrb[29].mxu0 }
 0x12f   :  { %v495_v23 = vadd.f32 %v2204_v48, %v494_v22  ;;  %v1865_v24 = vpop.f32.mrb[30].mxu0  ;;  %1938 = vmatprep.mubr.bf16.mxu1 %v713_v19 }
 0x130   :  { %v506_v25 = vadd.f32 %v1865_v24, %v2204_v48  ;;  %v497_v26 = vpop.f32.mrb[31].mxu0  ;;  %1939 = vmatmul.mubr.bf16.gmra.mrb[24].mxu1 %v714_v18  ;;  %v667_v28 = vmax.f32 %v503_v21, 0.0 }
 0x131   :  { %v498_v27 = vadd.f32 %v2204_v48, %v497_v26  ;;  %v665_v30 = vmax.f32 %v495_v23, 0.0 }
 0x132   :  { %v668_v29 = vmax.f32 %v506_v25, 0.0 }
 0x133   :  { %v666_v31 = vmax.f32 %v498_v27, 0.0 }
 0x134   :  { %v716_v32 = vpack.c.bf16 %v668_v29, %v667_v28 }
 0x135   :  { %v715_v33 = vpack.c.bf16 %v666_v31, %v665_v30  ;;  %v1868_v34 = vpop.f32.mrb[32].mxu0 }
 0x136   :  { %v519_v35 = vadd.f32 %v1868_v34, %v2204_v48  ;;  %v510_v36 = vpop.f32.mrb[33].mxu0 }
 0x137   :  { %v511_v37 = vadd.f32 %v2204_v48, %v510_v36  ;;  %v1869_v38 = vpop.f32.mrb[34].mxu0  ;;  %1942 = vmatprep.mubr.bf16.mxu1 %v715_v33 }
 0x138   :  { %v522_v39 = vadd.f32 %v1869_v38, %v2204_v48  ;;  %v513_v40 = vpop.f32.mrb[35].mxu0  ;;  %1943 = vmatmul.mubr.bf16.gmra.mrb[28].mxu1 %v716_v32  ;;  %v671_v42 = vmax.f32 %v519_v35, 0.0 }
 0x139   :  { %v514_v41 = vadd.f32 %v2204_v48, %v513_v40  ;;  %v669_v44 = vmax.f32 %v511_v37, 0.0 }
 0x13a   :  { %v672_v43 = vmax.f32 %v522_v39, 0.0 }
 0x13b   :  { %v670_v45 = vmax.f32 %v514_v41, 0.0 }
 0x13c   :  { %v718_v46 = vpack.c.bf16 %v672_v43, %v671_v42 }
 0x13d   :  { %v717_v47 = vpack.c.bf16 %v670_v45, %v669_v44  ;;  %v1872_v49 = vpop.f32.mrb[36].mxu0 }
 0x13e   :  { %v535_v50 = vadd.f32 %v1872_v49, %v2204_v48  ;;  %v526_v51 = vpop.f32.mrb[37].mxu0 }
 0x13f   :  { %v527_v52 = vadd.f32 %v2204_v48, %v526_v51  ;;  %v1873_v53 = vpop.f32.mrb[38].mxu0  ;;  %1946 = vmatprep.mubr.bf16.mxu1 %v717_v47 }
 0x140   :  { %v538_v54 = vadd.f32 %v1873_v53, %v2204_v48  ;;  %v529_v55 = vpop.f32.mrb[39].mxu0  ;;  %1947 = vmatmul.mubr.bf16.gmra.mrb[32].mxu1 %v718_v46  ;;  %v675_v57 = vmax.f32 %v535_v50, 0.0 }
 0x141   :  { %v530_v56 = vadd.f32 %v2204_v48, %v529_v55  ;;  %v673_v59 = vmax.f32 %v527_v52, 0.0 }
 0x142   :  { %v676_v58 = vmax.f32 %v538_v54, 0.0 }
 0x143   :  { %v674_v60 = vmax.f32 %v530_v56, 0.0 }
 0x144   :  { %v720_v61 = vpack.c.bf16 %v676_v58, %v675_v57 }
 0x145   :  { %v719_v62 = vpack.c.bf16 %v674_v60, %v673_v59  ;;  %v1876_v63 = vpop.f32.mrb[40].mxu0 }
 0x146   :  { %v551_v0 = vadd.f32 %v1876_v63, %v2204_v48  ;;  %v542_v1 = vpop.f32.mrb[41].mxu0 }
 0x147   :  { %v543_v2 = vadd.f32 %v2204_v48, %v542_v1  ;;  %v1877_v3 = vpop.f32.mrb[42].mxu0  ;;  %1950 = vmatprep.mubr.bf16.mxu1 %v719_v62 }
 0x148   :  { %v554_v4 = vadd.f32 %v1877_v3, %v2204_v48  ;;  %v545_v5 = vpop.f32.mrb[43].mxu0  ;;  %1951 = vmatmul.mubr.bf16.gmra.mrb[36].mxu1 %v720_v61  ;;  %v679_v7 = vmax.f32 %v551_v0, 0.0 }
 0x149   :  { %v546_v6 = vadd.f32 %v2204_v48, %v545_v5  ;;  %v677_v9 = vmax.f32 %v543_v2, 0.0 }
 0x14a   :  { %v680_v8 = vmax.f32 %v554_v4, 0.0 }
 0x14b   :  { %v678_v10 = vmax.f32 %v546_v6, 0.0 }
 0x14c   :  { %v722_v11 = vpack.c.bf16 %v680_v8, %v679_v7 }
 0x14d   :  { %v721_v12 = vpack.c.bf16 %v678_v10, %v677_v9  ;;  %v1880_v13 = vpop.f32.mrb[44].mxu0 }
 0x14e   :  { %v567_v14 = vadd.f32 %v1880_v13, %v2204_v48  ;;  %v558_v15 = vpop.f32.mrb[45].mxu0 }
 0x14f   :  { %v559_v16 = vadd.f32 %v2204_v48, %v558_v15  ;;  %v1881_v17 = vpop.f32.mrb[46].mxu0  ;;  %1954 = vmatprep.mubr.bf16.mxu1 %v721_v12 }
 0x150   :  { %v570_v18 = vadd.f32 %v1881_v17, %v2204_v48  ;;  %v561_v19 = vpop.f32.mrb[47].mxu0  ;;  %1955 = vmatmul.mubr.bf16.gmra.mrb[40].mxu1 %v722_v11  ;;  %v683_v21 = vmax.f32 %v567_v14, 0.0 }
 0x151   :  { %v562_v20 = vadd.f32 %v2204_v48, %v561_v19  ;;  %v681_v23 = vmax.f32 %v559_v16, 0.0 }
 0x152   :  { %v684_v22 = vmax.f32 %v570_v18, 0.0 }
 0x153   :  { %v682_v24 = vmax.f32 %v562_v20, 0.0  ;;  %v2273_v20 = vld [vmem:[%s2442_s4] ss:$0 sm:$0xff] }
 0x154   :  { %v724_v25 = vpack.c.bf16 %v684_v22, %v683_v21 }
 0x155   :  { %v723_v26 = vpack.c.bf16 %v682_v24, %v681_v23  ;;  %v1884_v27 = vpop.f32.mrb[48].mxu0 }
 0x156   :  { %v583_v28 = vadd.f32 %v1884_v27, %v2204_v48  ;;  %v574_v29 = vpop.f32.mrb[49].mxu0 }
 0x157   :  { %v575_v30 = vadd.f32 %v2204_v48, %v574_v29  ;;  %v1885_v31 = vpop.f32.mrb[50].mxu0  ;;  %1958 = vmatprep.mubr.bf16.mxu1 %v723_v26 }
 0x158   :  { %v586_v32 = vadd.f32 %v1885_v31, %v2204_v48  ;;  %v577_v33 = vpop.f32.mrb[51].mxu0  ;;  %1959 = vmatmul.mubr.bf16.gmra.mrb[44].mxu1 %v724_v25  ;;  %v687_v35 = vmax.f32 %v583_v28, 0.0 }
 0x159   :  { %v578_v34 = vadd.f32 %v2204_v48, %v577_v33  ;;  %v685_v37 = vmax.f32 %v575_v30, 0.0 }
 0x15a   :  { %v688_v36 = vmax.f32 %v586_v32, 0.0 }
 0x15b   :  { %v686_v38 = vmax.f32 %v578_v34, 0.0 }
 0x15c   :  { %v726_v39 = vpack.c.bf16 %v688_v36, %v687_v35 }
 0x15d   :  { %v725_v40 = vpack.c.bf16 %v686_v38, %v685_v37  ;;  %v1888_v41 = vpop.f32.mrb[52].mxu0 }
 0x15e   :  { %v599_v42 = vadd.f32 %v1888_v41, %v2204_v48  ;;  %v590_v43 = vpop.f32.mrb[53].mxu0 }
 0x15f   :  { %v591_v44 = vadd.f32 %v2204_v48, %v590_v43  ;;  %v1889_v45 = vpop.f32.mrb[54].mxu0  ;;  %1962 = vmatprep.mubr.bf16.mxu1 %v725_v40 }
 0x160   :  { %v602_v46 = vadd.f32 %v1889_v45, %v2204_v48  ;;  %v593_v47 = vpop.f32.mrb[55].mxu0  ;;  %1963 = vmatmul.mubr.bf16.gmra.mrb[48].mxu1 %v726_v39  ;;  %v691_v50 = vmax.f32 %v599_v42, 0.0 }
 0x161   :  { %v594_v49 = vadd.f32 %v2204_v48, %v593_v47  ;;  %v689_v52 = vmax.f32 %v591_v44, 0.0 }
 0x162   :  { %v692_v51 = vmax.f32 %v602_v46, 0.0 }
 0x163   :  { %v690_v53 = vmax.f32 %v594_v49, 0.0 }
 0x164   :  { %v728_v54 = vpack.c.bf16 %v692_v51, %v691_v50 }
 0x165   :  { %v727_v55 = vpack.c.bf16 %v690_v53, %v689_v52  ;;  %v1892_v56 = vpop.f32.mrb[56].mxu0 }
 0x166   :  { %v615_v57 = vadd.f32 %v1892_v56, %v2204_v48  ;;  %v606_v58 = vpop.f32.mrb[57].mxu0 }
 0x167   :  { %v607_v59 = vadd.f32 %v2204_v48, %v606_v58  ;;  %v1893_v60 = vpop.f32.mrb[58].mxu0  ;;  %1966 = vmatprep.mubr.bf16.mxu1 %v727_v55 }
 0x168   :  { %v618_v61 = vadd.f32 %v1893_v60, %v2204_v48  ;;  %v609_v62 = vpop.f32.mrb[59].mxu0  ;;  %1967 = vmatmul.mubr.bf16.gmra.mrb[52].mxu1 %v728_v54  ;;  %v695_v0 = vmax.f32 %v615_v57, 0.0 }
 0x169   :  { %v610_v63 = vadd.f32 %v2204_v48, %v609_v62  ;;  %v693_v2 = vmax.f32 %v607_v59, 0.0 }
 0x16a   :  { %v696_v1 = vmax.f32 %v618_v61, 0.0 }
 0x16b   :  { %v694_v3 = vmax.f32 %v610_v63, 0.0 }
 0x16c   :  { %v730_v4 = vpack.c.bf16 %v696_v1, %v695_v0 }
 0x16d   :  { %v729_v5 = vpack.c.bf16 %v694_v3, %v693_v2  ;;  %v1896_v6 = vpop.f32.mrb[60].mxu0 }
 0x16e   :  { %v631_v7 = vadd.f32 %v1896_v6, %v2204_v48  ;;  %v622_v8 = vpop.f32.mrb[61].mxu0 }
 0x16f   :  { %v623_v9 = vadd.f32 %v2204_v48, %v622_v8  ;;  %v1897_v10 = vpop.f32.mrb[62].mxu0  ;;  %1970 = vmatprep.mubr.bf16.mxu1 %v729_v5 }
 0x170   :  { %v634_v11 = vadd.f32 %v1897_v10, %v2204_v48  ;;  %v625_v12 = vpop.f32.mrb[63].mxu0  ;;  %1971 = vmatmul.mubr.bf16.gmra.mrb[56].mxu1 %v730_v4  ;;  %v699_v14 = vmax.f32 %v631_v7, 0.0 }
 0x171   :  { %v626_v13 = vadd.f32 %v2204_v48, %v625_v12  ;;  %v697_v16 = vmax.f32 %v623_v9, 0.0 }
 0x172   :  { %v700_v15 = vmax.f32 %v634_v11, 0.0 }
 0x173   :  { %v698_v17 = vmax.f32 %v626_v13, 0.0 }
 0x174   :  { %v732_v18 = vpack.c.bf16 %v700_v15, %v699_v14 }
 0x175   :  { %v731_v19 = vpack.c.bf16 %v698_v17, %v697_v16 }
 0x177   :  { %1974 = vmatprep.mubr.bf16.mxu1 %v731_v19 }
 0x178   :  { %1975 = vmatmul.mubr.bf16.gmra.mrb[60].mxu1 %v732_v18 }
 0x1d3   :  { %v1916_v21 = vpop.f32.mrb[0].mxu1 }
 0x1d4   :  { %v847_v22 = vadd.f32 %v1916_v21, %v2273_v20  ;;  %v838_v23 = vpop.f32.mrb[1].mxu1 }
 0x1d5   :  { %v839_v24 = vadd.f32 %v2273_v20, %v838_v23  ;;  %v1917_v48 = vpop.f32.mrb[2].mxu1 }
 0x1d6   :  { %v1095_v25 = vmax.f32 %v847_v22, 0.0  ;;  %v850_v26 = vadd.f32 %v1917_v48, %v2273_v20  ;;  %v841_v27 = vpop.f32.mrb[3].mxu1 }
 0x1d7   :  { %v1093_v28 = vmax.f32 %v839_v24, 0.0  ;;  %v842_v29 = vadd.f32 %v2273_v20, %v841_v27 }
 0x1d8   :  { %v1169_v30 = vrot.slane %v1095_v25, 4  ;;  %v1096_v31 = vmax.f32 %v850_v26, 0.0 }
 0x1d9   :  { %v1157_v32 = vrot.slane %v1093_v28, 4  ;;  %v1094_v33 = vmax.f32 %v842_v29, 0.0 }
 0x1da   :  { %v1170_v34 = vmax.f32 %v1095_v25, %v1169_v30  ;;  %v1175_v35 = vrot.slane %v1096_v31, 4 }
 0x1db   :  { %v1158_v36 = vmax.f32 %v1093_v28, %v1157_v32  ;;  %v1163_v37 = vrot.slane %v1094_v33, 4  ;;  %v1920_v38 = vpop.f32.mrb[4].mxu1 }
 0x1dc   :  { %v1171_v39 = vrot.slane %v1170_v34, 2  ;;  %v1176_v40 = vmax.f32 %v1096_v31, %v1175_v35  ;;  %v863_v41 = vadd.f32 %v1920_v38, %v2273_v20  ;;  %v854_v42 = vpop.f32.mrb[5].mxu1 }
 0x1dd   :  { %v1159_v43 = vrot.slane %v1158_v36, 2  ;;  %v1164_v44 = vmax.f32 %v1094_v33, %v1163_v37  ;;  %v855_v45 = vadd.f32 %v2273_v20, %v854_v42  ;;  %v1921_v46 = vpop.f32.mrb[6].mxu1 }
 0x1de   :  { %v1172_v47 = vmax.f32 %v1170_v34, %v1171_v39  ;;  %v1177_v49 = vrot.slane %v1176_v40, 2  ;;  %v1099_v50 = vmax.f32 %v863_v41, 0.0  ;;  %v866_v51 = vadd.f32 %v1921_v46, %v2273_v20  ;;  %v857_v52 = vpop.f32.mrb[7].mxu1 }
 0x1df   :  { %v1160_v53 = vmax.f32 %v1158_v36, %v1159_v43  ;;  %v1165_v54 = vrot.slane %v1164_v44, 2  ;;  %v1097_v55 = vmax.f32 %v855_v45, 0.0  ;;  %v858_v56 = vadd.f32 %v2273_v20, %v857_v52 }
 0x1e0   :  { %v1173_v57 = vrot.slane %v1172_v47, 1  ;;  %v1178_v58 = vmax.f32 %v1176_v40, %v1177_v49  ;;  %v1193_v59 = vrot.slane %v1099_v50, 4  ;;  %v1100_v60 = vmax.f32 %v866_v51, 0.0 }
 0x1e1   :  { %v1161_v61 = vrot.slane %v1160_v53, 1  ;;  %v1166_v62 = vmax.f32 %v1164_v44, %v1165_v54  ;;  %v1181_v63 = vrot.slane %v1097_v55, 4  ;;  %v1098_v0 = vmax.f32 %v858_v56, 0.0 }
 0x1e2   :  { %v1174_v1 = vmax.f32 %v1172_v47, %v1173_v57  ;;  %v1179_v2 = vrot.slane %v1178_v58, 1  ;;  %v1194_v3 = vmax.f32 %v1099_v50, %v1193_v59  ;;  %v1199_v4 = vrot.slane %v1100_v60, 4 }
 0x1e3   :  { %v1162_v5 = vmax.f32 %v1160_v53, %v1161_v61  ;;  %v1167_v6 = vrot.slane %v1166_v62, 1  ;;  %v1182_v7 = vmax.f32 %v1097_v55, %v1181_v63  ;;  %v1187_v8 = vrot.slane %v1098_v0, 4  ;;  %v1924_v9 = vpop.f32.mrb[8].mxu1 }
 0x1e4   :  { %v1180_v10 = vmax.f32 %v1178_v58, %v1179_v2  ;;  %v1195_v11 = vrot.slane %v1194_v3, 2  ;;  %v1200_v12 = vmax.f32 %v1100_v60, %v1199_v4  ;;  %v879_v13 = vadd.f32 %v1924_v9, %v2273_v20  ;;  %v870_v14 = vpop.f32.mrb[9].mxu1 }
 0x1e5   :  { %v1168_v15 = vmax.f32 %v1166_v62, %v1167_v6  ;;  %v1183_v16 = vrot.slane %v1182_v7, 2  ;;  %v1188_v17 = vmax.f32 %v1098_v0, %v1187_v8  ;;  %v871_v18 = vadd.f32 %v2273_v20, %v870_v14  ;;  %v1925_v19 = vpop.f32.mrb[10].mxu1 }
 0x1e6   :  { %v1196_v21 = vmax.f32 %v1194_v3, %v1195_v11  ;;  %v1201_v22 = vrot.slane %v1200_v12, 2  ;;  %v1103_v23 = vmax.f32 %v879_v13, 0.0  ;;  %v882_v24 = vadd.f32 %v1925_v19, %v2273_v20  ;;  %v873_v48 = vpop.f32.mrb[11].mxu1 }
 0x1e7   :  { %v1606_v25 = vsel %vm1605_vm0, %v1168_v15, %v1162_v5  ;;  %v1184_v26 = vmax.f32 %v1182_v7, %v1183_v16  ;;  %v1189_v27 = vrot.slane %v1188_v17, 2  ;;  %v1101_v28 = vmax.f32 %v871_v18, 0.0 }
 0x1e8   :  { %v1608_v29 = vsel %vm1607_vm1, %v1174_v1, %v1606_v25  ;;  %v1197_v30 = vrot.slane %v1196_v21, 1  ;;  %v1202_v31 = vmax.f32 %v1200_v12, %v1201_v22  ;;  %v1217_v32 = vrot.slane %v1103_v23, 4 }
 0x1e9   :  { %v1185_v33 = vrot.slane %v1184_v26, 1  ;;  %v1610_v34 = vsel %vm1609_vm2, %v1180_v10, %v1608_v29  ;;  %v1190_v35 = vmax.f32 %v1188_v17, %v1189_v27  ;;  %v1205_v36 = vrot.slane %v1101_v28, 4 }
 0x1ea   :  { %v1198_v37 = vmax.f32 %v1196_v21, %v1197_v30  ;;  %v1203_v38 = vrot.slane %v1202_v31, 1  ;;  %v1218_v39 = vmax.f32 %v1103_v23, %v1217_v32  ;;  %v1104_v40 = vmax.f32 %v882_v24, 0.0 }
 0x1eb   :  { %v1186_v41 = vmax.f32 %v1184_v26, %v1185_v33  ;;  %v1191_v42 = vrot.slane %v1190_v35, 1  ;;  %v1206_v43 = vmax.f32 %v1101_v28, %v1205_v36  ;;  %v874_v44 = vadd.f32 %v2273_v20, %v873_v48  ;;  %v1928_v45 = vpop.f32.mrb[12].mxu1 }
 0x1ec   :  { %v1204_v46 = vmax.f32 %v1202_v31, %v1203_v38  ;;  %v1219_v47 = vrot.slane %v1218_v39, 2  ;;  %v1223_v49 = vrot.slane %v1104_v40, 4  ;;  %v895_v50 = vadd.f32 %v1928_v45, %v2273_v20  ;;  %v886_v51 = vpop.f32.mrb[13].mxu1 }
 0x1ed   :  { %v1612_v52 = vsel %vm1611_vm3, %v1186_v41, %v1610_v34  ;;  %v1192_v53 = vmax.f32 %v1190_v35, %v1191_v42  ;;  %v1207_v54 = vrot.slane %v1206_v43, 2  ;;  %v1102_v55 = vmax.f32 %v874_v44, 0.0  ;;  %v1929_v56 = vpop.f32.mrb[14].mxu1 }
 0x1ee   :  { %v1220_v57 = vmax.f32 %v1218_v39, %v1219_v47  ;;  %v1224_v58 = vmax.f32 %v1104_v40, %v1223_v49  ;;  %v1107_v59 = vmax.f32 %v895_v50, 0.0  ;;  %v887_v60 = vadd.f32 %v2273_v20, %v886_v51  ;;  %v889_v61 = vpop.f32.mrb[15].mxu1 }
 0x1ef   :  { %v1614_v62 = vsel %vm1613_vm4, %v1192_v53, %v1612_v52  ;;  %v1208_v63 = vmax.f32 %v1206_v43, %v1207_v54  ;;  %v1211_v0 = vrot.slane %v1102_v55, 4  ;;  %v898_v1 = vadd.f32 %v1929_v56, %v2273_v20 }
 0x1f0   :  { %v1616_v2 = vsel %vm1615_vm5, %v1198_v37, %v1614_v62  ;;  %v1221_v3 = vrot.slane %v1220_v57, 1  ;;  %v1225_v4 = vrot.slane %v1224_v58, 2  ;;  %v1241_v5 = vrot.slane %v1107_v59, 4 }
 0x1f1   :  { %v1618_v6 = vsel %vm1617_vm6, %v1204_v46, %v1616_v2  ;;  %v1212_v7 = vmax.f32 %v1102_v55, %v1211_v0  ;;  %v1105_v8 = vmax.f32 %v887_v60, 0.0  ;;  %v1209_v9 = vrot.slane %v1208_v63, 1 }
 0x1f2   :  { %1676 = vst [vmem:[%s2443_s5] sm:$0xff] %v1618_v6  ;;  %v1226_v10 = vmax.f32 %v1224_v58, %v1225_v4  ;;  %v1242_v11 = vmax.f32 %v1107_v59, %v1241_v5  ;;  %v1108_v12 = vmax.f32 %v898_v1, 0.0  ;;  %v890_v15 = vadd.f32 %v2273_v20, %v889_v61 }
 0x1f3   :  { %v1213_v13 = vrot.slane %v1212_v7, 2  ;;  %v1229_v14 = vrot.slane %v1105_v8, 4  ;;  %v1932_v16 = vpop.f32.mrb[16].mxu1  ;;  %v1222_v17 = vmax.f32 %v1220_v57, %v1221_v3  ;;  %v1210_v27 = vmax.f32 %v1208_v63, %v1209_v9 }
 0x1f4   :  { %v1243_v18 = vrot.slane %v1242_v11, 2  ;;  %v1247_v19 = vrot.slane %v1108_v12, 4  ;;  %v911_v21 = vadd.f32 %v1932_v16, %v2273_v20  ;;  %v902_v22 = vpop.f32.mrb[17].mxu1  ;;  %v1106_v48 = vmax.f32 %v890_v15, 0.0 }
 0x1f5   :  { %v1214_v23 = vmax.f32 %v1212_v7, %v1213_v13  ;;  %v1230_v24 = vmax.f32 %v1105_v8, %v1229_v14  ;;  %v903_v25 = vadd.f32 %v2273_v20, %v902_v22  ;;  %v1933_v26 = vpop.f32.mrb[18].mxu1  ;;  %v1227_v28 = vrot.slane %v1226_v10, 1 }
 0x1f6   :  { %v1248_v29 = vmax.f32 %v1108_v12, %v1247_v19  ;;  %v1111_v30 = vmax.f32 %v911_v21, 0.0  ;;  %v905_v31 = vpop.f32.mrb[19].mxu1  ;;  %v1235_v34 = vrot.slane %v1106_v48, 4  ;;  %v1244_v36 = vmax.f32 %v1242_v11, %v1243_v18 }
 0x1f7   :  { %v1215_v32 = vrot.slane %v1214_v23, 1  ;;  %v1231_v33 = vrot.slane %v1230_v24, 2  ;;  %v1109_v35 = vmax.f32 %v903_v25, 0.0  ;;  %v914_v39 = vadd.f32 %v1933_v26, %v2273_v20 }
 0x1f8   :  { %v1249_v37 = vrot.slane %v1248_v29, 2  ;;  %v1265_v38 = vrot.slane %v1111_v30, 4  ;;  %v1236_v42 = vmax.f32 %v1106_v48, %v1235_v34  ;;  %v1228_v44 = vmax.f32 %v1226_v10, %v1227_v28 }
 0x1f9   :  { %v1216_v40 = vmax.f32 %v1214_v23, %v1215_v32  ;;  %v1232_v41 = vmax.f32 %v1230_v24, %v1231_v33  ;;  %v1253_v43 = vrot.slane %v1109_v35, 4  ;;  %v1112_v47 = vmax.f32 %v914_v39, 0.0 }
 0x1fa   :  { %v1250_v45 = vmax.f32 %v1248_v29, %v1249_v37  ;;  %v1266_v46 = vmax.f32 %v1111_v30, %v1265_v38  ;;  %v1237_v51 = vrot.slane %v1236_v42, 2  ;;  %v1245_v55 = vrot.slane %v1244_v36, 1 }
 0x1fb   :  { %v1619_v49 = vsel %vm1605_vm0, %v1216_v40, %v1210_v27  ;;  %v1233_v50 = vrot.slane %v1232_v41, 1  ;;  %v1254_v52 = vmax.f32 %v1109_v35, %v1253_v43  ;;  %v1936_v53 = vpop.f32.mrb[20].mxu1  ;;  %v1271_v57 = vrot.slane %v1112_v47, 4 }
 0x1fc   :  { %v1620_v54 = vsel %vm1607_vm1, %v1222_v17, %v1619_v49  ;;  %v1267_v56 = vrot.slane %v1266_v46, 2  ;;  %v918_v58 = vpop.f32.mrb[21].mxu1  ;;  %v1238_v61 = vmax.f32 %v1236_v42, %v1237_v51  ;;  %v1251_v0 = vrot.slane %v1250_v45, 1 }
 0x1fd   :  { %v1234_v59 = vmax.f32 %v1232_v41, %v1233_v50  ;;  %v1621_v60 = vsel %vm1609_vm2, %v1228_v44, %v1620_v54  ;;  %v1255_v62 = vrot.slane %v1254_v52, 2  ;;  %v1937_v63 = vpop.f32.mrb[22].mxu1  ;;  %v1272_v2 = vmax.f32 %v1112_v47, %v1271_v57 }
 0x1fe   :  { %v1268_v1 = vmax.f32 %v1266_v46, %v1267_v56  ;;  %v906_v3 = vadd.f32 %v2273_v20, %v905_v31  ;;  %v921_v4 = vpop.f32.mrb[23].mxu1  ;;  %v1239_v6 = vrot.slane %v1238_v61, 1  ;;  %v927_v8 = vadd.f32 %v1936_v53, %v2273_v20 }
 0x1ff   :  { %v1622_v5 = vsel %vm1611_vm3, %v1234_v59, %v1621_v60  ;;  %v1256_v7 = vmax.f32 %v1254_v52, %v1255_v62  ;;  %v1273_v10 = vrot.slane %v1272_v2, 2  ;;  %v919_v12 = vadd.f32 %v2273_v20, %v918_v58 }
 0x200   :  { %v1269_v9 = vrot.slane %v1268_v1, 1  ;;  %v1110_v11 = vmax.f32 %v906_v3, 0.0  ;;  %v1246_v13 = vmax.f32 %v1244_v36, %v1245_v55  ;;  %v1240_v14 = vmax.f32 %v1238_v61, %v1239_v6 }
 0x201   :  { %v1115_v15 = vmax.f32 %v927_v8, 0.0  ;;  %v930_v16 = vadd.f32 %v1937_v63, %v2273_v20  ;;  %v1252_v17 = vmax.f32 %v1250_v45, %v1251_v0  ;;  %v1274_v18 = vmax.f32 %v1272_v2, %v1273_v10 }
 0x202   :  { %v1259_v19 = vrot.slane %v1110_v11, 4  ;;  %v1113_v21 = vmax.f32 %v919_v12, 0.0  ;;  %v1623_v22 = vsel %vm1613_vm4, %v1240_v14, %v1622_v5  ;;  %v1257_v23 = vrot.slane %v1256_v7, 1 }
 0x203   :  { %v1289_v24 = vrot.slane %v1115_v15, 4  ;;  %v1116_v48 = vmax.f32 %v930_v16, 0.0  ;;  %v1940_v25 = vpop.f32.mrb[24].mxu1  ;;  %v1624_v26 = vsel %vm1615_vm5, %v1246_v13, %v1623_v22  ;;  %v1270_v27 = vmax.f32 %v1268_v1, %v1269_v9 }
 0x204   :  { %v1260_v28 = vmax.f32 %v1110_v11, %v1259_v19  ;;  %v1277_v29 = vrot.slane %v1113_v21, 4  ;;  %v934_v30 = vpop.f32.mrb[25].mxu1  ;;  %v1625_v31 = vsel %vm1617_vm6, %v1252_v17, %v1624_v26  ;;  %v922_v34 = vadd.f32 %v2273_v20, %v921_v4 }
 0x205   :  { %v1290_v32 = vmax.f32 %v1115_v15, %v1289_v24  ;;  %v1295_v33 = vrot.slane %v1116_v48, 4  ;;  %v1941_v35 = vpop.f32.mrb[26].mxu1  ;;  %1677 = vst [vmem:[%s2443_s5 + $0x8] sm:$0xff] %v1625_v31  ;;  %v1275_v36 = vrot.slane %v1274_v18, 1  ;;  %v943_v39 = vadd.f32 %v1940_v25, %v2273_v20 }
 0x206   :  { %v1261_v37 = vrot.slane %v1260_v28, 2  ;;  %v1278_v38 = vmax.f32 %v1113_v21, %v1277_v29  ;;  %v937_v40 = vpop.f32.mrb[27].mxu1  ;;  %v1114_v43 = vmax.f32 %v922_v34, 0.0  ;;  %v935_v44 = vadd.f32 %v2273_v20, %v934_v30 }
 0x207   :  { %v1291_v41 = vrot.slane %v1290_v32, 2  ;;  %v1296_v42 = vmax.f32 %v1116_v48, %v1295_v33  ;;  %v1119_v47 = vmax.f32 %v943_v39, 0.0  ;;  %v946_v49 = vadd.f32 %v1941_v35, %v2273_v20 }
 0x208   :  { %v1262_v45 = vmax.f32 %v1260_v28, %v1261_v37  ;;  %v1279_v46 = vrot.slane %v1278_v38, 2  ;;  %v1283_v52 = vrot.slane %v1114_v43, 4  ;;  %v1117_v53 = vmax.f32 %v935_v44, 0.0 }
 0x209   :  { %v1292_v50 = vmax.f32 %v1290_v32, %v1291_v41  ;;  %v1297_v51 = vrot.slane %v1296_v42, 2  ;;  %v1313_v56 = vrot.slane %v1119_v47, 4  ;;  %v1120_v57 = vmax.f32 %v946_v49, 0.0 }
 0x20a   :  { %v1263_v54 = vrot.slane %v1262_v45, 1  ;;  %v1280_v55 = vmax.f32 %v1278_v38, %v1279_v46  ;;  %v1258_v58 = vmax.f32 %v1256_v7, %v1257_v23  ;;  %v1284_v60 = vmax.f32 %v1114_v43, %v1283_v52 }
 0x20b   :  { %v1298_v59 = vmax.f32 %v1296_v42, %v1297_v51  ;;  %v1301_v61 = vrot.slane %v1117_v53, 4  ;;  %v1944_v62 = vpop.f32.mrb[28].mxu1  ;;  %v1314_v1 = vmax.f32 %v1119_v47, %v1313_v56  ;;  %v1319_v2 = vrot.slane %v1120_v57, 4 }
 0x20c   :  { %v1264_v63 = vmax.f32 %v1262_v45, %v1263_v54  ;;  %v1281_v0 = vrot.slane %v1280_v55, 1  ;;  %v950_v3 = vpop.f32.mrb[29].mxu1  ;;  %v1276_v4 = vmax.f32 %v1274_v18, %v1275_v36  ;;  %v1293_v5 = vrot.slane %v1292_v50, 1 }
 0x20d   :  { %v1285_v6 = vrot.slane %v1284_v60, 2  ;;  %v1302_v8 = vmax.f32 %v1117_v53, %v1301_v61  ;;  %v1945_v9 = vpop.f32.mrb[30].mxu1  ;;  %v1315_v12 = vrot.slane %v1314_v1, 2  ;;  %v1320_v13 = vmax.f32 %v1120_v57, %v1319_v2 }
 0x20e   :  { %v1626_v10 = vsel %vm1605_vm0, %v1264_v63, %v1258_v58  ;;  %v1282_v11 = vmax.f32 %v1280_v55, %v1281_v0  ;;  %v953_v7 = vpop.f32.mrb[31].mxu1  ;;  %v1299_v15 = vrot.slane %v1298_v59, 1  ;;  %v938_v18 = vadd.f32 %v2273_v20, %v937_v40 }
 0x20f   :  { %v1627_v14 = vsel %vm1607_vm1, %v1270_v27, %v1626_v10  ;;  %v1286_v16 = vmax.f32 %v1284_v60, %v1285_v6  ;;  %v1303_v17 = vrot.slane %v1302_v8, 2  ;;  %v1316_v21 = vmax.f32 %v1314_v1, %v1315_v12 }
 0x210   :  { %v1628_v19 = vsel %vm1609_vm2, %v1276_v4, %v1627_v14  ;;  %v1321_v22 = vrot.slane %v1320_v13, 2  ;;  %v959_v25 = vadd.f32 %v1944_v62, %v2273_v20  ;;  %v1118_v29 = vmax.f32 %v938_v18, 0.0 }
 0x211   :  { %v1629_v23 = vsel %vm1611_vm3, %v1282_v11, %v1628_v19  ;;  %v1287_v24 = vrot.slane %v1286_v16, 1  ;;  %v1304_v48 = vmax.f32 %v1302_v8, %v1303_v17  ;;  %v1317_v26 = vrot.slane %v1316_v21, 1 }
 0x212   :  { %v1322_v28 = vmax.f32 %v1320_v13, %v1321_v22  ;;  %v951_v27 = vadd.f32 %v2273_v20, %v950_v3  ;;  %v1294_v30 = vmax.f32 %v1292_v50, %v1293_v5  ;;  %v1123_v32 = vmax.f32 %v959_v25, 0.0 }
 0x213   :  { %v1288_v31 = vmax.f32 %v1286_v16, %v1287_v24  ;;  %v962_v33 = vadd.f32 %v1945_v9, %v2273_v20  ;;  %v1948_v34 = vpop.f32.mrb[32].mxu1  ;;  %v1300_v35 = vmax.f32 %v1298_v59, %v1299_v15  ;;  %v1305_v36 = vrot.slane %v1304_v48, 1 }
 0x214   :  { %v1307_v37 = vrot.slane %v1118_v29, 4  ;;  %v1121_v38 = vmax.f32 %v951_v27, 0.0  ;;  %v966_v39 = vpop.f32.mrb[33].mxu1  ;;  %v1318_v41 = vmax.f32 %v1316_v21, %v1317_v26  ;;  %v1337_v42 = vrot.slane %v1123_v32, 4 }
 0x215   :  { %v1630_v40 = vsel %vm1613_vm4, %v1288_v31, %v1629_v23  ;;  %v1124_v43 = vmax.f32 %v962_v33, 0.0  ;;  %v1949_v44 = vpop.f32.mrb[34].mxu1  ;;  %v1323_v46 = vrot.slane %v1322_v28, 1  ;;  %v954_v54 = vadd.f32 %v2273_v20, %v953_v7 }
 0x216   :  { %v1631_v45 = vsel %vm1615_vm5, %v1294_v30, %v1630_v40  ;;  %v1308_v47 = vmax.f32 %v1118_v29, %v1307_v37  ;;  %v1325_v49 = vrot.slane %v1121_v38, 4  ;;  %v969_v50 = vpop.f32.mrb[35].mxu1  ;;  %v1338_v52 = vmax.f32 %v1123_v32, %v1337_v42 }
 0x217   :  { %v1632_v51 = vsel %vm1617_vm6, %v1300_v35, %v1631_v45  ;;  %v1343_v53 = vrot.slane %v1124_v43, 4  ;;  %v975_v57 = vadd.f32 %v1948_v34, %v2273_v20  ;;  %v967_v58 = vadd.f32 %v2273_v20, %v966_v39 }
 0x218   :  { %1678 = vst [vmem:[%s2443_s5 + $0x10] sm:$0xff] %v1632_v51  ;;  %v1309_v55 = vrot.slane %v1308_v47, 2  ;;  %v1326_v56 = vmax.f32 %v1121_v38, %v1325_v49  ;;  %v1339_v59 = vrot.slane %v1338_v52, 2  ;;  %v1122_v61 = vmax.f32 %v954_v54, 0.0 }
 0x219   :  { %v1344_v60 = vmax.f32 %v1124_v43, %v1343_v53  ;;  %v978_v62 = vadd.f32 %v1949_v44, %v2273_v20  ;;  %v1127_v1 = vmax.f32 %v975_v57, 0.0  ;;  %v1125_v2 = vmax.f32 %v967_v58, 0.0 }
 0x21a   :  { %v1310_v63 = vmax.f32 %v1308_v47, %v1309_v55  ;;  %v1327_v0 = vrot.slane %v1326_v56, 2  ;;  %v1340_v3 = vmax.f32 %v1338_v52, %v1339_v59  ;;  %v1331_v5 = vrot.slane %v1122_v61, 4 }
 0x21b   :  { %v1345_v4 = vrot.slane %v1344_v60, 2  ;;  %v1128_v6 = vmax.f32 %v978_v62, 0.0  ;;  %v1952_v8 = vpop.f32.mrb[36].mxu1  ;;  %v1361_v11 = vrot.slane %v1127_v1, 4  ;;  %v1349_v12 = vrot.slane %v1125_v2, 4 }
 0x21c   :  { %v1311_v9 = vrot.slane %v1310_v63, 1  ;;  %v1328_v10 = vmax.f32 %v1326_v56, %v1327_v0  ;;  %v982_v13 = vpop.f32.mrb[37].mxu1  ;;  %v1306_v7 = vmax.f32 %v1304_v48, %v1305_v36  ;;  %v1332_v15 = vmax.f32 %v1122_v61, %v1331_v5 }
 0x21d   :  { %v1346_v14 = vmax.f32 %v1344_v60, %v1345_v4  ;;  %v1367_v16 = vrot.slane %v1128_v6, 4  ;;  %v1953_v17 = vpop.f32.mrb[38].mxu1  ;;  %v1362_v22 = vmax.f32 %v1127_v1, %v1361_v11  ;;  %v1350_v18 = vmax.f32 %v1125_v2, %v1349_v12 }
 0x21e   :  { %v1312_v19 = vmax.f32 %v1310_v63, %v1311_v9  ;;  %v1329_v21 = vrot.slane %v1328_v10, 1  ;;  %v985_v23 = vpop.f32.mrb[39].mxu1  ;;  %v1324_v24 = vmax.f32 %v1322_v28, %v1323_v46  ;;  %v1341_v25 = vrot.slane %v1340_v3, 1 }
 0x21f   :  { %v1333_v26 = vrot.slane %v1332_v15, 2  ;;  %v1368_v29 = vmax.f32 %v1128_v6, %v1367_v16  ;;  %v1363_v31 = vrot.slane %v1362_v22, 2  ;;  %v1351_v32 = vrot.slane %v1350_v18, 2 }
 0x220   :  { %v1633_v27 = vsel %vm1605_vm0, %v1312_v19, %v1306_v7  ;;  %v1330_v30 = vmax.f32 %v1328_v10, %v1329_v21  ;;  %v1347_v33 = vrot.slane %v1346_v14, 1  ;;  %v970_v39 = vadd.f32 %v2273_v20, %v969_v50 }
 0x221   :  { %v1634_v48 = vsel %vm1607_vm1, %v1318_v41, %v1633_v27  ;;  %v1334_v34 = vmax.f32 %v1332_v15, %v1333_v26  ;;  %v1369_v35 = vrot.slane %v1368_v29, 2  ;;  %v1364_v37 = vmax.f32 %v1362_v22, %v1363_v31 }
 0x222   :  { %v1635_v36 = vsel %vm1609_vm2, %v1324_v24, %v1634_v48  ;;  %v1352_v38 = vmax.f32 %v1350_v18, %v1351_v32  ;;  %v991_v43 = vadd.f32 %v1952_v8, %v2273_v20  ;;  %v1342_v45 = vmax.f32 %v1340_v3, %v1341_v25 }
 0x223   :  { %v1636_v28 = vsel %vm1611_vm3, %v1330_v30, %v1635_v36  ;;  %v1335_v40 = vrot.slane %v1334_v34, 1  ;;  %v2345_v42 = vmax.f32 %v1368_v29, %v1369_v35  ;;  %v1956_v44 = vpop.f32.mrb[40].mxu1  ;;  %v1365_v46 = vrot.slane %v1364_v37, 1 }
 0x224   :  { %v1126_v41 = vmax.f32 %v970_v39, 0.0  ;;  %v983_v47 = vadd.f32 %v2273_v20, %v982_v13  ;;  %v998_v49 = vpop.f32.mrb[41].mxu1  ;;  %v1348_v51 = vmax.f32 %v1346_v14, %v1347_v33  ;;  %v1131_v53 = vmax.f32 %v991_v43, 0.0 }
 0x225   :  { %v1336_v52 = vmax.f32 %v1334_v34, %v1335_v40  ;;  %v994_v54 = vadd.f32 %v1953_v17, %v2273_v20  ;;  %v1957_v50 = vpop.f32.mrb[42].mxu1  ;;  %v1353_v55 = vrot.slane %v1352_v38, 1  ;;  %v1371_v56 = vrot.slane %v2345_v42, 1 }
 0x226   :  { %v1355_v57 = vrot.slane %v1126_v41, 4  ;;  %v1129_v58 = vmax.f32 %v983_v47, 0.0  ;;  %v1001_v59 = vpop.f32.mrb[43].mxu1  ;;  %v1366_v61 = vmax.f32 %v1364_v37, %v1365_v46  ;;  %v1385_v62 = vrot.slane %v1131_v53, 4 }
 0x227   :  { %v1637_v60 = vsel %vm1613_vm4, %v1336_v52, %v1636_v28  ;;  %v1132_v63 = vmax.f32 %v994_v54, 0.0  ;;  %v986_v3 = vadd.f32 %v2273_v20, %v985_v23  ;;  %v1007_v8 = vadd.f32 %v1956_v44, %v2273_v20 }
 0x228   :  { %v1638_v0 = vsel %vm1615_vm5, %v1342_v45, %v1637_v60  ;;  %v1356_v1 = vmax.f32 %v1126_v41, %v1355_v57  ;;  %v1373_v2 = vrot.slane %v1129_v58, 4  ;;  %v1386_v5 = vmax.f32 %v1131_v53, %v1385_v62 }
 0x229   :  { %v1639_v4 = vsel %vm1617_vm6, %v1348_v51, %v1638_v0  ;;  %v1391_v6 = vrot.slane %v1132_v63, 4  ;;  %v1130_v11 = vmax.f32 %v986_v3, 0.0  ;;  %v999_v12 = vadd.f32 %v2273_v20, %v998_v49 }
 0x22a   :  { %1679 = vst [vmem:[%s2443_s5 + $0x18] sm:$0xff] %v1639_v4  ;;  %v1357_v9 = vrot.slane %v1356_v1, 2  ;;  %v1374_v10 = vmax.f32 %v1129_v58, %v1373_v2  ;;  %v1387_v13 = vrot.slane %v1386_v5, 2  ;;  %v1135_v14 = vmax.f32 %v1007_v8, 0.0 }
 0x22b   :  { %v1392_v7 = vmax.f32 %v1132_v63, %v1391_v6  ;;  %v1010_v15 = vadd.f32 %v1957_v50, %v2273_v20  ;;  %v1960_v16 = vpop.f32.mrb[44].mxu1  ;;  %v1379_v21 = vrot.slane %v1130_v11, 4  ;;  %v1133_v22 = vmax.f32 %v999_v12, 0.0 }
 0x22c   :  { %v1358_v17 = vmax.f32 %v1356_v1, %v1357_v9  ;;  %v1375_v19 = vrot.slane %v1374_v10, 2  ;;  %v1014_v18 = vpop.f32.mrb[45].mxu1  ;;  %v1388_v23 = vmax.f32 %v1386_v5, %v1387_v13  ;;  %v1409_v25 = vrot.slane %v1135_v14, 4 }
 0x22d   :  { %v1393_v24 = vrot.slane %v1392_v7, 2  ;;  %v1136_v26 = vmax.f32 %v1010_v15, 0.0  ;;  %v1961_v29 = vpop.f32.mrb[46].mxu1  ;;  %v1380_v31 = vmax.f32 %v1130_v11, %v1379_v21  ;;  %v1397_v32 = vrot.slane %v1133_v22, 4 }
 0x22e   :  { %v1359_v27 = vrot.slane %v1358_v17, 1  ;;  %v1376_v30 = vmax.f32 %v1374_v10, %v1375_v19  ;;  %v1017_v48 = vpop.f32.mrb[47].mxu1  ;;  %v1354_v33 = vmax.f32 %v1352_v38, %v1353_v55  ;;  %v1410_v35 = vmax.f32 %v1135_v14, %v1409_v25 }
 0x22f   :  { %v1394_v34 = vmax.f32 %v1392_v7, %v1393_v24  ;;  %v1415_v36 = vrot.slane %v1136_v26, 4  ;;  %v1381_v28 = vrot.slane %v1380_v31, 2  ;;  %v1398_v40 = vmax.f32 %v1133_v22, %v1397_v32 }
 0x230   :  { %v1360_v37 = vmax.f32 %v1358_v17, %v1359_v27  ;;  %v1377_v39 = vrot.slane %v1376_v30, 1  ;;  %v1372_v43 = vmax.f32 %v2345_v42, %v1371_v56  ;;  %v1389_v44 = vrot.slane %v1388_v23, 1 }
 0x231   :  { %v1411_v45 = vrot.slane %v1410_v35, 2  ;;  %v1416_v46 = vmax.f32 %v1136_v26, %v1415_v36  ;;  %v1382_v49 = vmax.f32 %v1380_v31, %v1381_v28  ;;  %v1399_v51 = vrot.slane %v1398_v40, 2 }
 0x232   :  { %v1640_v41 = vsel %vm1605_vm0, %v1360_v37, %v1354_v33  ;;  %v1378_v47 = vmax.f32 %v1376_v30, %v1377_v39  ;;  %v1395_v38 = vrot.slane %v1394_v34, 1  ;;  %v1002_v42 = vadd.f32 %v2273_v20, %v1001_v59 }
 0x233   :  { %v1641_v52 = vsel %vm1607_vm1, %v1366_v61, %v1640_v41  ;;  %v2364_v53 = vmax.f32 %v1410_v35, %v1411_v45  ;;  %v1417_v54 = vrot.slane %v1416_v46, 2  ;;  %v1964_v50 = vpop.f32.mrb[48].mxu1  ;;  %v1383_v57 = vrot.slane %v1382_v49, 1 }
 0x234   :  { %v1642_v55 = vsel %vm1609_vm2, %v1372_v43, %v1641_v52  ;;  %v1400_v58 = vmax.f32 %v1398_v40, %v1399_v51  ;;  %v1030_v56 = vpop.f32.mrb[49].mxu1  ;;  %v1023_v63 = vadd.f32 %v1960_v16, %v2273_v20  ;;  %v1390_v1 = vmax.f32 %v1388_v23, %v1389_v44 }
 0x235   :  { %v1643_v60 = vsel %vm1611_vm3, %v1378_v47, %v1642_v55  ;;  %v1418_v62 = vmax.f32 %v1416_v46, %v1417_v54  ;;  %v1965_v0 = vpop.f32.mrb[50].mxu1  ;;  %v1384_v61 = vmax.f32 %v1382_v49, %v1383_v57  ;;  %v1134_v2 = vmax.f32 %v1002_v42, 0.0 }
 0x236   :  { %v1015_v3 = vadd.f32 %v2273_v20, %v1014_v18  ;;  %v2371_v4 = vpop.f32.mrb[51].mxu1  ;;  %v1396_v5 = vmax.f32 %v1394_v34, %v1395_v38  ;;  %v1413_v6 = vrot.slane %v2364_v53, 1  ;;  %v1139_v8 = vmax.f32 %v1023_v63, 0.0 }
 0x237   :  { %v1026_v59 = vadd.f32 %v1961_v29, %v2273_v20  ;;  %v1644_v9 = vsel %vm1613_vm4, %v1384_v61, %v1643_v60  ;;  %v1401_v10 = vrot.slane %v1400_v58, 1  ;;  %v1403_v11 = vrot.slane %v1134_v2, 4 }
 0x238   :  { %v1137_v12 = vmax.f32 %v1015_v3, 0.0  ;;  %v1645_v13 = vsel %vm1615_vm5, %v1390_v1, %v1644_v9  ;;  %v1419_v7 = vrot.slane %v1418_v62, 1  ;;  %v1433_v14 = vrot.slane %v1139_v8, 4 }
 0x239   :  { %v1140_v15 = vmax.f32 %v1026_v59, 0.0  ;;  %v1646_v16 = vsel %vm1617_vm6, %v1396_v5, %v1645_v13  ;;  %v1404_v17 = vmax.f32 %v1134_v2, %v1403_v11  ;;  %v1018_v21 = vadd.f32 %v2273_v20, %v1017_v48 }
 0x23a   :  { %v1421_v19 = vrot.slane %v1137_v12, 4  ;;  %1680 = vst [vmem:[%s2443_s5 + $0x20] sm:$0xff] %v1646_v16  ;;  %v1434_v22 = vmax.f32 %v1139_v8, %v1433_v14  ;;  %v1039_v23 = vadd.f32 %v1964_v50, %v2273_v20  ;;  %v1031_v24 = vadd.f32 %v2273_v20, %v1030_v56 }
 0x23b   :  { %v1439_v18 = vrot.slane %v1140_v15, 4  ;;  %v1968_v25 = vpop.f32.mrb[52].mxu1  ;;  %v1405_v26 = vrot.slane %v1404_v17, 2  ;;  %v1138_v27 = vmax.f32 %v1018_v21, 0.0  ;;  %v1042_v30 = vadd.f32 %v1965_v0, %v2273_v20 }
 0x23c   :  { %v1422_v29 = vmax.f32 %v1137_v12, %v1421_v19  ;;  %v1046_v31 = vpop.f32.mrb[53].mxu1  ;;  %v1435_v32 = vrot.slane %v1434_v22, 2  ;;  %v1143_v48 = vmax.f32 %v1039_v23, 0.0  ;;  %v1141_v34 = vmax.f32 %v1031_v24, 0.0 }
 0x23d   :  { %v1440_v33 = vmax.f32 %v1140_v15, %v1439_v18  ;;  %v1969_v35 = vpop.f32.mrb[54].mxu1  ;;  %v1406_v36 = vmax.f32 %v1404_v17, %v1405_v26  ;;  %v1427_v39 = vrot.slane %v1138_v27, 4  ;;  %v1144_v28 = vmax.f32 %v1042_v30, 0.0  ;;  %v2397_v15 = vld [vmem:[%s2442_s4] ss:$0 sm:$0xff] }
 0x23e   :  { %v1423_v37 = vrot.slane %v1422_v29, 2  ;;  %v1049_v40 = vpop.f32.mrb[55].mxu1  ;;  %v1436_v43 = vmax.f32 %v1434_v22, %v1435_v32  ;;  %v1457_v45 = vrot.slane %v1143_v48, 4  ;;  %v1445_v46 = vrot.slane %v1141_v34, 4 }
 0x23f   :  { %v1441_v44 = vrot.slane %v1440_v33, 2  ;;  %v1407_v41 = vrot.slane %v1406_v36, 1  ;;  %v1428_v49 = vmax.f32 %v1138_v27, %v1427_v39  ;;  %v1463_v51 = vrot.slane %v1144_v28, 4 }
 0x240   :  { %v1424_v47 = vmax.f32 %v1422_v29, %v1423_v37  ;;  %v1402_v52 = vmax.f32 %v1400_v58, %v1401_v10  ;;  %v1458_v54 = vmax.f32 %v1143_v48, %v1457_v45  ;;  %v1446_v50 = vmax.f32 %v1141_v34, %v1445_v46 }
 0x241   :  { %v1442_v38 = vmax.f32 %v1440_v33, %v1441_v44  ;;  %v1408_v55 = vmax.f32 %v1406_v36, %v1407_v41  ;;  %v1429_v42 = vrot.slane %v1428_v49, 2  ;;  %v1464_v56 = vmax.f32 %v1144_v28, %v1463_v51 }
 0x242   :  { %v1425_v57 = vrot.slane %v1424_v47, 1  ;;  %v1414_v60 = vmax.f32 %v2364_v53, %v1413_v6  ;;  %v1420_v63 = vmax.f32 %v1418_v62, %v1419_v7  ;;  %v1437_v0 = vrot.slane %v1436_v43, 1 }
 0x243   :  { %v1459_v1 = vrot.slane %v1458_v54, 2  ;;  %v1972_v61 = vpop.f32.mrb[56].mxu1  ;;  %v1647_v2 = vsel %vm1605_vm0, %v1408_v55, %v1402_v52  ;;  %v1443_v5 = vrot.slane %v1442_v38, 1  ;;  %v1430_v8 = vmax.f32 %v1428_v49, %v1429_v42 }
 0x244   :  { %v1426_v3 = vmax.f32 %v1424_v47, %v1425_v57  ;;  %v1062_v59 = vpop.f32.mrb[57].mxu1  ;;  %v1648_v58 = vsel %vm1607_vm1, %v1414_v60, %v1647_v2  ;;  %v1447_v9 = vrot.slane %v1446_v50, 2  ;;  %v1465_v10 = vrot.slane %v1464_v56, 2 }
 0x245   :  { %v1973_v11 = vpop.f32.mrb[58].mxu1  ;;  %v1649_v12 = vsel %vm1609_vm2, %v1420_v63, %v1648_v58  ;;  %v1431_v13 = vrot.slane %v1430_v8, 1  ;;  %v1460_v14 = vmax.f32 %v1458_v54, %v1459_v1  ;;  %v1034_v53 = vadd.f32 %v2273_v20, %v2371_v4 }
 0x246   :  { %v2391_v62 = vpop.f32.mrb[59].mxu1  ;;  %v1438_v6 = vmax.f32 %v1436_v43, %v1437_v0  ;;  %v1650_v7 = vsel %vm1611_vm3, %v1426_v3, %v1649_v12  ;;  %v1055_v16 = vadd.f32 %v2397_v15, %v1968_v25  ;;  %v1444_v17 = vmax.f32 %v1442_v38, %v1443_v5 }
 0x247   :  { %v1432_v19 = vmax.f32 %v1430_v8, %v1431_v13  ;;  %v1142_v21 = vmax.f32 %v1034_v53, 0.0  ;;  %v1047_v22 = vadd.f32 %v2397_v15, %v1046_v31  ;;  %v1448_v18 = vmax.f32 %v1446_v50, %v1447_v9 }
 0x248   :  { %v1466_v23 = vmax.f32 %v1464_v56, %v1465_v10  ;;  %v1147_v20 = vmax.f32 %v1055_v16, 0.0  ;;  %v1058_v4 = vadd.f32 %v2397_v15, %v1969_v35  ;;  %v1461_v26 = vrot.slane %v1460_v14, 1 }
 0x249   :  { %v1651_v24 = vsel %vm1613_vm4, %v1432_v19, %v1650_v7  ;;  %v1451_v29 = vrot.slane %v1142_v21, 4  ;;  %v1145_v27 = vmax.f32 %v1047_v22, 0.0  ;;  %v1050_v25 = vadd.f32 %v2397_v15, %v1049_v40 }
 0x24a   :  { %v1652_v30 = vsel %vm1615_vm5, %v1438_v6, %v1651_v24  ;;  %v1481_v32 = vrot.slane %v1147_v20, 4  ;;  %v1148_v33 = vmax.f32 %v1058_v4, 0.0  ;;  %v1071_v37 = vadd.f32 %v2397_v15, %v1972_v61 }
 0x24b   :  { %v1976_v48 = vpop.f32.mrb[60].mxu1  ;;  %v1653_v34 = vsel %vm1617_vm6, %v1444_v17, %v1652_v30  ;;  %v1452_v31 = vmax.f32 %v1142_v21, %v1451_v29  ;;  %v1469_v36 = vrot.slane %v1145_v27, 4  ;;  %v1146_v43 = vmax.f32 %v1050_v25, 0.0 }
 0x24c   :  { %v1078_v39 = vpop.f32.mrb[61].mxu1  ;;  %1681 = vst [vmem:[%s2443_s5 + $0x28] sm:$0xff] %v1653_v34  ;;  %v1482_v35 = vmax.f32 %v1147_v20, %v1481_v32  ;;  %v1487_v28 = vrot.slane %v1148_v33, 4  ;;  %v1063_v44 = vadd.f32 %v2397_v15, %v1062_v59  ;;  %v1151_v41 = vmax.f32 %v1071_v37, 0.0 }
 0x24d   :  { %v1977_v45 = vpop.f32.mrb[62].mxu1  ;;  %v1453_v46 = vrot.slane %v1452_v31, 2  ;;  %v1470_v40 = vmax.f32 %v1145_v27, %v1469_v36  ;;  %v1074_v47 = vadd.f32 %v2397_v15, %v1973_v11  ;;  %v1475_v38 = vrot.slane %v1146_v43, 4 }
 0x24e   :  { %v1081_v49 = vpop.f32.mrb[63].mxu1  ;;  %v1483_v51 = vrot.slane %v1482_v35, 2  ;;  %v1488_v52 = vmax.f32 %v1148_v33, %v1487_v28  ;;  %v1149_v54 = vmax.f32 %v1063_v44, 0.0  ;;  %v1449_v50 = vrot.slane %v1448_v18, 1 }
 0x24f   :  { %v1454_v55 = vmax.f32 %v1452_v31, %v1453_v46  ;;  %v1471_v57 = vrot.slane %v1470_v40, 2  ;;  %v1152_v42 = vmax.f32 %v1074_v47, 0.0  ;;  %v1467_v56 = vrot.slane %v1466_v23, 1 }
 0x250   :  { %v1489_v60 = vrot.slane %v1488_v52, 2  ;;  %v1476_v63 = vmax.f32 %v1146_v43, %v1475_v38  ;;  %v1505_v0 = vrot.slane %v1151_v41, 4  ;;  %v1484_v61 = vmax.f32 %v1482_v35, %v1483_v51 }
 0x251   :  { %v1455_v1 = vrot.slane %v1454_v55, 1  ;;  %v1472_v2 = vmax.f32 %v1470_v40, %v1471_v57  ;;  %v1493_v3 = vrot.slane %v1149_v54, 4  ;;  %v1450_v59 = vmax.f32 %v1448_v18, %v1449_v50 }
 0x252   :  { %v1490_v5 = vmax.f32 %v1488_v52, %v1489_v60  ;;  %v1477_v8 = vrot.slane %v1476_v63, 2  ;;  %v1511_v10 = vrot.slane %v1152_v42, 4  ;;  %v1462_v11 = vmax.f32 %v1460_v14, %v1461_v26 }
 0x253   :  { %v1456_v58 = vmax.f32 %v1454_v55, %v1455_v1  ;;  %v1473_v9 = vrot.slane %v1472_v2, 1  ;;  %v1468_v12 = vmax.f32 %v1466_v23, %v1467_v56  ;;  %v1506_v53 = vmax.f32 %v1151_v41, %v1505_v0 }
 0x254   :  { %v1478_v13 = vmax.f32 %v1476_v63, %v1477_v8  ;;  %v1485_v7 = vrot.slane %v1484_v61, 1  ;;  %v1494_v17 = vmax.f32 %v1149_v54, %v1493_v3  ;;  %v1491_v21 = vrot.slane %v1490_v5, 1 }
 0x255   :  { %v1654_v6 = vsel %vm1605_vm0, %v1456_v58, %v1450_v59  ;;  %v1474_v16 = vmax.f32 %v1472_v2, %v1473_v9  ;;  %v1512_v4 = vmax.f32 %v1152_v42, %v1511_v10  ;;  %v1066_v18 = vadd.f32 %v2397_v15, %v2391_v62 }
 0x256   :  { %v1655_v19 = vsel %vm1607_vm1, %v1462_v11, %v1654_v6  ;;  %v1479_v22 = vrot.slane %v1478_v13, 1  ;;  %v1507_v24 = vrot.slane %v1506_v53, 2  ;;  %v1087_v26 = vadd.f32 %v2397_v15, %v1976_v48 }
 0x257   :  { %v1656_v20 = vsel %vm1609_vm2, %v1468_v12, %v1655_v19  ;;  %v1486_v29 = vmax.f32 %v1484_v61, %v1485_v7  ;;  %v1495_v27 = vrot.slane %v1494_v17, 2  ;;  %v1150_v30 = vmax.f32 %v1066_v18, 0.0 }
 0x258   :  { %v1657_v14 = vsel %vm1611_vm3, %v1474_v16, %v1656_v20  ;;  %v1480_v23 = vmax.f32 %v1478_v13, %v1479_v22  ;;  %v1079_v32 = vadd.f32 %v2397_v15, %v1078_v39  ;;  %v1492_v33 = vmax.f32 %v1490_v5, %v1491_v21 }
 0x259   :  { %v1155_v34 = vmax.f32 %v1087_v26, 0.0  ;;  %v1090_v31 = vadd.f32 %v2397_v15, %v1977_v45  ;;  %v1513_v62 = vrot.slane %v1512_v4, 2  ;;  %v1499_v37 = vrot.slane %v1150_v30, 4 }
 0x25a   :  { %v1658_v25 = vsel %vm1613_vm4, %v1480_v23, %v1657_v14  ;;  %v1153_v35 = vmax.f32 %v1079_v32, 0.0  ;;  %v1082_v44 = vadd.f32 %v2397_v15, %v1081_v49  ;;  %v1496_v39 = vmax.f32 %v1494_v17, %v1495_v27 }
 0x25b   :  { %v1659_v36 = vsel %vm1615_vm5, %v1486_v29, %v1658_v25  ;;  %v1529_v43 = vrot.slane %v1155_v34, 4  ;;  %v1156_v48 = vmax.f32 %v1090_v31, 0.0  ;;  %v1500_v46 = vmax.f32 %v1150_v30, %v1499_v37 }
 0x25c   :  { %v1660_v28 = vsel %vm1617_vm6, %v1492_v33, %v1659_v36  ;;  %v1517_v40 = vrot.slane %v1153_v35, 4  ;;  %v1508_v41 = vmax.f32 %v1506_v53, %v1507_v24  ;;  %v1154_v51 = vmax.f32 %v1082_v44, 0.0 }
 0x25d   :  { %1682 = vst [vmem:[%s2443_s5 + $0x30] sm:$0xff] %v1660_v28  ;;  %v1530_v45 = vmax.f32 %v1155_v34, %v1529_v43  ;;  %v1535_v47 = vrot.slane %v1156_v48, 4  ;;  %v1514_v52 = vmax.f32 %v1512_v4, %v1513_v62  ;;  %v1501_v38 = vrot.slane %v1500_v46, 2 }
 0x25e   :  { %v1518_v54 = vmax.f32 %v1153_v35, %v1517_v40  ;;  %v1523_v57 = vrot.slane %v1154_v51, 4  ;;  %v1497_v42 = vrot.slane %v1496_v39, 1  ;;  %v1509_v49 = vrot.slane %v1508_v41, 1 }
 0x25f   :  { %v1531_v50 = vrot.slane %v1530_v45, 2  ;;  %v1536_v55 = vmax.f32 %v1156_v48, %v1535_v47  ;;  %v1502_v56 = vmax.f32 %v1500_v46, %v1501_v38  ;;  %v1515_v0 = vrot.slane %v1514_v52, 1 }
 0x260   :  { %v1519_v15 = vrot.slane %v1518_v54, 2  ;;  %v1524_v63 = vmax.f32 %v1154_v51, %v1523_v57  ;;  %v1498_v8 = vmax.f32 %v1496_v39, %v1497_v42  ;;  %v1510_v9 = vmax.f32 %v1508_v41, %v1509_v49 }
 0x261   :  { %v1537_v60 = vrot.slane %v1536_v55, 2  ;;  %v1503_v1 = vrot.slane %v1502_v56, 1  ;;  %v1532_v61 = vmax.f32 %v1530_v45, %v1531_v50  ;;  %v1516_v11 = vmax.f32 %v1514_v52, %v1515_v0 }
 0x262   :  { %v1520_v2 = vmax.f32 %v1518_v54, %v1519_v15  ;;  %v1525_v5 = vrot.slane %v1524_v63, 2 }
 0x263   :  { %v1538_v3 = vmax.f32 %v1536_v55, %v1537_v60  ;;  %v1504_v59 = vmax.f32 %v1502_v56, %v1503_v1  ;;  %v1533_v13 = vrot.slane %v1532_v61, 1 }
 0x264   :  { %v1521_v58 = vrot.slane %v1520_v2, 1  ;;  %v1526_v10 = vmax.f32 %v1524_v63, %v1525_v5 }
 0x265   :  { %v1661_v12 = vsel %vm1605_vm0, %v1504_v59, %v1498_v8  ;;  %v1539_v7 = vrot.slane %v1538_v3, 1  ;;  %v1534_v22 = vmax.f32 %v1532_v61, %v1533_v13 }
 0x266   :  { %v1522_v53 = vmax.f32 %v1520_v2, %v1521_v58  ;;  %v1662_v6 = vsel %vm1607_vm1, %v1510_v9, %v1661_v12  ;;  %v1527_v16 = vrot.slane %v1526_v10, 1 }
 0x267   :  { %v1663_v17 = vsel %vm1609_vm2, %v1516_v11, %v1662_v6  ;;  %v1540_v20 = vmax.f32 %v1538_v3, %v1539_v7 }
 0x268   :  { %v1664_v19 = vsel %vm1611_vm3, %v1522_v53, %v1663_v17  ;;  %v1528_v21 = vmax.f32 %v1526_v10, %v1527_v16 }
 0x26a   :  { %v1665_v4 = vsel %vm1613_vm4, %v1528_v21, %v1664_v19 }
 0x26b   :  { %v1666_v18 = vsel %vm1615_vm5, %v1534_v22, %v1665_v4 }
 0x26c   :  { %v1667_v14 = vsel %vm1617_vm6, %v1540_v20, %v1666_v18 }
 0x26d   :  { %1683 = vst [vmem:[%s2443_s5 + $0x38] sm:$0xff] %v1667_v14 }

// kernel: pointnet_forward.13
= control target key start
LH: loop header
LB: loop body
LE: loop exit
PB: predicated region body
PF: predicated region fallthrough
CT: control target
= control target key end

     0   :  { %s783_s1 = inlined_call_operand.vmem [shape: bf16[128,128], index: 1, kind: input, shape index: {}]   ;;  %s784_s0 = inlined_call_operand.vmem [shape: bf16[128,128], index: 0, kind: input, shape index: {}]   ;;  %s785_s3 = inlined_call_operand.vmem [shape: bf16[128,128], index: 3, kind: input, shape index: {}]   ;;  %s786_s2 = inlined_call_operand.vmem [shape: f32[1,128], index: 2, kind: input, shape index: {}]   ;;  %s787_s4 = inlined_call_operand.vmem [shape: f32[1,128], index: 4, kind: input, shape index: {}]   ;;  %s788_s5 = inlined_call_operand.vmem [shape: f32[128,128], index: 5, kind: output, shape index: {}]  }
   0x1   :  { %v603_v0 = vld [vmem:[%s783_s1] sm:$0xff]   ;;  %v604_v1 = vld [vmem:[%s783_s1 + $0x8] sm:$0xff]   ;;  %v605_v2 = vld [vmem:[%s783_s1 + $0x10] sm:$0xff]  }
   0x2   :  { %539 = vmatprep.subr.bf16.mxu0 %v603_v0  ;;  %v606_v3 = vld [vmem:[%s783_s1 + $0x18] sm:$0xff]   ;;  %v611_v4 = vld [vmem:[%s784_s0] sm:$0xff]   ;;  %v608_v6 = vld [vmem:[%s783_s1 + $0x28] sm:$0xff]  }
   0x3   :  { %540 = vmatpush3.bf16.msra.mxu0 %v603_v0  ;;  %555 = vmatprep.mubr.bf16.mxu0 %v611_v4  ;;  %v607_v5 = vld [vmem:[%s783_s1 + $0x20] sm:$0xff]   ;;  %v620_v8 = vld [vmem:[%s785_s3 + $0x8] sm:$0xff]   ;;  %v609_v9 = vld [vmem:[%s783_s1 + $0x30] sm:$0xff]  }
   0x4   :  { %541 = vmatprep.subr.bf16.mxu0 %v604_v1  ;;  %v619_v7 = vld [vmem:[%s785_s3] sm:$0xff]   ;;  %v621_v10 = vld [vmem:[%s785_s3 + $0x10] sm:$0xff]   ;;  %v610_v11 = vld [vmem:[%s783_s1 + $0x38] sm:$0xff]  }
   0x5   :  { %571 = vmatprep.subr.bf16.mxu1 %v619_v7  ;;  %v622_v12 = vld [vmem:[%s785_s3 + $0x18] sm:$0xff]   ;;  %v623_v13 = vld [vmem:[%s785_s3 + $0x20] sm:$0xff]   ;;  %v612_v14 = vld [vmem:[%s784_s0 + $0x8] sm:$0xff]  }
   0x6   :  { %572 = vmatpush3.bf16.msra.mxu1 %v619_v7  ;;  %v613_v15 = vld [vmem:[%s784_s0 + $0x10] sm:$0xff]   ;;  %v624_v16 = vld [vmem:[%s785_s3 + $0x28] sm:$0xff]   ;;  %v614_v17 = vld [vmem:[%s784_s0 + $0x18] sm:$0xff]  }
   0x7   :  { %542 = vmatpush3.bf16.msra.mxu0 %v604_v1  ;;  %573 = vmatprep.subr.bf16.mxu1 %v620_v8  ;;  %v615_v18 = vld [vmem:[%s784_s0 + $0x20] sm:$0xff]   ;;  %v616_v19 = vld [vmem:[%s784_s0 + $0x28] sm:$0xff]   ;;  %v617_v20 = vld [vmem:[%s784_s0 + $0x30] sm:$0xff]  }
   0x8   :  { %543 = vmatprep.subr.bf16.mxu0 %v605_v2  ;;  %v618_v21 = vld [vmem:[%s784_s0 + $0x38] sm:$0xff]   ;;  %v625_v22 = vld [vmem:[%s785_s3 + $0x30] sm:$0xff]   ;;  %v481_v24 = vld [vmem:[%s786_s2] ss:$0 sm:$0xff] }
   0x9   :  { %v626_v23 = vld [vmem:[%s785_s3 + $0x38] sm:$0xff]  }
   0xa   :  { %574 = vmatpush3.bf16.msra.mxu1 %v620_v8 }
   0xb   :  { %544 = vmatpush3.bf16.msra.mxu0 %v605_v2  ;;  %575 = vmatprep.subr.bf16.mxu1 %v621_v10 }
   0xc   :  { %545 = vmatprep.subr.bf16.mxu0 %v606_v3 }
   0xe   :  { %576 = vmatpush3.bf16.msra.mxu1 %v621_v10 }
   0xf   :  { %546 = vmatpush3.bf16.msra.mxu0 %v606_v3  ;;  %577 = vmatprep.subr.bf16.mxu1 %v622_v12 }
  0x10   :  { %547 = vmatprep.subr.bf16.mxu0 %v607_v5 }
  0x12   :  { %578 = vmatpush3.bf16.msra.mxu1 %v622_v12 }
  0x13   :  { %548 = vmatpush3.bf16.msra.mxu0 %v607_v5  ;;  %579 = vmatprep.subr.bf16.mxu1 %v623_v13 }
  0x14   :  { %549 = vmatprep.subr.bf16.mxu0 %v608_v6 }
  0x16   :  { %580 = vmatpush3.bf16.msra.mxu1 %v623_v13 }
  0x17   :  { %550 = vmatpush3.bf16.msra.mxu0 %v608_v6  ;;  %581 = vmatprep.subr.bf16.mxu1 %v624_v16 }
  0x18   :  { %551 = vmatprep.subr.bf16.mxu0 %v609_v9 }
  0x1a   :  { %582 = vmatpush3.bf16.msra.mxu1 %v624_v16 }
  0x1b   :  { %552 = vmatpush3.bf16.msra.mxu0 %v609_v9  ;;  %583 = vmatprep.subr.bf16.mxu1 %v625_v22 }
  0x1c   :  { %553 = vmatprep.subr.bf16.mxu0 %v610_v11 }
  0x1e   :  { %584 = vmatpush3.bf16.msra.mxu1 %v625_v22 }
  0x1f   :  { %554 = vmatpush3.bf16.msra.mxu0 %v610_v11  ;;  %585 = vmatprep.subr.bf16.mxu1 %v626_v23 }
  0x22   :  { %556 = vmatmul.mubr.bf16.vlgmr.msra.gmra.mrb[0].mxu0 %v612_v14  ;;  %586 = vmatpush3.bf16.msra.mxu1 %v626_v23 }
  0x23   :  { %559 = vmatprep.mubr.bf16.mxu0 %v613_v15 }
  0x2a   :  { %560 = vmatmul.mubr.bf16.gmra.mrb[4].mxu0 %v614_v17  ;;  %v498_v17 = vld [vmem:[%s787_s4] ss:$0 sm:$0xff] }
  0x2b   :  { %563 = vmatprep.mubr.bf16.mxu0 %v615_v18 }
  0x32   :  { %564 = vmatmul.mubr.bf16.gmra.mrb[8].mxu0 %v616_v19 }
  0x33   :  { %567 = vmatprep.mubr.bf16.mxu0 %v617_v20 }
  0x3a   :  { %568 = vmatmul.mubr.bf16.gmra.mrb[12].mxu0 %v618_v21 }
  0xf5   :  { %v557_v25 = vpop.f32.mrb[0].mxu0 }
  0xf6   :  { %v199_v26 = vadd.f32 %v557_v25, %v481_v24  ;;  %v190_v27 = vpop.f32.mrb[1].mxu0 }
  0xf7   :  { %v191_v28 = vadd.f32 %v481_v24, %v190_v27  ;;  %v558_v29 = vpop.f32.mrb[2].mxu0 }
  0xf8   :  { %v202_v30 = vadd.f32 %v558_v29, %v481_v24  ;;  %v193_v31 = vpop.f32.mrb[3].mxu0  ;;  %v255_v33 = vmax.f32 %v199_v26, 0.0 }
  0xf9   :  { %v194_v32 = vadd.f32 %v481_v24, %v193_v31  ;;  %v253_v35 = vmax.f32 %v191_v28, 0.0 }
  0xfa   :  { %v256_v34 = vmax.f32 %v202_v30, 0.0 }
  0xfb   :  { %v254_v36 = vmax.f32 %v194_v32, 0.0 }
  0xfc   :  { %v270_v37 = vpack.c.bf16 %v256_v34, %v255_v33 }
  0xfd   :  { %v561_v38 = vpop.f32.mrb[4].mxu0  ;;  %v269_v39 = vpack.c.bf16 %v254_v36, %v253_v35 }
  0xfe   :  { %v215_v40 = vadd.f32 %v561_v38, %v481_v24  ;;  %v206_v41 = vpop.f32.mrb[5].mxu0 }
  0xff   :  { %v207_v42 = vadd.f32 %v481_v24, %v206_v41  ;;  %v562_v43 = vpop.f32.mrb[6].mxu0  ;;  %587 = vmatprep.mubr.bf16.mxu1 %v269_v39 }
 0x100   :  { %v218_v44 = vadd.f32 %v562_v43, %v481_v24  ;;  %v209_v45 = vpop.f32.mrb[7].mxu0  ;;  %588 = vmatmul.mubr.bf16.vlgmr.msra.gmra.mrb[0].mxu1 %v270_v37  ;;  %v259_v47 = vmax.f32 %v215_v40, 0.0 }
 0x101   :  { %v210_v46 = vadd.f32 %v481_v24, %v209_v45  ;;  %v257_v49 = vmax.f32 %v207_v42, 0.0 }
 0x102   :  { %v260_v48 = vmax.f32 %v218_v44, 0.0 }
 0x103   :  { %v258_v50 = vmax.f32 %v210_v46, 0.0 }
 0x104   :  { %v272_v51 = vpack.c.bf16 %v260_v48, %v259_v47 }
 0x105   :  { %v271_v52 = vpack.c.bf16 %v258_v50, %v257_v49  ;;  %v565_v53 = vpop.f32.mrb[8].mxu0 }
 0x106   :  { %v231_v54 = vadd.f32 %v565_v53, %v481_v24  ;;  %v222_v55 = vpop.f32.mrb[9].mxu0 }
 0x107   :  { %v223_v56 = vadd.f32 %v481_v24, %v222_v55  ;;  %v566_v57 = vpop.f32.mrb[10].mxu0  ;;  %591 = vmatprep.mubr.bf16.mxu1 %v271_v52 }
 0x108   :  { %v234_v58 = vadd.f32 %v566_v57, %v481_v24  ;;  %v225_v59 = vpop.f32.mrb[11].mxu0  ;;  %592 = vmatmul.mubr.bf16.gmra.mrb[4].mxu1 %v272_v51  ;;  %v263_v61 = vmax.f32 %v231_v54, 0.0 }
 0x109   :  { %v226_v60 = vadd.f32 %v481_v24, %v225_v59  ;;  %v261_v63 = vmax.f32 %v223_v56, 0.0 }
 0x10a   :  { %v264_v62 = vmax.f32 %v234_v58, 0.0 }
 0x10b   :  { %v262_v0 = vmax.f32 %v226_v60, 0.0 }
 0x10c   :  { %v274_v1 = vpack.c.bf16 %v264_v62, %v263_v61 }
 0x10d   :  { %v273_v2 = vpack.c.bf16 %v262_v0, %v261_v63  ;;  %v569_v3 = vpop.f32.mrb[12].mxu0 }
 0x10e   :  { %v247_v4 = vadd.f32 %v569_v3, %v481_v24  ;;  %v238_v5 = vpop.f32.mrb[13].mxu0 }
 0x10f   :  { %v239_v6 = vadd.f32 %v481_v24, %v238_v5  ;;  %v570_v7 = vpop.f32.mrb[14].mxu0  ;;  %595 = vmatprep.mubr.bf16.mxu1 %v273_v2 }
 0x110   :  { %v250_v8 = vadd.f32 %v570_v7, %v481_v24  ;;  %v241_v9 = vpop.f32.mrb[15].mxu0  ;;  %596 = vmatmul.mubr.bf16.gmra.mrb[8].mxu1 %v274_v1  ;;  %v267_v11 = vmax.f32 %v247_v4, 0.0 }
 0x111   :  { %v242_v10 = vadd.f32 %v481_v24, %v241_v9  ;;  %v265_v13 = vmax.f32 %v239_v6, 0.0 }
 0x112   :  { %v268_v12 = vmax.f32 %v250_v8, 0.0 }
 0x113   :  { %v266_v14 = vmax.f32 %v242_v10, 0.0 }
 0x114   :  { %v276_v15 = vpack.c.bf16 %v268_v12, %v267_v11 }
 0x115   :  { %v275_v16 = vpack.c.bf16 %v266_v14, %v265_v13 }
 0x117   :  { %599 = vmatprep.mubr.bf16.mxu1 %v275_v16 }
 0x118   :  { %600 = vmatmul.mubr.bf16.gmra.mrb[12].mxu1 %v276_v15 }
 0x1d3   :  { %v589_v18 = vpop.f32.mrb[0].mxu1 }
 0x1d4   :  { %v391_v19 = vadd.f32 %v589_v18, %v498_v17  ;;  %v382_v20 = vpop.f32.mrb[1].mxu1 }
 0x1d5   :  { %v383_v21 = vadd.f32 %v498_v17, %v382_v20  ;;  %v590_v22 = vpop.f32.mrb[2].mxu1 }
 0x1d6   :  { %v447_v23 = vmax.f32 %v391_v19, 0.0  ;;  %v394_v25 = vadd.f32 %v590_v22, %v498_v17  ;;  %v385_v24 = vpop.f32.mrb[3].mxu1 }
 0x1d7   :  { %v445_v26 = vmax.f32 %v383_v21, 0.0  ;;  %v386_v27 = vadd.f32 %v498_v17, %v385_v24 }
 0x1d8   :  { %463 = vst [vmem:[%s788_s5 + $0x10] sm:$0xff] %v447_v23  ;;  %v448_v28 = vmax.f32 %v394_v25, 0.0 }
 0x1d9   :  { %461 = vst [vmem:[%s788_s5] sm:$0xff] %v445_v26  ;;  %v446_v29 = vmax.f32 %v386_v27, 0.0 }
 0x1da   :  { %464 = vst [vmem:[%s788_s5 + $0x18] sm:$0xff] %v448_v28 }
 0x1db   :  { %462 = vst [vmem:[%s788_s5 + $0x8] sm:$0xff] %v446_v29  ;;  %v593_v30 = vpop.f32.mrb[4].mxu1 }
 0x1dc   :  { %v407_v31 = vadd.f32 %v593_v30, %v498_v17  ;;  %v398_v32 = vpop.f32.mrb[5].mxu1 }
 0x1dd   :  { %v399_v33 = vadd.f32 %v498_v17, %v398_v32  ;;  %v594_v34 = vpop.f32.mrb[6].mxu1 }
 0x1de   :  { %v451_v35 = vmax.f32 %v407_v31, 0.0  ;;  %v410_v36 = vadd.f32 %v594_v34, %v498_v17  ;;  %v401_v37 = vpop.f32.mrb[7].mxu1 }
 0x1df   :  { %v449_v38 = vmax.f32 %v399_v33, 0.0  ;;  %v402_v39 = vadd.f32 %v498_v17, %v401_v37 }
 0x1e0   :  { %467 = vst [vmem:[%s788_s5 + $0x30] sm:$0xff] %v451_v35  ;;  %v452_v40 = vmax.f32 %v410_v36, 0.0 }
 0x1e1   :  { %465 = vst [vmem:[%s788_s5 + $0x20] sm:$0xff] %v449_v38  ;;  %v450_v41 = vmax.f32 %v402_v39, 0.0 }
 0x1e2   :  { %468 = vst [vmem:[%s788_s5 + $0x38] sm:$0xff] %v452_v40 }
 0x1e3   :  { %466 = vst [vmem:[%s788_s5 + $0x28] sm:$0xff] %v450_v41  ;;  %v597_v42 = vpop.f32.mrb[8].mxu1 }
 0x1e4   :  { %v423_v43 = vadd.f32 %v597_v42, %v498_v17  ;;  %v414_v44 = vpop.f32.mrb[9].mxu1 }
 0x1e5   :  { %v415_v45 = vadd.f32 %v498_v17, %v414_v44  ;;  %v598_v46 = vpop.f32.mrb[10].mxu1 }
 0x1e6   :  { %v455_v47 = vmax.f32 %v423_v43, 0.0  ;;  %v426_v48 = vadd.f32 %v598_v46, %v498_v17  ;;  %v417_v49 = vpop.f32.mrb[11].mxu1 }
 0x1e7   :  { %v453_v50 = vmax.f32 %v415_v45, 0.0  ;;  %v418_v51 = vadd.f32 %v498_v17, %v417_v49 }
 0x1e8   :  { %471 = vst [vmem:[%s788_s5 + $0x50] sm:$0xff] %v455_v47  ;;  %v456_v52 = vmax.f32 %v426_v48, 0.0 }
 0x1e9   :  { %469 = vst [vmem:[%s788_s5 + $0x40] sm:$0xff] %v453_v50  ;;  %v454_v53 = vmax.f32 %v418_v51, 0.0 }
 0x1ea   :  { %472 = vst [vmem:[%s788_s5 + $0x58] sm:$0xff] %v456_v52 }
 0x1eb   :  { %470 = vst [vmem:[%s788_s5 + $0x48] sm:$0xff] %v454_v53  ;;  %v601_v54 = vpop.f32.mrb[12].mxu1 }
 0x1ec   :  { %v439_v55 = vadd.f32 %v601_v54, %v498_v17  ;;  %v430_v56 = vpop.f32.mrb[13].mxu1 }
 0x1ed   :  { %v431_v57 = vadd.f32 %v498_v17, %v430_v56  ;;  %v602_v58 = vpop.f32.mrb[14].mxu1 }
 0x1ee   :  { %v459_v59 = vmax.f32 %v439_v55, 0.0  ;;  %v442_v60 = vadd.f32 %v602_v58, %v498_v17  ;;  %v433_v61 = vpop.f32.mrb[15].mxu1 }
 0x1ef   :  { %v457_v62 = vmax.f32 %v431_v57, 0.0  ;;  %v434_v63 = vadd.f32 %v498_v17, %v433_v61 }
 0x1f0   :  { %475 = vst [vmem:[%s788_s5 + $0x70] sm:$0xff] %v459_v59  ;;  %v460_v0 = vmax.f32 %v442_v60, 0.0 }
 0x1f1   :  { %473 = vst [vmem:[%s788_s5 + $0x60] sm:$0xff] %v457_v62  ;;  %v458_v1 = vmax.f32 %v434_v63, 0.0 }
 0x1f2   :  { %476 = vst [vmem:[%s788_s5 + $0x78] sm:$0xff] %v460_v0 }
 0x1f3   :  { %474 = vst [vmem:[%s788_s5 + $0x68] sm:$0xff] %v458_v1 }

// kernel: neg.10
= control target key start
LH: loop header
LB: loop body
LE: loop exit
PB: predicated region body
PF: predicated region fallthrough
CT: control target
= control target key end

     0   :  { %s520_s0 = inlined_call_operand.vmem [shape: f32[256,128], index: 0, kind: input, shape index: {}]   ;;  %s521_s1 = inlined_call_operand.vmem [shape: f32[256,128], index: 1, kind: output, shape index: {}]  }
   0x1   :  { %v2_v0 = vld [vmem:[%s520_s0] sm:$0xff]  ;;  %v256_v1 = vld [vmem:[%s520_s0 + $0x8] sm:$0xff]  ;;  %v258_v2 = vld [vmem:[%s520_s0 + $0x10] sm:$0xff] }
   0x2   :  { %v5_v3 = vxor.u32 2147483648, %v2_v0  ;;  %v12_v4 = vxor.u32 2147483648, %v256_v1  ;;  %v20_v5 = vxor.u32 2147483648, %v258_v2  ;;  %v260_v6 = vld [vmem:[%s520_s0 + $0x18] sm:$0xff]  ;;  %v262_v7 = vld [vmem:[%s520_s0 + $0x20] sm:$0xff]  ;;  %v264_v8 = vld [vmem:[%s520_s0 + $0x28] sm:$0xff] }
   0x3   :  { %v28_v9 = vxor.u32 2147483648, %v260_v6  ;;  %v36_v10 = vxor.u32 2147483648, %v262_v7  ;;  %v44_v11 = vxor.u32 2147483648, %v264_v8  ;;  %v266_v12 = vld [vmem:[%s520_s0 + $0x30] sm:$0xff]  ;;  %v268_v13 = vld [vmem:[%s520_s0 + $0x38] sm:$0xff]  ;;  %v270_v14 = vld [vmem:[%s520_s0 + $0x40] sm:$0xff] }
   0x4   :  { %7 = vst [vmem:[%s521_s1] sm:$0xff] %v5_v3  ;;  %257 = vst [vmem:[%s521_s1 + $0x8] sm:$0xff] %v12_v4  ;;  %v52_v15 = vxor.u32 2147483648, %v266_v12  ;;  %v60_v16 = vxor.u32 2147483648, %v268_v13  ;;  %v68_v17 = vxor.u32 2147483648, %v270_v14  ;;  %v272_v18 = vld [vmem:[%s520_s0 + $0x48] sm:$0xff]  ;;  %v274_v19 = vld [vmem:[%s520_s0 + $0x50] sm:$0xff] }
   0x5   :  { %259 = vst [vmem:[%s521_s1 + $0x10] sm:$0xff] %v20_v5  ;;  %v276_v20 = vld [vmem:[%s520_s0 + $0x58] sm:$0xff]  ;;  %261 = vst [vmem:[%s521_s1 + $0x18] sm:$0xff] %v28_v9  ;;  %v76_v21 = vxor.u32 2147483648, %v272_v18  ;;  %v84_v22 = vxor.u32 2147483648, %v274_v19  ;;  %v278_v24 = vld [vmem:[%s520_s0 + $0x60] sm:$0xff] }
   0x6   :  { %263 = vst [vmem:[%s521_s1 + $0x20] sm:$0xff] %v36_v10  ;;  %265 = vst [vmem:[%s521_s1 + $0x28] sm:$0xff] %v44_v11  ;;  %v92_v23 = vxor.u32 2147483648, %v276_v20  ;;  %v280_v25 = vld [vmem:[%s520_s0 + $0x68] sm:$0xff]  ;;  %v282_v26 = vld [vmem:[%s520_s0 + $0x70] sm:$0xff]  ;;  %v100_v27 = vxor.u32 2147483648, %v278_v24 }
   0x7   :  { %267 = vst [vmem:[%s521_s1 + $0x30] sm:$0xff] %v52_v15  ;;  %269 = vst [vmem:[%s521_s1 + $0x38] sm:$0xff] %v60_v16  ;;  %v108_v28 = vxor.u32 2147483648, %v280_v25  ;;  %v116_v29 = vxor.u32 2147483648, %v282_v26  ;;  %v284_v30 = vld [vmem:[%s520_s0 + $0x78] sm:$0xff]  ;;  %v286_v31 = vld [vmem:[%s520_s0 + $0x80] sm:$0xff] }
   0x8   :  { %271 = vst [vmem:[%s521_s1 + $0x40] sm:$0xff] %v68_v17  ;;  %v288_v32 = vld [vmem:[%s520_s0 + $0x88] sm:$0xff]  ;;  %273 = vst [vmem:[%s521_s1 + $0x48] sm:$0xff] %v76_v21  ;;  %v124_v33 = vxor.u32 2147483648, %v284_v30  ;;  %v132_v34 = vxor.u32 2147483648, %v286_v31  ;;  %v290_v36 = vld [vmem:[%s520_s0 + $0x90] sm:$0xff] }
   0x9   :  { %275 = vst [vmem:[%s521_s1 + $0x50] sm:$0xff] %v84_v22  ;;  %277 = vst [vmem:[%s521_s1 + $0x58] sm:$0xff] %v92_v23  ;;  %v140_v35 = vxor.u32 2147483648, %v288_v32  ;;  %v292_v37 = vld [vmem:[%s520_s0 + $0x98] sm:$0xff]  ;;  %v294_v38 = vld [vmem:[%s520_s0 + $0xa0] sm:$0xff]  ;;  %v148_v39 = vxor.u32 2147483648, %v290_v36 }
   0xa   :  { %279 = vst [vmem:[%s521_s1 + $0x60] sm:$0xff] %v100_v27  ;;  %281 = vst [vmem:[%s521_s1 + $0x68] sm:$0xff] %v108_v28  ;;  %v156_v40 = vxor.u32 2147483648, %v292_v37  ;;  %v164_v41 = vxor.u32 2147483648, %v294_v38  ;;  %v296_v42 = vld [vmem:[%s520_s0 + $0xa8] sm:$0xff]  ;;  %v298_v43 = vld [vmem:[%s520_s0 + $0xb0] sm:$0xff] }
   0xb   :  { %283 = vst [vmem:[%s521_s1 + $0x70] sm:$0xff] %v116_v29  ;;  %v300_v44 = vld [vmem:[%s520_s0 + $0xb8] sm:$0xff]  ;;  %285 = vst [vmem:[%s521_s1 + $0x78] sm:$0xff] %v124_v33  ;;  %v172_v45 = vxor.u32 2147483648, %v296_v42  ;;  %v180_v46 = vxor.u32 2147483648, %v298_v43  ;;  %v302_v48 = vld [vmem:[%s520_s0 + $0xc0] sm:$0xff] }
   0xc   :  { %287 = vst [vmem:[%s521_s1 + $0x80] sm:$0xff] %v132_v34  ;;  %289 = vst [vmem:[%s521_s1 + $0x88] sm:$0xff] %v140_v35  ;;  %v188_v47 = vxor.u32 2147483648, %v300_v44  ;;  %v304_v49 = vld [vmem:[%s520_s0 + $0xc8] sm:$0xff]  ;;  %v306_v50 = vld [vmem:[%s520_s0 + $0xd0] sm:$0xff]  ;;  %v196_v51 = vxor.u32 2147483648, %v302_v48 }
   0xd   :  { %291 = vst [vmem:[%s521_s1 + $0x90] sm:$0xff] %v148_v39  ;;  %293 = vst [vmem:[%s521_s1 + $0x98] sm:$0xff] %v156_v40  ;;  %v204_v52 = vxor.u32 2147483648, %v304_v49  ;;  %v212_v53 = vxor.u32 2147483648, %v306_v50  ;;  %v308_v54 = vld [vmem:[%s520_s0 + $0xd8] sm:$0xff]  ;;  %v310_v55 = vld [vmem:[%s520_s0 + $0xe0] sm:$0xff] }
   0xe   :  { %295 = vst [vmem:[%s521_s1 + $0xa0] sm:$0xff] %v164_v41  ;;  %v312_v56 = vld [vmem:[%s520_s0 + $0xe8] sm:$0xff]  ;;  %297 = vst [vmem:[%s521_s1 + $0xa8] sm:$0xff] %v172_v45  ;;  %v220_v57 = vxor.u32 2147483648, %v308_v54  ;;  %v228_v58 = vxor.u32 2147483648, %v310_v55  ;;  %v314_v60 = vld [vmem:[%s520_s0 + $0xf0] sm:$0xff] }
   0xf   :  { %299 = vst [vmem:[%s521_s1 + $0xb0] sm:$0xff] %v180_v46  ;;  %301 = vst [vmem:[%s521_s1 + $0xb8] sm:$0xff] %v188_v47  ;;  %v236_v59 = vxor.u32 2147483648, %v312_v56  ;;  %v316_v61 = vld [vmem:[%s520_s0 + $0xf8] sm:$0xff]  ;;  %v244_v62 = vxor.u32 2147483648, %v314_v60 }
  0x10   :  { %303 = vst [vmem:[%s521_s1 + $0xc0] sm:$0xff] %v196_v51  ;;  %305 = vst [vmem:[%s521_s1 + $0xc8] sm:$0xff] %v204_v52  ;;  %v252_v63 = vxor.u32 2147483648, %v316_v61 }
  0x11   :  { %307 = vst [vmem:[%s521_s1 + $0xd0] sm:$0xff] %v212_v53  ;;  %309 = vst [vmem:[%s521_s1 + $0xd8] sm:$0xff] %v220_v57 }
  0x12   :  { %311 = vst [vmem:[%s521_s1 + $0xe0] sm:$0xff] %v228_v58  ;;  %313 = vst [vmem:[%s521_s1 + $0xe8] sm:$0xff] %v236_v59 }
  0x13   :  { %315 = vst [vmem:[%s521_s1 + $0xf0] sm:$0xff] %v244_v62  ;;  %317 = vst [vmem:[%s521_s1 + $0xf8] sm:$0xff] %v252_v63 }

// kernel: pointnet_forward.14
= control target key start
LH: loop header
LB: loop body
LE: loop exit
PB: predicated region body
PF: predicated region fallthrough
CT: control target
= control target key end

     0   :  { %vm44_vm0 = vcmask 64512   ;;  %s1214_s1 = inlined_call_operand.vmem [shape: f32[8,128], index: 1, kind: input, shape index: {}]   ;;  %s1215_s0 = inlined_call_operand.vmem [shape: f32[256,8], index: 0, kind: input, shape index: {}]   ;;  %s1216_s2 = inlined_call_operand.vmem [shape: f32[256,128], index: 2, kind: output, shape index: {}]  }
   0x1   :  { %v800_v0 = vld [vmem:[%s1214_s1] sm:$0xff]  ;;  %v12_v4 = vld [vmem:[%s1215_s0 + $0x8] sm:$0xff]  ;;  %v13_v6 = vld [vmem:[%s1215_s0 + $0x10] sm:$0xff] }
   0x2   :  { %v11_v1 = vld [vmem:[%s1215_s0] sm:$0xff]  ;;  %730 = vmatprep.subr.mxu0 %v800_v0  ;;  %780 = vmatprep.subr.mxu1 %v800_v0  ;;  %v818_v5 = vld [vmem:[%s1215_s0 + $0x88] sm:$0xff]  ;;  %v828_v7 = vld [vmem:[%s1215_s0 + $0x90] sm:$0xff]  ;;  %v368_v9 = vmul.f32 %v13_v6, %v13_v6  ;;  %v367_v12 = vmul.f32 %v12_v4, %v12_v4 }
   0x3   :  { %v808_v2 = vld [vmem:[%s1215_s0 + $0x80] sm:$0xff]  ;;  %v366_v3 = vmul.f32 %v11_v1, %v11_v1  ;;  %731 = vmatpush3.msra.mxu0 %v800_v0  ;;  %781 = vmatpush3.msra.mxu1 %v800_v0  ;;  %v14_v8 = vld [vmem:[%s1215_s0 + $0x18] sm:$0xff]  ;;  %v16_v17 = vld [vmem:[%s1215_s0 + $0x28] sm:$0xff] }
   0x4   :  { %732 = vmatprep.mubr.msk.f32.mxu0 %vm44_vm0, %v11_v1  ;;  %756 = vmatprep.mubr.msk.f32.mxu1 %vm44_vm0, %v808_v2  ;;  %v369_v11 = vmul.f32 %v14_v8, %v14_v8  ;;  %v404_v13 = vsel %vm44_vm0, %v368_v9, 0.0  ;;  %v847_v14 = vld [vmem:[%s1215_s0 + $0x98] sm:$0xff]  ;;  %v15_v15 = vld [vmem:[%s1215_s0 + $0x20] sm:$0xff]  ;;  %v401_v19 = vsel %vm44_vm0, %v367_v12, 0.0  ;;  %v371_v20 = vmul.f32 %v16_v17, %v16_v17  ;;  %v871_v22 = vld [vmem:[%s1215_s0 + $0xa8] sm:$0xff] }
   0x5   :  { %v398_v10 = vsel %vm44_vm0, %v366_v3, 0.0  ;;  %733 = vmatmul.mubr.msk.f32.vlgmr.msra.gmra.mrb[0].mxu0 %vm44_vm0, %v12_v4  ;;  %757 = vmatmul.mubr.msk.f32.vlgmr.msra.gmra.mrb[0].mxu1 %vm44_vm0, %v818_v5  ;;  %v855_v16 = vld [vmem:[%s1215_s0 + $0xa0] sm:$0xff]  ;;  %v370_v21 = vmul.f32 %v15_v15, %v15_v15  ;;  %v17_v23 = vld [vmem:[%s1215_s0 + $0x30] sm:$0xff]  ;;  %v18_v25 = vld [vmem:[%s1215_s0 + $0x38] sm:$0xff]  ;;  %v382_v63 = vmul.f32 %v808_v2, %v808_v2  ;;  %v383_v4 = vmul.f32 %v818_v5, %v818_v5 }
   0x6   :  { %735 = vmatprep.mubr.msk.f32.mxu0 %vm44_vm0, %v13_v6  ;;  %759 = vmatprep.mubr.msk.f32.mxu1 %vm44_vm0, %v828_v7  ;;  %v407_v18 = vsel %vm44_vm0, %v369_v11, 0.0  ;;  %v879_v24 = vld [vmem:[%s1215_s0 + $0xb0] sm:$0xff]  ;;  %v413_v26 = vsel %vm44_vm0, %v371_v20, 0.0  ;;  %v373_v28 = vmul.f32 %v18_v25, %v18_v25  ;;  %v372_v29 = vmul.f32 %v17_v23, %v17_v23  ;;  %v895_v30 = vld [vmem:[%s1215_s0 + $0xb8] sm:$0xff]  ;;  %v19_v31 = vld [vmem:[%s1215_s0 + $0x40] sm:$0xff] }
   0x7   :  { %405 = vadd.xlane.f32.xlu1 %v404_v13  ;;  %399 = vadd.xlane.f32.xlu0 %v398_v10  ;;  %v410_v27 = vsel %vm44_vm0, %v370_v21, 0.0  ;;  %v903_v32 = vld [vmem:[%s1215_s0 + $0xc0] sm:$0xff]  ;;  %v20_v33 = vld [vmem:[%s1215_s0 + $0x48] sm:$0xff]  ;;  %v374_v37 = vmul.f32 %v19_v31, %v19_v31  ;;  %v21_v39 = vld [vmem:[%s1215_s0 + $0x50] sm:$0xff]  ;;  %v449_v6 = vsel %vm44_vm0, %v383_v4, 0.0  ;;  %v385_v2 = vmul.f32 %v847_v14, %v847_v14 }
   0x8   :  { %v419_v34 = vsel %vm44_vm0, %v373_v28, 0.0  ;;  %v416_v35 = vsel %vm44_vm0, %v372_v29, 0.0  ;;  %v375_v36 = vmul.f32 %v20_v33, %v20_v33  ;;  %v919_v38 = vld [vmem:[%s1215_s0 + $0xc8] sm:$0xff]  ;;  %v927_v40 = vld [vmem:[%s1215_s0 + $0xd0] sm:$0xff]  ;;  %v22_v41 = vld [vmem:[%s1215_s0 + $0x58] sm:$0xff]  ;;  %v376_v45 = vmul.f32 %v21_v39, %v21_v39 }
   0x9   :  { %736 = vmatmul.mubr.msk.f32.gmra.mrb[2].mxu0 %vm44_vm0, %v14_v8  ;;  %760 = vmatmul.mubr.msk.f32.gmra.mrb[2].mxu1 %vm44_vm0, %v847_v14  ;;  %v422_v43 = vsel %vm44_vm0, %v374_v37, 0.0  ;;  %v377_v44 = vmul.f32 %v22_v41, %v22_v41  ;;  %v943_v46 = vld [vmem:[%s1215_s0 + $0xd8] sm:$0xff]  ;;  %v23_v47 = vld [vmem:[%s1215_s0 + $0x60] sm:$0xff]  ;;  %v24_v49 = vld [vmem:[%s1215_s0 + $0x68] sm:$0xff]  ;;  %v446_v8 = vsel %vm44_vm0, %v382_v63, 0.0  ;;  %v384_v9 = vmul.f32 %v828_v7, %v828_v7 }
   0xa   :  { %738 = vmatprep.mubr.msk.f32.mxu0 %vm44_vm0, %v15_v15  ;;  %762 = vmatprep.mubr.msk.f32.mxu1 %vm44_vm0, %v855_v16  ;;  %v425_v42 = vsel %vm44_vm0, %v375_v36, 0.0  ;;  %v951_v48 = vld [vmem:[%s1215_s0 + $0xe0] sm:$0xff]  ;;  %v428_v51 = vsel %vm44_vm0, %v376_v45, 0.0  ;;  %v379_v52 = vmul.f32 %v24_v49, %v24_v49  ;;  %v378_v53 = vmul.f32 %v23_v47, %v23_v47  ;;  %v40_v54 = vld [vmem:[%s1215_s0 + $0xe8] sm:$0xff]  ;;  %v25_v55 = vld [vmem:[%s1215_s0 + $0x70] sm:$0xff] }
   0xb   :  { %408 = vadd.xlane.f32.xlu1 %v407_v18  ;;  %402 = vadd.xlane.f32.xlu0 %v401_v19  ;;  %v431_v50 = vsel %vm44_vm0, %v377_v44, 0.0  ;;  %v41_v56 = vld [vmem:[%s1215_s0 + $0xf0] sm:$0xff]  ;;  %v26_v57 = vld [vmem:[%s1215_s0 + $0x78] sm:$0xff]  ;;  %v380_v61 = vmul.f32 %v25_v55, %v25_v55  ;;  %v455_v5 = vsel %vm44_vm0, %v385_v2, 0.0  ;;  %v452_v10 = vsel %vm44_vm0, %v384_v9, 0.0 }
   0xc   :  { %v437_v58 = vsel %vm44_vm0, %v379_v52, 0.0  ;;  %v434_v59 = vsel %vm44_vm0, %v378_v53, 0.0  ;;  %v381_v60 = vmul.f32 %v26_v57, %v26_v57  ;;  %v42_v62 = vld [vmem:[%s1215_s0 + $0xf8] sm:$0xff]  ;;  %v387_v11 = vmul.f32 %v871_v22, %v871_v22 }
   0xd   :  { %739 = vmatmul.mubr.msk.f32.gmra.mrb[4].mxu0 %vm44_vm0, %v16_v17  ;;  %763 = vmatmul.mubr.msk.f32.gmra.mrb[4].mxu1 %vm44_vm0, %v871_v22  ;;  %v440_v3 = vsel %vm44_vm0, %v380_v61, 0.0  ;;  %v386_v12 = vmul.f32 %v855_v16, %v855_v16  ;;  %v389_v7 = vmul.f32 %v895_v30, %v895_v30  ;;  %v388_v15 = vmul.f32 %v879_v24, %v879_v24 }
   0xe   :  { %741 = vmatprep.mubr.msk.f32.mxu0 %vm44_vm0, %v17_v23  ;;  %765 = vmatprep.mubr.msk.f32.mxu1 %vm44_vm0, %v879_v24  ;;  %v443_v1 = vsel %vm44_vm0, %v381_v60, 0.0  ;;  %v461_v13 = vsel %vm44_vm0, %v387_v11, 0.0  ;;  %v391_v16 = vmul.f32 %v919_v38, %v919_v38  ;;  %v390_v19 = vmul.f32 %v903_v32, %v903_v32 }
   0xf   :  { %414 = vadd.xlane.f32.xlu1 %v413_v26  ;;  %411 = vadd.xlane.f32.xlu0 %v410_v27  ;;  %v458_v14 = vsel %vm44_vm0, %v386_v12, 0.0  ;;  %v467_v17 = vsel %vm44_vm0, %v389_v7, 0.0  ;;  %v464_v18 = vsel %vm44_vm0, %v388_v15, 0.0  ;;  %v393_v22 = vmul.f32 %v943_v46, %v943_v46 }
  0x10   :  { %v473_v20 = vsel %vm44_vm0, %v391_v16, 0.0  ;;  %v470_v21 = vsel %vm44_vm0, %v390_v19, 0.0  ;;  %v392_v23 = vmul.f32 %v927_v40, %v927_v40  ;;  %v395_v26 = vmul.f32 %v40_v54, %v40_v54 }
  0x11   :  { %742 = vmatmul.mubr.msk.f32.gmra.mrb[6].mxu0 %vm44_vm0, %v18_v25  ;;  %766 = vmatmul.mubr.msk.f32.gmra.mrb[6].mxu1 %vm44_vm0, %v895_v30  ;;  %v479_v24 = vsel %vm44_vm0, %v393_v22, 0.0  ;;  %v394_v27 = vmul.f32 %v951_v48, %v951_v48  ;;  %v397_v30 = vmul.f32 %v42_v62, %v42_v62 }
  0x12   :  { %744 = vmatprep.mubr.msk.f32.mxu0 %vm44_vm0, %v19_v31  ;;  %768 = vmatprep.mubr.msk.f32.mxu1 %vm44_vm0, %v903_v32  ;;  %v476_v25 = vsel %vm44_vm0, %v392_v23, 0.0  ;;  %v485_v28 = vsel %vm44_vm0, %v395_v26, 0.0  ;;  %v396_v31 = vmul.f32 %v41_v56, %v41_v56 }
  0x13   :  { %420 = vadd.xlane.f32.xlu1 %v419_v34  ;;  %417 = vadd.xlane.f32.xlu0 %v416_v35  ;;  %v482_v29 = vsel %vm44_vm0, %v394_v27, 0.0  ;;  %v491_v32 = vsel %vm44_vm0, %v397_v30, 0.0 }
  0x15   :  { %745 = vmatmul.mubr.msk.f32.gmra.mrb[8].mxu0 %vm44_vm0, %v20_v33  ;;  %769 = vmatmul.mubr.msk.f32.gmra.mrb[8].mxu1 %vm44_vm0, %v919_v38  ;;  %v488_v33 = vsel %vm44_vm0, %v396_v31, 0.0 }
  0x16   :  { %747 = vmatprep.mubr.msk.f32.mxu0 %vm44_vm0, %v21_v39  ;;  %771 = vmatprep.mubr.msk.f32.mxu1 %vm44_vm0, %v927_v40 }
  0x17   :  { %426 = vadd.xlane.f32.xlu1 %v425_v42  ;;  %423 = vadd.xlane.f32.xlu0 %v422_v43 }
  0x19   :  { %748 = vmatmul.mubr.msk.f32.gmra.mrb[10].mxu0 %vm44_vm0, %v22_v41  ;;  %772 = vmatmul.mubr.msk.f32.gmra.mrb[10].mxu1 %vm44_vm0, %v943_v46 }
  0x1a   :  { %750 = vmatprep.mubr.msk.f32.mxu0 %vm44_vm0, %v23_v47  ;;  %774 = vmatprep.mubr.msk.f32.mxu1 %vm44_vm0, %v951_v48 }
  0x1b   :  { %432 = vadd.xlane.f32.xlu1 %v431_v50  ;;  %429 = vadd.xlane.f32.xlu0 %v428_v51  ;;  %v494_v50 = vmul.f32 %v800_v0, %v800_v0 }
  0x1d   :  { %751 = vmatmul.mubr.msk.f32.gmra.mrb[12].mxu0 %vm44_vm0, %v24_v49  ;;  %775 = vmatmul.mubr.msk.f32.gmra.mrb[12].mxu1 %vm44_vm0, %v40_v54  ;;  %v495_v53 = vrot.slane %v494_v50, 4 }
  0x1e   :  { %753 = vmatprep.mubr.msk.f32.mxu0 %vm44_vm0, %v25_v55  ;;  %777 = vmatprep.mubr.msk.f32.mxu1 %vm44_vm0, %v41_v56 }
  0x1f   :  { %438 = vadd.xlane.f32.xlu1 %v437_v58  ;;  %435 = vadd.xlane.f32.xlu0 %v434_v59  ;;  %v496_v54 = vadd.f32 %v495_v53, %v494_v50 }
  0x21   :  { %754 = vmatmul.mubr.msk.f32.gmra.mrb[14].mxu0 %vm44_vm0, %v26_v57  ;;  %778 = vmatmul.mubr.msk.f32.gmra.mrb[14].mxu1 %vm44_vm0, %v42_v62  ;;  %v497_v57 = vrot.slane %v496_v54, 2 }
  0x23   :  { %444 = vadd.xlane.f32.xlu1 %v443_v1  ;;  %441 = vadd.xlane.f32.xlu0 %v440_v3  ;;  %v498_v60 = vadd.f32 %v497_v57, %v496_v54 }
  0x25   :  { %v499_v61 = vrot.slane %v498_v60, 1 }
  0x27   :  { %450 = vadd.xlane.f32.xlu1 %v449_v6  ;;  %447 = vadd.xlane.f32.xlu0 %v446_v8  ;;  %v1059_v1 = vadd.f32 %v499_v61, %v498_v60 }
  0x2b   :  { %456 = vadd.xlane.f32.xlu1 %v455_v5  ;;  %453 = vadd.xlane.f32.xlu0 %v452_v10 }
  0x2f   :  { %462 = vadd.xlane.f32.xlu1 %v461_v13  ;;  %459 = vadd.xlane.f32.xlu0 %v458_v14 }
  0x33   :  { %468 = vadd.xlane.f32.xlu1 %v467_v17  ;;  %465 = vadd.xlane.f32.xlu0 %v464_v18 }
  0x37   :  { %474 = vadd.xlane.f32.xlu1 %v473_v20  ;;  %471 = vadd.xlane.f32.xlu0 %v470_v21 }
  0x3b   :  { %480 = vadd.xlane.f32.xlu1 %v479_v24  ;;  %477 = vadd.xlane.f32.xlu0 %v476_v25 }
  0x3f   :  { %486 = vadd.xlane.f32.xlu1 %v485_v28  ;;  %483 = vadd.xlane.f32.xlu0 %v482_v29 }
  0x43   :  { %492 = vadd.xlane.f32.xlu1 %v491_v32  ;;  %489 = vadd.xlane.f32.xlu0 %v488_v33 }
  0x94   :  { %v406_v34 = vpop.xlane.xlu1 %405  ;;  %v400_v35 = vpop.xlane.xlu0 %399 }
  0x95   :  { %v501_v13 = vadd.f32 %v1059_v1, %v400_v35  ;;  %v503_v15 = vadd.f32 %v1059_v1, %v406_v34 }
  0x98   :  { %v409_v36 = vpop.xlane.xlu1 %408  ;;  %v403_v37 = vpop.xlane.xlu0 %402 }
  0x99   :  { %v502_v9 = vadd.f32 %v1059_v1, %v403_v37  ;;  %v504_v19 = vadd.f32 %v1059_v1, %v409_v36 }
  0x9c   :  { %v415_v38 = vpop.xlane.xlu1 %414  ;;  %v1031_v39 = vpop.xlane.xlu0 %411 }
  0x9d   :  { %v506_v35 = vadd.f32 %v1059_v1, %v415_v38  ;;  %v505_v53 = vadd.f32 %v1059_v1, %v1031_v39 }
  0xa0   :  { %v1033_v40 = vpop.xlane.xlu1 %420  ;;  %v1035_v41 = vpop.xlane.xlu0 %417 }
  0xa4   :  { %v1037_v42 = vpop.xlane.xlu1 %426  ;;  %v1039_v43 = vpop.xlane.xlu0 %423 }
  0xa8   :  { %v1041_v44 = vpop.xlane.xlu1 %432  ;;  %v1043_v45 = vpop.xlane.xlu0 %429 }
  0xac   :  { %v1045_v46 = vpop.xlane.xlu1 %438  ;;  %v1047_v47 = vpop.xlane.xlu0 %435 }
  0xb0   :  { %v1049_v48 = vpop.xlane.xlu1 %444  ;;  %v1051_v49 = vpop.xlane.xlu0 %441 }
  0xb4   :  { %v451_v51 = vpop.xlane.xlu1 %450  ;;  %v448_v52 = vpop.xlane.xlu0 %447 }
  0xb5   :  { %v518_v3 = vadd.f32 %v1059_v1, %v451_v51  ;;  %v517_v2 = vadd.f32 %v1059_v1, %v448_v52 }
  0xb8   :  { %v457_v55 = vpop.xlane.xlu1 %456  ;;  %v454_v56 = vpop.xlane.xlu0 %453 }
  0xb9   :  { %v520_v16 = vadd.f32 %v1059_v1, %v457_v55  ;;  %v519_v24 = vadd.f32 %v1059_v1, %v454_v56 }
  0xbc   :  { %v463_v58 = vpop.xlane.xlu1 %462  ;;  %v460_v59 = vpop.xlane.xlu0 %459 }
  0xbd   :  { %v522_v50 = vadd.f32 %v1059_v1, %v463_v58  ;;  %v521_v57 = vadd.f32 %v1059_v1, %v460_v59 }
  0xc0   :  { %v1055_v62 = vpop.xlane.xlu1 %468  ;;  %v1057_v63 = vpop.xlane.xlu0 %465 }
  0xc4   :  { %v1062_v0 = vpop.xlane.xlu1 %474  ;;  %v1064_v4 = vpop.xlane.xlu0 %471 }
  0xc8   :  { %v1081_v51 = vpop.xlane.xlu1 %480  ;;  %v1083_v52 = vpop.xlane.xlu0 %477 }
  0xd8   :  { %v758_v6 = vpop.f32.mrb[0].mxu1  ;;  %v734_v8 = vpop.f32.mrb[0].mxu0 }
  0xd9   :  { %v550_v5 = vmul.f32 2.0, %v758_v6  ;;  %v534_v10 = vmul.f32 2.0, %v734_v8  ;;  %v287_v11 = vpop.f32.mrb[1].mxu1  ;;  %v207_v12 = vpop.f32.mrb[1].mxu0 }
  0xda   :  { %v549_v14 = vmul.f32 2.0, %v287_v11  ;;  %v533_v7 = vmul.f32 2.0, %v207_v12  ;;  %v524_v12 = vadd.f32 %v1059_v1, %v1055_v62 }
  0xdb   :  { %v582_v17 = vsub.f32 %v518_v3, %v550_v5  ;;  %v566_v18 = vsub.f32 %v502_v9, %v534_v10  ;;  %v508_v10 = vadd.f32 %v1059_v1, %v1033_v40 }
  0xdc   :  { %v581_v20 = vsub.f32 %v517_v2, %v549_v14  ;;  %v565_v21 = vsub.f32 %v501_v13, %v533_v7  ;;  %v761_v22 = vpop.f32.mrb[2].mxu1  ;;  %v737_v23 = vpop.f32.mrb[2].mxu0  ;;  %v507_v13 = vadd.f32 %v1059_v1, %v1035_v41 }
  0xdd   :  { %v614_v25 = vmax.f32 %v582_v17, 0.0  ;;  %v598_v26 = vmax.f32 %v566_v18, 0.0  ;;  %v552_v27 = vmul.f32 2.0, %v761_v22  ;;  %v536_v28 = vmul.f32 2.0, %v737_v23  ;;  %v297_v29 = vpop.f32.mrb[3].mxu1  ;;  %v217_v30 = vpop.f32.mrb[3].mxu0 }
  0xde   :  { %v613_v31 = vmax.f32 %v581_v20, 0.0  ;;  %v597_v32 = vmax.f32 %v565_v21, 0.0  ;;  %v551_v33 = vmul.f32 2.0, %v297_v29  ;;  %v535_v34 = vmul.f32 2.0, %v217_v30  ;;  %v484_v29 = vpop.xlane.xlu0 %483 }
  0xdf   :  { %646 = vst [vmem:[%s1216_s2 + $0x88] sm:$0xff] %v614_v25  ;;  %630 = vst [vmem:[%s1216_s2 + $0x8] sm:$0xff] %v598_v26  ;;  %v584_v36 = vsub.f32 %v520_v16, %v552_v27  ;;  %v568_v37 = vsub.f32 %v504_v19, %v536_v28  ;;  %v523_v17 = vadd.f32 %v1059_v1, %v1057_v63  ;;  %v487_v28 = vpop.xlane.xlu1 %486 }
  0xe0   :  { %645 = vst [vmem:[%s1216_s2 + $0x80] sm:$0xff] %v613_v31  ;;  %629 = vst [vmem:[%s1216_s2] sm:$0xff] %v597_v32  ;;  %v583_v38 = vsub.f32 %v519_v24, %v551_v33  ;;  %v567_v54 = vsub.f32 %v503_v15, %v535_v34  ;;  %v764_v55 = vpop.f32.mrb[4].mxu1  ;;  %v740_v56 = vpop.f32.mrb[4].mxu0  ;;  %v510_v25 = vadd.f32 %v1059_v1, %v1037_v42 }
  0xe1   :  { %v616_v58 = vmax.f32 %v584_v36, 0.0  ;;  %v600_v60 = vmax.f32 %v568_v37, 0.0  ;;  %v554_v61 = vmul.f32 2.0, %v764_v55  ;;  %v538_v3 = vmul.f32 2.0, %v740_v56  ;;  %v307_v6 = vpop.f32.mrb[5].mxu1  ;;  %v227_v39 = vpop.f32.mrb[5].mxu0 }
  0xe2   :  { %v615_v8 = vmax.f32 %v583_v38, 0.0  ;;  %v599_v2 = vmax.f32 %v567_v54, 0.0  ;;  %v553_v9 = vmul.f32 2.0, %v307_v6  ;;  %v537_v5 = vmul.f32 2.0, %v227_v39 }
  0xe3   :  { %648 = vst [vmem:[%s1216_s2 + $0x98] sm:$0xff] %v616_v58  ;;  %632 = vst [vmem:[%s1216_s2 + $0x18] sm:$0xff] %v600_v60  ;;  %v586_v59 = vsub.f32 %v522_v50, %v554_v61  ;;  %v570_v11 = vsub.f32 %v506_v35, %v538_v3  ;;  %v526_v27 = vadd.f32 %v1059_v1, %v1062_v0 }
  0xe4   :  { %647 = vst [vmem:[%s1216_s2 + $0x90] sm:$0xff] %v615_v8  ;;  %631 = vst [vmem:[%s1216_s2 + $0x10] sm:$0xff] %v599_v2  ;;  %v585_v40 = vsub.f32 %v521_v57, %v553_v9  ;;  %v569_v14 = vsub.f32 %v505_v53, %v537_v5  ;;  %v767_v7 = vpop.f32.mrb[6].mxu1  ;;  %v743_v15 = vpop.f32.mrb[6].mxu0  ;;  %v509_v30 = vadd.f32 %v1059_v1, %v1039_v43 }
  0xe5   :  { %v618_v18 = vmax.f32 %v586_v59, 0.0  ;;  %v602_v62 = vmax.f32 %v570_v11, 0.0  ;;  %v556_v16 = vmul.f32 2.0, %v767_v7  ;;  %v540_v19 = vmul.f32 2.0, %v743_v15  ;;  %v317_v41 = vpop.f32.mrb[7].mxu1  ;;  %v237_v20 = vpop.f32.mrb[7].mxu0 }
  0xe6   :  { %v617_v21 = vmax.f32 %v585_v40, 0.0  ;;  %v601_v22 = vmax.f32 %v569_v14, 0.0  ;;  %v555_v23 = vmul.f32 2.0, %v317_v41  ;;  %v539_v24 = vmul.f32 2.0, %v237_v20  ;;  %v493_v7 = vpop.xlane.xlu1 %492  ;;  %v490_v15 = vpop.xlane.xlu0 %489 }
  0xe7   :  { %650 = vst [vmem:[%s1216_s2 + $0xa8] sm:$0xff] %v618_v18  ;;  %634 = vst [vmem:[%s1216_s2 + $0x28] sm:$0xff] %v602_v62  ;;  %v588_v63 = vsub.f32 %v524_v12, %v556_v16  ;;  %v572_v26 = vsub.f32 %v508_v10, %v540_v19  ;;  %v525_v0 = vadd.f32 %v1059_v1, %v1064_v4 }
  0xe8   :  { %649 = vst [vmem:[%s1216_s2 + $0xa0] sm:$0xff] %v617_v21  ;;  %633 = vst [vmem:[%s1216_s2 + $0x20] sm:$0xff] %v601_v22  ;;  %v587_v42 = vsub.f32 %v523_v17, %v555_v23  ;;  %v571_v31 = vsub.f32 %v507_v13, %v539_v24  ;;  %v770_v32 = vpop.f32.mrb[8].mxu1  ;;  %v746_v33 = vpop.f32.mrb[8].mxu0  ;;  %v512_v56 = vadd.f32 %v1059_v1, %v1041_v44 }
  0xe9   :  { %v620_v34 = vmax.f32 %v588_v63, 0.0  ;;  %v604_v35 = vmax.f32 %v572_v26, 0.0  ;;  %v558_v36 = vmul.f32 2.0, %v770_v32  ;;  %v542_v37 = vmul.f32 2.0, %v746_v33  ;;  %v327_v43 = vpop.f32.mrb[9].mxu1  ;;  %v247_v50 = vpop.f32.mrb[9].mxu0 }
  0xea   :  { %v619_v53 = vmax.f32 %v587_v42, 0.0  ;;  %v603_v38 = vmax.f32 %v571_v31, 0.0  ;;  %v557_v54 = vmul.f32 2.0, %v327_v43  ;;  %v541_v55 = vmul.f32 2.0, %v247_v50 }
  0xeb   :  { %652 = vst [vmem:[%s1216_s2 + $0xb8] sm:$0xff] %v620_v34  ;;  %636 = vst [vmem:[%s1216_s2 + $0x38] sm:$0xff] %v604_v35  ;;  %v590_v4 = vsub.f32 %v526_v27, %v558_v36  ;;  %v574_v57 = vsub.f32 %v510_v25, %v542_v37  ;;  %v528_v58 = vadd.f32 %v1059_v1, %v1081_v51 }
  0xec   :  { %v511_v60 = vadd.f32 %v1059_v1, %v1043_v45  ;;  %651 = vst [vmem:[%s1216_s2 + $0xb0] sm:$0xff] %v619_v53  ;;  %635 = vst [vmem:[%s1216_s2 + $0x30] sm:$0xff] %v603_v38  ;;  %v589_v44 = vsub.f32 %v525_v0, %v557_v54  ;;  %v573_v61 = vsub.f32 %v509_v30, %v541_v55  ;;  %v773_v3 = vpop.f32.mrb[10].mxu1  ;;  %v749_v6 = vpop.f32.mrb[10].mxu0 }
  0xed   :  { %v527_v39 = vadd.f32 %v1059_v1, %v1083_v52  ;;  %v622_v8 = vmax.f32 %v590_v4, 0.0  ;;  %v606_v51 = vmax.f32 %v574_v57, 0.0  ;;  %v560_v2 = vmul.f32 2.0, %v773_v3  ;;  %v337_v45 = vpop.f32.mrb[11].mxu1  ;;  %v257_v5 = vpop.f32.mrb[11].mxu0 }
  0xee   :  { %v544_v9 = vmul.f32 2.0, %v749_v6  ;;  %v621_v10 = vmax.f32 %v589_v44, 0.0  ;;  %v605_v59 = vmax.f32 %v573_v61, 0.0  ;;  %v559_v11 = vmul.f32 2.0, %v337_v45 }
  0xef   :  { %v543_v12 = vmul.f32 2.0, %v257_v5  ;;  %v514_v13 = vadd.f32 %v1059_v1, %v1045_v46  ;;  %654 = vst [vmem:[%s1216_s2 + $0xc8] sm:$0xff] %v622_v8  ;;  %638 = vst [vmem:[%s1216_s2 + $0x48] sm:$0xff] %v606_v51  ;;  %v592_v52 = vsub.f32 %v528_v58, %v560_v2  ;;  %v530_v14 = vadd.f32 %v1059_v1, %v487_v28 }
  0xf0   :  { %v576_v40 = vsub.f32 %v512_v56, %v544_v9  ;;  %v513_v17 = vadd.f32 %v1059_v1, %v1047_v47  ;;  %653 = vst [vmem:[%s1216_s2 + $0xc0] sm:$0xff] %v621_v10  ;;  %637 = vst [vmem:[%s1216_s2 + $0x40] sm:$0xff] %v605_v59  ;;  %v591_v46 = vsub.f32 %v527_v39, %v559_v11  ;;  %v776_v62 = vpop.f32.mrb[12].mxu1  ;;  %v752_v16 = vpop.f32.mrb[12].mxu0 }
  0xf1   :  { %v575_v18 = vsub.f32 %v511_v60, %v543_v12  ;;  %v529_v19 = vadd.f32 %v1059_v1, %v484_v29  ;;  %v624_v41 = vmax.f32 %v592_v52, 0.0  ;;  %v562_v21 = vmul.f32 2.0, %v776_v62  ;;  %v347_v23 = vpop.f32.mrb[13].mxu1  ;;  %v267_v47 = vpop.f32.mrb[13].mxu0 }
  0xf2   :  { %v608_v20 = vmax.f32 %v576_v40, 0.0  ;;  %v546_v22 = vmul.f32 2.0, %v752_v16  ;;  %v623_v24 = vmax.f32 %v591_v46, 0.0  ;;  %v561_v63 = vmul.f32 2.0, %v347_v23 }
  0xf3   :  { %v607_v25 = vmax.f32 %v575_v18, 0.0  ;;  %v545_v26 = vmul.f32 2.0, %v267_v47  ;;  %v516_v27 = vadd.f32 %v1059_v1, %v1049_v48  ;;  %656 = vst [vmem:[%s1216_s2 + $0xd8] sm:$0xff] %v624_v41  ;;  %v594_v28 = vsub.f32 %v530_v14, %v562_v21 }
  0xf4   :  { %640 = vst [vmem:[%s1216_s2 + $0x58] sm:$0xff] %v608_v20  ;;  %v578_v29 = vsub.f32 %v514_v13, %v546_v22  ;;  %v532_v30 = vadd.f32 %v1059_v1, %v493_v7  ;;  %v515_v42 = vadd.f32 %v1059_v1, %v1051_v49  ;;  %655 = vst [vmem:[%s1216_s2 + $0xd0] sm:$0xff] %v623_v24  ;;  %v779_v32 = vpop.f32.mrb[14].mxu1  ;;  %v755_v33 = vpop.f32.mrb[14].mxu0 }
  0xf5   :  { %639 = vst [vmem:[%s1216_s2 + $0x50] sm:$0xff] %v607_v25  ;;  %v593_v48 = vsub.f32 %v529_v19, %v561_v63  ;;  %v577_v31 = vsub.f32 %v513_v17, %v545_v26  ;;  %v531_v0 = vadd.f32 %v1059_v1, %v490_v15  ;;  %v626_v34 = vmax.f32 %v594_v28, 0.0  ;;  %v357_v43 = vpop.f32.mrb[15].mxu1  ;;  %v277_v49 = vpop.f32.mrb[15].mxu0 }
  0xf6   :  { %v610_v35 = vmax.f32 %v578_v29, 0.0  ;;  %v564_v36 = vmul.f32 2.0, %v779_v32  ;;  %v548_v37 = vmul.f32 2.0, %v755_v33  ;;  %v563_v38 = vmul.f32 2.0, %v357_v43 }
  0xf7   :  { %v625_v50 = vmax.f32 %v593_v48, 0.0  ;;  %v609_v53 = vmax.f32 %v577_v31, 0.0  ;;  %v547_v54 = vmul.f32 2.0, %v277_v49  ;;  %658 = vst [vmem:[%s1216_s2 + $0xe8] sm:$0xff] %v626_v34 }
  0xf8   :  { %642 = vst [vmem:[%s1216_s2 + $0x68] sm:$0xff] %v610_v35  ;;  %v596_v55 = vsub.f32 %v532_v30, %v564_v36  ;;  %v580_v1 = vsub.f32 %v516_v27, %v548_v37  ;;  %v595_v56 = vsub.f32 %v531_v0, %v563_v38 }
  0xf9   :  { %657 = vst [vmem:[%s1216_s2 + $0xe0] sm:$0xff] %v625_v50  ;;  %641 = vst [vmem:[%s1216_s2 + $0x60] sm:$0xff] %v609_v53  ;;  %v579_v4 = vsub.f32 %v515_v42, %v547_v54 }
  0xfa   :  { %v628_v57 = vmax.f32 %v596_v55, 0.0  ;;  %v612_v58 = vmax.f32 %v580_v1, 0.0  ;;  %v627_v60 = vmax.f32 %v595_v56, 0.0 }
  0xfb   :  { %v611_v44 = vmax.f32 %v579_v4, 0.0 }
  0xfc   :  { %660 = vst [vmem:[%s1216_s2 + $0xf8] sm:$0xff] %v628_v57  ;;  %644 = vst [vmem:[%s1216_s2 + $0x78] sm:$0xff] %v612_v58 }
  0xfd   :  { %659 = vst [vmem:[%s1216_s2 + $0xf0] sm:$0xff] %v627_v60  ;;  %643 = vst [vmem:[%s1216_s2 + $0x70] sm:$0xff] %v611_v44 }

// kernel: pointnet_forward.15
= control target key start
LH: loop header
LB: loop body
LE: loop exit
PB: predicated region body
PF: predicated region fallthrough
CT: control target
= control target key end

     0   :  { %s1235_s1 = inlined_call_operand.vmem [shape: bf16[128,128], index: 1, kind: input, shape index: {}]   ;;  %s1236_s0 = inlined_call_operand.vmem [shape: bf16[256,128], index: 0, kind: input, shape index: {}]   ;;  %s1237_s3 = inlined_call_operand.vmem [shape: bf16[128,128], index: 3, kind: input, shape index: {}]   ;;  %s1238_s2 = inlined_call_operand.vmem [shape: f32[1,128], index: 2, kind: input, shape index: {}]   ;;  %s1239_s4 = inlined_call_operand.vmem [shape: f32[1,128], index: 4, kind: input, shape index: {}]   ;;  %s1240_s5 = inlined_call_operand.vmem [shape: f32[256,128], index: 5, kind: output, shape index: {}]  }
   0x1   :  { %v907_v0 = vld [vmem:[%s1235_s1] sm:$0xff]   ;;  %v908_v1 = vld [vmem:[%s1235_s1 + $0x8] sm:$0xff]   ;;  %v909_v2 = vld [vmem:[%s1235_s1 + $0x10] sm:$0xff]  }
   0x2   :  { %811 = vmatprep.subr.bf16.mxu0 %v907_v0  ;;  %v910_v3 = vld [vmem:[%s1235_s1 + $0x18] sm:$0xff]   ;;  %v915_v4 = vld [vmem:[%s1236_s0] sm:$0xff]   ;;  %v912_v6 = vld [vmem:[%s1235_s1 + $0x28] sm:$0xff]  }
   0x3   :  { %812 = vmatpush3.bf16.msra.mxu0 %v907_v0  ;;  %827 = vmatprep.mubr.bf16.mxu0 %v915_v4  ;;  %v911_v5 = vld [vmem:[%s1235_s1 + $0x20] sm:$0xff]   ;;  %v913_v7 = vld [vmem:[%s1235_s1 + $0x30] sm:$0xff]   ;;  %v914_v8 = vld [vmem:[%s1235_s1 + $0x38] sm:$0xff]  }
   0x4   :  { %813 = vmatprep.subr.bf16.mxu0 %v908_v1  ;;  %v931_v9 = vld [vmem:[%s1237_s3] sm:$0xff]   ;;  %v932_v10 = vld [vmem:[%s1237_s3 + $0x8] sm:$0xff]   ;;  %v933_v11 = vld [vmem:[%s1237_s3 + $0x10] sm:$0xff]  }
   0x5   :  { %859 = vmatprep.subr.bf16.mxu1 %v931_v9  ;;  %v916_v12 = vld [vmem:[%s1236_s0 + $0x8] sm:$0xff]   ;;  %v917_v13 = vld [vmem:[%s1236_s0 + $0x10] sm:$0xff]   ;;  %v934_v14 = vld [vmem:[%s1237_s3 + $0x18] sm:$0xff]  }
   0x6   :  { %860 = vmatpush3.bf16.msra.mxu1 %v931_v9  ;;  %v935_v15 = vld [vmem:[%s1237_s3 + $0x20] sm:$0xff]   ;;  %v918_v16 = vld [vmem:[%s1236_s0 + $0x18] sm:$0xff]   ;;  %v936_v18 = vld [vmem:[%s1237_s3 + $0x28] sm:$0xff]  }
   0x7   :  { %814 = vmatpush3.bf16.msra.mxu0 %v908_v1  ;;  %861 = vmatprep.subr.bf16.mxu1 %v932_v10  ;;  %v919_v17 = vld [vmem:[%s1236_s0 + $0x20] sm:$0xff]   ;;  %v920_v19 = vld [vmem:[%s1236_s0 + $0x28] sm:$0xff]   ;;  %v921_v20 = vld [vmem:[%s1236_s0 + $0x30] sm:$0xff]  }
   0x8   :  { %815 = vmatprep.subr.bf16.mxu0 %v909_v2  ;;  %v922_v21 = vld [vmem:[%s1236_s0 + $0x38] sm:$0xff]   ;;  %v923_v22 = vld [vmem:[%s1236_s0 + $0x40] sm:$0xff]   ;;  %v924_v23 = vld [vmem:[%s1236_s0 + $0x48] sm:$0xff]  }
   0x9   :  { %v925_v24 = vld [vmem:[%s1236_s0 + $0x50] sm:$0xff]   ;;  %v926_v25 = vld [vmem:[%s1236_s0 + $0x58] sm:$0xff]   ;;  %v927_v26 = vld [vmem:[%s1236_s0 + $0x60] sm:$0xff]  }
   0xa   :  { %862 = vmatpush3.bf16.msra.mxu1 %v932_v10  ;;  %v928_v27 = vld [vmem:[%s1236_s0 + $0x68] sm:$0xff]   ;;  %v929_v28 = vld [vmem:[%s1236_s0 + $0x70] sm:$0xff]   ;;  %v930_v29 = vld [vmem:[%s1236_s0 + $0x78] sm:$0xff]  }
   0xb   :  { %816 = vmatpush3.bf16.msra.mxu0 %v909_v2  ;;  %863 = vmatprep.subr.bf16.mxu1 %v933_v11  ;;  %v937_v30 = vld [vmem:[%s1237_s3 + $0x30] sm:$0xff]   ;;  %v938_v31 = vld [vmem:[%s1237_s3 + $0x38] sm:$0xff]   ;;  %v1068_v32 = vld [vmem:[%s1238_s2] ss:$0 sm:$0xff] }
   0xc   :  { %817 = vmatprep.subr.bf16.mxu0 %v910_v3 }
   0xe   :  { %864 = vmatpush3.bf16.msra.mxu1 %v933_v11 }
   0xf   :  { %818 = vmatpush3.bf16.msra.mxu0 %v910_v3  ;;  %865 = vmatprep.subr.bf16.mxu1 %v934_v14 }
  0x10   :  { %819 = vmatprep.subr.bf16.mxu0 %v911_v5 }
  0x12   :  { %866 = vmatpush3.bf16.msra.mxu1 %v934_v14 }
  0x13   :  { %820 = vmatpush3.bf16.msra.mxu0 %v911_v5  ;;  %867 = vmatprep.subr.bf16.mxu1 %v935_v15 }
  0x14   :  { %821 = vmatprep.subr.bf16.mxu0 %v912_v6 }
  0x16   :  { %868 = vmatpush3.bf16.msra.mxu1 %v935_v15 }
  0x17   :  { %822 = vmatpush3.bf16.msra.mxu0 %v912_v6  ;;  %869 = vmatprep.subr.bf16.mxu1 %v936_v18 }
  0x18   :  { %823 = vmatprep.subr.bf16.mxu0 %v913_v7 }
  0x1a   :  { %870 = vmatpush3.bf16.msra.mxu1 %v936_v18 }
  0x1b   :  { %824 = vmatpush3.bf16.msra.mxu0 %v913_v7  ;;  %871 = vmatprep.subr.bf16.mxu1 %v937_v30 }
  0x1c   :  { %825 = vmatprep.subr.bf16.mxu0 %v914_v8 }
  0x1e   :  { %872 = vmatpush3.bf16.msra.mxu1 %v937_v30 }
  0x1f   :  { %826 = vmatpush3.bf16.msra.mxu0 %v914_v8  ;;  %873 = vmatprep.subr.bf16.mxu1 %v938_v31 }
  0x22   :  { %828 = vmatmul.mubr.bf16.vlgmr.msra.gmra.mrb[0].mxu0 %v916_v12  ;;  %874 = vmatpush3.bf16.msra.mxu1 %v938_v31 }
  0x23   :  { %831 = vmatprep.mubr.bf16.mxu0 %v917_v13 }
  0x2a   :  { %832 = vmatmul.mubr.bf16.gmra.mrb[4].mxu0 %v918_v16 }
  0x2b   :  { %835 = vmatprep.mubr.bf16.mxu0 %v919_v17 }
  0x32   :  { %836 = vmatmul.mubr.bf16.gmra.mrb[8].mxu0 %v920_v19 }
  0x33   :  { %839 = vmatprep.mubr.bf16.mxu0 %v921_v20 }
  0x3a   :  { %840 = vmatmul.mubr.bf16.gmra.mrb[12].mxu0 %v922_v21 }
  0x3b   :  { %843 = vmatprep.mubr.bf16.mxu0 %v923_v22 }
  0x42   :  { %844 = vmatmul.mubr.bf16.gmra.mrb[16].mxu0 %v924_v23 }
  0x43   :  { %847 = vmatprep.mubr.bf16.mxu0 %v925_v24 }
  0x4a   :  { %848 = vmatmul.mubr.bf16.gmra.mrb[20].mxu0 %v926_v25 }
  0x4b   :  { %851 = vmatprep.mubr.bf16.mxu0 %v927_v26 }
  0x52   :  { %852 = vmatmul.mubr.bf16.gmra.mrb[24].mxu0 %v928_v27 }
  0x53   :  { %855 = vmatprep.mubr.bf16.mxu0 %v929_v28 }
  0x5a   :  { %856 = vmatmul.mubr.bf16.gmra.mrb[28].mxu0 %v930_v29 }
  0xf5   :  { %v829_v33 = vpop.f32.mrb[0].mxu0 }
  0xf6   :  { %v263_v34 = vadd.f32 %v829_v33, %v1068_v32  ;;  %v254_v35 = vpop.f32.mrb[1].mxu0 }
  0xf7   :  { %v255_v36 = vadd.f32 %v1068_v32, %v254_v35  ;;  %v830_v37 = vpop.f32.mrb[2].mxu0 }
  0xf8   :  { %v266_v38 = vadd.f32 %v830_v37, %v1068_v32  ;;  %v257_v39 = vpop.f32.mrb[3].mxu0  ;;  %v383_v41 = vmax.f32 %v263_v34, 0.0 }
  0xf9   :  { %v258_v40 = vadd.f32 %v1068_v32, %v257_v39  ;;  %v381_v43 = vmax.f32 %v255_v36, 0.0 }
  0xfa   :  { %v384_v42 = vmax.f32 %v266_v38, 0.0 }
  0xfb   :  { %v382_v44 = vmax.f32 %v258_v40, 0.0 }
  0xfc   :  { %v414_v45 = vpack.c.bf16 %v384_v42, %v383_v41 }
  0xfd   :  { %v833_v46 = vpop.f32.mrb[4].mxu0  ;;  %v413_v47 = vpack.c.bf16 %v382_v44, %v381_v43 }
  0xfe   :  { %v279_v48 = vadd.f32 %v833_v46, %v1068_v32  ;;  %v270_v49 = vpop.f32.mrb[5].mxu0 }
  0xff   :  { %v271_v50 = vadd.f32 %v1068_v32, %v270_v49  ;;  %v834_v51 = vpop.f32.mrb[6].mxu0  ;;  %875 = vmatprep.mubr.bf16.mxu1 %v413_v47 }
 0x100   :  { %v282_v52 = vadd.f32 %v834_v51, %v1068_v32  ;;  %v273_v53 = vpop.f32.mrb[7].mxu0  ;;  %876 = vmatmul.mubr.bf16.vlgmr.msra.gmra.mrb[0].mxu1 %v414_v45  ;;  %v387_v55 = vmax.f32 %v279_v48, 0.0 }
 0x101   :  { %v274_v54 = vadd.f32 %v1068_v32, %v273_v53  ;;  %v385_v57 = vmax.f32 %v271_v50, 0.0 }
 0x102   :  { %v388_v56 = vmax.f32 %v282_v52, 0.0 }
 0x103   :  { %v386_v58 = vmax.f32 %v274_v54, 0.0 }
 0x104   :  { %v416_v59 = vpack.c.bf16 %v388_v56, %v387_v55 }
 0x105   :  { %v415_v60 = vpack.c.bf16 %v386_v58, %v385_v57  ;;  %v837_v61 = vpop.f32.mrb[8].mxu0 }
 0x106   :  { %v295_v62 = vadd.f32 %v837_v61, %v1068_v32  ;;  %v286_v63 = vpop.f32.mrb[9].mxu0 }
 0x107   :  { %v287_v0 = vadd.f32 %v1068_v32, %v286_v63  ;;  %v838_v1 = vpop.f32.mrb[10].mxu0  ;;  %879 = vmatprep.mubr.bf16.mxu1 %v415_v60 }
 0x108   :  { %v298_v2 = vadd.f32 %v838_v1, %v1068_v32  ;;  %v289_v3 = vpop.f32.mrb[11].mxu0  ;;  %880 = vmatmul.mubr.bf16.gmra.mrb[4].mxu1 %v416_v59  ;;  %v391_v5 = vmax.f32 %v295_v62, 0.0 }
 0x109   :  { %v290_v4 = vadd.f32 %v1068_v32, %v289_v3  ;;  %v389_v7 = vmax.f32 %v287_v0, 0.0 }
 0x10a   :  { %v392_v6 = vmax.f32 %v298_v2, 0.0 }
 0x10b   :  { %v390_v8 = vmax.f32 %v290_v4, 0.0 }
 0x10c   :  { %v418_v9 = vpack.c.bf16 %v392_v6, %v391_v5 }
 0x10d   :  { %v417_v10 = vpack.c.bf16 %v390_v8, %v389_v7  ;;  %v841_v11 = vpop.f32.mrb[12].mxu0 }
 0x10e   :  { %v311_v12 = vadd.f32 %v841_v11, %v1068_v32  ;;  %v302_v13 = vpop.f32.mrb[13].mxu0 }
 0x10f   :  { %v303_v14 = vadd.f32 %v1068_v32, %v302_v13  ;;  %v842_v15 = vpop.f32.mrb[14].mxu0  ;;  %883 = vmatprep.mubr.bf16.mxu1 %v417_v10 }
 0x110   :  { %v314_v16 = vadd.f32 %v842_v15, %v1068_v32  ;;  %v305_v17 = vpop.f32.mrb[15].mxu0  ;;  %884 = vmatmul.mubr.bf16.gmra.mrb[8].mxu1 %v418_v9  ;;  %v395_v19 = vmax.f32 %v311_v12, 0.0 }
 0x111   :  { %v306_v18 = vadd.f32 %v1068_v32, %v305_v17  ;;  %v393_v21 = vmax.f32 %v303_v14, 0.0 }
 0x112   :  { %v396_v20 = vmax.f32 %v314_v16, 0.0 }
 0x113   :  { %v394_v22 = vmax.f32 %v306_v18, 0.0  ;;  %v1105_v18 = vld [vmem:[%s1239_s4] ss:$0 sm:$0xff] }
 0x114   :  { %v420_v23 = vpack.c.bf16 %v396_v20, %v395_v19 }
 0x115   :  { %v419_v24 = vpack.c.bf16 %v394_v22, %v393_v21  ;;  %v845_v25 = vpop.f32.mrb[16].mxu0 }
 0x116   :  { %v327_v26 = vadd.f32 %v845_v25, %v1068_v32  ;;  %v318_v27 = vpop.f32.mrb[17].mxu0 }
 0x117   :  { %v319_v28 = vadd.f32 %v1068_v32, %v318_v27  ;;  %v846_v29 = vpop.f32.mrb[18].mxu0  ;;  %887 = vmatprep.mubr.bf16.mxu1 %v419_v24 }
 0x118   :  { %v330_v30 = vadd.f32 %v846_v29, %v1068_v32  ;;  %v321_v31 = vpop.f32.mrb[19].mxu0  ;;  %888 = vmatmul.mubr.bf16.gmra.mrb[12].mxu1 %v420_v23  ;;  %v399_v34 = vmax.f32 %v327_v26, 0.0 }
 0x119   :  { %v322_v33 = vadd.f32 %v1068_v32, %v321_v31  ;;  %v397_v36 = vmax.f32 %v319_v28, 0.0 }
 0x11a   :  { %v400_v35 = vmax.f32 %v330_v30, 0.0 }
 0x11b   :  { %v398_v37 = vmax.f32 %v322_v33, 0.0 }
 0x11c   :  { %v422_v38 = vpack.c.bf16 %v400_v35, %v399_v34 }
 0x11d   :  { %v421_v39 = vpack.c.bf16 %v398_v37, %v397_v36  ;;  %v849_v40 = vpop.f32.mrb[20].mxu0 }
 0x11e   :  { %v343_v41 = vadd.f32 %v849_v40, %v1068_v32  ;;  %v334_v42 = vpop.f32.mrb[21].mxu0 }
 0x11f   :  { %v335_v43 = vadd.f32 %v1068_v32, %v334_v42  ;;  %v850_v44 = vpop.f32.mrb[22].mxu0  ;;  %891 = vmatprep.mubr.bf16.mxu1 %v421_v39 }
 0x120   :  { %v346_v45 = vadd.f32 %v850_v44, %v1068_v32  ;;  %v337_v46 = vpop.f32.mrb[23].mxu0  ;;  %892 = vmatmul.mubr.bf16.gmra.mrb[16].mxu1 %v422_v38  ;;  %v403_v48 = vmax.f32 %v343_v41, 0.0 }
 0x121   :  { %v338_v47 = vadd.f32 %v1068_v32, %v337_v46  ;;  %v401_v50 = vmax.f32 %v335_v43, 0.0 }
 0x122   :  { %v404_v49 = vmax.f32 %v346_v45, 0.0 }
 0x123   :  { %v402_v51 = vmax.f32 %v338_v47, 0.0 }
 0x124   :  { %v424_v52 = vpack.c.bf16 %v404_v49, %v403_v48 }
 0x125   :  { %v423_v53 = vpack.c.bf16 %v402_v51, %v401_v50  ;;  %v853_v54 = vpop.f32.mrb[24].mxu0 }
 0x126   :  { %v359_v55 = vadd.f32 %v853_v54, %v1068_v32  ;;  %v350_v56 = vpop.f32.mrb[25].mxu0 }
 0x127   :  { %v351_v57 = vadd.f32 %v1068_v32, %v350_v56  ;;  %v854_v58 = vpop.f32.mrb[26].mxu0  ;;  %895 = vmatprep.mubr.bf16.mxu1 %v423_v53 }
 0x128   :  { %v362_v59 = vadd.f32 %v854_v58, %v1068_v32  ;;  %v353_v60 = vpop.f32.mrb[27].mxu0  ;;  %896 = vmatmul.mubr.bf16.gmra.mrb[20].mxu1 %v424_v52  ;;  %v407_v62 = vmax.f32 %v359_v55, 0.0 }
 0x129   :  { %v354_v61 = vadd.f32 %v1068_v32, %v353_v60  ;;  %v405_v0 = vmax.f32 %v351_v57, 0.0 }
 0x12a   :  { %v408_v63 = vmax.f32 %v362_v59, 0.0 }
 0x12b   :  { %v406_v1 = vmax.f32 %v354_v61, 0.0 }
 0x12c   :  { %v426_v2 = vpack.c.bf16 %v408_v63, %v407_v62 }
 0x12d   :  { %v425_v3 = vpack.c.bf16 %v406_v1, %v405_v0  ;;  %v857_v4 = vpop.f32.mrb[28].mxu0 }
 0x12e   :  { %v375_v5 = vadd.f32 %v857_v4, %v1068_v32  ;;  %v366_v6 = vpop.f32.mrb[29].mxu0 }
 0x12f   :  { %v367_v7 = vadd.f32 %v1068_v32, %v366_v6  ;;  %v858_v8 = vpop.f32.mrb[30].mxu0  ;;  %899 = vmatprep.mubr.bf16.mxu1 %v425_v3 }
 0x130   :  { %v378_v9 = vadd.f32 %v858_v8, %v1068_v32  ;;  %v369_v10 = vpop.f32.mrb[31].mxu0  ;;  %900 = vmatmul.mubr.bf16.gmra.mrb[24].mxu1 %v426_v2  ;;  %v411_v12 = vmax.f32 %v375_v5, 0.0 }
 0x131   :  { %v370_v11 = vadd.f32 %v1068_v32, %v369_v10  ;;  %v409_v14 = vmax.f32 %v367_v7, 0.0 }
 0x132   :  { %v412_v13 = vmax.f32 %v378_v9, 0.0 }
 0x133   :  { %v410_v15 = vmax.f32 %v370_v11, 0.0 }
 0x134   :  { %v428_v16 = vpack.c.bf16 %v412_v13, %v411_v12 }
 0x135   :  { %v427_v17 = vpack.c.bf16 %v410_v15, %v409_v14 }
 0x137   :  { %903 = vmatprep.mubr.bf16.mxu1 %v427_v17 }
 0x138   :  { %904 = vmatmul.mubr.bf16.gmra.mrb[28].mxu1 %v428_v16 }
 0x1d3   :  { %v877_v19 = vpop.f32.mrb[0].mxu1 }
 0x1d4   :  { %v543_v20 = vadd.f32 %v877_v19, %v1105_v18  ;;  %v534_v21 = vpop.f32.mrb[1].mxu1 }
 0x1d5   :  { %v535_v22 = vadd.f32 %v1105_v18, %v534_v21  ;;  %v878_v32 = vpop.f32.mrb[2].mxu1 }
 0x1d6   :  { %v663_v23 = vmax.f32 %v543_v20, 0.0  ;;  %v546_v24 = vadd.f32 %v878_v32, %v1105_v18  ;;  %v537_v25 = vpop.f32.mrb[3].mxu1 }
 0x1d7   :  { %v661_v26 = vmax.f32 %v535_v22, 0.0  ;;  %v538_v27 = vadd.f32 %v1105_v18, %v537_v25 }
 0x1d8   :  { %695 = vst [vmem:[%s1240_s5 + $0x10] sm:$0xff] %v663_v23  ;;  %v664_v28 = vmax.f32 %v546_v24, 0.0 }
 0x1d9   :  { %693 = vst [vmem:[%s1240_s5] sm:$0xff] %v661_v26  ;;  %v662_v29 = vmax.f32 %v538_v27, 0.0 }
 0x1da   :  { %696 = vst [vmem:[%s1240_s5 + $0x18] sm:$0xff] %v664_v28 }
 0x1db   :  { %694 = vst [vmem:[%s1240_s5 + $0x8] sm:$0xff] %v662_v29  ;;  %v881_v30 = vpop.f32.mrb[4].mxu1 }
 0x1dc   :  { %v559_v31 = vadd.f32 %v881_v30, %v1105_v18  ;;  %v550_v33 = vpop.f32.mrb[5].mxu1 }
 0x1dd   :  { %v551_v34 = vadd.f32 %v1105_v18, %v550_v33  ;;  %v882_v35 = vpop.f32.mrb[6].mxu1 }
 0x1de   :  { %v667_v36 = vmax.f32 %v559_v31, 0.0  ;;  %v562_v37 = vadd.f32 %v882_v35, %v1105_v18  ;;  %v553_v38 = vpop.f32.mrb[7].mxu1 }
 0x1df   :  { %v665_v39 = vmax.f32 %v551_v34, 0.0  ;;  %v554_v40 = vadd.f32 %v1105_v18, %v553_v38 }
 0x1e0   :  { %699 = vst [vmem:[%s1240_s5 + $0x30] sm:$0xff] %v667_v36  ;;  %v668_v41 = vmax.f32 %v562_v37, 0.0 }
 0x1e1   :  { %697 = vst [vmem:[%s1240_s5 + $0x20] sm:$0xff] %v665_v39  ;;  %v666_v42 = vmax.f32 %v554_v40, 0.0 }
 0x1e2   :  { %700 = vst [vmem:[%s1240_s5 + $0x38] sm:$0xff] %v668_v41 }
 0x1e3   :  { %698 = vst [vmem:[%s1240_s5 + $0x28] sm:$0xff] %v666_v42  ;;  %v885_v43 = vpop.f32.mrb[8].mxu1 }
 0x1e4   :  { %v575_v44 = vadd.f32 %v885_v43, %v1105_v18  ;;  %v566_v45 = vpop.f32.mrb[9].mxu1 }
 0x1e5   :  { %v567_v46 = vadd.f32 %v1105_v18, %v566_v45  ;;  %v886_v47 = vpop.f32.mrb[10].mxu1 }
 0x1e6   :  { %v671_v48 = vmax.f32 %v575_v44, 0.0  ;;  %v578_v49 = vadd.f32 %v886_v47, %v1105_v18  ;;  %v569_v50 = vpop.f32.mrb[11].mxu1 }
 0x1e7   :  { %v669_v51 = vmax.f32 %v567_v46, 0.0  ;;  %v570_v52 = vadd.f32 %v1105_v18, %v569_v50 }
 0x1e8   :  { %703 = vst [vmem:[%s1240_s5 + $0x50] sm:$0xff] %v671_v48  ;;  %v672_v53 = vmax.f32 %v578_v49, 0.0 }
 0x1e9   :  { %701 = vst [vmem:[%s1240_s5 + $0x40] sm:$0xff] %v669_v51  ;;  %v670_v54 = vmax.f32 %v570_v52, 0.0 }
 0x1ea   :  { %704 = vst [vmem:[%s1240_s5 + $0x58] sm:$0xff] %v672_v53 }
 0x1eb   :  { %702 = vst [vmem:[%s1240_s5 + $0x48] sm:$0xff] %v670_v54  ;;  %v889_v55 = vpop.f32.mrb[12].mxu1 }
 0x1ec   :  { %v591_v56 = vadd.f32 %v889_v55, %v1105_v18  ;;  %v582_v57 = vpop.f32.mrb[13].mxu1 }
 0x1ed   :  { %v583_v58 = vadd.f32 %v1105_v18, %v582_v57  ;;  %v890_v59 = vpop.f32.mrb[14].mxu1 }
 0x1ee   :  { %v675_v60 = vmax.f32 %v591_v56, 0.0  ;;  %v594_v61 = vadd.f32 %v890_v59, %v1105_v18  ;;  %v585_v62 = vpop.f32.mrb[15].mxu1 }
 0x1ef   :  { %v673_v63 = vmax.f32 %v583_v58, 0.0  ;;  %v586_v0 = vadd.f32 %v1105_v18, %v585_v62 }
 0x1f0   :  { %707 = vst [vmem:[%s1240_s5 + $0x70] sm:$0xff] %v675_v60  ;;  %v676_v1 = vmax.f32 %v594_v61, 0.0 }
 0x1f1   :  { %705 = vst [vmem:[%s1240_s5 + $0x60] sm:$0xff] %v673_v63  ;;  %v674_v2 = vmax.f32 %v586_v0, 0.0 }
 0x1f2   :  { %708 = vst [vmem:[%s1240_s5 + $0x78] sm:$0xff] %v676_v1 }
 0x1f3   :  { %706 = vst [vmem:[%s1240_s5 + $0x68] sm:$0xff] %v674_v2  ;;  %v893_v3 = vpop.f32.mrb[16].mxu1 }
 0x1f4   :  { %v607_v4 = vadd.f32 %v893_v3, %v1105_v18  ;;  %v598_v5 = vpop.f32.mrb[17].mxu1 }
 0x1f5   :  { %v599_v6 = vadd.f32 %v1105_v18, %v598_v5  ;;  %v894_v7 = vpop.f32.mrb[18].mxu1 }
 0x1f6   :  { %v679_v8 = vmax.f32 %v607_v4, 0.0  ;;  %v610_v9 = vadd.f32 %v894_v7, %v1105_v18  ;;  %v601_v10 = vpop.f32.mrb[19].mxu1 }
 0x1f7   :  { %v677_v11 = vmax.f32 %v599_v6, 0.0  ;;  %v602_v12 = vadd.f32 %v1105_v18, %v601_v10 }
 0x1f8   :  { %711 = vst [vmem:[%s1240_s5 + $0x90] sm:$0xff] %v679_v8  ;;  %v680_v13 = vmax.f32 %v610_v9, 0.0 }
 0x1f9   :  { %709 = vst [vmem:[%s1240_s5 + $0x80] sm:$0xff] %v677_v11  ;;  %v678_v14 = vmax.f32 %v602_v12, 0.0 }
 0x1fa   :  { %712 = vst [vmem:[%s1240_s5 + $0x98] sm:$0xff] %v680_v13 }
 0x1fb   :  { %710 = vst [vmem:[%s1240_s5 + $0x88] sm:$0xff] %v678_v14  ;;  %v897_v15 = vpop.f32.mrb[20].mxu1 }
 0x1fc   :  { %v623_v16 = vadd.f32 %v897_v15, %v1105_v18  ;;  %v614_v17 = vpop.f32.mrb[21].mxu1 }
 0x1fd   :  { %v615_v19 = vadd.f32 %v1105_v18, %v614_v17  ;;  %v898_v20 = vpop.f32.mrb[22].mxu1 }
 0x1fe   :  { %v683_v21 = vmax.f32 %v623_v16, 0.0  ;;  %v626_v22 = vadd.f32 %v898_v20, %v1105_v18  ;;  %v617_v32 = vpop.f32.mrb[23].mxu1 }
 0x1ff   :  { %v681_v23 = vmax.f32 %v615_v19, 0.0  ;;  %v618_v24 = vadd.f32 %v1105_v18, %v617_v32 }
 0x200   :  { %715 = vst [vmem:[%s1240_s5 + $0xb0] sm:$0xff] %v683_v21  ;;  %v684_v25 = vmax.f32 %v626_v22, 0.0 }
 0x201   :  { %713 = vst [vmem:[%s1240_s5 + $0xa0] sm:$0xff] %v681_v23  ;;  %v682_v26 = vmax.f32 %v618_v24, 0.0 }
 0x202   :  { %716 = vst [vmem:[%s1240_s5 + $0xb8] sm:$0xff] %v684_v25 }
 0x203   :  { %714 = vst [vmem:[%s1240_s5 + $0xa8] sm:$0xff] %v682_v26  ;;  %v901_v27 = vpop.f32.mrb[24].mxu1 }
 0x204   :  { %v639_v28 = vadd.f32 %v901_v27, %v1105_v18  ;;  %v630_v29 = vpop.f32.mrb[25].mxu1 }
 0x205   :  { %v631_v30 = vadd.f32 %v1105_v18, %v630_v29  ;;  %v902_v31 = vpop.f32.mrb[26].mxu1 }
 0x206   :  { %v687_v33 = vmax.f32 %v639_v28, 0.0  ;;  %v642_v34 = vadd.f32 %v902_v31, %v1105_v18  ;;  %v633_v35 = vpop.f32.mrb[27].mxu1 }
 0x207   :  { %v685_v36 = vmax.f32 %v631_v30, 0.0  ;;  %v634_v37 = vadd.f32 %v1105_v18, %v633_v35 }
 0x208   :  { %719 = vst [vmem:[%s1240_s5 + $0xd0] sm:$0xff] %v687_v33  ;;  %v688_v38 = vmax.f32 %v642_v34, 0.0 }
 0x209   :  { %717 = vst [vmem:[%s1240_s5 + $0xc0] sm:$0xff] %v685_v36  ;;  %v686_v39 = vmax.f32 %v634_v37, 0.0 }
 0x20a   :  { %720 = vst [vmem:[%s1240_s5 + $0xd8] sm:$0xff] %v688_v38 }
 0x20b   :  { %718 = vst [vmem:[%s1240_s5 + $0xc8] sm:$0xff] %v686_v39  ;;  %v905_v40 = vpop.f32.mrb[28].mxu1 }
 0x20c   :  { %v655_v41 = vadd.f32 %v905_v40, %v1105_v18  ;;  %v646_v42 = vpop.f32.mrb[29].mxu1 }
 0x20d   :  { %v647_v43 = vadd.f32 %v1105_v18, %v646_v42  ;;  %v906_v44 = vpop.f32.mrb[30].mxu1 }
 0x20e   :  { %v691_v45 = vmax.f32 %v655_v41, 0.0  ;;  %v658_v46 = vadd.f32 %v906_v44, %v1105_v18  ;;  %v649_v47 = vpop.f32.mrb[31].mxu1 }
 0x20f   :  { %v689_v48 = vmax.f32 %v647_v43, 0.0  ;;  %v650_v49 = vadd.f32 %v1105_v18, %v649_v47 }
 0x210   :  { %723 = vst [vmem:[%s1240_s5 + $0xf0] sm:$0xff] %v691_v45  ;;  %v692_v50 = vmax.f32 %v658_v46, 0.0 }
 0x211   :  { %721 = vst [vmem:[%s1240_s5 + $0xe0] sm:$0xff] %v689_v48  ;;  %v690_v51 = vmax.f32 %v650_v49, 0.0 }
 0x212   :  { %724 = vst [vmem:[%s1240_s5 + $0xf8] sm:$0xff] %v692_v50 }
 0x213   :  { %722 = vst [vmem:[%s1240_s5 + $0xe8] sm:$0xff] %v690_v51 }

</bundles_post_ra>
